<compile_context>
chip_gen: v7x
topology: tpu7x:2x2x1
jax: 0.10.0
libtpu: 0.0.40
codegen_flags: <defaults>
</compile_context>

<pallas_src>
import functools
import math

import jax
import jax.numpy as jnp
from jax import lax
from jax.experimental import pallas as pl
from jax.experimental.pallas import tpu as pltpu


# ----------------------------------------------------------------------------
# helpers
# ----------------------------------------------------------------------------
def _round_up(v, m):
    return -(-v // m) * m


def _vmem_limit_bytes():
    try:
        cap = int(pltpu.get_tpu_info().vmem_capacity_bytes)
        # leave headroom: ~100 MiB on 128-MiB chips (v5e/v6e), ~48 MiB on v7x.
        return max(32 * 1024 * 1024, min(cap - 16 * 1024 * 1024, 100 * 1024 * 1024))
    except Exception:
        return None


_VMEM_LIMIT = _vmem_limit_bytes()


def _compiler_params(dims):
    kw = dict(dimension_semantics=dims)
    if _VMEM_LIMIT is not None:
        kw["vmem_limit_bytes"] = _VMEM_LIMIT
    return pltpu.CompilerParams(**kw)


# ----------------------------------------------------------------------------
# fused kernel: conv1+ReLU -> conv2+ReLU -> flatten -> Linear -> +PE
# ----------------------------------------------------------------------------
def _fused_subsampler_kernel(x_ref, w1_ref, b1_ref, w2_ref, b2_ref, wl_ref,
                             bl_ref, pe_ref, o_ref, h1_ref, lin_ref, *, T1):
    """One (batch, time-tile) grid step.

    x_ref : (1, 1, 2, Tt+2, Fh*4) f32  space-to-depth input planes;
            lane = f'*4 + q holds x_pad[2*f'+pf, 4*(j*Tt + s) + q - 3].
    w1_ref: (9, Cp)      f32   conv1 weight, tap = kf*3 + kt
    b1_ref: (1, Cp)      f32
    w2_ref: (9, Cp, Cp)  bf16  conv2 weight, tap-major, [ci, co]
    b2_ref: (1, Cp)      f32
    wl_ref: (F2*Cp, Dp)  bf16  Linear weight (sqrt(d_model) folded), row=fo*Cp+c
    bl_ref: (1, Dp)      f32   Linear bias  (sqrt(d_model) folded)
    pe_ref: (1, Tt, Dp)  f32   positional encoding for this time tile
    o_ref : (1, Tt, Dp)  f32
    h1_ref: (2, F1n, Tt+1, Cp) bf16 VMEM scratch (conv1 out, space-to-depth)
    lin_ref:(Tt, F2*Cp)        bf16 VMEM scratch (flattened conv2 out)
    """
    Tt = o_ref.shape[1]
    Cp = w2_ref.shape[1]
    F2 = lin_ref.shape[1] // Cp
    F1n = h1_ref.shape[1]
    j = pl.program_id(1)

    # conv1 output (t1) validity: realizes conv2's time zero-padding and masks
    # the right-edge tile overrun.  Pure static tile geometry, no mask input.
    tt_idx = lax.broadcasted_iota(jnp.int32, (Tt + 1, 1), 0)
    t1_base = 2 * j * Tt - 1 + 2 * tt_idx

    # -------- conv1 + ReLU (VPU broadcast-MACs) into space-to-depth VMEM -----
    for pt in range(2):
        valid = jnp.logical_and(t1_base + pt >= 0, t1_base + pt < T1)
        for f1 in range(F1n):
            acc = None
            for kf in range(3):
                pf = kf % 2
                fp = f1 + kf // 2
                for kt in range(3):
                    r = 2 * pt + kt
                    q, s0 = r % 4, r // 4
                    lane = fp * 4 + q
                    k = kf * 3 + kt
                    col = x_ref[0, 0, pf, s0:s0 + Tt + 1, lane:lane + 1]
                    term = col * w1_ref[k:k + 1, :]
                    acc = term if acc is None else acc + term
            h = jnp.maximum(acc + b1_ref[...], 0.0)
            h = jnp.where(valid, h, 0.0)
            h1_ref[pt, f1] = h.astype(h1_ref.dtype)

    # -------- conv2 + ReLU per output frequency -> flat Linear scratch -------
    # (kept as a chained sum of 9 dots so the MXU accumulates in place on v7x)
    b2 = b2_ref[...]
    for fo in range(F2):
        acc = None
        for kf in range(3):
            for kt in range(3):
                k = kf * 3 + kt
                s0 = kt // 2
                a = h1_ref[kt % 2, 2 * fo + kf, s0:s0 + Tt, :]       # (Tt, Cp)
                d = jnp.dot(a, w2_ref[k], preferred_element_type=jnp.float32)
                acc = d if acc is None else acc + d
        h2 = jnp.maximum(acc + b2, 0.0)
        lin_ref[:, fo * Cp:(fo + 1) * Cp] = h2.astype(lin_ref.dtype)

    # -------- ONE fat-K Linear matmul + bias + positional encoding -----------
    y = jnp.dot(lin_ref[...], wl_ref[...], preferred_element_type=jnp.float32)
    o_ref[0] = (y + bl_ref[...] + pe_ref[0]).astype(o_ref.dtype)


# ----------------------------------------------------------------------------
# positional encoding (hyperion-style sinusoidal, eval mode)
# ----------------------------------------------------------------------------
def make_sinusoidal_pe(length, d_model):
    pos = jnp.arange(length, dtype=jnp.float32)[:, None]
    div = jnp.exp(jnp.arange(0, d_model, 2, dtype=jnp.float32)
                  * (-math.log(10000.0) / d_model))
    pe = jnp.zeros((length, d_model), jnp.float32)
    pe = pe.at[:, 0::2].set(jnp.sin(pos * div))
    pe = pe.at[:, 1::2].set(jnp.cos(pos * div))
    return pe


# ----------------------------------------------------------------------------
# forward wrapper
# ----------------------------------------------------------------------------
def transformer_conv2d_subsampler_forward(x, params, pe=None, x_mask=None, *,
                                          time_tile=128):
    """x: (B, time, in_feats) -> ((B, ~time//4, out_feats), subsampled mask)."""
    B, T, F = x.shape
    C = params["w1"].shape[0]            # out_feats == conv channels == d_model
    D = C

    F1 = (F - 3) // 2 + 1                # conv1 freq out (no freq padding)
    T1 = (T - 1) // 2 + 1                # conv1 time out (time pad 1)
    F2 = (F1 - 3) // 2 + 1               # conv2 freq out
    T2 = (T1 - 1) // 2 + 1               # conv2 time out
    F1n = 2 * F2 + 1                     # conv1 freq rows consumed by conv2
    Fh = F1n + 1                         # freq rows kept per input parity plane
    Cp = _round_up(C, 128)               # lane-dense channel dim
    Dp = _round_up(D, 128)               # lane-dense d_model dim

    # Time tiling: Tt multiple of 8 whenever more than one tile is needed.
    # TODO(synk): on v7x also keep B*nT even so both TensorCores stay busy.
    if T2 <= time_tile:
        Tt, nT = T2, 1
    else:
        Tt = max(8, (time_tile // 8) * 8)
        nT = -(-T2 // Tt)
    T2r = nT * Tt

    f32, bf16 = jnp.float32, jnp.bfloat16
    scale = math.sqrt(D)

    # ---- one-time parameter relayout + channel padding + fold sqrt(D) -------
    w1c = jnp.pad(params["w1"].reshape(C, 9).T, ((0, 0), (0, Cp - C))).astype(f32)
    b1 = jnp.pad(params["b1"], (0, Cp - C)).reshape(1, Cp).astype(f32)
    w2k = jnp.transpose(params["w2"], (2, 3, 1, 0)).reshape(9, C, C)
    w2k = jnp.pad(w2k, ((0, 0), (0, Cp - C), (0, Cp - C))).astype(bf16)
    b2 = jnp.pad(params["b2"], (0, Cp - C)).reshape(1, Cp).astype(f32)
    wl = jnp.transpose((params["wlin"] * scale).reshape(D, C, F2), (2, 1, 0))
    wl = jnp.pad(wl, ((0, 0), (0, Cp - C), (0, Dp - D)))
    wl = wl.reshape(F2 * Cp, Dp).astype(bf16)
    bl = jnp.pad(params["blin"] * scale, (0, Dp - D)).reshape(1, Dp).astype(f32)

    # ---- positional encoding: one copy per time tile (no batch replication) -
    if pe is None:
        pe = make_sinusoidal_pe(T2r, D)
    pe = pe.astype(f32)[:T2r]
    pe_t = jnp.pad(pe, ((0, T2r - pe.shape[0]), (0, Dp - D))).reshape(nT, Tt, Dp)

    # ---- input relayout: time/freq space-to-depth planes (pure reshape/
    #      transpose/slice, no gather, ~1x input size in HBM) -----------------
    xT = jnp.transpose(x, (0, 2, 1)).astype(f32)                  # (B, F, T)
    Lp = 4 * (T2r + 2)                                            # padded time
    Fp = max(F, 2 * Fh)
    xpad = jnp.pad(xT, ((0, 0), (0, Fp - F), (3, Lp - 3 - T)))    # (B, Fp, Lp)
    Sg = T2r + 2
    xq = xpad.reshape(B, Fp, Sg, 4)                               # [b, f, s, q]
    xs = jnp.stack([xq[:, 0:2 * Fh:2], xq[:, 1:2 * Fh:2]], axis=1)  # (B,2,Fh,Sg,4)
    if nT == 1:
        xt6 = xs[:, :, :, None, :, :]                             # (B,2,Fh,1,Tt+2,4)
    else:
        body = xs[:, :, :, :nT * Tt, :].reshape(B, 2, Fh, nT, Tt, 4)
        pad_s = (nT + 1) * Tt - Sg
        halo = jnp.pad(xs, ((0, 0), (0, 0), (0, 0), (0, pad_s), (0, 0)))
        halo = halo.reshape(B, 2, Fh, nT + 1, Tt, 4)[:, :, :, 1:, :2, :]
        xt6 = jnp.concatenate([body, halo], axis=4)               # (B,2,Fh,nT,Tt+2,4)
    LX = Fh * 4
    xt = jnp.transpose(xt6, (0, 3, 1, 4, 2, 5)).reshape(B, nT, 2, Tt + 2, LX)

    # ---- fused kernel --------------------------------------------------------
    kern = functools.partial(_fused_subsampler_kernel, T1=T1)
    y_full = pl.pallas_call(
        kern,
        out_shape=jax.ShapeDtypeStruct((B, T2r, Dp), jnp.float32),
        grid=(B, nT),
        in_specs=[
            pl.BlockSpec((1, 1, 2, Tt + 2, LX), lambda b, j: (b, j, 0, 0, 0)),
            pl.BlockSpec((9, Cp), lambda b, j: (0, 0)),
            pl.BlockSpec((1, Cp), lambda b, j: (0, 0)),
            pl.BlockSpec((9, Cp, Cp), lambda b, j: (0, 0, 0)),
            pl.BlockSpec((1, Cp), lambda b, j: (0, 0)),
            pl.BlockSpec((F2 * Cp, Dp), lambda b, j: (0, 0)),
            pl.BlockSpec((1, Dp), lambda b, j: (0, 0)),
            pl.BlockSpec((1, Tt, Dp), lambda b, j: (j, 0, 0)),
        ],
        out_specs=pl.BlockSpec((1, Tt, Dp), lambda b, j: (b, j, 0)),
        scratch_shapes=[
            pltpu.VMEM((2, F1n, Tt + 1, Cp), jnp.bfloat16),   # conv1 out (s2d)
            pltpu.VMEM((Tt, F2 * Cp), jnp.bfloat16),          # flattened conv2
        ],
        compiler_params=_compiler_params(("parallel", "parallel")),
    )(xt, w1c, b1, w2k, b2, wl, bl, pe_t)

    y = y_full[:, :T2, :D]

    if x_mask is None:
        return y, None
    # NOTE: mirrors the PyTorch module verbatim; with time padding (0,1) the
    # module's own mask subsampling is 1-2 frames shorter than y's time dim.
    return y, x_mask[:, :, :-2:2][:, :, :-2:2]


# ----------------------------------------------------------------------------
# Pure-JAX reference (bf16-matched casts so the comparison is apples-to-apples)
# ----------------------------------------------------------------------------
def _reference_forward(x, params, pe):
    C = params["w1"].shape[0]
    scale = math.sqrt(C)
    f32 = jnp.float32
    rnd = lambda a: a.astype(jnp.bfloat16).astype(f32)

    xc = jnp.transpose(x, (0, 2, 1))[:, None, :, :].astype(f32)
    h = lax.conv_general_dilated(
        xc, params["w1"].astype(f32), window_strides=(2, 2),
        padding=((0, 0), (1, 1)), dimension_numbers=("NCHW", "OIHW", "NCHW"),
        precision=lax.Precision.HIGHEST)
    h = jax.nn.relu(h + params["b1"][None, :, None, None])
    h = rnd(h)                                             # kernel stores h1 as bf16
    h = lax.conv_general_dilated(
        h, rnd(params["w2"]), window_strides=(2, 2),
        padding=((0, 0), (1, 1)), dimension_numbers=("NCHW", "OIHW", "NCHW"),
        precision=lax.Precision.HIGHEST)
    h = jax.nn.relu(h + params["b2"][None, :, None, None])
    b, c, f, t = h.shape
    feat = jnp.transpose(h.reshape(b, c * f, t), (0, 2, 1))
    y = jnp.matmul(rnd(feat), rnd(params["wlin"].T * scale),
                   precision=lax.Precision.HIGHEST)
    y = y + params["blin"] * scale
    return y + pe[None, : y.shape[1]]


# ----------------------------------------------------------------------------
# Main
# ----------------------------------------------------------------------------
if __name__ == "__main__":
    B, T, F, D = 2, 16, 16, 32            # batch, time, in_feats, out_feats
    key = jax.random.PRNGKey(0)
    kx, kw1, kb1, kw2, kb2, kwl, kbl = jax.random.split(key, 7)

    F1 = (F - 3) // 2 + 1
    T1 = (T - 1) // 2 + 1
    F2 = (F1 - 3) // 2 + 1
    T2 = (T1 - 1) // 2 + 1

    x = jax.random.normal(kx, (B, T, F), jnp.float32)
    x_mask = jnp.ones((B, 1, T), dtype=bool)

    params = dict(
        w1=jax.random.normal(kw1, (D, 1, 3, 3), jnp.float32) / 3.0,
        b1=jax.random.normal(kb1, (D,), jnp.float32) * 0.1,
        w2=jax.random.normal(kw2, (D, D, 3, 3), jnp.float32) / math.sqrt(9 * D),
        b2=jax.random.normal(kb2, (D,), jnp.float32) * 0.1,
        wlin=jax.random.normal(kwl, (D, D * F2), jnp.float32) / math.sqrt(D * F2),
        blin=jax.random.normal(kbl, (D,), jnp.float32) * 0.1,
    )
    pe = make_sinusoidal_pe(T2, D)

    y, y_mask = transformer_conv2d_subsampler_forward(x, params, pe, x_mask)
    y = jax.block_until_ready(y)

    assert y.shape == (B, T2, D), y.shape
    y_ref = jax.block_until_ready(_reference_forward(x, params, pe))
    max_err = float(jnp.max(jnp.abs(y - y_ref)))
    assert jnp.allclose(y, y_ref, atol=2e-2, rtol=2e-2), max_err

    print("KERNEL_OK")
</pallas_src>

<mosaic_0001>
module attributes {stable_mosaic.version = 11 : i64} {
  func.func @_fused_subsampler_kernel(%arg0: i32, %arg1: i32, %arg2: memref<1x1x2x6x32xf32, #tpu.memory_space<vmem>>, %arg3: memref<9x128xf32, #tpu.memory_space<vmem>>, %arg4: memref<1x128xf32, #tpu.memory_space<vmem>>, %arg5: memref<9x128x128xbf16, #tpu.memory_space<vmem>>, %arg6: memref<1x128xf32, #tpu.memory_space<vmem>>, %arg7: memref<384x128xbf16, #tpu.memory_space<vmem>>, %arg8: memref<1x128xf32, #tpu.memory_space<vmem>>, %arg9: memref<1x4x128xf32, #tpu.memory_space<vmem>>, %arg10: memref<1x4x128xf32, #tpu.memory_space<vmem>>, %arg11: memref<2x7x5x128xbf16, #tpu.memory_space<vmem>>, %arg12: memref<4x384xbf16, #tpu.memory_space<vmem>>) attributes {dimension_semantics = [#tpu.dimension_semantics<parallel>, #tpu.dimension_semantics<parallel>], iteration_bounds = array<i64: 2, 1>, scalar_prefetch = 0 : i64, scratch_operands = 2 : i64, tpu.core_type = #tpu.core_type<tc>, window_params = [{transform_indices = @transform_0, window_bounds = array<i64: 1, 1, 2, 6, 32>}, {pipeline_mode = #tpu.pipeline_mode<synchronous>, transform_indices = @transform_1, window_bounds = array<i64: 9, 128>}, {pipeline_mode = #tpu.pipeline_mode<synchronous>, transform_indices = @transform_2, window_bounds = array<i64: 1, 128>}, {pipeline_mode = #tpu.pipeline_mode<synchronous>, transform_indices = @transform_3, window_bounds = array<i64: 9, 128, 128>}, {pipeline_mode = #tpu.pipeline_mode<synchronous>, transform_indices = @transform_4, window_bounds = array<i64: 1, 128>}, {pipeline_mode = #tpu.pipeline_mode<synchronous>, transform_indices = @transform_5, window_bounds = array<i64: 384, 128>}, {pipeline_mode = #tpu.pipeline_mode<synchronous>, transform_indices = @transform_6, window_bounds = array<i64: 1, 128>}, {transform_indices = @transform_7, window_bounds = array<i64: 1, 4, 128>}, {transform_indices = @transform_8, window_bounds = array<i64: 1, 4, 128>}]} {
    %0 = tpu.iota {dimensions = array<i32: 0>} : vector<5x1xi32>
    %c2_i32 = arith.constant 2 : i32
    %1 = arith.muli %c2_i32, %arg1 : i32
    %c4_i32 = arith.constant 4 : i32
    %2 = arith.muli %1, %c4_i32 : i32
    %c1_i32 = arith.constant 1 : i32
    %3 = arith.subi %2, %c1_i32 : i32
    %c2_i32_0 = arith.constant 2 : i32
    %4 = vector.broadcast %c2_i32_0 : i32 to vector<5x1xi32>
    %5 = arith.muli %4, %0 : vector<5x1xi32>
    %6 = vector.broadcast %3 : i32 to vector<5x1xi32>
    %7 = arith.addi %6, %5 : vector<5x1xi32>
    %c0_i32 = arith.constant 0 : i32
    %8 = vector.broadcast %c0_i32 : i32 to vector<5x1xi32>
    %9 = arith.addi %7, %8 : vector<5x1xi32>
    %c0_i32_1 = arith.constant 0 : i32
    %10 = vector.broadcast %c0_i32_1 : i32 to vector<5x1xi32>
    %11 = arith.cmpi sge, %9, %10 : vector<5x1xi32>
    %c0_i32_2 = arith.constant 0 : i32
    %12 = vector.broadcast %c0_i32_2 : i32 to vector<5x1xi32>
    %13 = arith.addi %7, %12 : vector<5x1xi32>
    %c8_i32 = arith.constant 8 : i32
    %14 = vector.broadcast %c8_i32 : i32 to vector<5x1xi32>
    %15 = arith.cmpi slt, %13, %14 : vector<5x1xi32>
    %16 = arith.andi %11, %15 : vector<5x1xi1>
    %c0 = arith.constant 0 : index
    %c0_3 = arith.constant 0 : index
    %c0_4 = arith.constant 0 : index
    %c0_5 = arith.constant 0 : index
    %c0_6 = arith.constant 0 : index
    %17 = vector.load %arg2[%c0, %c0_3, %c0_4, %c0_5, %c0_6] : memref<1x1x2x6x32xf32, #tpu.memory_space<vmem>>, vector<1x1x1x5x1xf32>
    %18 = vector.shape_cast %17 : vector<1x1x1x5x1xf32> to vector<5x1xf32>
    %c0_7 = arith.constant 0 : index
    %c0_8 = arith.constant 0 : index
    %19 = vector.load %arg3[%c0_7, %c0_8] : memref<9x128xf32, #tpu.memory_space<vmem>>, vector<1x128xf32>
    %20 = vector.broadcast %18 : vector<5x1xf32> to vector<5x128xf32>
    %21 = vector.broadcast %19 : vector<1x128xf32> to vector<5x128xf32>
    %22 = arith.mulf %20, %21 : vector<5x128xf32>
    %c0_9 = arith.constant 0 : index
    %c0_10 = arith.constant 0 : index
    %c0_11 = arith.constant 0 : index
    %c0_12 = arith.constant 0 : index
    %c1 = arith.constant 1 : index
    %23 = vector.load %arg2[%c0_9, %c0_10, %c0_11, %c0_12, %c1] : memref<1x1x2x6x32xf32, #tpu.memory_space<vmem>>, vector<1x1x1x5x1xf32>
    %24 = vector.shape_cast %23 : vector<1x1x1x5x1xf32> to vector<5x1xf32>
    %c1_13 = arith.constant 1 : index
    %c0_14 = arith.constant 0 : index
    %25 = vector.load %arg3[%c1_13, %c0_14] : memref<9x128xf32, #tpu.memory_space<vmem>>, vector<1x128xf32>
    %26 = vector.broadcast %24 : vector<5x1xf32> to vector<5x128xf32>
    %27 = vector.broadcast %25 : vector<1x128xf32> to vector<5x128xf32>
    %28 = arith.mulf %26, %27 : vector<5x128xf32>
    %29 = arith.addf %22, %28 : vector<5x128xf32>
    %c0_15 = arith.constant 0 : index
    %c0_16 = arith.constant 0 : index
    %c0_17 = arith.constant 0 : index
    %c0_18 = arith.constant 0 : index
    %c2 = arith.constant 2 : index
    %30 = vector.load %arg2[%c0_15, %c0_16, %c0_17, %c0_18, %c2] : memref<1x1x2x6x32xf32, #tpu.memory_space<vmem>>, vector<1x1x1x5x1xf32>
    %31 = vector.shape_cast %30 : vector<1x1x1x5x1xf32> to vector<5x1xf32>
    %c2_19 = arith.constant 2 : index
    %c0_20 = arith.constant 0 : index
    %32 = vector.load %arg3[%c2_19, %c0_20] : memref<9x128xf32, #tpu.memory_space<vmem>>, vector<1x128xf32>
    %33 = vector.broadcast %31 : vector<5x1xf32> to vector<5x128xf32>
    %34 = vector.broadcast %32 : vector<1x128xf32> to vector<5x128xf32>
    %35 = arith.mulf %33, %34 : vector<5x128xf32>
    %36 = arith.addf %29, %35 : vector<5x128xf32>
    %c0_21 = arith.constant 0 : index
    %c0_22 = arith.constant 0 : index
    %c1_23 = arith.constant 1 : index
    %c0_24 = arith.constant 0 : index
    %c0_25 = arith.constant 0 : index
    %37 = vector.load %arg2[%c0_21, %c0_22, %c1_23, %c0_24, %c0_25] : memref<1x1x2x6x32xf32, #tpu.memory_space<vmem>>, vector<1x1x1x5x1xf32>
    %38 = vector.shape_cast %37 : vector<1x1x1x5x1xf32> to vector<5x1xf32>
    %c3 = arith.constant 3 : index
    %c0_26 = arith.constant 0 : index
    %39 = vector.load %arg3[%c3, %c0_26] : memref<9x128xf32, #tpu.memory_space<vmem>>, vector<1x128xf32>
    %40 = vector.broadcast %38 : vector<5x1xf32> to vector<5x128xf32>
    %41 = vector.broadcast %39 : vector<1x128xf32> to vector<5x128xf32>
    %42 = arith.mulf %40, %41 : vector<5x128xf32>
    %43 = arith.addf %36, %42 : vector<5x128xf32>
    %c0_27 = arith.constant 0 : index
    %c0_28 = arith.constant 0 : index
    %c1_29 = arith.constant 1 : index
    %c0_30 = arith.constant 0 : index
    %c1_31 = arith.constant 1 : index
    %44 = vector.load %arg2[%c0_27, %c0_28, %c1_29, %c0_30, %c1_31] : memref<1x1x2x6x32xf32, #tpu.memory_space<vmem>>, vector<1x1x1x5x1xf32>
    %45 = vector.shape_cast %44 : vector<1x1x1x5x1xf32> to vector<5x1xf32>
    %c4 = arith.constant 4 : index
    %c0_32 = arith.constant 0 : index
    %46 = vector.load %arg3[%c4, %c0_32] : memref<9x128xf32, #tpu.memory_space<vmem>>, vector<1x128xf32>
    %47 = vector.broadcast %45 : vector<5x1xf32> to vector<5x128xf32>
    %48 = vector.broadcast %46 : vector<1x128xf32> to vector<5x128xf32>
    %49 = arith.mulf %47, %48 : vector<5x128xf32>
    %50 = arith.addf %43, %49 : vector<5x128xf32>
    %c0_33 = arith.constant 0 : index
    %c0_34 = arith.constant 0 : index
    %c1_35 = arith.constant 1 : index
    %c0_36 = arith.constant 0 : index
    %c2_37 = arith.constant 2 : index
    %51 = vector.load %arg2[%c0_33, %c0_34, %c1_35, %c0_36, %c2_37] : memref<1x1x2x6x32xf32, #tpu.memory_space<vmem>>, vector<1x1x1x5x1xf32>
    %52 = vector.shape_cast %51 : vector<1x1x1x5x1xf32> to vector<5x1xf32>
    %c5 = arith.constant 5 : index
    %c0_38 = arith.constant 0 : index
    %53 = vector.load %arg3[%c5, %c0_38] : memref<9x128xf32, #tpu.memory_space<vmem>>, vector<1x128xf32>
    %54 = vector.broadcast %52 : vector<5x1xf32> to vector<5x128xf32>
    %55 = vector.broadcast %53 : vector<1x128xf32> to vector<5x128xf32>
    %56 = arith.mulf %54, %55 : vector<5x128xf32>
    %57 = arith.addf %50, %56 : vector<5x128xf32>
    %c0_39 = arith.constant 0 : index
    %c0_40 = arith.constant 0 : index
    %c0_41 = arith.constant 0 : index
    %c0_42 = arith.constant 0 : index
    %c4_43 = arith.constant 4 : index
    %58 = vector.load %arg2[%c0_39, %c0_40, %c0_41, %c0_42, %c4_43] : memref<1x1x2x6x32xf32, #tpu.memory_space<vmem>>, vector<1x1x1x5x1xf32>
    %59 = vector.shape_cast %58 : vector<1x1x1x5x1xf32> to vector<5x1xf32>
    %c6 = arith.constant 6 : index
    %c0_44 = arith.constant 0 : index
    %60 = vector.load %arg3[%c6, %c0_44] : memref<9x128xf32, #tpu.memory_space<vmem>>, vector<1x128xf32>
    %61 = vector.broadcast %59 : vector<5x1xf32> to vector<5x128xf32>
    %62 = vector.broadcast %60 : vector<1x128xf32> to vector<5x128xf32>
    %63 = arith.mulf %61, %62 : vector<5x128xf32>
    %64 = arith.addf %57, %63 : vector<5x128xf32>
    %c0_45 = arith.constant 0 : index
    %c0_46 = arith.constant 0 : index
    %c0_47 = arith.constant 0 : index
    %c0_48 = arith.constant 0 : index
    %c5_49 = arith.constant 5 : index
    %65 = vector.load %arg2[%c0_45, %c0_46, %c0_47, %c0_48, %c5_49] : memref<1x1x2x6x32xf32, #tpu.memory_space<vmem>>, vector<1x1x1x5x1xf32>
    %66 = vector.shape_cast %65 : vector<1x1x1x5x1xf32> to vector<5x1xf32>
    %c7 = arith.constant 7 : index
    %c0_50 = arith.constant 0 : index
    %67 = vector.load %arg3[%c7, %c0_50] : memref<9x128xf32, #tpu.memory_space<vmem>>, vector<1x128xf32>
    %68 = vector.broadcast %66 : vector<5x1xf32> to vector<5x128xf32>
    %69 = vector.broadcast %67 : vector<1x128xf32> to vector<5x128xf32>
    %70 = arith.mulf %68, %69 : vector<5x128xf32>
    %71 = arith.addf %64, %70 : vector<5x128xf32>
    %c0_51 = arith.constant 0 : index
    %c0_52 = arith.constant 0 : index
    %c0_53 = arith.constant 0 : index
    %c0_54 = arith.constant 0 : index
    %c6_55 = arith.constant 6 : index
    %72 = vector.load %arg2[%c0_51, %c0_52, %c0_53, %c0_54, %c6_55] : memref<1x1x2x6x32xf32, #tpu.memory_space<vmem>>, vector<1x1x1x5x1xf32>
    %73 = vector.shape_cast %72 : vector<1x1x1x5x1xf32> to vector<5x1xf32>
    %c8 = arith.constant 8 : index
    %c0_56 = arith.constant 0 : index
    %74 = vector.load %arg3[%c8, %c0_56] : memref<9x128xf32, #tpu.memory_space<vmem>>, vector<1x128xf32>
    %75 = vector.broadcast %73 : vector<5x1xf32> to vector<5x128xf32>
    %76 = vector.broadcast %74 : vector<1x128xf32> to vector<5x128xf32>
    %77 = arith.mulf %75, %76 : vector<5x128xf32>
    %78 = arith.addf %71, %77 : vector<5x128xf32>
    %c0_57 = arith.constant 0 : index
    %c0_58 = arith.constant 0 : index
    %79 = vector.load %arg4[%c0_57, %c0_58] : memref<1x128xf32, #tpu.memory_space<vmem>>, vector<1x128xf32>
    %80 = vector.broadcast %79 : vector<1x128xf32> to vector<5x128xf32>
    %81 = arith.addf %78, %80 : vector<5x128xf32>
    %cst = arith.constant 0.000000e+00 : f32
    %82 = vector.broadcast %cst : f32 to vector<5x128xf32>
    %83 = arith.maximumf %81, %82 : vector<5x128xf32>
    %cst_59 = arith.constant 0.000000e+00 : f32
    %84 = vector.shape_cast %16 : vector<5x1xi1> to vector<5x1xi1>
    %85 = vector.broadcast %84 : vector<5x1xi1> to vector<5x128xi1>
    %86 = vector.broadcast %cst_59 : f32 to vector<5x128xf32>
    %87 = arith.select %85, %83, %86 : vector<5x128xi1>, vector<5x128xf32>
    %88 = arith.truncf %87 : vector<5x128xf32> to vector<5x128xbf16>
    %c0_60 = arith.constant 0 : index
    %c0_61 = arith.constant 0 : index
    %c0_62 = arith.constant 0 : index
    %c0_63 = arith.constant 0 : index
    %89 = vector.load %arg11[%c0_60, %c0_61, %c0_62, %c0_63] : memref<2x7x5x128xbf16, #tpu.memory_space<vmem>>, vector<1x1x5x128xbf16>
    %90 = vector.shape_cast %89 : vector<1x1x5x128xbf16> to vector<5x128xbf16>
    %91 = vector.shape_cast %88 : vector<5x128xbf16> to vector<1x1x5x128xbf16>
    tpu.vector_store %arg11[%c0_60, %c0_61, %c0_62, %c0_63], %91 {strides = array<i32>} : memref<2x7x5x128xbf16, #tpu.memory_space<vmem>>, vector<1x1x5x128xbf16>,
    %c0_64 = arith.constant 0 : index
    %c0_65 = arith.constant 0 : index
    %c0_66 = arith.constant 0 : index
    %c0_67 = arith.constant 0 : index
    %c4_68 = arith.constant 4 : index
    %92 = vector.load %arg2[%c0_64, %c0_65, %c0_66, %c0_67, %c4_68] : memref<1x1x2x6x32xf32, #tpu.memory_space<vmem>>, vector<1x1x1x5x1xf32>
    %93 = vector.shape_cast %92 : vector<1x1x1x5x1xf32> to vector<5x1xf32>
    %c0_69 = arith.constant 0 : index
    %c0_70 = arith.constant 0 : index
    %94 = vector.load %arg3[%c0_69, %c0_70] : memref<9x128xf32, #tpu.memory_space<vmem>>, vector<1x128xf32>
    %95 = vector.broadcast %93 : vector<5x1xf32> to vector<5x128xf32>
    %96 = vector.broadcast %94 : vector<1x128xf32> to vector<5x128xf32>
    %97 = arith.mulf %95, %96 : vector<5x128xf32>
    %c0_71 = arith.constant 0 : index
    %c0_72 = arith.constant 0 : index
    %c0_73 = arith.constant 0 : index
    %c0_74 = arith.constant 0 : index
    %c5_75 = arith.constant 5 : index
    %98 = vector.load %arg2[%c0_71, %c0_72, %c0_73, %c0_74, %c5_75] : memref<1x1x2x6x32xf32, #tpu.memory_space<vmem>>, vector<1x1x1x5x1xf32>
    %99 = vector.shape_cast %98 : vector<1x1x1x5x1xf32> to vector<5x1xf32>
    %c1_76 = arith.constant 1 : index
    %c0_77 = arith.constant 0 : index
    %100 = vector.load %arg3[%c1_76, %c0_77] : memref<9x128xf32, #tpu.memory_space<vmem>>, vector<1x128xf32>
    %101 = vector.broadcast %99 : vector<5x1xf32> to vector<5x128xf32>
    %102 = vector.broadcast %100 : vector<1x128xf32> to vector<5x128xf32>
    %103 = arith.mulf %101, %102 : vector<5x128xf32>
    %104 = arith.addf %97, %103 : vector<5x128xf32>
    %c0_78 = arith.constant 0 : index
    %c0_79 = arith.constant 0 : index
    %c0_80 = arith.constant 0 : index
    %c0_81 = arith.constant 0 : index
    %c6_82 = arith.constant 6 : index
    %105 = vector.load %arg2[%c0_78, %c0_79, %c0_80, %c0_81, %c6_82] : memref<1x1x2x6x32xf32, #tpu.memory_space<vmem>>, vector<1x1x1x5x1xf32>
    %106 = vector.shape_cast %105 : vector<1x1x1x5x1xf32> to vector<5x1xf32>
    %c2_83 = arith.constant 2 : index
    %c0_84 = arith.constant 0 : index
    %107 = vector.load %arg3[%c2_83, %c0_84] : memref<9x128xf32, #tpu.memory_space<vmem>>, vector<1x128xf32>
    %108 = vector.broadcast %106 : vector<5x1xf32> to vector<5x128xf32>
    %109 = vector.broadcast %107 : vector<1x128xf32> to vector<5x128xf32>
    %110 = arith.mulf %108, %109 : vector<5x128xf32>
    %111 = arith.addf %104, %110 : vector<5x128xf32>
    %c0_85 = arith.constant 0 : index
    %c0_86 = arith.constant 0 : index
    %c1_87 = arith.constant 1 : index
    %c0_88 = arith.constant 0 : index
    %c4_89 = arith.constant 4 : index
    %112 = vector.load %arg2[%c0_85, %c0_86, %c1_87, %c0_88, %c4_89] : memref<1x1x2x6x32xf32, #tpu.memory_space<vmem>>, vector<1x1x1x5x1xf32>
    %113 = vector.shape_cast %112 : vector<1x1x1x5x1xf32> to vector<5x1xf32>
    %c3_90 = arith.constant 3 : index
    %c0_91 = arith.constant 0 : index
    %114 = vector.load %arg3[%c3_90, %c0_91] : memref<9x128xf32, #tpu.memory_space<vmem>>, vector<1x128xf32>
    %115 = vector.broadcast %113 : vector<5x1xf32> to vector<5x128xf32>
    %116 = vector.broadcast %114 : vector<1x128xf32> to vector<5x128xf32>
    %117 = arith.mulf %115, %116 : vector<5x128xf32>
    %118 = arith.addf %111, %117 : vector<5x128xf32>
    %c0_92 = arith.constant 0 : index
    %c0_93 = arith.constant 0 : index
    %c1_94 = arith.constant 1 : index
    %c0_95 = arith.constant 0 : index
    %c5_96 = arith.constant 5 : index
    %119 = vector.load %arg2[%c0_92, %c0_93, %c1_94, %c0_95, %c5_96] : memref<1x1x2x6x32xf32, #tpu.memory_space<vmem>>, vector<1x1x1x5x1xf32>
    %120 = vector.shape_cast %119 : vector<1x1x1x5x1xf32> to vector<5x1xf32>
    %c4_97 = arith.constant 4 : index
    %c0_98 = arith.constant 0 : index
    %121 = vector.load %arg3[%c4_97, %c0_98] : memref<9x128xf32, #tpu.memory_space<vmem>>, vector<1x128xf32>
    %122 = vector.broadcast %120 : vector<5x1xf32> to vector<5x128xf32>
    %123 = vector.broadcast %121 : vector<1x128xf32> to vector<5x128xf32>
    %124 = arith.mulf %122, %123 : vector<5x128xf32>
    %125 = arith.addf %118, %124 : vector<5x128xf32>
    %c0_99 = arith.constant 0 : index
    %c0_100 = arith.constant 0 : index
    %c1_101 = arith.constant 1 : index
    %c0_102 = arith.constant 0 : index
    %c6_103 = arith.constant 6 : index
    %126 = vector.load %arg2[%c0_99, %c0_100, %c1_101, %c0_102, %c6_103] : memref<1x1x2x6x32xf32, #tpu.memory_space<vmem>>, vector<1x1x1x5x1xf32>
    %127 = vector.shape_cast %126 : vector<1x1x1x5x1xf32> to vector<5x1xf32>
    %c5_104 = arith.constant 5 : index
    %c0_105 = arith.constant 0 : index
    %128 = vector.load %arg3[%c5_104, %c0_105] : memref<9x128xf32, #tpu.memory_space<vmem>>, vector<1x128xf32>
    %129 = vector.broadcast %127 : vector<5x1xf32> to vector<5x128xf32>
    %130 = vector.broadcast %128 : vector<1x128xf32> to vector<5x128xf32>
    %131 = arith.mulf %129, %130 : vector<5x128xf32>
    %132 = arith.addf %125, %131 : vector<5x128xf32>
    %c0_106 = arith.constant 0 : index
    %c0_107 = arith.constant 0 : index
    %c0_108 = arith.constant 0 : index
    %c0_109 = arith.constant 0 : index
    %c8_110 = arith.constant 8 : index
    %133 = vector.load %arg2[%c0_106, %c0_107, %c0_108, %c0_109, %c8_110] : memref<1x1x2x6x32xf32, #tpu.memory_space<vmem>>, vector<1x1x1x5x1xf32>
    %134 = vector.shape_cast %133 : vector<1x1x1x5x1xf32> to vector<5x1xf32>
    %c6_111 = arith.constant 6 : index
    %c0_112 = arith.constant 0 : index
    %135 = vector.load %arg3[%c6_111, %c0_112] : memref<9x128xf32, #tpu.memory_space<vmem>>, vector<1x128xf32>
    %136 = vector.broadcast %134 : vector<5x1xf32> to vector<5x128xf32>
    %137 = vector.broadcast %135 : vector<1x128xf32> to vector<5x128xf32>
    %138 = arith.mulf %136, %137 : vector<5x128xf32>
    %139 = arith.addf %132, %138 : vector<5x128xf32>
    %c0_113 = arith.constant 0 : index
    %c0_114 = arith.constant 0 : index
    %c0_115 = arith.constant 0 : index
    %c0_116 = arith.constant 0 : index
    %c9 = arith.constant 9 : index
    %140 = vector.load %arg2[%c0_113, %c0_114, %c0_115, %c0_116, %c9] : memref<1x1x2x6x32xf32, #tpu.memory_space<vmem>>, vector<1x1x1x5x1xf32>
    %141 = vector.shape_cast %140 : vector<1x1x1x5x1xf32> to vector<5x1xf32>
    %c7_117 = arith.constant 7 : index
    %c0_118 = arith.constant 0 : index
    %142 = vector.load %arg3[%c7_117, %c0_118] : memref<9x128xf32, #tpu.memory_space<vmem>>, vector<1x128xf32>
    %143 = vector.broadcast %141 : vector<5x1xf32> to vector<5x128xf32>
    %144 = vector.broadcast %142 : vector<1x128xf32> to vector<5x128xf32>
    %145 = arith.mulf %143, %144 : vector<5x128xf32>
    %146 = arith.addf %139, %145 : vector<5x128xf32>
    %c0_119 = arith.constant 0 : index
    %c0_120 = arith.constant 0 : index
    %c0_121 = arith.constant 0 : index
    %c0_122 = arith.constant 0 : index
    %c10 = arith.constant 10 : index
    %147 = vector.load %arg2[%c0_119, %c0_120, %c0_121, %c0_122, %c10] : memref<1x1x2x6x32xf32, #tpu.memory_space<vmem>>, vector<1x1x1x5x1xf32>
    %148 = vector.shape_cast %147 : vector<1x1x1x5x1xf32> to vector<5x1xf32>
    %c8_123 = arith.constant 8 : index
    %c0_124 = arith.constant 0 : index
    %149 = vector.load %arg3[%c8_123, %c0_124] : memref<9x128xf32, #tpu.memory_space<vmem>>, vector<1x128xf32>
    %150 = vector.broadcast %148 : vector<5x1xf32> to vector<5x128xf32>
    %151 = vector.broadcast %149 : vector<1x128xf32> to vector<5x128xf32>
    %152 = arith.mulf %150, %151 : vector<5x128xf32>
    %153 = arith.addf %146, %152 : vector<5x128xf32>
    %c0_125 = arith.constant 0 : index
    %c0_126 = arith.constant 0 : index
    %154 = vector.load %arg4[%c0_125, %c0_126] : memref<1x128xf32, #tpu.memory_space<vmem>>, vector<1x128xf32>
    %155 = vector.broadcast %154 : vector<1x128xf32> to vector<5x128xf32>
    %156 = arith.addf %153, %155 : vector<5x128xf32>
    %cst_127 = arith.constant 0.000000e+00 : f32
    %157 = vector.broadcast %cst_127 : f32 to vector<5x128xf32>
    %158 = arith.maximumf %156, %157 : vector<5x128xf32>
    %cst_128 = arith.constant 0.000000e+00 : f32
    %159 = vector.shape_cast %16 : vector<5x1xi1> to vector<5x1xi1>
    %160 = vector.broadcast %159 : vector<5x1xi1> to vector<5x128xi1>
    %161 = vector.broadcast %cst_128 : f32 to vector<5x128xf32>
    %162 = arith.select %160, %158, %161 : vector<5x128xi1>, vector<5x128xf32>
    %163 = arith.truncf %162 : vector<5x128xf32> to vector<5x128xbf16>
    %c0_129 = arith.constant 0 : index
    %c1_130 = arith.constant 1 : index
    %c0_131 = arith.constant 0 : index
    %c0_132 = arith.constant 0 : index
    %164 = vector.load %arg11[%c0_129, %c1_130, %c0_131, %c0_132] : memref<2x7x5x128xbf16, #tpu.memory_space<vmem>>, vector<1x1x5x128xbf16>
    %165 = vector.shape_cast %164 : vector<1x1x5x128xbf16> to vector<5x128xbf16>
    %166 = vector.shape_cast %163 : vector<5x128xbf16> to vector<1x1x5x128xbf16>
    tpu.vector_store %arg11[%c0_129, %c1_130, %c0_131, %c0_132], %166 {strides = array<i32>} : memref<2x7x5x128xbf16, #tpu.memory_space<vmem>>, vector<1x1x5x128xbf16>,
    %c0_133 = arith.constant 0 : index
    %c0_134 = arith.constant 0 : index
    %c0_135 = arith.constant 0 : index
    %c0_136 = arith.constant 0 : index
    %c8_137 = arith.constant 8 : index
    %167 = vector.load %arg2[%c0_133, %c0_134, %c0_135, %c0_136, %c8_137] : memref<1x1x2x6x32xf32, #tpu.memory_space<vmem>>, vector<1x1x1x5x1xf32>
    %168 = vector.shape_cast %167 : vector<1x1x1x5x1xf32> to vector<5x1xf32>
    %c0_138 = arith.constant 0 : index
    %c0_139 = arith.constant 0 : index
    %169 = vector.load %arg3[%c0_138, %c0_139] : memref<9x128xf32, #tpu.memory_space<vmem>>, vector<1x128xf32>
    %170 = vector.broadcast %168 : vector<5x1xf32> to vector<5x128xf32>
    %171 = vector.broadcast %169 : vector<1x128xf32> to vector<5x128xf32>
    %172 = arith.mulf %170, %171 : vector<5x128xf32>
    %c0_140 = arith.constant 0 : index
    %c0_141 = arith.constant 0 : index
    %c0_142 = arith.constant 0 : index
    %c0_143 = arith.constant 0 : index
    %c9_144 = arith.constant 9 : index
    %173 = vector.load %arg2[%c0_140, %c0_141, %c0_142, %c0_143, %c9_144] : memref<1x1x2x6x32xf32, #tpu.memory_space<vmem>>, vector<1x1x1x5x1xf32>
    %174 = vector.shape_cast %173 : vector<1x1x1x5x1xf32> to vector<5x1xf32>
    %c1_145 = arith.constant 1 : index
    %c0_146 = arith.constant 0 : index
    %175 = vector.load %arg3[%c1_145, %c0_146] : memref<9x128xf32, #tpu.memory_space<vmem>>, vector<1x128xf32>
    %176 = vector.broadcast %174 : vector<5x1xf32> to vector<5x128xf32>
    %177 = vector.broadcast %175 : vector<1x128xf32> to vector<5x128xf32>
    %178 = arith.mulf %176, %177 : vector<5x128xf32>
    %179 = arith.addf %172, %178 : vector<5x128xf32>
    %c0_147 = arith.constant 0 : index
    %c0_148 = arith.constant 0 : index
    %c0_149 = arith.constant 0 : index
    %c0_150 = arith.constant 0 : index
    %c10_151 = arith.constant 10 : index
    %180 = vector.load %arg2[%c0_147, %c0_148, %c0_149, %c0_150, %c10_151] : memref<1x1x2x6x32xf32, #tpu.memory_space<vmem>>, vector<1x1x1x5x1xf32>
    %181 = vector.shape_cast %180 : vector<1x1x1x5x1xf32> to vector<5x1xf32>
    %c2_152 = arith.constant 2 : index
    %c0_153 = arith.constant 0 : index
    %182 = vector.load %arg3[%c2_152, %c0_153] : memref<9x128xf32, #tpu.memory_space<vmem>>, vector<1x128xf32>
    %183 = vector.broadcast %181 : vector<5x1xf32> to vector<5x128xf32>
    %184 = vector.broadcast %182 : vector<1x128xf32> to vector<5x128xf32>
    %185 = arith.mulf %183, %184 : vector<5x128xf32>
    %186 = arith.addf %179, %185 : vector<5x128xf32>
    %c0_154 = arith.constant 0 : index
    %c0_155 = arith.constant 0 : index
    %c1_156 = arith.constant 1 : index
    %c0_157 = arith.constant 0 : index
    %c8_158 = arith.constant 8 : index
    %187 = vector.load %arg2[%c0_154, %c0_155, %c1_156, %c0_157, %c8_158] : memref<1x1x2x6x32xf32, #tpu.memory_space<vmem>>, vector<1x1x1x5x1xf32>
    %188 = vector.shape_cast %187 : vector<1x1x1x5x1xf32> to vector<5x1xf32>
    %c3_159 = arith.constant 3 : index
    %c0_160 = arith.constant 0 : index
    %189 = vector.load %arg3[%c3_159, %c0_160] : memref<9x128xf32, #tpu.memory_space<vmem>>, vector<1x128xf32>
    %190 = vector.broadcast %188 : vector<5x1xf32> to vector<5x128xf32>
    %191 = vector.broadcast %189 : vector<1x128xf32> to vector<5x128xf32>
    %192 = arith.mulf %190, %191 : vector<5x128xf32>
    %193 = arith.addf %186, %192 : vector<5x128xf32>
    %c0_161 = arith.constant 0 : index
    %c0_162 = arith.constant 0 : index
    %c1_163 = arith.constant 1 : index
    %c0_164 = arith.constant 0 : index
    %c9_165 = arith.constant 9 : index
    %194 = vector.load %arg2[%c0_161, %c0_162, %c1_163, %c0_164, %c9_165] : memref<1x1x2x6x32xf32, #tpu.memory_space<vmem>>, vector<1x1x1x5x1xf32>
    %195 = vector.shape_cast %194 : vector<1x1x1x5x1xf32> to vector<5x1xf32>
    %c4_166 = arith.constant 4 : index
    %c0_167 = arith.constant 0 : index
    %196 = vector.load %arg3[%c4_166, %c0_167] : memref<9x128xf32, #tpu.memory_space<vmem>>, vector<1x128xf32>
    %197 = vector.broadcast %195 : vector<5x1xf32> to vector<5x128xf32>
    %198 = vector.broadcast %196 : vector<1x128xf32> to vector<5x128xf32>
    %199 = arith.mulf %197, %198 : vector<5x128xf32>
    %200 = arith.addf %193, %199 : vector<5x128xf32>
    %c0_168 = arith.constant 0 : index
    %c0_169 = arith.constant 0 : index
    %c1_170 = arith.constant 1 : index
    %c0_171 = arith.constant 0 : index
    %c10_172 = arith.constant 10 : index
    %201 = vector.load %arg2[%c0_168, %c0_169, %c1_170, %c0_171, %c10_172] : memref<1x1x2x6x32xf32, #tpu.memory_space<vmem>>, vector<1x1x1x5x1xf32>
    %202 = vector.shape_cast %201 : vector<1x1x1x5x1xf32> to vector<5x1xf32>
    %c5_173 = arith.constant 5 : index
    %c0_174 = arith.constant 0 : index
    %203 = vector.load %arg3[%c5_173, %c0_174] : memref<9x128xf32, #tpu.memory_space<vmem>>, vector<1x128xf32>
    %204 = vector.broadcast %202 : vector<5x1xf32> to vector<5x128xf32>
    %205 = vector.broadcast %203 : vector<1x128xf32> to vector<5x128xf32>
    %206 = arith.mulf %204, %205 : vector<5x128xf32>
    %207 = arith.addf %200, %206 : vector<5x128xf32>
    %c0_175 = arith.constant 0 : index
    %c0_176 = arith.constant 0 : index
    %c0_177 = arith.constant 0 : index
    %c0_178 = arith.constant 0 : index
    %c12 = arith.constant 12 : index
    %208 = vector.load %arg2[%c0_175, %c0_176, %c0_177, %c0_178, %c12] : memref<1x1x2x6x32xf32, #tpu.memory_space<vmem>>, vector<1x1x1x5x1xf32>
    %209 = vector.shape_cast %208 : vector<1x1x1x5x1xf32> to vector<5x1xf32>
    %c6_179 = arith.constant 6 : index
    %c0_180 = arith.constant 0 : index
    %210 = vector.load %arg3[%c6_179, %c0_180] : memref<9x128xf32, #tpu.memory_space<vmem>>, vector<1x128xf32>
    %211 = vector.broadcast %209 : vector<5x1xf32> to vector<5x128xf32>
    %212 = vector.broadcast %210 : vector<1x128xf32> to vector<5x128xf32>
    %213 = arith.mulf %211, %212 : vector<5x128xf32>
    %214 = arith.addf %207, %213 : vector<5x128xf32>
    %c0_181 = arith.constant 0 : index
    %c0_182 = arith.constant 0 : index
    %c0_183 = arith.constant 0 : index
    %c0_184 = arith.constant 0 : index
    %c13 = arith.constant 13 : index
    %215 = vector.load %arg2[%c0_181, %c0_182, %c0_183, %c0_184, %c13] : memref<1x1x2x6x32xf32, #tpu.memory_space<vmem>>, vector<1x1x1x5x1xf32>
    %216 = vector.shape_cast %215 : vector<1x1x1x5x1xf32> to vector<5x1xf32>
    %c7_185 = arith.constant 7 : index
    %c0_186 = arith.constant 0 : index
    %217 = vector.load %arg3[%c7_185, %c0_186] : memref<9x128xf32, #tpu.memory_space<vmem>>, vector<1x128xf32>
    %218 = vector.broadcast %216 : vector<5x1xf32> to vector<5x128xf32>
    %219 = vector.broadcast %217 : vector<1x128xf32> to vector<5x128xf32>
    %220 = arith.mulf %218, %219 : vector<5x128xf32>
    %221 = arith.addf %214, %220 : vector<5x128xf32>
    %c0_187 = arith.constant 0 : index
    %c0_188 = arith.constant 0 : index
    %c0_189 = arith.constant 0 : index
    %c0_190 = arith.constant 0 : index
    %c14 = arith.constant 14 : index
    %222 = vector.load %arg2[%c0_187, %c0_188, %c0_189, %c0_190, %c14] : memref<1x1x2x6x32xf32, #tpu.memory_space<vmem>>, vector<1x1x1x5x1xf32>
    %223 = vector.shape_cast %222 : vector<1x1x1x5x1xf32> to vector<5x1xf32>
    %c8_191 = arith.constant 8 : index
    %c0_192 = arith.constant 0 : index
    %224 = vector.load %arg3[%c8_191, %c0_192] : memref<9x128xf32, #tpu.memory_space<vmem>>, vector<1x128xf32>
    %225 = vector.broadcast %223 : vector<5x1xf32> to vector<5x128xf32>
    %226 = vector.broadcast %224 : vector<1x128xf32> to vector<5x128xf32>
    %227 = arith.mulf %225, %226 : vector<5x128xf32>
    %228 = arith.addf %221, %227 : vector<5x128xf32>
    %c0_193 = arith.constant 0 : index
    %c0_194 = arith.constant 0 : index
    %229 = vector.load %arg4[%c0_193, %c0_194] : memref<1x128xf32, #tpu.memory_space<vmem>>, vector<1x128xf32>
    %230 = vector.broadcast %229 : vector<1x128xf32> to vector<5x128xf32>
    %231 = arith.addf %228, %230 : vector<5x128xf32>
    %cst_195 = arith.constant 0.000000e+00 : f32
    %232 = vector.broadcast %cst_195 : f32 to vector<5x128xf32>
    %233 = arith.maximumf %231, %232 : vector<5x128xf32>
    %cst_196 = arith.constant 0.000000e+00 : f32
    %234 = vector.shape_cast %16 : vector<5x1xi1> to vector<5x1xi1>
    %235 = vector.broadcast %234 : vector<5x1xi1> to vector<5x128xi1>
    %236 = vector.broadcast %cst_196 : f32 to vector<5x128xf32>
    %237 = arith.select %235, %233, %236 : vector<5x128xi1>, vector<5x128xf32>
    %238 = arith.truncf %237 : vector<5x128xf32> to vector<5x128xbf16>
    %c0_197 = arith.constant 0 : index
    %c2_198 = arith.constant 2 : index
    %c0_199 = arith.constant 0 : index
    %c0_200 = arith.constant 0 : index
    %239 = vector.load %arg11[%c0_197, %c2_198, %c0_199, %c0_200] : memref<2x7x5x128xbf16, #tpu.memory_space<vmem>>, vector<1x1x5x128xbf16>
    %240 = vector.shape_cast %239 : vector<1x1x5x128xbf16> to vector<5x128xbf16>
    %241 = vector.shape_cast %238 : vector<5x128xbf16> to vector<1x1x5x128xbf16>
    tpu.vector_store %arg11[%c0_197, %c2_198, %c0_199, %c0_200], %241 {strides = array<i32>} : memref<2x7x5x128xbf16, #tpu.memory_space<vmem>>, vector<1x1x5x128xbf16>,
    %c0_201 = arith.constant 0 : index
    %c0_202 = arith.constant 0 : index
    %c0_203 = arith.constant 0 : index
    %c0_204 = arith.constant 0 : index
    %c12_205 = arith.constant 12 : index
    %242 = vector.load %arg2[%c0_201, %c0_202, %c0_203, %c0_204, %c12_205] : memref<1x1x2x6x32xf32, #tpu.memory_space<vmem>>, vector<1x1x1x5x1xf32>
    %243 = vector.shape_cast %242 : vector<1x1x1x5x1xf32> to vector<5x1xf32>
    %c0_206 = arith.constant 0 : index
    %c0_207 = arith.constant 0 : index
    %244 = vector.load %arg3[%c0_206, %c0_207] : memref<9x128xf32, #tpu.memory_space<vmem>>, vector<1x128xf32>
    %245 = vector.broadcast %243 : vector<5x1xf32> to vector<5x128xf32>
    %246 = vector.broadcast %244 : vector<1x128xf32> to vector<5x128xf32>
    %247 = arith.mulf %245, %246 : vector<5x128xf32>
    %c0_208 = arith.constant 0 : index
    %c0_209 = arith.constant 0 : index
    %c0_210 = arith.constant 0 : index
    %c0_211 = arith.constant 0 : index
    %c13_212 = arith.constant 13 : index
    %248 = vector.load %arg2[%c0_208, %c0_209, %c0_210, %c0_211, %c13_212] : memref<1x1x2x6x32xf32, #tpu.memory_space<vmem>>, vector<1x1x1x5x1xf32>
    %249 = vector.shape_cast %248 : vector<1x1x1x5x1xf32> to vector<5x1xf32>
    %c1_213 = arith.constant 1 : index
    %c0_214 = arith.constant 0 : index
    %250 = vector.load %arg3[%c1_213, %c0_214] : memref<9x128xf32, #tpu.memory_space<vmem>>, vector<1x128xf32>
    %251 = vector.broadcast %249 : vector<5x1xf32> to vector<5x128xf32>
    %252 = vector.broadcast %250 : vector<1x128xf32> to vector<5x128xf32>
    %253 = arith.mulf %251, %252 : vector<5x128xf32>
    %254 = arith.addf %247, %253 : vector<5x128xf32>
    %c0_215 = arith.constant 0 : index
    %c0_216 = arith.constant 0 : index
    %c0_217 = arith.constant 0 : index
    %c0_218 = arith.constant 0 : index
    %c14_219 = arith.constant 14 : index
    %255 = vector.load %arg2[%c0_215, %c0_216, %c0_217, %c0_218, %c14_219] : memref<1x1x2x6x32xf32, #tpu.memory_space<vmem>>, vector<1x1x1x5x1xf32>
    %256 = vector.shape_cast %255 : vector<1x1x1x5x1xf32> to vector<5x1xf32>
    %c2_220 = arith.constant 2 : index
    %c0_221 = arith.constant 0 : index
    %257 = vector.load %arg3[%c2_220, %c0_221] : memref<9x128xf32, #tpu.memory_space<vmem>>, vector<1x128xf32>
    %258 = vector.broadcast %256 : vector<5x1xf32> to vector<5x128xf32>
    %259 = vector.broadcast %257 : vector<1x128xf32> to vector<5x128xf32>
    %260 = arith.mulf %258, %259 : vector<5x128xf32>
    %261 = arith.addf %254, %260 : vector<5x128xf32>
    %c0_222 = arith.constant 0 : index
    %c0_223 = arith.constant 0 : index
    %c1_224 = arith.constant 1 : index
    %c0_225 = arith.constant 0 : index
    %c12_226 = arith.constant 12 : index
    %262 = vector.load %arg2[%c0_222, %c0_223, %c1_224, %c0_225, %c12_226] : memref<1x1x2x6x32xf32, #tpu.memory_space<vmem>>, vector<1x1x1x5x1xf32>
    %263 = vector.shape_cast %262 : vector<1x1x1x5x1xf32> to vector<5x1xf32>
    %c3_227 = arith.constant 3 : index
    %c0_228 = arith.constant 0 : index
    %264 = vector.load %arg3[%c3_227, %c0_228] : memref<9x128xf32, #tpu.memory_space<vmem>>, vector<1x128xf32>
    %265 = vector.broadcast %263 : vector<5x1xf32> to vector<5x128xf32>
    %266 = vector.broadcast %264 : vector<1x128xf32> to vector<5x128xf32>
    %267 = arith.mulf %265, %266 : vector<5x128xf32>
    %268 = arith.addf %261, %267 : vector<5x128xf32>
    %c0_229 = arith.constant 0 : index
    %c0_230 = arith.constant 0 : index
    %c1_231 = arith.constant 1 : index
    %c0_232 = arith.constant 0 : index
    %c13_233 = arith.constant 13 : index
    %269 = vector.load %arg2[%c0_229, %c0_230, %c1_231, %c0_232, %c13_233] : memref<1x1x2x6x32xf32, #tpu.memory_space<vmem>>, vector<1x1x1x5x1xf32>
    %270 = vector.shape_cast %269 : vector<1x1x1x5x1xf32> to vector<5x1xf32>
    %c4_234 = arith.constant 4 : index
    %c0_235 = arith.constant 0 : index
    %271 = vector.load %arg3[%c4_234, %c0_235] : memref<9x128xf32, #tpu.memory_space<vmem>>, vector<1x128xf32>
    %272 = vector.broadcast %270 : vector<5x1xf32> to vector<5x128xf32>
    %273 = vector.broadcast %271 : vector<1x128xf32> to vector<5x128xf32>
    %274 = arith.mulf %272, %273 : vector<5x128xf32>
    %275 = arith.addf %268, %274 : vector<5x128xf32>
    %c0_236 = arith.constant 0 : index
    %c0_237 = arith.constant 0 : index
    %c1_238 = arith.constant 1 : index
    %c0_239 = arith.constant 0 : index
    %c14_240 = arith.constant 14 : index
    %276 = vector.load %arg2[%c0_236, %c0_237, %c1_238, %c0_239, %c14_240] : memref<1x1x2x6x32xf32, #tpu.memory_space<vmem>>, vector<1x1x1x5x1xf32>
    %277 = vector.shape_cast %276 : vector<1x1x1x5x1xf32> to vector<5x1xf32>
    %c5_241 = arith.constant 5 : index
    %c0_242 = arith.constant 0 : index
    %278 = vector.load %arg3[%c5_241, %c0_242] : memref<9x128xf32, #tpu.memory_space<vmem>>, vector<1x128xf32>
    %279 = vector.broadcast %277 : vector<5x1xf32> to vector<5x128xf32>
    %280 = vector.broadcast %278 : vector<1x128xf32> to vector<5x128xf32>
    %281 = arith.mulf %279, %280 : vector<5x128xf32>
    %282 = arith.addf %275, %281 : vector<5x128xf32>
    %c0_243 = arith.constant 0 : index
    %c0_244 = arith.constant 0 : index
    %c0_245 = arith.constant 0 : index
    %c0_246 = arith.constant 0 : index
    %c16 = arith.constant 16 : index
    %283 = vector.load %arg2[%c0_243, %c0_244, %c0_245, %c0_246, %c16] : memref<1x1x2x6x32xf32, #tpu.memory_space<vmem>>, vector<1x1x1x5x1xf32>
    %284 = vector.shape_cast %283 : vector<1x1x1x5x1xf32> to vector<5x1xf32>
    %c6_247 = arith.constant 6 : index
    %c0_248 = arith.constant 0 : index
    %285 = vector.load %arg3[%c6_247, %c0_248] : memref<9x128xf32, #tpu.memory_space<vmem>>, vector<1x128xf32>
    %286 = vector.broadcast %284 : vector<5x1xf32> to vector<5x128xf32>
    %287 = vector.broadcast %285 : vector<1x128xf32> to vector<5x128xf32>
    %288 = arith.mulf %286, %287 : vector<5x128xf32>
    %289 = arith.addf %282, %288 : vector<5x128xf32>
    %c0_249 = arith.constant 0 : index
    %c0_250 = arith.constant 0 : index
    %c0_251 = arith.constant 0 : index
    %c0_252 = arith.constant 0 : index
    %c17 = arith.constant 17 : index
    %290 = vector.load %arg2[%c0_249, %c0_250, %c0_251, %c0_252, %c17] : memref<1x1x2x6x32xf32, #tpu.memory_space<vmem>>, vector<1x1x1x5x1xf32>
    %291 = vector.shape_cast %290 : vector<1x1x1x5x1xf32> to vector<5x1xf32>
    %c7_253 = arith.constant 7 : index
    %c0_254 = arith.constant 0 : index
    %292 = vector.load %arg3[%c7_253, %c0_254] : memref<9x128xf32, #tpu.memory_space<vmem>>, vector<1x128xf32>
    %293 = vector.broadcast %291 : vector<5x1xf32> to vector<5x128xf32>
    %294 = vector.broadcast %292 : vector<1x128xf32> to vector<5x128xf32>
    %295 = arith.mulf %293, %294 : vector<5x128xf32>
    %296 = arith.addf %289, %295 : vector<5x128xf32>
    %c0_255 = arith.constant 0 : index
    %c0_256 = arith.constant 0 : index
    %c0_257 = arith.constant 0 : index
    %c0_258 = arith.constant 0 : index
    %c18 = arith.constant 18 : index
    %297 = vector.load %arg2[%c0_255, %c0_256, %c0_257, %c0_258, %c18] : memref<1x1x2x6x32xf32, #tpu.memory_space<vmem>>, vector<1x1x1x5x1xf32>
    %298 = vector.shape_cast %297 : vector<1x1x1x5x1xf32> to vector<5x1xf32>
    %c8_259 = arith.constant 8 : index
    %c0_260 = arith.constant 0 : index
    %299 = vector.load %arg3[%c8_259, %c0_260] : memref<9x128xf32, #tpu.memory_space<vmem>>, vector<1x128xf32>
    %300 = vector.broadcast %298 : vector<5x1xf32> to vector<5x128xf32>
    %301 = vector.broadcast %299 : vector<1x128xf32> to vector<5x128xf32>
    %302 = arith.mulf %300, %301 : vector<5x128xf32>
    %303 = arith.addf %296, %302 : vector<5x128xf32>
    %c0_261 = arith.constant 0 : index
    %c0_262 = arith.constant 0 : index
    %304 = vector.load %arg4[%c0_261, %c0_262] : memref<1x128xf32, #tpu.memory_space<vmem>>, vector<1x128xf32>
    %305 = vector.broadcast %304 : vector<1x128xf32> to vector<5x128xf32>
    %306 = arith.addf %303, %305 : vector<5x128xf32>
    %cst_263 = arith.constant 0.000000e+00 : f32
    %307 = vector.broadcast %cst_263 : f32 to vector<5x128xf32>
    %308 = arith.maximumf %306, %307 : vector<5x128xf32>
    %cst_264 = arith.constant 0.000000e+00 : f32
    %309 = vector.shape_cast %16 : vector<5x1xi1> to vector<5x1xi1>
    %310 = vector.broadcast %309 : vector<5x1xi1> to vector<5x128xi1>
    %311 = vector.broadcast %cst_264 : f32 to vector<5x128xf32>
    %312 = arith.select %310, %308, %311 : vector<5x128xi1>, vector<5x128xf32>
    %313 = arith.truncf %312 : vector<5x128xf32> to vector<5x128xbf16>
    %c0_265 = arith.constant 0 : index
    %c3_266 = arith.constant 3 : index
    %c0_267 = arith.constant 0 : index
    %c0_268 = arith.constant 0 : index
    %314 = vector.load %arg11[%c0_265, %c3_266, %c0_267, %c0_268] : memref<2x7x5x128xbf16, #tpu.memory_space<vmem>>, vector<1x1x5x128xbf16>
    %315 = vector.shape_cast %314 : vector<1x1x5x128xbf16> to vector<5x128xbf16>
    %316 = vector.shape_cast %313 : vector<5x128xbf16> to vector<1x1x5x128xbf16>
    tpu.vector_store %arg11[%c0_265, %c3_266, %c0_267, %c0_268], %316 {strides = array<i32>} : memref<2x7x5x128xbf16, #tpu.memory_space<vmem>>, vector<1x1x5x128xbf16>,
    %c0_269 = arith.constant 0 : index
    %c0_270 = arith.constant 0 : index
    %c0_271 = arith.constant 0 : index
    %c0_272 = arith.constant 0 : index
    %c16_273 = arith.constant 16 : index
    %317 = vector.load %arg2[%c0_269, %c0_270, %c0_271, %c0_272, %c16_273] : memref<1x1x2x6x32xf32, #tpu.memory_space<vmem>>, vector<1x1x1x5x1xf32>
    %318 = vector.shape_cast %317 : vector<1x1x1x5x1xf32> to vector<5x1xf32>
    %c0_274 = arith.constant 0 : index
    %c0_275 = arith.constant 0 : index
    %319 = vector.load %arg3[%c0_274, %c0_275] : memref<9x128xf32, #tpu.memory_space<vmem>>, vector<1x128xf32>
    %320 = vector.broadcast %318 : vector<5x1xf32> to vector<5x128xf32>
    %321 = vector.broadcast %319 : vector<1x128xf32> to vector<5x128xf32>
    %322 = arith.mulf %320, %321 : vector<5x128xf32>
    %c0_276 = arith.constant 0 : index
    %c0_277 = arith.constant 0 : index
    %c0_278 = arith.constant 0 : index
    %c0_279 = arith.constant 0 : index
    %c17_280 = arith.constant 17 : index
    %323 = vector.load %arg2[%c0_276, %c0_277, %c0_278, %c0_279, %c17_280] : memref<1x1x2x6x32xf32, #tpu.memory_space<vmem>>, vector<1x1x1x5x1xf32>
    %324 = vector.shape_cast %323 : vector<1x1x1x5x1xf32> to vector<5x1xf32>
    %c1_281 = arith.constant 1 : index
    %c0_282 = arith.constant 0 : index
    %325 = vector.load %arg3[%c1_281, %c0_282] : memref<9x128xf32, #tpu.memory_space<vmem>>, vector<1x128xf32>
    %326 = vector.broadcast %324 : vector<5x1xf32> to vector<5x128xf32>
    %327 = vector.broadcast %325 : vector<1x128xf32> to vector<5x128xf32>
    %328 = arith.mulf %326, %327 : vector<5x128xf32>
    %329 = arith.addf %322, %328 : vector<5x128xf32>
    %c0_283 = arith.constant 0 : index
    %c0_284 = arith.constant 0 : index
    %c0_285 = arith.constant 0 : index
    %c0_286 = arith.constant 0 : index
    %c18_287 = arith.constant 18 : index
    %330 = vector.load %arg2[%c0_283, %c0_284, %c0_285, %c0_286, %c18_287] : memref<1x1x2x6x32xf32, #tpu.memory_space<vmem>>, vector<1x1x1x5x1xf32>
    %331 = vector.shape_cast %330 : vector<1x1x1x5x1xf32> to vector<5x1xf32>
    %c2_288 = arith.constant 2 : index
    %c0_289 = arith.constant 0 : index
    %332 = vector.load %arg3[%c2_288, %c0_289] : memref<9x128xf32, #tpu.memory_space<vmem>>, vector<1x128xf32>
    %333 = vector.broadcast %331 : vector<5x1xf32> to vector<5x128xf32>
    %334 = vector.broadcast %332 : vector<1x128xf32> to vector<5x128xf32>
    %335 = arith.mulf %333, %334 : vector<5x128xf32>
    %336 = arith.addf %329, %335 : vector<5x128xf32>
    %c0_290 = arith.constant 0 : index
    %c0_291 = arith.constant 0 : index
    %c1_292 = arith.constant 1 : index
    %c0_293 = arith.constant 0 : index
    %c16_294 = arith.constant 16 : index
    %337 = vector.load %arg2[%c0_290, %c0_291, %c1_292, %c0_293, %c16_294] : memref<1x1x2x6x32xf32, #tpu.memory_space<vmem>>, vector<1x1x1x5x1xf32>
    %338 = vector.shape_cast %337 : vector<1x1x1x5x1xf32> to vector<5x1xf32>
    %c3_295 = arith.constant 3 : index
    %c0_296 = arith.constant 0 : index
    %339 = vector.load %arg3[%c3_295, %c0_296] : memref<9x128xf32, #tpu.memory_space<vmem>>, vector<1x128xf32>
    %340 = vector.broadcast %338 : vector<5x1xf32> to vector<5x128xf32>
    %341 = vector.broadcast %339 : vector<1x128xf32> to vector<5x128xf32>
    %342 = arith.mulf %340, %341 : vector<5x128xf32>
    %343 = arith.addf %336, %342 : vector<5x128xf32>
    %c0_297 = arith.constant 0 : index
    %c0_298 = arith.constant 0 : index
    %c1_299 = arith.constant 1 : index
    %c0_300 = arith.constant 0 : index
    %c17_301 = arith.constant 17 : index
    %344 = vector.load %arg2[%c0_297, %c0_298, %c1_299, %c0_300, %c17_301] : memref<1x1x2x6x32xf32, #tpu.memory_space<vmem>>, vector<1x1x1x5x1xf32>
    %345 = vector.shape_cast %344 : vector<1x1x1x5x1xf32> to vector<5x1xf32>
    %c4_302 = arith.constant 4 : index
    %c0_303 = arith.constant 0 : index
    %346 = vector.load %arg3[%c4_302, %c0_303] : memref<9x128xf32, #tpu.memory_space<vmem>>, vector<1x128xf32>
    %347 = vector.broadcast %345 : vector<5x1xf32> to vector<5x128xf32>
    %348 = vector.broadcast %346 : vector<1x128xf32> to vector<5x128xf32>
    %349 = arith.mulf %347, %348 : vector<5x128xf32>
    %350 = arith.addf %343, %349 : vector<5x128xf32>
    %c0_304 = arith.constant 0 : index
    %c0_305 = arith.constant 0 : index
    %c1_306 = arith.constant 1 : index
    %c0_307 = arith.constant 0 : index
    %c18_308 = arith.constant 18 : index
    %351 = vector.load %arg2[%c0_304, %c0_305, %c1_306, %c0_307, %c18_308] : memref<1x1x2x6x32xf32, #tpu.memory_space<vmem>>, vector<1x1x1x5x1xf32>
    %352 = vector.shape_cast %351 : vector<1x1x1x5x1xf32> to vector<5x1xf32>
    %c5_309 = arith.constant 5 : index
    %c0_310 = arith.constant 0 : index
    %353 = vector.load %arg3[%c5_309, %c0_310] : memref<9x128xf32, #tpu.memory_space<vmem>>, vector<1x128xf32>
    %354 = vector.broadcast %352 : vector<5x1xf32> to vector<5x128xf32>
    %355 = vector.broadcast %353 : vector<1x128xf32> to vector<5x128xf32>
    %356 = arith.mulf %354, %355 : vector<5x128xf32>
    %357 = arith.addf %350, %356 : vector<5x128xf32>
    %c0_311 = arith.constant 0 : index
    %c0_312 = arith.constant 0 : index
    %c0_313 = arith.constant 0 : index
    %c0_314 = arith.constant 0 : index
    %c20 = arith.constant 20 : index
    %358 = vector.load %arg2[%c0_311, %c0_312, %c0_313, %c0_314, %c20] : memref<1x1x2x6x32xf32, #tpu.memory_space<vmem>>, vector<1x1x1x5x1xf32>
    %359 = vector.shape_cast %358 : vector<1x1x1x5x1xf32> to vector<5x1xf32>
    %c6_315 = arith.constant 6 : index
    %c0_316 = arith.constant 0 : index
    %360 = vector.load %arg3[%c6_315, %c0_316] : memref<9x128xf32, #tpu.memory_space<vmem>>, vector<1x128xf32>
    %361 = vector.broadcast %359 : vector<5x1xf32> to vector<5x128xf32>
    %362 = vector.broadcast %360 : vector<1x128xf32> to vector<5x128xf32>
    %363 = arith.mulf %361, %362 : vector<5x128xf32>
    %364 = arith.addf %357, %363 : vector<5x128xf32>
    %c0_317 = arith.constant 0 : index
    %c0_318 = arith.constant 0 : index
    %c0_319 = arith.constant 0 : index
    %c0_320 = arith.constant 0 : index
    %c21 = arith.constant 21 : index
    %365 = vector.load %arg2[%c0_317, %c0_318, %c0_319, %c0_320, %c21] : memref<1x1x2x6x32xf32, #tpu.memory_space<vmem>>, vector<1x1x1x5x1xf32>
    %366 = vector.shape_cast %365 : vector<1x1x1x5x1xf32> to vector<5x1xf32>
    %c7_321 = arith.constant 7 : index
    %c0_322 = arith.constant 0 : index
    %367 = vector.load %arg3[%c7_321, %c0_322] : memref<9x128xf32, #tpu.memory_space<vmem>>, vector<1x128xf32>
    %368 = vector.broadcast %366 : vector<5x1xf32> to vector<5x128xf32>
    %369 = vector.broadcast %367 : vector<1x128xf32> to vector<5x128xf32>
    %370 = arith.mulf %368, %369 : vector<5x128xf32>
    %371 = arith.addf %364, %370 : vector<5x128xf32>
    %c0_323 = arith.constant 0 : index
    %c0_324 = arith.constant 0 : index
    %c0_325 = arith.constant 0 : index
    %c0_326 = arith.constant 0 : index
    %c22 = arith.constant 22 : index
    %372 = vector.load %arg2[%c0_323, %c0_324, %c0_325, %c0_326, %c22] : memref<1x1x2x6x32xf32, #tpu.memory_space<vmem>>, vector<1x1x1x5x1xf32>
    %373 = vector.shape_cast %372 : vector<1x1x1x5x1xf32> to vector<5x1xf32>
    %c8_327 = arith.constant 8 : index
    %c0_328 = arith.constant 0 : index
    %374 = vector.load %arg3[%c8_327, %c0_328] : memref<9x128xf32, #tpu.memory_space<vmem>>, vector<1x128xf32>
    %375 = vector.broadcast %373 : vector<5x1xf32> to vector<5x128xf32>
    %376 = vector.broadcast %374 : vector<1x128xf32> to vector<5x128xf32>
    %377 = arith.mulf %375, %376 : vector<5x128xf32>
    %378 = arith.addf %371, %377 : vector<5x128xf32>
    %c0_329 = arith.constant 0 : index
    %c0_330 = arith.constant 0 : index
    %379 = vector.load %arg4[%c0_329, %c0_330] : memref<1x128xf32, #tpu.memory_space<vmem>>, vector<1x128xf32>
    %380 = vector.broadcast %379 : vector<1x128xf32> to vector<5x128xf32>
    %381 = arith.addf %378, %380 : vector<5x128xf32>
    %cst_331 = arith.constant 0.000000e+00 : f32
    %382 = vector.broadcast %cst_331 : f32 to vector<5x128xf32>
    %383 = arith.maximumf %381, %382 : vector<5x128xf32>
    %cst_332 = arith.constant 0.000000e+00 : f32
    %384 = vector.shape_cast %16 : vector<5x1xi1> to vector<5x1xi1>
    %385 = vector.broadcast %384 : vector<5x1xi1> to vector<5x128xi1>
    %386 = vector.broadcast %cst_332 : f32 to vector<5x128xf32>
    %387 = arith.select %385, %383, %386 : vector<5x128xi1>, vector<5x128xf32>
    %388 = arith.truncf %387 : vector<5x128xf32> to vector<5x128xbf16>
    %c0_333 = arith.constant 0 : index
    %c4_334 = arith.constant 4 : index
    %c0_335 = arith.constant 0 : index
    %c0_336 = arith.constant 0 : index
    %389 = vector.load %arg11[%c0_333, %c4_334, %c0_335, %c0_336] : memref<2x7x5x128xbf16, #tpu.memory_space<vmem>>, vector<1x1x5x128xbf16>
    %390 = vector.shape_cast %389 : vector<1x1x5x128xbf16> to vector<5x128xbf16>
    %391 = vector.shape_cast %388 : vector<5x128xbf16> to vector<1x1x5x128xbf16>
    tpu.vector_store %arg11[%c0_333, %c4_334, %c0_335, %c0_336], %391 {strides = array<i32>} : memref<2x7x5x128xbf16, #tpu.memory_space<vmem>>, vector<1x1x5x128xbf16>,
    %c0_337 = arith.constant 0 : index
    %c0_338 = arith.constant 0 : index
    %c0_339 = arith.constant 0 : index
    %c0_340 = arith.constant 0 : index
    %c20_341 = arith.constant 20 : index
    %392 = vector.load %arg2[%c0_337, %c0_338, %c0_339, %c0_340, %c20_341] : memref<1x1x2x6x32xf32, #tpu.memory_space<vmem>>, vector<1x1x1x5x1xf32>
    %393 = vector.shape_cast %392 : vector<1x1x1x5x1xf32> to vector<5x1xf32>
    %c0_342 = arith.constant 0 : index
    %c0_343 = arith.constant 0 : index
    %394 = vector.load %arg3[%c0_342, %c0_343] : memref<9x128xf32, #tpu.memory_space<vmem>>, vector<1x128xf32>
    %395 = vector.broadcast %393 : vector<5x1xf32> to vector<5x128xf32>
    %396 = vector.broadcast %394 : vector<1x128xf32> to vector<5x128xf32>
    %397 = arith.mulf %395, %396 : vector<5x128xf32>
    %c0_344 = arith.constant 0 : index
    %c0_345 = arith.constant 0 : index
    %c0_346 = arith.constant 0 : index
    %c0_347 = arith.constant 0 : index
    %c21_348 = arith.constant 21 : index
    %398 = vector.load %arg2[%c0_344, %c0_345, %c0_346, %c0_347, %c21_348] : memref<1x1x2x6x32xf32, #tpu.memory_space<vmem>>, vector<1x1x1x5x1xf32>
    %399 = vector.shape_cast %398 : vector<1x1x1x5x1xf32> to vector<5x1xf32>
    %c1_349 = arith.constant 1 : index
    %c0_350 = arith.constant 0 : index
    %400 = vector.load %arg3[%c1_349, %c0_350] : memref<9x128xf32, #tpu.memory_space<vmem>>, vector<1x128xf32>
    %401 = vector.broadcast %399 : vector<5x1xf32> to vector<5x128xf32>
    %402 = vector.broadcast %400 : vector<1x128xf32> to vector<5x128xf32>
    %403 = arith.mulf %401, %402 : vector<5x128xf32>
    %404 = arith.addf %397, %403 : vector<5x128xf32>
    %c0_351 = arith.constant 0 : index
    %c0_352 = arith.constant 0 : index
    %c0_353 = arith.constant 0 : index
    %c0_354 = arith.constant 0 : index
    %c22_355 = arith.constant 22 : index
    %405 = vector.load %arg2[%c0_351, %c0_352, %c0_353, %c0_354, %c22_355] : memref<1x1x2x6x32xf32, #tpu.memory_space<vmem>>, vector<1x1x1x5x1xf32>
    %406 = vector.shape_cast %405 : vector<1x1x1x5x1xf32> to vector<5x1xf32>
    %c2_356 = arith.constant 2 : index
    %c0_357 = arith.constant 0 : index
    %407 = vector.load %arg3[%c2_356, %c0_357] : memref<9x128xf32, #tpu.memory_space<vmem>>, vector<1x128xf32>
    %408 = vector.broadcast %406 : vector<5x1xf32> to vector<5x128xf32>
    %409 = vector.broadcast %407 : vector<1x128xf32> to vector<5x128xf32>
    %410 = arith.mulf %408, %409 : vector<5x128xf32>
    %411 = arith.addf %404, %410 : vector<5x128xf32>
    %c0_358 = arith.constant 0 : index
    %c0_359 = arith.constant 0 : index
    %c1_360 = arith.constant 1 : index
    %c0_361 = arith.constant 0 : index
    %c20_362 = arith.constant 20 : index
    %412 = vector.load %arg2[%c0_358, %c0_359, %c1_360, %c0_361, %c20_362] : memref<1x1x2x6x32xf32, #tpu.memory_space<vmem>>, vector<1x1x1x5x1xf32>
    %413 = vector.shape_cast %412 : vector<1x1x1x5x1xf32> to vector<5x1xf32>
    %c3_363 = arith.constant 3 : index
    %c0_364 = arith.constant 0 : index
    %414 = vector.load %arg3[%c3_363, %c0_364] : memref<9x128xf32, #tpu.memory_space<vmem>>, vector<1x128xf32>
    %415 = vector.broadcast %413 : vector<5x1xf32> to vector<5x128xf32>
    %416 = vector.broadcast %414 : vector<1x128xf32> to vector<5x128xf32>
    %417 = arith.mulf %415, %416 : vector<5x128xf32>
    %418 = arith.addf %411, %417 : vector<5x128xf32>
    %c0_365 = arith.constant 0 : index
    %c0_366 = arith.constant 0 : index
    %c1_367 = arith.constant 1 : index
    %c0_368 = arith.constant 0 : index
    %c21_369 = arith.constant 21 : index
    %419 = vector.load %arg2[%c0_365, %c0_366, %c1_367, %c0_368, %c21_369] : memref<1x1x2x6x32xf32, #tpu.memory_space<vmem>>, vector<1x1x1x5x1xf32>
    %420 = vector.shape_cast %419 : vector<1x1x1x5x1xf32> to vector<5x1xf32>
    %c4_370 = arith.constant 4 : index
    %c0_371 = arith.constant 0 : index
    %421 = vector.load %arg3[%c4_370, %c0_371] : memref<9x128xf32, #tpu.memory_space<vmem>>, vector<1x128xf32>
    %422 = vector.broadcast %420 : vector<5x1xf32> to vector<5x128xf32>
    %423 = vector.broadcast %421 : vector<1x128xf32> to vector<5x128xf32>
    %424 = arith.mulf %422, %423 : vector<5x128xf32>
    %425 = arith.addf %418, %424 : vector<5x128xf32>
    %c0_372 = arith.constant 0 : index
    %c0_373 = arith.constant 0 : index
    %c1_374 = arith.constant 1 : index
    %c0_375 = arith.constant 0 : index
    %c22_376 = arith.constant 22 : index
    %426 = vector.load %arg2[%c0_372, %c0_373, %c1_374, %c0_375, %c22_376] : memref<1x1x2x6x32xf32, #tpu.memory_space<vmem>>, vector<1x1x1x5x1xf32>
    %427 = vector.shape_cast %426 : vector<1x1x1x5x1xf32> to vector<5x1xf32>
    %c5_377 = arith.constant 5 : index
    %c0_378 = arith.constant 0 : index
    %428 = vector.load %arg3[%c5_377, %c0_378] : memref<9x128xf32, #tpu.memory_space<vmem>>, vector<1x128xf32>
    %429 = vector.broadcast %427 : vector<5x1xf32> to vector<5x128xf32>
    %430 = vector.broadcast %428 : vector<1x128xf32> to vector<5x128xf32>
    %431 = arith.mulf %429, %430 : vector<5x128xf32>
    %432 = arith.addf %425, %431 : vector<5x128xf32>
    %c0_379 = arith.constant 0 : index
    %c0_380 = arith.constant 0 : index
    %c0_381 = arith.constant 0 : index
    %c0_382 = arith.constant 0 : index
    %c24 = arith.constant 24 : index
    %433 = vector.load %arg2[%c0_379, %c0_380, %c0_381, %c0_382, %c24] : memref<1x1x2x6x32xf32, #tpu.memory_space<vmem>>, vector<1x1x1x5x1xf32>
    %434 = vector.shape_cast %433 : vector<1x1x1x5x1xf32> to vector<5x1xf32>
    %c6_383 = arith.constant 6 : index
    %c0_384 = arith.constant 0 : index
    %435 = vector.load %arg3[%c6_383, %c0_384] : memref<9x128xf32, #tpu.memory_space<vmem>>, vector<1x128xf32>
    %436 = vector.broadcast %434 : vector<5x1xf32> to vector<5x128xf32>
    %437 = vector.broadcast %435 : vector<1x128xf32> to vector<5x128xf32>
    %438 = arith.mulf %436, %437 : vector<5x128xf32>
    %439 = arith.addf %432, %438 : vector<5x128xf32>
    %c0_385 = arith.constant 0 : index
    %c0_386 = arith.constant 0 : index
    %c0_387 = arith.constant 0 : index
    %c0_388 = arith.constant 0 : index
    %c25 = arith.constant 25 : index
    %440 = vector.load %arg2[%c0_385, %c0_386, %c0_387, %c0_388, %c25] : memref<1x1x2x6x32xf32, #tpu.memory_space<vmem>>, vector<1x1x1x5x1xf32>
    %441 = vector.shape_cast %440 : vector<1x1x1x5x1xf32> to vector<5x1xf32>
    %c7_389 = arith.constant 7 : index
    %c0_390 = arith.constant 0 : index
    %442 = vector.load %arg3[%c7_389, %c0_390] : memref<9x128xf32, #tpu.memory_space<vmem>>, vector<1x128xf32>
    %443 = vector.broadcast %441 : vector<5x1xf32> to vector<5x128xf32>
    %444 = vector.broadcast %442 : vector<1x128xf32> to vector<5x128xf32>
    %445 = arith.mulf %443, %444 : vector<5x128xf32>
    %446 = arith.addf %439, %445 : vector<5x128xf32>
    %c0_391 = arith.constant 0 : index
    %c0_392 = arith.constant 0 : index
    %c0_393 = arith.constant 0 : index
    %c0_394 = arith.constant 0 : index
    %c26 = arith.constant 26 : index
    %447 = vector.load %arg2[%c0_391, %c0_392, %c0_393, %c0_394, %c26] : memref<1x1x2x6x32xf32, #tpu.memory_space<vmem>>, vector<1x1x1x5x1xf32>
    %448 = vector.shape_cast %447 : vector<1x1x1x5x1xf32> to vector<5x1xf32>
    %c8_395 = arith.constant 8 : index
    %c0_396 = arith.constant 0 : index
    %449 = vector.load %arg3[%c8_395, %c0_396] : memref<9x128xf32, #tpu.memory_space<vmem>>, vector<1x128xf32>
    %450 = vector.broadcast %448 : vector<5x1xf32> to vector<5x128xf32>
    %451 = vector.broadcast %449 : vector<1x128xf32> to vector<5x128xf32>
    %452 = arith.mulf %450, %451 : vector<5x128xf32>
    %453 = arith.addf %446, %452 : vector<5x128xf32>
    %c0_397 = arith.constant 0 : index
    %c0_398 = arith.constant 0 : index
    %454 = vector.load %arg4[%c0_397, %c0_398] : memref<1x128xf32, #tpu.memory_space<vmem>>, vector<1x128xf32>
    %455 = vector.broadcast %454 : vector<1x128xf32> to vector<5x128xf32>
    %456 = arith.addf %453, %455 : vector<5x128xf32>
    %cst_399 = arith.constant 0.000000e+00 : f32
    %457 = vector.broadcast %cst_399 : f32 to vector<5x128xf32>
    %458 = arith.maximumf %456, %457 : vector<5x128xf32>
    %cst_400 = arith.constant 0.000000e+00 : f32
    %459 = vector.shape_cast %16 : vector<5x1xi1> to vector<5x1xi1>
    %460 = vector.broadcast %459 : vector<5x1xi1> to vector<5x128xi1>
    %461 = vector.broadcast %cst_400 : f32 to vector<5x128xf32>
    %462 = arith.select %460, %458, %461 : vector<5x128xi1>, vector<5x128xf32>
    %463 = arith.truncf %462 : vector<5x128xf32> to vector<5x128xbf16>
    %c0_401 = arith.constant 0 : index
    %c5_402 = arith.constant 5 : index
    %c0_403 = arith.constant 0 : index
    %c0_404 = arith.constant 0 : index
    %464 = vector.load %arg11[%c0_401, %c5_402, %c0_403, %c0_404] : memref<2x7x5x128xbf16, #tpu.memory_space<vmem>>, vector<1x1x5x128xbf16>
    %465 = vector.shape_cast %464 : vector<1x1x5x128xbf16> to vector<5x128xbf16>
    %466 = vector.shape_cast %463 : vector<5x128xbf16> to vector<1x1x5x128xbf16>
    tpu.vector_store %arg11[%c0_401, %c5_402, %c0_403, %c0_404], %466 {strides = array<i32>} : memref<2x7x5x128xbf16, #tpu.memory_space<vmem>>, vector<1x1x5x128xbf16>,
    %c0_405 = arith.constant 0 : index
    %c0_406 = arith.constant 0 : index
    %c0_407 = arith.constant 0 : index
    %c0_408 = arith.constant 0 : index
    %c24_409 = arith.constant 24 : index
    %467 = vector.load %arg2[%c0_405, %c0_406, %c0_407, %c0_408, %c24_409] : memref<1x1x2x6x32xf32, #tpu.memory_space<vmem>>, vector<1x1x1x5x1xf32>
    %468 = vector.shape_cast %467 : vector<1x1x1x5x1xf32> to vector<5x1xf32>
    %c0_410 = arith.constant 0 : index
    %c0_411 = arith.constant 0 : index
    %469 = vector.load %arg3[%c0_410, %c0_411] : memref<9x128xf32, #tpu.memory_space<vmem>>, vector<1x128xf32>
    %470 = vector.broadcast %468 : vector<5x1xf32> to vector<5x128xf32>
    %471 = vector.broadcast %469 : vector<1x128xf32> to vector<5x128xf32>
    %472 = arith.mulf %470, %471 : vector<5x128xf32>
    %c0_412 = arith.constant 0 : index
    %c0_413 = arith.constant 0 : index
    %c0_414 = arith.constant 0 : index
    %c0_415 = arith.constant 0 : index
    %c25_416 = arith.constant 25 : index
    %473 = vector.load %arg2[%c0_412, %c0_413, %c0_414, %c0_415, %c25_416] : memref<1x1x2x6x32xf32, #tpu.memory_space<vmem>>, vector<1x1x1x5x1xf32>
    %474 = vector.shape_cast %473 : vector<1x1x1x5x1xf32> to vector<5x1xf32>
    %c1_417 = arith.constant 1 : index
    %c0_418 = arith.constant 0 : index
    %475 = vector.load %arg3[%c1_417, %c0_418] : memref<9x128xf32, #tpu.memory_space<vmem>>, vector<1x128xf32>
    %476 = vector.broadcast %474 : vector<5x1xf32> to vector<5x128xf32>
    %477 = vector.broadcast %475 : vector<1x128xf32> to vector<5x128xf32>
    %478 = arith.mulf %476, %477 : vector<5x128xf32>
    %479 = arith.addf %472, %478 : vector<5x128xf32>
    %c0_419 = arith.constant 0 : index
    %c0_420 = arith.constant 0 : index
    %c0_421 = arith.constant 0 : index
    %c0_422 = arith.constant 0 : index
    %c26_423 = arith.constant 26 : index
    %480 = vector.load %arg2[%c0_419, %c0_420, %c0_421, %c0_422, %c26_423] : memref<1x1x2x6x32xf32, #tpu.memory_space<vmem>>, vector<1x1x1x5x1xf32>
    %481 = vector.shape_cast %480 : vector<1x1x1x5x1xf32> to vector<5x1xf32>
    %c2_424 = arith.constant 2 : index
    %c0_425 = arith.constant 0 : index
    %482 = vector.load %arg3[%c2_424, %c0_425] : memref<9x128xf32, #tpu.memory_space<vmem>>, vector<1x128xf32>
    %483 = vector.broadcast %481 : vector<5x1xf32> to vector<5x128xf32>
    %484 = vector.broadcast %482 : vector<1x128xf32> to vector<5x128xf32>
    %485 = arith.mulf %483, %484 : vector<5x128xf32>
    %486 = arith.addf %479, %485 : vector<5x128xf32>
    %c0_426 = arith.constant 0 : index
    %c0_427 = arith.constant 0 : index
    %c1_428 = arith.constant 1 : index
    %c0_429 = arith.constant 0 : index
    %c24_430 = arith.constant 24 : index
    %487 = vector.load %arg2[%c0_426, %c0_427, %c1_428, %c0_429, %c24_430] : memref<1x1x2x6x32xf32, #tpu.memory_space<vmem>>, vector<1x1x1x5x1xf32>
    %488 = vector.shape_cast %487 : vector<1x1x1x5x1xf32> to vector<5x1xf32>
    %c3_431 = arith.constant 3 : index
    %c0_432 = arith.constant 0 : index
    %489 = vector.load %arg3[%c3_431, %c0_432] : memref<9x128xf32, #tpu.memory_space<vmem>>, vector<1x128xf32>
    %490 = vector.broadcast %488 : vector<5x1xf32> to vector<5x128xf32>
    %491 = vector.broadcast %489 : vector<1x128xf32> to vector<5x128xf32>
    %492 = arith.mulf %490, %491 : vector<5x128xf32>
    %493 = arith.addf %486, %492 : vector<5x128xf32>
    %c0_433 = arith.constant 0 : index
    %c0_434 = arith.constant 0 : index
    %c1_435 = arith.constant 1 : index
    %c0_436 = arith.constant 0 : index
    %c25_437 = arith.constant 25 : index
    %494 = vector.load %arg2[%c0_433, %c0_434, %c1_435, %c0_436, %c25_437] : memref<1x1x2x6x32xf32, #tpu.memory_space<vmem>>, vector<1x1x1x5x1xf32>
    %495 = vector.shape_cast %494 : vector<1x1x1x5x1xf32> to vector<5x1xf32>
    %c4_438 = arith.constant 4 : index
    %c0_439 = arith.constant 0 : index
    %496 = vector.load %arg3[%c4_438, %c0_439] : memref<9x128xf32, #tpu.memory_space<vmem>>, vector<1x128xf32>
    %497 = vector.broadcast %495 : vector<5x1xf32> to vector<5x128xf32>
    %498 = vector.broadcast %496 : vector<1x128xf32> to vector<5x128xf32>
    %499 = arith.mulf %497, %498 : vector<5x128xf32>
    %500 = arith.addf %493, %499 : vector<5x128xf32>
    %c0_440 = arith.constant 0 : index
    %c0_441 = arith.constant 0 : index
    %c1_442 = arith.constant 1 : index
    %c0_443 = arith.constant 0 : index
    %c26_444 = arith.constant 26 : index
    %501 = vector.load %arg2[%c0_440, %c0_441, %c1_442, %c0_443, %c26_444] : memref<1x1x2x6x32xf32, #tpu.memory_space<vmem>>, vector<1x1x1x5x1xf32>
    %502 = vector.shape_cast %501 : vector<1x1x1x5x1xf32> to vector<5x1xf32>
    %c5_445 = arith.constant 5 : index
    %c0_446 = arith.constant 0 : index
    %503 = vector.load %arg3[%c5_445, %c0_446] : memref<9x128xf32, #tpu.memory_space<vmem>>, vector<1x128xf32>
    %504 = vector.broadcast %502 : vector<5x1xf32> to vector<5x128xf32>
    %505 = vector.broadcast %503 : vector<1x128xf32> to vector<5x128xf32>
    %506 = arith.mulf %504, %505 : vector<5x128xf32>
    %507 = arith.addf %500, %506 : vector<5x128xf32>
    %c0_447 = arith.constant 0 : index
    %c0_448 = arith.constant 0 : index
    %c0_449 = arith.constant 0 : index
    %c0_450 = arith.constant 0 : index
    %c28 = arith.constant 28 : index
    %508 = vector.load %arg2[%c0_447, %c0_448, %c0_449, %c0_450, %c28] : memref<1x1x2x6x32xf32, #tpu.memory_space<vmem>>, vector<1x1x1x5x1xf32>
    %509 = vector.shape_cast %508 : vector<1x1x1x5x1xf32> to vector<5x1xf32>
    %c6_451 = arith.constant 6 : index
    %c0_452 = arith.constant 0 : index
    %510 = vector.load %arg3[%c6_451, %c0_452] : memref<9x128xf32, #tpu.memory_space<vmem>>, vector<1x128xf32>
    %511 = vector.broadcast %509 : vector<5x1xf32> to vector<5x128xf32>
    %512 = vector.broadcast %510 : vector<1x128xf32> to vector<5x128xf32>
    %513 = arith.mulf %511, %512 : vector<5x128xf32>
    %514 = arith.addf %507, %513 : vector<5x128xf32>
    %c0_453 = arith.constant 0 : index
    %c0_454 = arith.constant 0 : index
    %c0_455 = arith.constant 0 : index
    %c0_456 = arith.constant 0 : index
    %c29 = arith.constant 29 : index
    %515 = vector.load %arg2[%c0_453, %c0_454, %c0_455, %c0_456, %c29] : memref<1x1x2x6x32xf32, #tpu.memory_space<vmem>>, vector<1x1x1x5x1xf32>
    %516 = vector.shape_cast %515 : vector<1x1x1x5x1xf32> to vector<5x1xf32>
    %c7_457 = arith.constant 7 : index
    %c0_458 = arith.constant 0 : index
    %517 = vector.load %arg3[%c7_457, %c0_458] : memref<9x128xf32, #tpu.memory_space<vmem>>, vector<1x128xf32>
    %518 = vector.broadcast %516 : vector<5x1xf32> to vector<5x128xf32>
    %519 = vector.broadcast %517 : vector<1x128xf32> to vector<5x128xf32>
    %520 = arith.mulf %518, %519 : vector<5x128xf32>
    %521 = arith.addf %514, %520 : vector<5x128xf32>
    %c0_459 = arith.constant 0 : index
    %c0_460 = arith.constant 0 : index
    %c0_461 = arith.constant 0 : index
    %c0_462 = arith.constant 0 : index
    %c30 = arith.constant 30 : index
    %522 = vector.load %arg2[%c0_459, %c0_460, %c0_461, %c0_462, %c30] : memref<1x1x2x6x32xf32, #tpu.memory_space<vmem>>, vector<1x1x1x5x1xf32>
    %523 = vector.shape_cast %522 : vector<1x1x1x5x1xf32> to vector<5x1xf32>
    %c8_463 = arith.constant 8 : index
    %c0_464 = arith.constant 0 : index
    %524 = vector.load %arg3[%c8_463, %c0_464] : memref<9x128xf32, #tpu.memory_space<vmem>>, vector<1x128xf32>
    %525 = vector.broadcast %523 : vector<5x1xf32> to vector<5x128xf32>
    %526 = vector.broadcast %524 : vector<1x128xf32> to vector<5x128xf32>
    %527 = arith.mulf %525, %526 : vector<5x128xf32>
    %528 = arith.addf %521, %527 : vector<5x128xf32>
    %c0_465 = arith.constant 0 : index
    %c0_466 = arith.constant 0 : index
    %529 = vector.load %arg4[%c0_465, %c0_466] : memref<1x128xf32, #tpu.memory_space<vmem>>, vector<1x128xf32>
    %530 = vector.broadcast %529 : vector<1x128xf32> to vector<5x128xf32>
    %531 = arith.addf %528, %530 : vector<5x128xf32>
    %cst_467 = arith.constant 0.000000e+00 : f32
    %532 = vector.broadcast %cst_467 : f32 to vector<5x128xf32>
    %533 = arith.maximumf %531, %532 : vector<5x128xf32>
    %cst_468 = arith.constant 0.000000e+00 : f32
    %534 = vector.shape_cast %16 : vector<5x1xi1> to vector<5x1xi1>
    %535 = vector.broadcast %534 : vector<5x1xi1> to vector<5x128xi1>
    %536 = vector.broadcast %cst_468 : f32 to vector<5x128xf32>
    %537 = arith.select %535, %533, %536 : vector<5x128xi1>, vector<5x128xf32>
    %538 = arith.truncf %537 : vector<5x128xf32> to vector<5x128xbf16>
    %c0_469 = arith.constant 0 : index
    %c6_470 = arith.constant 6 : index
    %c0_471 = arith.constant 0 : index
    %c0_472 = arith.constant 0 : index
    %539 = vector.load %arg11[%c0_469, %c6_470, %c0_471, %c0_472] : memref<2x7x5x128xbf16, #tpu.memory_space<vmem>>, vector<1x1x5x128xbf16>
    %540 = vector.shape_cast %539 : vector<1x1x5x128xbf16> to vector<5x128xbf16>
    %541 = vector.shape_cast %538 : vector<5x128xbf16> to vector<1x1x5x128xbf16>
    tpu.vector_store %arg11[%c0_469, %c6_470, %c0_471, %c0_472], %541 {strides = array<i32>} : memref<2x7x5x128xbf16, #tpu.memory_space<vmem>>, vector<1x1x5x128xbf16>,
    %c1_i32_473 = arith.constant 1 : i32
    %542 = vector.broadcast %c1_i32_473 : i32 to vector<5x1xi32>
    %543 = arith.addi %7, %542 : vector<5x1xi32>
    %c0_i32_474 = arith.constant 0 : i32
    %544 = vector.broadcast %c0_i32_474 : i32 to vector<5x1xi32>
    %545 = arith.cmpi sge, %543, %544 : vector<5x1xi32>
    %c1_i32_475 = arith.constant 1 : i32
    %546 = vector.broadcast %c1_i32_475 : i32 to vector<5x1xi32>
    %547 = arith.addi %7, %546 : vector<5x1xi32>
    %c8_i32_476 = arith.constant 8 : i32
    %548 = vector.broadcast %c8_i32_476 : i32 to vector<5x1xi32>
    %549 = arith.cmpi slt, %547, %548 : vector<5x1xi32>
    %550 = arith.andi %545, %549 : vector<5x1xi1>
    %c0_477 = arith.constant 0 : index
    %c0_478 = arith.constant 0 : index
    %c0_479 = arith.constant 0 : index
    %c0_480 = arith.constant 0 : index
    %c2_481 = arith.constant 2 : index
    %551 = vector.load %arg2[%c0_477, %c0_478, %c0_479, %c0_480, %c2_481] : memref<1x1x2x6x32xf32, #tpu.memory_space<vmem>>, vector<1x1x1x5x1xf32>
    %552 = vector.shape_cast %551 : vector<1x1x1x5x1xf32> to vector<5x1xf32>
    %c0_482 = arith.constant 0 : index
    %c0_483 = arith.constant 0 : index
    %553 = vector.load %arg3[%c0_482, %c0_483] : memref<9x128xf32, #tpu.memory_space<vmem>>, vector<1x128xf32>
    %554 = vector.broadcast %552 : vector<5x1xf32> to vector<5x128xf32>
    %555 = vector.broadcast %553 : vector<1x128xf32> to vector<5x128xf32>
    %556 = arith.mulf %554, %555 : vector<5x128xf32>
    %c0_484 = arith.constant 0 : index
    %c0_485 = arith.constant 0 : index
    %c0_486 = arith.constant 0 : index
    %c0_487 = arith.constant 0 : index
    %c3_488 = arith.constant 3 : index
    %557 = vector.load %arg2[%c0_484, %c0_485, %c0_486, %c0_487, %c3_488] : memref<1x1x2x6x32xf32, #tpu.memory_space<vmem>>, vector<1x1x1x5x1xf32>
    %558 = vector.shape_cast %557 : vector<1x1x1x5x1xf32> to vector<5x1xf32>
    %c1_489 = arith.constant 1 : index
    %c0_490 = arith.constant 0 : index
    %559 = vector.load %arg3[%c1_489, %c0_490] : memref<9x128xf32, #tpu.memory_space<vmem>>, vector<1x128xf32>
    %560 = vector.broadcast %558 : vector<5x1xf32> to vector<5x128xf32>
    %561 = vector.broadcast %559 : vector<1x128xf32> to vector<5x128xf32>
    %562 = arith.mulf %560, %561 : vector<5x128xf32>
    %563 = arith.addf %556, %562 : vector<5x128xf32>
    %c0_491 = arith.constant 0 : index
    %c0_492 = arith.constant 0 : index
    %c0_493 = arith.constant 0 : index
    %c1_494 = arith.constant 1 : index
    %c0_495 = arith.constant 0 : index
    %564 = vector.load %arg2[%c0_491, %c0_492, %c0_493, %c1_494, %c0_495] : memref<1x1x2x6x32xf32, #tpu.memory_space<vmem>>, vector<1x1x1x5x1xf32>
    %565 = vector.shape_cast %564 : vector<1x1x1x5x1xf32> to vector<5x1xf32>
    %c2_496 = arith.constant 2 : index
    %c0_497 = arith.constant 0 : index
    %566 = vector.load %arg3[%c2_496, %c0_497] : memref<9x128xf32, #tpu.memory_space<vmem>>, vector<1x128xf32>
    %567 = vector.broadcast %565 : vector<5x1xf32> to vector<5x128xf32>
    %568 = vector.broadcast %566 : vector<1x128xf32> to vector<5x128xf32>
    %569 = arith.mulf %567, %568 : vector<5x128xf32>
    %570 = arith.addf %563, %569 : vector<5x128xf32>
    %c0_498 = arith.constant 0 : index
    %c0_499 = arith.constant 0 : index
    %c1_500 = arith.constant 1 : index
    %c0_501 = arith.constant 0 : index
    %c2_502 = arith.constant 2 : index
    %571 = vector.load %arg2[%c0_498, %c0_499, %c1_500, %c0_501, %c2_502] : memref<1x1x2x6x32xf32, #tpu.memory_space<vmem>>, vector<1x1x1x5x1xf32>
    %572 = vector.shape_cast %571 : vector<1x1x1x5x1xf32> to vector<5x1xf32>
    %c3_503 = arith.constant 3 : index
    %c0_504 = arith.constant 0 : index
    %573 = vector.load %arg3[%c3_503, %c0_504] : memref<9x128xf32, #tpu.memory_space<vmem>>, vector<1x128xf32>
    %574 = vector.broadcast %572 : vector<5x1xf32> to vector<5x128xf32>
    %575 = vector.broadcast %573 : vector<1x128xf32> to vector<5x128xf32>
    %576 = arith.mulf %574, %575 : vector<5x128xf32>
    %577 = arith.addf %570, %576 : vector<5x128xf32>
    %c0_505 = arith.constant 0 : index
    %c0_506 = arith.constant 0 : index
    %c1_507 = arith.constant 1 : index
    %c0_508 = arith.constant 0 : index
    %c3_509 = arith.constant 3 : index
    %578 = vector.load %arg2[%c0_505, %c0_506, %c1_507, %c0_508, %c3_509] : memref<1x1x2x6x32xf32, #tpu.memory_space<vmem>>, vector<1x1x1x5x1xf32>
    %579 = vector.shape_cast %578 : vector<1x1x1x5x1xf32> to vector<5x1xf32>
    %c4_510 = arith.constant 4 : index
    %c0_511 = arith.constant 0 : index
    %580 = vector.load %arg3[%c4_510, %c0_511] : memref<9x128xf32, #tpu.memory_space<vmem>>, vector<1x128xf32>
    %581 = vector.broadcast %579 : vector<5x1xf32> to vector<5x128xf32>
    %582 = vector.broadcast %580 : vector<1x128xf32> to vector<5x128xf32>
    %583 = arith.mulf %581, %582 : vector<5x128xf32>
    %584 = arith.addf %577, %583 : vector<5x128xf32>
    %c0_512 = arith.constant 0 : index
    %c0_513 = arith.constant 0 : index
    %c1_514 = arith.constant 1 : index
    %c1_515 = arith.constant 1 : index
    %c0_516 = arith.constant 0 : index
    %585 = vector.load %arg2[%c0_512, %c0_513, %c1_514, %c1_515, %c0_516] : memref<1x1x2x6x32xf32, #tpu.memory_space<vmem>>, vector<1x1x1x5x1xf32>
    %586 = vector.shape_cast %585 : vector<1x1x1x5x1xf32> to vector<5x1xf32>
    %c5_517 = arith.constant 5 : index
    %c0_518 = arith.constant 0 : index
    %587 = vector.load %arg3[%c5_517, %c0_518] : memref<9x128xf32, #tpu.memory_space<vmem>>, vector<1x128xf32>
    %588 = vector.broadcast %586 : vector<5x1xf32> to vector<5x128xf32>
    %589 = vector.broadcast %587 : vector<1x128xf32> to vector<5x128xf32>
    %590 = arith.mulf %588, %589 : vector<5x128xf32>
    %591 = arith.addf %584, %590 : vector<5x128xf32>
    %c0_519 = arith.constant 0 : index
    %c0_520 = arith.constant 0 : index
    %c0_521 = arith.constant 0 : index
    %c0_522 = arith.constant 0 : index
    %c6_523 = arith.constant 6 : index
    %592 = vector.load %arg2[%c0_519, %c0_520, %c0_521, %c0_522, %c6_523] : memref<1x1x2x6x32xf32, #tpu.memory_space<vmem>>, vector<1x1x1x5x1xf32>
    %593 = vector.shape_cast %592 : vector<1x1x1x5x1xf32> to vector<5x1xf32>
    %c6_524 = arith.constant 6 : index
    %c0_525 = arith.constant 0 : index
    %594 = vector.load %arg3[%c6_524, %c0_525] : memref<9x128xf32, #tpu.memory_space<vmem>>, vector<1x128xf32>
    %595 = vector.broadcast %593 : vector<5x1xf32> to vector<5x128xf32>
    %596 = vector.broadcast %594 : vector<1x128xf32> to vector<5x128xf32>
    %597 = arith.mulf %595, %596 : vector<5x128xf32>
    %598 = arith.addf %591, %597 : vector<5x128xf32>
    %c0_526 = arith.constant 0 : index
    %c0_527 = arith.constant 0 : index
    %c0_528 = arith.constant 0 : index
    %c0_529 = arith.constant 0 : index
    %c7_530 = arith.constant 7 : index
    %599 = vector.load %arg2[%c0_526, %c0_527, %c0_528, %c0_529, %c7_530] : memref<1x1x2x6x32xf32, #tpu.memory_space<vmem>>, vector<1x1x1x5x1xf32>
    %600 = vector.shape_cast %599 : vector<1x1x1x5x1xf32> to vector<5x1xf32>
    %c7_531 = arith.constant 7 : index
    %c0_532 = arith.constant 0 : index
    %601 = vector.load %arg3[%c7_531, %c0_532] : memref<9x128xf32, #tpu.memory_space<vmem>>, vector<1x128xf32>
    %602 = vector.broadcast %600 : vector<5x1xf32> to vector<5x128xf32>
    %603 = vector.broadcast %601 : vector<1x128xf32> to vector<5x128xf32>
    %604 = arith.mulf %602, %603 : vector<5x128xf32>
    %605 = arith.addf %598, %604 : vector<5x128xf32>
    %c0_533 = arith.constant 0 : index
    %c0_534 = arith.constant 0 : index
    %c0_535 = arith.constant 0 : index
    %c1_536 = arith.constant 1 : index
    %c4_537 = arith.constant 4 : index
    %606 = vector.load %arg2[%c0_533, %c0_534, %c0_535, %c1_536, %c4_537] : memref<1x1x2x6x32xf32, #tpu.memory_space<vmem>>, vector<1x1x1x5x1xf32>
    %607 = vector.shape_cast %606 : vector<1x1x1x5x1xf32> to vector<5x1xf32>
    %c8_538 = arith.constant 8 : index
    %c0_539 = arith.constant 0 : index
    %608 = vector.load %arg3[%c8_538, %c0_539] : memref<9x128xf32, #tpu.memory_space<vmem>>, vector<1x128xf32>
    %609 = vector.broadcast %607 : vector<5x1xf32> to vector<5x128xf32>
    %610 = vector.broadcast %608 : vector<1x128xf32> to vector<5x128xf32>
    %611 = arith.mulf %609, %610 : vector<5x128xf32>
    %612 = arith.addf %605, %611 : vector<5x128xf32>
    %c0_540 = arith.constant 0 : index
    %c0_541 = arith.constant 0 : index
    %613 = vector.load %arg4[%c0_540, %c0_541] : memref<1x128xf32, #tpu.memory_space<vmem>>, vector<1x128xf32>
    %614 = vector.broadcast %613 : vector<1x128xf32> to vector<5x128xf32>
    %615 = arith.addf %612, %614 : vector<5x128xf32>
    %cst_542 = arith.constant 0.000000e+00 : f32
    %616 = vector.broadcast %cst_542 : f32 to vector<5x128xf32>
    %617 = arith.maximumf %615, %616 : vector<5x128xf32>
    %cst_543 = arith.constant 0.000000e+00 : f32
    %618 = vector.shape_cast %550 : vector<5x1xi1> to vector<5x1xi1>
    %619 = vector.broadcast %618 : vector<5x1xi1> to vector<5x128xi1>
    %620 = vector.broadcast %cst_543 : f32 to vector<5x128xf32>
    %621 = arith.select %619, %617, %620 : vector<5x128xi1>, vector<5x128xf32>
    %622 = arith.truncf %621 : vector<5x128xf32> to vector<5x128xbf16>
    %c1_544 = arith.constant 1 : index
    %c0_545 = arith.constant 0 : index
    %c0_546 = arith.constant 0 : index
    %c0_547 = arith.constant 0 : index
    %623 = vector.load %arg11[%c1_544, %c0_545, %c0_546, %c0_547] : memref<2x7x5x128xbf16, #tpu.memory_space<vmem>>, vector<1x1x5x128xbf16>
    %624 = vector.shape_cast %623 : vector<1x1x5x128xbf16> to vector<5x128xbf16>
    %625 = vector.shape_cast %622 : vector<5x128xbf16> to vector<1x1x5x128xbf16>
    tpu.vector_store %arg11[%c1_544, %c0_545, %c0_546, %c0_547], %625 {strides = array<i32>} : memref<2x7x5x128xbf16, #tpu.memory_space<vmem>>, vector<1x1x5x128xbf16>,
    %c0_548 = arith.constant 0 : index
    %c0_549 = arith.constant 0 : index
    %c0_550 = arith.constant 0 : index
    %c0_551 = arith.constant 0 : index
    %c6_552 = arith.constant 6 : index
    %626 = vector.load %arg2[%c0_548, %c0_549, %c0_550, %c0_551, %c6_552] : memref<1x1x2x6x32xf32, #tpu.memory_space<vmem>>, vector<1x1x1x5x1xf32>
    %627 = vector.shape_cast %626 : vector<1x1x1x5x1xf32> to vector<5x1xf32>
    %c0_553 = arith.constant 0 : index
    %c0_554 = arith.constant 0 : index
    %628 = vector.load %arg3[%c0_553, %c0_554] : memref<9x128xf32, #tpu.memory_space<vmem>>, vector<1x128xf32>
    %629 = vector.broadcast %627 : vector<5x1xf32> to vector<5x128xf32>
    %630 = vector.broadcast %628 : vector<1x128xf32> to vector<5x128xf32>
    %631 = arith.mulf %629, %630 : vector<5x128xf32>
    %c0_555 = arith.constant 0 : index
    %c0_556 = arith.constant 0 : index
    %c0_557 = arith.constant 0 : index
    %c0_558 = arith.constant 0 : index
    %c7_559 = arith.constant 7 : index
    %632 = vector.load %arg2[%c0_555, %c0_556, %c0_557, %c0_558, %c7_559] : memref<1x1x2x6x32xf32, #tpu.memory_space<vmem>>, vector<1x1x1x5x1xf32>
    %633 = vector.shape_cast %632 : vector<1x1x1x5x1xf32> to vector<5x1xf32>
    %c1_560 = arith.constant 1 : index
    %c0_561 = arith.constant 0 : index
    %634 = vector.load %arg3[%c1_560, %c0_561] : memref<9x128xf32, #tpu.memory_space<vmem>>, vector<1x128xf32>
    %635 = vector.broadcast %633 : vector<5x1xf32> to vector<5x128xf32>
    %636 = vector.broadcast %634 : vector<1x128xf32> to vector<5x128xf32>
    %637 = arith.mulf %635, %636 : vector<5x128xf32>
    %638 = arith.addf %631, %637 : vector<5x128xf32>
    %c0_562 = arith.constant 0 : index
    %c0_563 = arith.constant 0 : index
    %c0_564 = arith.constant 0 : index
    %c1_565 = arith.constant 1 : index
    %c4_566 = arith.constant 4 : index
    %639 = vector.load %arg2[%c0_562, %c0_563, %c0_564, %c1_565, %c4_566] : memref<1x1x2x6x32xf32, #tpu.memory_space<vmem>>, vector<1x1x1x5x1xf32>
    %640 = vector.shape_cast %639 : vector<1x1x1x5x1xf32> to vector<5x1xf32>
    %c2_567 = arith.constant 2 : index
    %c0_568 = arith.constant 0 : index
    %641 = vector.load %arg3[%c2_567, %c0_568] : memref<9x128xf32, #tpu.memory_space<vmem>>, vector<1x128xf32>
    %642 = vector.broadcast %640 : vector<5x1xf32> to vector<5x128xf32>
    %643 = vector.broadcast %641 : vector<1x128xf32> to vector<5x128xf32>
    %644 = arith.mulf %642, %643 : vector<5x128xf32>
    %645 = arith.addf %638, %644 : vector<5x128xf32>
    %c0_569 = arith.constant 0 : index
    %c0_570 = arith.constant 0 : index
    %c1_571 = arith.constant 1 : index
    %c0_572 = arith.constant 0 : index
    %c6_573 = arith.constant 6 : index
    %646 = vector.load %arg2[%c0_569, %c0_570, %c1_571, %c0_572, %c6_573] : memref<1x1x2x6x32xf32, #tpu.memory_space<vmem>>, vector<1x1x1x5x1xf32>
    %647 = vector.shape_cast %646 : vector<1x1x1x5x1xf32> to vector<5x1xf32>
    %c3_574 = arith.constant 3 : index
    %c0_575 = arith.constant 0 : index
    %648 = vector.load %arg3[%c3_574, %c0_575] : memref<9x128xf32, #tpu.memory_space<vmem>>, vector<1x128xf32>
    %649 = vector.broadcast %647 : vector<5x1xf32> to vector<5x128xf32>
    %650 = vector.broadcast %648 : vector<1x128xf32> to vector<5x128xf32>
    %651 = arith.mulf %649, %650 : vector<5x128xf32>
    %652 = arith.addf %645, %651 : vector<5x128xf32>
    %c0_576 = arith.constant 0 : index
    %c0_577 = arith.constant 0 : index
    %c1_578 = arith.constant 1 : index
    %c0_579 = arith.constant 0 : index
    %c7_580 = arith.constant 7 : index
    %653 = vector.load %arg2[%c0_576, %c0_577, %c1_578, %c0_579, %c7_580] : memref<1x1x2x6x32xf32, #tpu.memory_space<vmem>>, vector<1x1x1x5x1xf32>
    %654 = vector.shape_cast %653 : vector<1x1x1x5x1xf32> to vector<5x1xf32>
    %c4_581 = arith.constant 4 : index
    %c0_582 = arith.constant 0 : index
    %655 = vector.load %arg3[%c4_581, %c0_582] : memref<9x128xf32, #tpu.memory_space<vmem>>, vector<1x128xf32>
    %656 = vector.broadcast %654 : vector<5x1xf32> to vector<5x128xf32>
    %657 = vector.broadcast %655 : vector<1x128xf32> to vector<5x128xf32>
    %658 = arith.mulf %656, %657 : vector<5x128xf32>
    %659 = arith.addf %652, %658 : vector<5x128xf32>
    %c0_583 = arith.constant 0 : index
    %c0_584 = arith.constant 0 : index
    %c1_585 = arith.constant 1 : index
    %c1_586 = arith.constant 1 : index
    %c4_587 = arith.constant 4 : index
    %660 = vector.load %arg2[%c0_583, %c0_584, %c1_585, %c1_586, %c4_587] : memref<1x1x2x6x32xf32, #tpu.memory_space<vmem>>, vector<1x1x1x5x1xf32>
    %661 = vector.shape_cast %660 : vector<1x1x1x5x1xf32> to vector<5x1xf32>
    %c5_588 = arith.constant 5 : index
    %c0_589 = arith.constant 0 : index
    %662 = vector.load %arg3[%c5_588, %c0_589] : memref<9x128xf32, #tpu.memory_space<vmem>>, vector<1x128xf32>
    %663 = vector.broadcast %661 : vector<5x1xf32> to vector<5x128xf32>
    %664 = vector.broadcast %662 : vector<1x128xf32> to vector<5x128xf32>
    %665 = arith.mulf %663, %664 : vector<5x128xf32>
    %666 = arith.addf %659, %665 : vector<5x128xf32>
    %c0_590 = arith.constant 0 : index
    %c0_591 = arith.constant 0 : index
    %c0_592 = arith.constant 0 : index
    %c0_593 = arith.constant 0 : index
    %c10_594 = arith.constant 10 : index
    %667 = vector.load %arg2[%c0_590, %c0_591, %c0_592, %c0_593, %c10_594] : memref<1x1x2x6x32xf32, #tpu.memory_space<vmem>>, vector<1x1x1x5x1xf32>
    %668 = vector.shape_cast %667 : vector<1x1x1x5x1xf32> to vector<5x1xf32>
    %c6_595 = arith.constant 6 : index
    %c0_596 = arith.constant 0 : index
    %669 = vector.load %arg3[%c6_595, %c0_596] : memref<9x128xf32, #tpu.memory_space<vmem>>, vector<1x128xf32>
    %670 = vector.broadcast %668 : vector<5x1xf32> to vector<5x128xf32>
    %671 = vector.broadcast %669 : vector<1x128xf32> to vector<5x128xf32>
    %672 = arith.mulf %670, %671 : vector<5x128xf32>
    %673 = arith.addf %666, %672 : vector<5x128xf32>
    %c0_597 = arith.constant 0 : index
    %c0_598 = arith.constant 0 : index
    %c0_599 = arith.constant 0 : index
    %c0_600 = arith.constant 0 : index
    %c11 = arith.constant 11 : index
    %674 = vector.load %arg2[%c0_597, %c0_598, %c0_599, %c0_600, %c11] : memref<1x1x2x6x32xf32, #tpu.memory_space<vmem>>, vector<1x1x1x5x1xf32>
    %675 = vector.shape_cast %674 : vector<1x1x1x5x1xf32> to vector<5x1xf32>
    %c7_601 = arith.constant 7 : index
    %c0_602 = arith.constant 0 : index
    %676 = vector.load %arg3[%c7_601, %c0_602] : memref<9x128xf32, #tpu.memory_space<vmem>>, vector<1x128xf32>
    %677 = vector.broadcast %675 : vector<5x1xf32> to vector<5x128xf32>
    %678 = vector.broadcast %676 : vector<1x128xf32> to vector<5x128xf32>
    %679 = arith.mulf %677, %678 : vector<5x128xf32>
    %680 = arith.addf %673, %679 : vector<5x128xf32>
    %c0_603 = arith.constant 0 : index
    %c0_604 = arith.constant 0 : index
    %c0_605 = arith.constant 0 : index
    %c1_606 = arith.constant 1 : index
    %c8_607 = arith.constant 8 : index
    %681 = vector.load %arg2[%c0_603, %c0_604, %c0_605, %c1_606, %c8_607] : memref<1x1x2x6x32xf32, #tpu.memory_space<vmem>>, vector<1x1x1x5x1xf32>
    %682 = vector.shape_cast %681 : vector<1x1x1x5x1xf32> to vector<5x1xf32>
    %c8_608 = arith.constant 8 : index
    %c0_609 = arith.constant 0 : index
    %683 = vector.load %arg3[%c8_608, %c0_609] : memref<9x128xf32, #tpu.memory_space<vmem>>, vector<1x128xf32>
    %684 = vector.broadcast %682 : vector<5x1xf32> to vector<5x128xf32>
    %685 = vector.broadcast %683 : vector<1x128xf32> to vector<5x128xf32>
    %686 = arith.mulf %684, %685 : vector<5x128xf32>
    %687 = arith.addf %680, %686 : vector<5x128xf32>
    %c0_610 = arith.constant 0 : index
    %c0_611 = arith.constant 0 : index
    %688 = vector.load %arg4[%c0_610, %c0_611] : memref<1x128xf32, #tpu.memory_space<vmem>>, vector<1x128xf32>
    %689 = vector.broadcast %688 : vector<1x128xf32> to vector<5x128xf32>
    %690 = arith.addf %687, %689 : vector<5x128xf32>
    %cst_612 = arith.constant 0.000000e+00 : f32
    %691 = vector.broadcast %cst_612 : f32 to vector<5x128xf32>
    %692 = arith.maximumf %690, %691 : vector<5x128xf32>
    %cst_613 = arith.constant 0.000000e+00 : f32
    %693 = vector.shape_cast %550 : vector<5x1xi1> to vector<5x1xi1>
    %694 = vector.broadcast %693 : vector<5x1xi1> to vector<5x128xi1>
    %695 = vector.broadcast %cst_613 : f32 to vector<5x128xf32>
    %696 = arith.select %694, %692, %695 : vector<5x128xi1>, vector<5x128xf32>
    %697 = arith.truncf %696 : vector<5x128xf32> to vector<5x128xbf16>
    %c1_614 = arith.constant 1 : index
    %c1_615 = arith.constant 1 : index
    %c0_616 = arith.constant 0 : index
    %c0_617 = arith.constant 0 : index
    %698 = vector.load %arg11[%c1_614, %c1_615, %c0_616, %c0_617] : memref<2x7x5x128xbf16, #tpu.memory_space<vmem>>, vector<1x1x5x128xbf16>
    %699 = vector.shape_cast %698 : vector<1x1x5x128xbf16> to vector<5x128xbf16>
    %700 = vector.shape_cast %697 : vector<5x128xbf16> to vector<1x1x5x128xbf16>
    tpu.vector_store %arg11[%c1_614, %c1_615, %c0_616, %c0_617], %700 {strides = array<i32>} : memref<2x7x5x128xbf16, #tpu.memory_space<vmem>>, vector<1x1x5x128xbf16>,
    %c0_618 = arith.constant 0 : index
    %c0_619 = arith.constant 0 : index
    %c0_620 = arith.constant 0 : index
    %c0_621 = arith.constant 0 : index
    %c10_622 = arith.constant 10 : index
    %701 = vector.load %arg2[%c0_618, %c0_619, %c0_620, %c0_621, %c10_622] : memref<1x1x2x6x32xf32, #tpu.memory_space<vmem>>, vector<1x1x1x5x1xf32>
    %702 = vector.shape_cast %701 : vector<1x1x1x5x1xf32> to vector<5x1xf32>
    %c0_623 = arith.constant 0 : index
    %c0_624 = arith.constant 0 : index
    %703 = vector.load %arg3[%c0_623, %c0_624] : memref<9x128xf32, #tpu.memory_space<vmem>>, vector<1x128xf32>
    %704 = vector.broadcast %702 : vector<5x1xf32> to vector<5x128xf32>
    %705 = vector.broadcast %703 : vector<1x128xf32> to vector<5x128xf32>
    %706 = arith.mulf %704, %705 : vector<5x128xf32>
    %c0_625 = arith.constant 0 : index
    %c0_626 = arith.constant 0 : index
    %c0_627 = arith.constant 0 : index
    %c0_628 = arith.constant 0 : index
    %c11_629 = arith.constant 11 : index
    %707 = vector.load %arg2[%c0_625, %c0_626, %c0_627, %c0_628, %c11_629] : memref<1x1x2x6x32xf32, #tpu.memory_space<vmem>>, vector<1x1x1x5x1xf32>
    %708 = vector.shape_cast %707 : vector<1x1x1x5x1xf32> to vector<5x1xf32>
    %c1_630 = arith.constant 1 : index
    %c0_631 = arith.constant 0 : index
    %709 = vector.load %arg3[%c1_630, %c0_631] : memref<9x128xf32, #tpu.memory_space<vmem>>, vector<1x128xf32>
    %710 = vector.broadcast %708 : vector<5x1xf32> to vector<5x128xf32>
    %711 = vector.broadcast %709 : vector<1x128xf32> to vector<5x128xf32>
    %712 = arith.mulf %710, %711 : vector<5x128xf32>
    %713 = arith.addf %706, %712 : vector<5x128xf32>
    %c0_632 = arith.constant 0 : index
    %c0_633 = arith.constant 0 : index
    %c0_634 = arith.constant 0 : index
    %c1_635 = arith.constant 1 : index
    %c8_636 = arith.constant 8 : index
    %714 = vector.load %arg2[%c0_632, %c0_633, %c0_634, %c1_635, %c8_636] : memref<1x1x2x6x32xf32, #tpu.memory_space<vmem>>, vector<1x1x1x5x1xf32>
    %715 = vector.shape_cast %714 : vector<1x1x1x5x1xf32> to vector<5x1xf32>
    %c2_637 = arith.constant 2 : index
    %c0_638 = arith.constant 0 : index
    %716 = vector.load %arg3[%c2_637, %c0_638] : memref<9x128xf32, #tpu.memory_space<vmem>>, vector<1x128xf32>
    %717 = vector.broadcast %715 : vector<5x1xf32> to vector<5x128xf32>
    %718 = vector.broadcast %716 : vector<1x128xf32> to vector<5x128xf32>
    %719 = arith.mulf %717, %718 : vector<5x128xf32>
    %720 = arith.addf %713, %719 : vector<5x128xf32>
    %c0_639 = arith.constant 0 : index
    %c0_640 = arith.constant 0 : index
    %c1_641 = arith.constant 1 : index
    %c0_642 = arith.constant 0 : index
    %c10_643 = arith.constant 10 : index
    %721 = vector.load %arg2[%c0_639, %c0_640, %c1_641, %c0_642, %c10_643] : memref<1x1x2x6x32xf32, #tpu.memory_space<vmem>>, vector<1x1x1x5x1xf32>
    %722 = vector.shape_cast %721 : vector<1x1x1x5x1xf32> to vector<5x1xf32>
    %c3_644 = arith.constant 3 : index
    %c0_645 = arith.constant 0 : index
    %723 = vector.load %arg3[%c3_644, %c0_645] : memref<9x128xf32, #tpu.memory_space<vmem>>, vector<1x128xf32>
    %724 = vector.broadcast %722 : vector<5x1xf32> to vector<5x128xf32>
    %725 = vector.broadcast %723 : vector<1x128xf32> to vector<5x128xf32>
    %726 = arith.mulf %724, %725 : vector<5x128xf32>
    %727 = arith.addf %720, %726 : vector<5x128xf32>
    %c0_646 = arith.constant 0 : index
    %c0_647 = arith.constant 0 : index
    %c1_648 = arith.constant 1 : index
    %c0_649 = arith.constant 0 : index
    %c11_650 = arith.constant 11 : index
    %728 = vector.load %arg2[%c0_646, %c0_647, %c1_648, %c0_649, %c11_650] : memref<1x1x2x6x32xf32, #tpu.memory_space<vmem>>, vector<1x1x1x5x1xf32>
    %729 = vector.shape_cast %728 : vector<1x1x1x5x1xf32> to vector<5x1xf32>
    %c4_651 = arith.constant 4 : index
    %c0_652 = arith.constant 0 : index
    %730 = vector.load %arg3[%c4_651, %c0_652] : memref<9x128xf32, #tpu.memory_space<vmem>>, vector<1x128xf32>
    %731 = vector.broadcast %729 : vector<5x1xf32> to vector<5x128xf32>
    %732 = vector.broadcast %730 : vector<1x128xf32> to vector<5x128xf32>
    %733 = arith.mulf %731, %732 : vector<5x128xf32>
    %734 = arith.addf %727, %733 : vector<5x128xf32>
    %c0_653 = arith.constant 0 : index
    %c0_654 = arith.constant 0 : index
    %c1_655 = arith.constant 1 : index
    %c1_656 = arith.constant 1 : index
    %c8_657 = arith.constant 8 : index
    %735 = vector.load %arg2[%c0_653, %c0_654, %c1_655, %c1_656, %c8_657] : memref<1x1x2x6x32xf32, #tpu.memory_space<vmem>>, vector<1x1x1x5x1xf32>
    %736 = vector.shape_cast %735 : vector<1x1x1x5x1xf32> to vector<5x1xf32>
    %c5_658 = arith.constant 5 : index
    %c0_659 = arith.constant 0 : index
    %737 = vector.load %arg3[%c5_658, %c0_659] : memref<9x128xf32, #tpu.memory_space<vmem>>, vector<1x128xf32>
    %738 = vector.broadcast %736 : vector<5x1xf32> to vector<5x128xf32>
    %739 = vector.broadcast %737 : vector<1x128xf32> to vector<5x128xf32>
    %740 = arith.mulf %738, %739 : vector<5x128xf32>
    %741 = arith.addf %734, %740 : vector<5x128xf32>
    %c0_660 = arith.constant 0 : index
    %c0_661 = arith.constant 0 : index
    %c0_662 = arith.constant 0 : index
    %c0_663 = arith.constant 0 : index
    %c14_664 = arith.constant 14 : index
    %742 = vector.load %arg2[%c0_660, %c0_661, %c0_662, %c0_663, %c14_664] : memref<1x1x2x6x32xf32, #tpu.memory_space<vmem>>, vector<1x1x1x5x1xf32>
    %743 = vector.shape_cast %742 : vector<1x1x1x5x1xf32> to vector<5x1xf32>
    %c6_665 = arith.constant 6 : index
    %c0_666 = arith.constant 0 : index
    %744 = vector.load %arg3[%c6_665, %c0_666] : memref<9x128xf32, #tpu.memory_space<vmem>>, vector<1x128xf32>
    %745 = vector.broadcast %743 : vector<5x1xf32> to vector<5x128xf32>
    %746 = vector.broadcast %744 : vector<1x128xf32> to vector<5x128xf32>
    %747 = arith.mulf %745, %746 : vector<5x128xf32>
    %748 = arith.addf %741, %747 : vector<5x128xf32>
    %c0_667 = arith.constant 0 : index
    %c0_668 = arith.constant 0 : index
    %c0_669 = arith.constant 0 : index
    %c0_670 = arith.constant 0 : index
    %c15 = arith.constant 15 : index
    %749 = vector.load %arg2[%c0_667, %c0_668, %c0_669, %c0_670, %c15] : memref<1x1x2x6x32xf32, #tpu.memory_space<vmem>>, vector<1x1x1x5x1xf32>
    %750 = vector.shape_cast %749 : vector<1x1x1x5x1xf32> to vector<5x1xf32>
    %c7_671 = arith.constant 7 : index
    %c0_672 = arith.constant 0 : index
    %751 = vector.load %arg3[%c7_671, %c0_672] : memref<9x128xf32, #tpu.memory_space<vmem>>, vector<1x128xf32>
    %752 = vector.broadcast %750 : vector<5x1xf32> to vector<5x128xf32>
    %753 = vector.broadcast %751 : vector<1x128xf32> to vector<5x128xf32>
    %754 = arith.mulf %752, %753 : vector<5x128xf32>
    %755 = arith.addf %748, %754 : vector<5x128xf32>
    %c0_673 = arith.constant 0 : index
    %c0_674 = arith.constant 0 : index
    %c0_675 = arith.constant 0 : index
    %c1_676 = arith.constant 1 : index
    %c12_677 = arith.constant 12 : index
    %756 = vector.load %arg2[%c0_673, %c0_674, %c0_675, %c1_676, %c12_677] : memref<1x1x2x6x32xf32, #tpu.memory_space<vmem>>, vector<1x1x1x5x1xf32>
    %757 = vector.shape_cast %756 : vector<1x1x1x5x1xf32> to vector<5x1xf32>
    %c8_678 = arith.constant 8 : index
    %c0_679 = arith.constant 0 : index
    %758 = vector.load %arg3[%c8_678, %c0_679] : memref<9x128xf32, #tpu.memory_space<vmem>>, vector<1x128xf32>
    %759 = vector.broadcast %757 : vector<5x1xf32> to vector<5x128xf32>
    %760 = vector.broadcast %758 : vector<1x128xf32> to vector<5x128xf32>
    %761 = arith.mulf %759, %760 : vector<5x128xf32>
    %762 = arith.addf %755, %761 : vector<5x128xf32>
    %c0_680 = arith.constant 0 : index
    %c0_681 = arith.constant 0 : index
    %763 = vector.load %arg4[%c0_680, %c0_681] : memref<1x128xf32, #tpu.memory_space<vmem>>, vector<1x128xf32>
    %764 = vector.broadcast %763 : vector<1x128xf32> to vector<5x128xf32>
    %765 = arith.addf %762, %764 : vector<5x128xf32>
    %cst_682 = arith.constant 0.000000e+00 : f32
    %766 = vector.broadcast %cst_682 : f32 to vector<5x128xf32>
    %767 = arith.maximumf %765, %766 : vector<5x128xf32>
    %cst_683 = arith.constant 0.000000e+00 : f32
    %768 = vector.shape_cast %550 : vector<5x1xi1> to vector<5x1xi1>
    %769 = vector.broadcast %768 : vector<5x1xi1> to vector<5x128xi1>
    %770 = vector.broadcast %cst_683 : f32 to vector<5x128xf32>
    %771 = arith.select %769, %767, %770 : vector<5x128xi1>, vector<5x128xf32>
    %772 = arith.truncf %771 : vector<5x128xf32> to vector<5x128xbf16>
    %c1_684 = arith.constant 1 : index
    %c2_685 = arith.constant 2 : index
    %c0_686 = arith.constant 0 : index
    %c0_687 = arith.constant 0 : index
    %773 = vector.load %arg11[%c1_684, %c2_685, %c0_686, %c0_687] : memref<2x7x5x128xbf16, #tpu.memory_space<vmem>>, vector<1x1x5x128xbf16>
    %774 = vector.shape_cast %773 : vector<1x1x5x128xbf16> to vector<5x128xbf16>
    %775 = vector.shape_cast %772 : vector<5x128xbf16> to vector<1x1x5x128xbf16>
    tpu.vector_store %arg11[%c1_684, %c2_685, %c0_686, %c0_687], %775 {strides = array<i32>} : memref<2x7x5x128xbf16, #tpu.memory_space<vmem>>, vector<1x1x5x128xbf16>,
    %c0_688 = arith.constant 0 : index
    %c0_689 = arith.constant 0 : index
    %c0_690 = arith.constant 0 : index
    %c0_691 = arith.constant 0 : index
    %c14_692 = arith.constant 14 : index
    %776 = vector.load %arg2[%c0_688, %c0_689, %c0_690, %c0_691, %c14_692] : memref<1x1x2x6x32xf32, #tpu.memory_space<vmem>>, vector<1x1x1x5x1xf32>
    %777 = vector.shape_cast %776 : vector<1x1x1x5x1xf32> to vector<5x1xf32>
    %c0_693 = arith.constant 0 : index
    %c0_694 = arith.constant 0 : index
    %778 = vector.load %arg3[%c0_693, %c0_694] : memref<9x128xf32, #tpu.memory_space<vmem>>, vector<1x128xf32>
    %779 = vector.broadcast %777 : vector<5x1xf32> to vector<5x128xf32>
    %780 = vector.broadcast %778 : vector<1x128xf32> to vector<5x128xf32>
    %781 = arith.mulf %779, %780 : vector<5x128xf32>
    %c0_695 = arith.constant 0 : index
    %c0_696 = arith.constant 0 : index
    %c0_697 = arith.constant 0 : index
    %c0_698 = arith.constant 0 : index
    %c15_699 = arith.constant 15 : index
    %782 = vector.load %arg2[%c0_695, %c0_696, %c0_697, %c0_698, %c15_699] : memref<1x1x2x6x32xf32, #tpu.memory_space<vmem>>, vector<1x1x1x5x1xf32>
    %783 = vector.shape_cast %782 : vector<1x1x1x5x1xf32> to vector<5x1xf32>
    %c1_700 = arith.constant 1 : index
    %c0_701 = arith.constant 0 : index
    %784 = vector.load %arg3[%c1_700, %c0_701] : memref<9x128xf32, #tpu.memory_space<vmem>>, vector<1x128xf32>
    %785 = vector.broadcast %783 : vector<5x1xf32> to vector<5x128xf32>
    %786 = vector.broadcast %784 : vector<1x128xf32> to vector<5x128xf32>
    %787 = arith.mulf %785, %786 : vector<5x128xf32>
    %788 = arith.addf %781, %787 : vector<5x128xf32>
    %c0_702 = arith.constant 0 : index
    %c0_703 = arith.constant 0 : index
    %c0_704 = arith.constant 0 : index
    %c1_705 = arith.constant 1 : index
    %c12_706 = arith.constant 12 : index
    %789 = vector.load %arg2[%c0_702, %c0_703, %c0_704, %c1_705, %c12_706] : memref<1x1x2x6x32xf32, #tpu.memory_space<vmem>>, vector<1x1x1x5x1xf32>
    %790 = vector.shape_cast %789 : vector<1x1x1x5x1xf32> to vector<5x1xf32>
    %c2_707 = arith.constant 2 : index
    %c0_708 = arith.constant 0 : index
    %791 = vector.load %arg3[%c2_707, %c0_708] : memref<9x128xf32, #tpu.memory_space<vmem>>, vector<1x128xf32>
    %792 = vector.broadcast %790 : vector<5x1xf32> to vector<5x128xf32>
    %793 = vector.broadcast %791 : vector<1x128xf32> to vector<5x128xf32>
    %794 = arith.mulf %792, %793 : vector<5x128xf32>
    %795 = arith.addf %788, %794 : vector<5x128xf32>
    %c0_709 = arith.constant 0 : index
    %c0_710 = arith.constant 0 : index
    %c1_711 = arith.constant 1 : index
    %c0_712 = arith.constant 0 : index
    %c14_713 = arith.constant 14 : index
    %796 = vector.load %arg2[%c0_709, %c0_710, %c1_711, %c0_712, %c14_713] : memref<1x1x2x6x32xf32, #tpu.memory_space<vmem>>, vector<1x1x1x5x1xf32>
    %797 = vector.shape_cast %796 : vector<1x1x1x5x1xf32> to vector<5x1xf32>
    %c3_714 = arith.constant 3 : index
    %c0_715 = arith.constant 0 : index
    %798 = vector.load %arg3[%c3_714, %c0_715] : memref<9x128xf32, #tpu.memory_space<vmem>>, vector<1x128xf32>
    %799 = vector.broadcast %797 : vector<5x1xf32> to vector<5x128xf32>
    %800 = vector.broadcast %798 : vector<1x128xf32> to vector<5x128xf32>
    %801 = arith.mulf %799, %800 : vector<5x128xf32>
    %802 = arith.addf %795, %801 : vector<5x128xf32>
    %c0_716 = arith.constant 0 : index
    %c0_717 = arith.constant 0 : index
    %c1_718 = arith.constant 1 : index
    %c0_719 = arith.constant 0 : index
    %c15_720 = arith.constant 15 : index
    %803 = vector.load %arg2[%c0_716, %c0_717, %c1_718, %c0_719, %c15_720] : memref<1x1x2x6x32xf32, #tpu.memory_space<vmem>>, vector<1x1x1x5x1xf32>
    %804 = vector.shape_cast %803 : vector<1x1x1x5x1xf32> to vector<5x1xf32>
    %c4_721 = arith.constant 4 : index
    %c0_722 = arith.constant 0 : index
    %805 = vector.load %arg3[%c4_721, %c0_722] : memref<9x128xf32, #tpu.memory_space<vmem>>, vector<1x128xf32>
    %806 = vector.broadcast %804 : vector<5x1xf32> to vector<5x128xf32>
    %807 = vector.broadcast %805 : vector<1x128xf32> to vector<5x128xf32>
    %808 = arith.mulf %806, %807 : vector<5x128xf32>
    %809 = arith.addf %802, %808 : vector<5x128xf32>
    %c0_723 = arith.constant 0 : index
    %c0_724 = arith.constant 0 : index
    %c1_725 = arith.constant 1 : index
    %c1_726 = arith.constant 1 : index
    %c12_727 = arith.constant 12 : index
    %810 = vector.load %arg2[%c0_723, %c0_724, %c1_725, %c1_726, %c12_727] : memref<1x1x2x6x32xf32, #tpu.memory_space<vmem>>, vector<1x1x1x5x1xf32>
    %811 = vector.shape_cast %810 : vector<1x1x1x5x1xf32> to vector<5x1xf32>
    %c5_728 = arith.constant 5 : index
    %c0_729 = arith.constant 0 : index
    %812 = vector.load %arg3[%c5_728, %c0_729] : memref<9x128xf32, #tpu.memory_space<vmem>>, vector<1x128xf32>
    %813 = vector.broadcast %811 : vector<5x1xf32> to vector<5x128xf32>
    %814 = vector.broadcast %812 : vector<1x128xf32> to vector<5x128xf32>
    %815 = arith.mulf %813, %814 : vector<5x128xf32>
    %816 = arith.addf %809, %815 : vector<5x128xf32>
    %c0_730 = arith.constant 0 : index
    %c0_731 = arith.constant 0 : index
    %c0_732 = arith.constant 0 : index
    %c0_733 = arith.constant 0 : index
    %c18_734 = arith.constant 18 : index
    %817 = vector.load %arg2[%c0_730, %c0_731, %c0_732, %c0_733, %c18_734] : memref<1x1x2x6x32xf32, #tpu.memory_space<vmem>>, vector<1x1x1x5x1xf32>
    %818 = vector.shape_cast %817 : vector<1x1x1x5x1xf32> to vector<5x1xf32>
    %c6_735 = arith.constant 6 : index
    %c0_736 = arith.constant 0 : index
    %819 = vector.load %arg3[%c6_735, %c0_736] : memref<9x128xf32, #tpu.memory_space<vmem>>, vector<1x128xf32>
    %820 = vector.broadcast %818 : vector<5x1xf32> to vector<5x128xf32>
    %821 = vector.broadcast %819 : vector<1x128xf32> to vector<5x128xf32>
    %822 = arith.mulf %820, %821 : vector<5x128xf32>
    %823 = arith.addf %816, %822 : vector<5x128xf32>
    %c0_737 = arith.constant 0 : index
    %c0_738 = arith.constant 0 : index
    %c0_739 = arith.constant 0 : index
    %c0_740 = arith.constant 0 : index
    %c19 = arith.constant 19 : index
    %824 = vector.load %arg2[%c0_737, %c0_738, %c0_739, %c0_740, %c19] : memref<1x1x2x6x32xf32, #tpu.memory_space<vmem>>, vector<1x1x1x5x1xf32>
    %825 = vector.shape_cast %824 : vector<1x1x1x5x1xf32> to vector<5x1xf32>
    %c7_741 = arith.constant 7 : index
    %c0_742 = arith.constant 0 : index
    %826 = vector.load %arg3[%c7_741, %c0_742] : memref<9x128xf32, #tpu.memory_space<vmem>>, vector<1x128xf32>
    %827 = vector.broadcast %825 : vector<5x1xf32> to vector<5x128xf32>
    %828 = vector.broadcast %826 : vector<1x128xf32> to vector<5x128xf32>
    %829 = arith.mulf %827, %828 : vector<5x128xf32>
    %830 = arith.addf %823, %829 : vector<5x128xf32>
    %c0_743 = arith.constant 0 : index
    %c0_744 = arith.constant 0 : index
    %c0_745 = arith.constant 0 : index
    %c1_746 = arith.constant 1 : index
    %c16_747 = arith.constant 16 : index
    %831 = vector.load %arg2[%c0_743, %c0_744, %c0_745, %c1_746, %c16_747] : memref<1x1x2x6x32xf32, #tpu.memory_space<vmem>>, vector<1x1x1x5x1xf32>
    %832 = vector.shape_cast %831 : vector<1x1x1x5x1xf32> to vector<5x1xf32>
    %c8_748 = arith.constant 8 : index
    %c0_749 = arith.constant 0 : index
    %833 = vector.load %arg3[%c8_748, %c0_749] : memref<9x128xf32, #tpu.memory_space<vmem>>, vector<1x128xf32>
    %834 = vector.broadcast %832 : vector<5x1xf32> to vector<5x128xf32>
    %835 = vector.broadcast %833 : vector<1x128xf32> to vector<5x128xf32>
    %836 = arith.mulf %834, %835 : vector<5x128xf32>
    %837 = arith.addf %830, %836 : vector<5x128xf32>
    %c0_750 = arith.constant 0 : index
    %c0_751 = arith.constant 0 : index
    %838 = vector.load %arg4[%c0_750, %c0_751] : memref<1x128xf32, #tpu.memory_space<vmem>>, vector<1x128xf32>
    %839 = vector.broadcast %838 : vector<1x128xf32> to vector<5x128xf32>
    %840 = arith.addf %837, %839 : vector<5x128xf32>
    %cst_752 = arith.constant 0.000000e+00 : f32
    %841 = vector.broadcast %cst_752 : f32 to vector<5x128xf32>
    %842 = arith.maximumf %840, %841 : vector<5x128xf32>
    %cst_753 = arith.constant 0.000000e+00 : f32
    %843 = vector.shape_cast %550 : vector<5x1xi1> to vector<5x1xi1>
    %844 = vector.broadcast %843 : vector<5x1xi1> to vector<5x128xi1>
    %845 = vector.broadcast %cst_753 : f32 to vector<5x128xf32>
    %846 = arith.select %844, %842, %845 : vector<5x128xi1>, vector<5x128xf32>
    %847 = arith.truncf %846 : vector<5x128xf32> to vector<5x128xbf16>
    %c1_754 = arith.constant 1 : index
    %c3_755 = arith.constant 3 : index
    %c0_756 = arith.constant 0 : index
    %c0_757 = arith.constant 0 : index
    %848 = vector.load %arg11[%c1_754, %c3_755, %c0_756, %c0_757] : memref<2x7x5x128xbf16, #tpu.memory_space<vmem>>, vector<1x1x5x128xbf16>
    %849 = vector.shape_cast %848 : vector<1x1x5x128xbf16> to vector<5x128xbf16>
    %850 = vector.shape_cast %847 : vector<5x128xbf16> to vector<1x1x5x128xbf16>
    tpu.vector_store %arg11[%c1_754, %c3_755, %c0_756, %c0_757], %850 {strides = array<i32>} : memref<2x7x5x128xbf16, #tpu.memory_space<vmem>>, vector<1x1x5x128xbf16>,
    %c0_758 = arith.constant 0 : index
    %c0_759 = arith.constant 0 : index
    %c0_760 = arith.constant 0 : index
    %c0_761 = arith.constant 0 : index
    %c18_762 = arith.constant 18 : index
    %851 = vector.load %arg2[%c0_758, %c0_759, %c0_760, %c0_761, %c18_762] : memref<1x1x2x6x32xf32, #tpu.memory_space<vmem>>, vector<1x1x1x5x1xf32>
    %852 = vector.shape_cast %851 : vector<1x1x1x5x1xf32> to vector<5x1xf32>
    %c0_763 = arith.constant 0 : index
    %c0_764 = arith.constant 0 : index
    %853 = vector.load %arg3[%c0_763, %c0_764] : memref<9x128xf32, #tpu.memory_space<vmem>>, vector<1x128xf32>
    %854 = vector.broadcast %852 : vector<5x1xf32> to vector<5x128xf32>
    %855 = vector.broadcast %853 : vector<1x128xf32> to vector<5x128xf32>
    %856 = arith.mulf %854, %855 : vector<5x128xf32>
    %c0_765 = arith.constant 0 : index
    %c0_766 = arith.constant 0 : index
    %c0_767 = arith.constant 0 : index
    %c0_768 = arith.constant 0 : index
    %c19_769 = arith.constant 19 : index
    %857 = vector.load %arg2[%c0_765, %c0_766, %c0_767, %c0_768, %c19_769] : memref<1x1x2x6x32xf32, #tpu.memory_space<vmem>>, vector<1x1x1x5x1xf32>
    %858 = vector.shape_cast %857 : vector<1x1x1x5x1xf32> to vector<5x1xf32>
    %c1_770 = arith.constant 1 : index
    %c0_771 = arith.constant 0 : index
    %859 = vector.load %arg3[%c1_770, %c0_771] : memref<9x128xf32, #tpu.memory_space<vmem>>, vector<1x128xf32>
    %860 = vector.broadcast %858 : vector<5x1xf32> to vector<5x128xf32>
    %861 = vector.broadcast %859 : vector<1x128xf32> to vector<5x128xf32>
    %862 = arith.mulf %860, %861 : vector<5x128xf32>
    %863 = arith.addf %856, %862 : vector<5x128xf32>
    %c0_772 = arith.constant 0 : index
    %c0_773 = arith.constant 0 : index
    %c0_774 = arith.constant 0 : index
    %c1_775 = arith.constant 1 : index
    %c16_776 = arith.constant 16 : index
    %864 = vector.load %arg2[%c0_772, %c0_773, %c0_774, %c1_775, %c16_776] : memref<1x1x2x6x32xf32, #tpu.memory_space<vmem>>, vector<1x1x1x5x1xf32>
    %865 = vector.shape_cast %864 : vector<1x1x1x5x1xf32> to vector<5x1xf32>
    %c2_777 = arith.constant 2 : index
    %c0_778 = arith.constant 0 : index
    %866 = vector.load %arg3[%c2_777, %c0_778] : memref<9x128xf32, #tpu.memory_space<vmem>>, vector<1x128xf32>
    %867 = vector.broadcast %865 : vector<5x1xf32> to vector<5x128xf32>
    %868 = vector.broadcast %866 : vector<1x128xf32> to vector<5x128xf32>
    %869 = arith.mulf %867, %868 : vector<5x128xf32>
    %870 = arith.addf %863, %869 : vector<5x128xf32>
    %c0_779 = arith.constant 0 : index
    %c0_780 = arith.constant 0 : index
    %c1_781 = arith.constant 1 : index
    %c0_782 = arith.constant 0 : index
    %c18_783 = arith.constant 18 : index
    %871 = vector.load %arg2[%c0_779, %c0_780, %c1_781, %c0_782, %c18_783] : memref<1x1x2x6x32xf32, #tpu.memory_space<vmem>>, vector<1x1x1x5x1xf32>
    %872 = vector.shape_cast %871 : vector<1x1x1x5x1xf32> to vector<5x1xf32>
    %c3_784 = arith.constant 3 : index
    %c0_785 = arith.constant 0 : index
    %873 = vector.load %arg3[%c3_784, %c0_785] : memref<9x128xf32, #tpu.memory_space<vmem>>, vector<1x128xf32>
    %874 = vector.broadcast %872 : vector<5x1xf32> to vector<5x128xf32>
    %875 = vector.broadcast %873 : vector<1x128xf32> to vector<5x128xf32>
    %876 = arith.mulf %874, %875 : vector<5x128xf32>
    %877 = arith.addf %870, %876 : vector<5x128xf32>
    %c0_786 = arith.constant 0 : index
    %c0_787 = arith.constant 0 : index
    %c1_788 = arith.constant 1 : index
    %c0_789 = arith.constant 0 : index
    %c19_790 = arith.constant 19 : index
    %878 = vector.load %arg2[%c0_786, %c0_787, %c1_788, %c0_789, %c19_790] : memref<1x1x2x6x32xf32, #tpu.memory_space<vmem>>, vector<1x1x1x5x1xf32>
    %879 = vector.shape_cast %878 : vector<1x1x1x5x1xf32> to vector<5x1xf32>
    %c4_791 = arith.constant 4 : index
    %c0_792 = arith.constant 0 : index
    %880 = vector.load %arg3[%c4_791, %c0_792] : memref<9x128xf32, #tpu.memory_space<vmem>>, vector<1x128xf32>
    %881 = vector.broadcast %879 : vector<5x1xf32> to vector<5x128xf32>
    %882 = vector.broadcast %880 : vector<1x128xf32> to vector<5x128xf32>
    %883 = arith.mulf %881, %882 : vector<5x128xf32>
    %884 = arith.addf %877, %883 : vector<5x128xf32>
    %c0_793 = arith.constant 0 : index
    %c0_794 = arith.constant 0 : index
    %c1_795 = arith.constant 1 : index
    %c1_796 = arith.constant 1 : index
    %c16_797 = arith.constant 16 : index
    %885 = vector.load %arg2[%c0_793, %c0_794, %c1_795, %c1_796, %c16_797] : memref<1x1x2x6x32xf32, #tpu.memory_space<vmem>>, vector<1x1x1x5x1xf32>
    %886 = vector.shape_cast %885 : vector<1x1x1x5x1xf32> to vector<5x1xf32>
    %c5_798 = arith.constant 5 : index
    %c0_799 = arith.constant 0 : index
    %887 = vector.load %arg3[%c5_798, %c0_799] : memref<9x128xf32, #tpu.memory_space<vmem>>, vector<1x128xf32>
    %888 = vector.broadcast %886 : vector<5x1xf32> to vector<5x128xf32>
    %889 = vector.broadcast %887 : vector<1x128xf32> to vector<5x128xf32>
    %890 = arith.mulf %888, %889 : vector<5x128xf32>
    %891 = arith.addf %884, %890 : vector<5x128xf32>
    %c0_800 = arith.constant 0 : index
    %c0_801 = arith.constant 0 : index
    %c0_802 = arith.constant 0 : index
    %c0_803 = arith.constant 0 : index
    %c22_804 = arith.constant 22 : index
    %892 = vector.load %arg2[%c0_800, %c0_801, %c0_802, %c0_803, %c22_804] : memref<1x1x2x6x32xf32, #tpu.memory_space<vmem>>, vector<1x1x1x5x1xf32>
    %893 = vector.shape_cast %892 : vector<1x1x1x5x1xf32> to vector<5x1xf32>
    %c6_805 = arith.constant 6 : index
    %c0_806 = arith.constant 0 : index
    %894 = vector.load %arg3[%c6_805, %c0_806] : memref<9x128xf32, #tpu.memory_space<vmem>>, vector<1x128xf32>
    %895 = vector.broadcast %893 : vector<5x1xf32> to vector<5x128xf32>
    %896 = vector.broadcast %894 : vector<1x128xf32> to vector<5x128xf32>
    %897 = arith.mulf %895, %896 : vector<5x128xf32>
    %898 = arith.addf %891, %897 : vector<5x128xf32>
    %c0_807 = arith.constant 0 : index
    %c0_808 = arith.constant 0 : index
    %c0_809 = arith.constant 0 : index
    %c0_810 = arith.constant 0 : index
    %c23 = arith.constant 23 : index
    %899 = vector.load %arg2[%c0_807, %c0_808, %c0_809, %c0_810, %c23] : memref<1x1x2x6x32xf32, #tpu.memory_space<vmem>>, vector<1x1x1x5x1xf32>
    %900 = vector.shape_cast %899 : vector<1x1x1x5x1xf32> to vector<5x1xf32>
    %c7_811 = arith.constant 7 : index
    %c0_812 = arith.constant 0 : index
    %901 = vector.load %arg3[%c7_811, %c0_812] : memref<9x128xf32, #tpu.memory_space<vmem>>, vector<1x128xf32>
    %902 = vector.broadcast %900 : vector<5x1xf32> to vector<5x128xf32>
    %903 = vector.broadcast %901 : vector<1x128xf32> to vector<5x128xf32>
    %904 = arith.mulf %902, %903 : vector<5x128xf32>
    %905 = arith.addf %898, %904 : vector<5x128xf32>
    %c0_813 = arith.constant 0 : index
    %c0_814 = arith.constant 0 : index
    %c0_815 = arith.constant 0 : index
    %c1_816 = arith.constant 1 : index
    %c20_817 = arith.constant 20 : index
    %906 = vector.load %arg2[%c0_813, %c0_814, %c0_815, %c1_816, %c20_817] : memref<1x1x2x6x32xf32, #tpu.memory_space<vmem>>, vector<1x1x1x5x1xf32>
    %907 = vector.shape_cast %906 : vector<1x1x1x5x1xf32> to vector<5x1xf32>
    %c8_818 = arith.constant 8 : index
    %c0_819 = arith.constant 0 : index
    %908 = vector.load %arg3[%c8_818, %c0_819] : memref<9x128xf32, #tpu.memory_space<vmem>>, vector<1x128xf32>
    %909 = vector.broadcast %907 : vector<5x1xf32> to vector<5x128xf32>
    %910 = vector.broadcast %908 : vector<1x128xf32> to vector<5x128xf32>
    %911 = arith.mulf %909, %910 : vector<5x128xf32>
    %912 = arith.addf %905, %911 : vector<5x128xf32>
    %c0_820 = arith.constant 0 : index
    %c0_821 = arith.constant 0 : index
    %913 = vector.load %arg4[%c0_820, %c0_821] : memref<1x128xf32, #tpu.memory_space<vmem>>, vector<1x128xf32>
    %914 = vector.broadcast %913 : vector<1x128xf32> to vector<5x128xf32>
    %915 = arith.addf %912, %914 : vector<5x128xf32>
    %cst_822 = arith.constant 0.000000e+00 : f32
    %916 = vector.broadcast %cst_822 : f32 to vector<5x128xf32>
    %917 = arith.maximumf %915, %916 : vector<5x128xf32>
    %cst_823 = arith.constant 0.000000e+00 : f32
    %918 = vector.shape_cast %550 : vector<5x1xi1> to vector<5x1xi1>
    %919 = vector.broadcast %918 : vector<5x1xi1> to vector<5x128xi1>
    %920 = vector.broadcast %cst_823 : f32 to vector<5x128xf32>
    %921 = arith.select %919, %917, %920 : vector<5x128xi1>, vector<5x128xf32>
    %922 = arith.truncf %921 : vector<5x128xf32> to vector<5x128xbf16>
    %c1_824 = arith.constant 1 : index
    %c4_825 = arith.constant 4 : index
    %c0_826 = arith.constant 0 : index
    %c0_827 = arith.constant 0 : index
    %923 = vector.load %arg11[%c1_824, %c4_825, %c0_826, %c0_827] : memref<2x7x5x128xbf16, #tpu.memory_space<vmem>>, vector<1x1x5x128xbf16>
    %924 = vector.shape_cast %923 : vector<1x1x5x128xbf16> to vector<5x128xbf16>
    %925 = vector.shape_cast %922 : vector<5x128xbf16> to vector<1x1x5x128xbf16>
    tpu.vector_store %arg11[%c1_824, %c4_825, %c0_826, %c0_827], %925 {strides = array<i32>} : memref<2x7x5x128xbf16, #tpu.memory_space<vmem>>, vector<1x1x5x128xbf16>,
    %c0_828 = arith.constant 0 : index
    %c0_829 = arith.constant 0 : index
    %c0_830 = arith.constant 0 : index
    %c0_831 = arith.constant 0 : index
    %c22_832 = arith.constant 22 : index
    %926 = vector.load %arg2[%c0_828, %c0_829, %c0_830, %c0_831, %c22_832] : memref<1x1x2x6x32xf32, #tpu.memory_space<vmem>>, vector<1x1x1x5x1xf32>
    %927 = vector.shape_cast %926 : vector<1x1x1x5x1xf32> to vector<5x1xf32>
    %c0_833 = arith.constant 0 : index
    %c0_834 = arith.constant 0 : index
    %928 = vector.load %arg3[%c0_833, %c0_834] : memref<9x128xf32, #tpu.memory_space<vmem>>, vector<1x128xf32>
    %929 = vector.broadcast %927 : vector<5x1xf32> to vector<5x128xf32>
    %930 = vector.broadcast %928 : vector<1x128xf32> to vector<5x128xf32>
    %931 = arith.mulf %929, %930 : vector<5x128xf32>
    %c0_835 = arith.constant 0 : index
    %c0_836 = arith.constant 0 : index
    %c0_837 = arith.constant 0 : index
    %c0_838 = arith.constant 0 : index
    %c23_839 = arith.constant 23 : index
    %932 = vector.load %arg2[%c0_835, %c0_836, %c0_837, %c0_838, %c23_839] : memref<1x1x2x6x32xf32, #tpu.memory_space<vmem>>, vector<1x1x1x5x1xf32>
    %933 = vector.shape_cast %932 : vector<1x1x1x5x1xf32> to vector<5x1xf32>
    %c1_840 = arith.constant 1 : index
    %c0_841 = arith.constant 0 : index
    %934 = vector.load %arg3[%c1_840, %c0_841] : memref<9x128xf32, #tpu.memory_space<vmem>>, vector<1x128xf32>
    %935 = vector.broadcast %933 : vector<5x1xf32> to vector<5x128xf32>
    %936 = vector.broadcast %934 : vector<1x128xf32> to vector<5x128xf32>
    %937 = arith.mulf %935, %936 : vector<5x128xf32>
    %938 = arith.addf %931, %937 : vector<5x128xf32>
    %c0_842 = arith.constant 0 : index
    %c0_843 = arith.constant 0 : index
    %c0_844 = arith.constant 0 : index
    %c1_845 = arith.constant 1 : index
    %c20_846 = arith.constant 20 : index
    %939 = vector.load %arg2[%c0_842, %c0_843, %c0_844, %c1_845, %c20_846] : memref<1x1x2x6x32xf32, #tpu.memory_space<vmem>>, vector<1x1x1x5x1xf32>
    %940 = vector.shape_cast %939 : vector<1x1x1x5x1xf32> to vector<5x1xf32>
    %c2_847 = arith.constant 2 : index
    %c0_848 = arith.constant 0 : index
    %941 = vector.load %arg3[%c2_847, %c0_848] : memref<9x128xf32, #tpu.memory_space<vmem>>, vector<1x128xf32>
    %942 = vector.broadcast %940 : vector<5x1xf32> to vector<5x128xf32>
    %943 = vector.broadcast %941 : vector<1x128xf32> to vector<5x128xf32>
    %944 = arith.mulf %942, %943 : vector<5x128xf32>
    %945 = arith.addf %938, %944 : vector<5x128xf32>
    %c0_849 = arith.constant 0 : index
    %c0_850 = arith.constant 0 : index
    %c1_851 = arith.constant 1 : index
    %c0_852 = arith.constant 0 : index
    %c22_853 = arith.constant 22 : index
    %946 = vector.load %arg2[%c0_849, %c0_850, %c1_851, %c0_852, %c22_853] : memref<1x1x2x6x32xf32, #tpu.memory_space<vmem>>, vector<1x1x1x5x1xf32>
    %947 = vector.shape_cast %946 : vector<1x1x1x5x1xf32> to vector<5x1xf32>
    %c3_854 = arith.constant 3 : index
    %c0_855 = arith.constant 0 : index
    %948 = vector.load %arg3[%c3_854, %c0_855] : memref<9x128xf32, #tpu.memory_space<vmem>>, vector<1x128xf32>
    %949 = vector.broadcast %947 : vector<5x1xf32> to vector<5x128xf32>
    %950 = vector.broadcast %948 : vector<1x128xf32> to vector<5x128xf32>
    %951 = arith.mulf %949, %950 : vector<5x128xf32>
    %952 = arith.addf %945, %951 : vector<5x128xf32>
    %c0_856 = arith.constant 0 : index
    %c0_857 = arith.constant 0 : index
    %c1_858 = arith.constant 1 : index
    %c0_859 = arith.constant 0 : index
    %c23_860 = arith.constant 23 : index
    %953 = vector.load %arg2[%c0_856, %c0_857, %c1_858, %c0_859, %c23_860] : memref<1x1x2x6x32xf32, #tpu.memory_space<vmem>>, vector<1x1x1x5x1xf32>
    %954 = vector.shape_cast %953 : vector<1x1x1x5x1xf32> to vector<5x1xf32>
    %c4_861 = arith.constant 4 : index
    %c0_862 = arith.constant 0 : index
    %955 = vector.load %arg3[%c4_861, %c0_862] : memref<9x128xf32, #tpu.memory_space<vmem>>, vector<1x128xf32>
    %956 = vector.broadcast %954 : vector<5x1xf32> to vector<5x128xf32>
    %957 = vector.broadcast %955 : vector<1x128xf32> to vector<5x128xf32>
    %958 = arith.mulf %956, %957 : vector<5x128xf32>
    %959 = arith.addf %952, %958 : vector<5x128xf32>
    %c0_863 = arith.constant 0 : index
    %c0_864 = arith.constant 0 : index
    %c1_865 = arith.constant 1 : index
    %c1_866 = arith.constant 1 : index
    %c20_867 = arith.constant 20 : index
    %960 = vector.load %arg2[%c0_863, %c0_864, %c1_865, %c1_866, %c20_867] : memref<1x1x2x6x32xf32, #tpu.memory_space<vmem>>, vector<1x1x1x5x1xf32>
    %961 = vector.shape_cast %960 : vector<1x1x1x5x1xf32> to vector<5x1xf32>
    %c5_868 = arith.constant 5 : index
    %c0_869 = arith.constant 0 : index
    %962 = vector.load %arg3[%c5_868, %c0_869] : memref<9x128xf32, #tpu.memory_space<vmem>>, vector<1x128xf32>
    %963 = vector.broadcast %961 : vector<5x1xf32> to vector<5x128xf32>
    %964 = vector.broadcast %962 : vector<1x128xf32> to vector<5x128xf32>
    %965 = arith.mulf %963, %964 : vector<5x128xf32>
    %966 = arith.addf %959, %965 : vector<5x128xf32>
    %c0_870 = arith.constant 0 : index
    %c0_871 = arith.constant 0 : index
    %c0_872 = arith.constant 0 : index
    %c0_873 = arith.constant 0 : index
    %c26_874 = arith.constant 26 : index
    %967 = vector.load %arg2[%c0_870, %c0_871, %c0_872, %c0_873, %c26_874] : memref<1x1x2x6x32xf32, #tpu.memory_space<vmem>>, vector<1x1x1x5x1xf32>
    %968 = vector.shape_cast %967 : vector<1x1x1x5x1xf32> to vector<5x1xf32>
    %c6_875 = arith.constant 6 : index
    %c0_876 = arith.constant 0 : index
    %969 = vector.load %arg3[%c6_875, %c0_876] : memref<9x128xf32, #tpu.memory_space<vmem>>, vector<1x128xf32>
    %970 = vector.broadcast %968 : vector<5x1xf32> to vector<5x128xf32>
    %971 = vector.broadcast %969 : vector<1x128xf32> to vector<5x128xf32>
    %972 = arith.mulf %970, %971 : vector<5x128xf32>
    %973 = arith.addf %966, %972 : vector<5x128xf32>
    %c0_877 = arith.constant 0 : index
    %c0_878 = arith.constant 0 : index
    %c0_879 = arith.constant 0 : index
    %c0_880 = arith.constant 0 : index
    %c27 = arith.constant 27 : index
    %974 = vector.load %arg2[%c0_877, %c0_878, %c0_879, %c0_880, %c27] : memref<1x1x2x6x32xf32, #tpu.memory_space<vmem>>, vector<1x1x1x5x1xf32>
    %975 = vector.shape_cast %974 : vector<1x1x1x5x1xf32> to vector<5x1xf32>
    %c7_881 = arith.constant 7 : index
    %c0_882 = arith.constant 0 : index
    %976 = vector.load %arg3[%c7_881, %c0_882] : memref<9x128xf32, #tpu.memory_space<vmem>>, vector<1x128xf32>
    %977 = vector.broadcast %975 : vector<5x1xf32> to vector<5x128xf32>
    %978 = vector.broadcast %976 : vector<1x128xf32> to vector<5x128xf32>
    %979 = arith.mulf %977, %978 : vector<5x128xf32>
    %980 = arith.addf %973, %979 : vector<5x128xf32>
    %c0_883 = arith.constant 0 : index
    %c0_884 = arith.constant 0 : index
    %c0_885 = arith.constant 0 : index
    %c1_886 = arith.constant 1 : index
    %c24_887 = arith.constant 24 : index
    %981 = vector.load %arg2[%c0_883, %c0_884, %c0_885, %c1_886, %c24_887] : memref<1x1x2x6x32xf32, #tpu.memory_space<vmem>>, vector<1x1x1x5x1xf32>
    %982 = vector.shape_cast %981 : vector<1x1x1x5x1xf32> to vector<5x1xf32>
    %c8_888 = arith.constant 8 : index
    %c0_889 = arith.constant 0 : index
    %983 = vector.load %arg3[%c8_888, %c0_889] : memref<9x128xf32, #tpu.memory_space<vmem>>, vector<1x128xf32>
    %984 = vector.broadcast %982 : vector<5x1xf32> to vector<5x128xf32>
    %985 = vector.broadcast %983 : vector<1x128xf32> to vector<5x128xf32>
    %986 = arith.mulf %984, %985 : vector<5x128xf32>
    %987 = arith.addf %980, %986 : vector<5x128xf32>
    %c0_890 = arith.constant 0 : index
    %c0_891 = arith.constant 0 : index
    %988 = vector.load %arg4[%c0_890, %c0_891] : memref<1x128xf32, #tpu.memory_space<vmem>>, vector<1x128xf32>
    %989 = vector.broadcast %988 : vector<1x128xf32> to vector<5x128xf32>
    %990 = arith.addf %987, %989 : vector<5x128xf32>
    %cst_892 = arith.constant 0.000000e+00 : f32
    %991 = vector.broadcast %cst_892 : f32 to vector<5x128xf32>
    %992 = arith.maximumf %990, %991 : vector<5x128xf32>
    %cst_893 = arith.constant 0.000000e+00 : f32
    %993 = vector.shape_cast %550 : vector<5x1xi1> to vector<5x1xi1>
    %994 = vector.broadcast %993 : vector<5x1xi1> to vector<5x128xi1>
    %995 = vector.broadcast %cst_893 : f32 to vector<5x128xf32>
    %996 = arith.select %994, %992, %995 : vector<5x128xi1>, vector<5x128xf32>
    %997 = arith.truncf %996 : vector<5x128xf32> to vector<5x128xbf16>
    %c1_894 = arith.constant 1 : index
    %c5_895 = arith.constant 5 : index
    %c0_896 = arith.constant 0 : index
    %c0_897 = arith.constant 0 : index
    %998 = vector.load %arg11[%c1_894, %c5_895, %c0_896, %c0_897] : memref<2x7x5x128xbf16, #tpu.memory_space<vmem>>, vector<1x1x5x128xbf16>
    %999 = vector.shape_cast %998 : vector<1x1x5x128xbf16> to vector<5x128xbf16>
    %1000 = vector.shape_cast %997 : vector<5x128xbf16> to vector<1x1x5x128xbf16>
    tpu.vector_store %arg11[%c1_894, %c5_895, %c0_896, %c0_897], %1000 {strides = array<i32>} : memref<2x7x5x128xbf16, #tpu.memory_space<vmem>>, vector<1x1x5x128xbf16>,
    %c0_898 = arith.constant 0 : index
    %c0_899 = arith.constant 0 : index
    %c0_900 = arith.constant 0 : index
    %c0_901 = arith.constant 0 : index
    %c26_902 = arith.constant 26 : index
    %1001 = vector.load %arg2[%c0_898, %c0_899, %c0_900, %c0_901, %c26_902] : memref<1x1x2x6x32xf32, #tpu.memory_space<vmem>>, vector<1x1x1x5x1xf32>
    %1002 = vector.shape_cast %1001 : vector<1x1x1x5x1xf32> to vector<5x1xf32>
    %c0_903 = arith.constant 0 : index
    %c0_904 = arith.constant 0 : index
    %1003 = vector.load %arg3[%c0_903, %c0_904] : memref<9x128xf32, #tpu.memory_space<vmem>>, vector<1x128xf32>
    %1004 = vector.broadcast %1002 : vector<5x1xf32> to vector<5x128xf32>
    %1005 = vector.broadcast %1003 : vector<1x128xf32> to vector<5x128xf32>
    %1006 = arith.mulf %1004, %1005 : vector<5x128xf32>
    %c0_905 = arith.constant 0 : index
    %c0_906 = arith.constant 0 : index
    %c0_907 = arith.constant 0 : index
    %c0_908 = arith.constant 0 : index
    %c27_909 = arith.constant 27 : index
    %1007 = vector.load %arg2[%c0_905, %c0_906, %c0_907, %c0_908, %c27_909] : memref<1x1x2x6x32xf32, #tpu.memory_space<vmem>>, vector<1x1x1x5x1xf32>
    %1008 = vector.shape_cast %1007 : vector<1x1x1x5x1xf32> to vector<5x1xf32>
    %c1_910 = arith.constant 1 : index
    %c0_911 = arith.constant 0 : index
    %1009 = vector.load %arg3[%c1_910, %c0_911] : memref<9x128xf32, #tpu.memory_space<vmem>>, vector<1x128xf32>
    %1010 = vector.broadcast %1008 : vector<5x1xf32> to vector<5x128xf32>
    %1011 = vector.broadcast %1009 : vector<1x128xf32> to vector<5x128xf32>
    %1012 = arith.mulf %1010, %1011 : vector<5x128xf32>
    %1013 = arith.addf %1006, %1012 : vector<5x128xf32>
    %c0_912 = arith.constant 0 : index
    %c0_913 = arith.constant 0 : index
    %c0_914 = arith.constant 0 : index
    %c1_915 = arith.constant 1 : index
    %c24_916 = arith.constant 24 : index
    %1014 = vector.load %arg2[%c0_912, %c0_913, %c0_914, %c1_915, %c24_916] : memref<1x1x2x6x32xf32, #tpu.memory_space<vmem>>, vector<1x1x1x5x1xf32>
    %1015 = vector.shape_cast %1014 : vector<1x1x1x5x1xf32> to vector<5x1xf32>
    %c2_917 = arith.constant 2 : index
    %c0_918 = arith.constant 0 : index
    %1016 = vector.load %arg3[%c2_917, %c0_918] : memref<9x128xf32, #tpu.memory_space<vmem>>, vector<1x128xf32>
    %1017 = vector.broadcast %1015 : vector<5x1xf32> to vector<5x128xf32>
    %1018 = vector.broadcast %1016 : vector<1x128xf32> to vector<5x128xf32>
    %1019 = arith.mulf %1017, %1018 : vector<5x128xf32>
    %1020 = arith.addf %1013, %1019 : vector<5x128xf32>
    %c0_919 = arith.constant 0 : index
    %c0_920 = arith.constant 0 : index
    %c1_921 = arith.constant 1 : index
    %c0_922 = arith.constant 0 : index
    %c26_923 = arith.constant 26 : index
    %1021 = vector.load %arg2[%c0_919, %c0_920, %c1_921, %c0_922, %c26_923] : memref<1x1x2x6x32xf32, #tpu.memory_space<vmem>>, vector<1x1x1x5x1xf32>
    %1022 = vector.shape_cast %1021 : vector<1x1x1x5x1xf32> to vector<5x1xf32>
    %c3_924 = arith.constant 3 : index
    %c0_925 = arith.constant 0 : index
    %1023 = vector.load %arg3[%c3_924, %c0_925] : memref<9x128xf32, #tpu.memory_space<vmem>>, vector<1x128xf32>
    %1024 = vector.broadcast %1022 : vector<5x1xf32> to vector<5x128xf32>
    %1025 = vector.broadcast %1023 : vector<1x128xf32> to vector<5x128xf32>
    %1026 = arith.mulf %1024, %1025 : vector<5x128xf32>
    %1027 = arith.addf %1020, %1026 : vector<5x128xf32>
    %c0_926 = arith.constant 0 : index
    %c0_927 = arith.constant 0 : index
    %c1_928 = arith.constant 1 : index
    %c0_929 = arith.constant 0 : index
    %c27_930 = arith.constant 27 : index
    %1028 = vector.load %arg2[%c0_926, %c0_927, %c1_928, %c0_929, %c27_930] : memref<1x1x2x6x32xf32, #tpu.memory_space<vmem>>, vector<1x1x1x5x1xf32>
    %1029 = vector.shape_cast %1028 : vector<1x1x1x5x1xf32> to vector<5x1xf32>
    %c4_931 = arith.constant 4 : index
    %c0_932 = arith.constant 0 : index
    %1030 = vector.load %arg3[%c4_931, %c0_932] : memref<9x128xf32, #tpu.memory_space<vmem>>, vector<1x128xf32>
    %1031 = vector.broadcast %1029 : vector<5x1xf32> to vector<5x128xf32>
    %1032 = vector.broadcast %1030 : vector<1x128xf32> to vector<5x128xf32>
    %1033 = arith.mulf %1031, %1032 : vector<5x128xf32>
    %1034 = arith.addf %1027, %1033 : vector<5x128xf32>
    %c0_933 = arith.constant 0 : index
    %c0_934 = arith.constant 0 : index
    %c1_935 = arith.constant 1 : index
    %c1_936 = arith.constant 1 : index
    %c24_937 = arith.constant 24 : index
    %1035 = vector.load %arg2[%c0_933, %c0_934, %c1_935, %c1_936, %c24_937] : memref<1x1x2x6x32xf32, #tpu.memory_space<vmem>>, vector<1x1x1x5x1xf32>
    %1036 = vector.shape_cast %1035 : vector<1x1x1x5x1xf32> to vector<5x1xf32>
    %c5_938 = arith.constant 5 : index
    %c0_939 = arith.constant 0 : index
    %1037 = vector.load %arg3[%c5_938, %c0_939] : memref<9x128xf32, #tpu.memory_space<vmem>>, vector<1x128xf32>
    %1038 = vector.broadcast %1036 : vector<5x1xf32> to vector<5x128xf32>
    %1039 = vector.broadcast %1037 : vector<1x128xf32> to vector<5x128xf32>
    %1040 = arith.mulf %1038, %1039 : vector<5x128xf32>
    %1041 = arith.addf %1034, %1040 : vector<5x128xf32>
    %c0_940 = arith.constant 0 : index
    %c0_941 = arith.constant 0 : index
    %c0_942 = arith.constant 0 : index
    %c0_943 = arith.constant 0 : index
    %c30_944 = arith.constant 30 : index
    %1042 = vector.load %arg2[%c0_940, %c0_941, %c0_942, %c0_943, %c30_944] : memref<1x1x2x6x32xf32, #tpu.memory_space<vmem>>, vector<1x1x1x5x1xf32>
    %1043 = vector.shape_cast %1042 : vector<1x1x1x5x1xf32> to vector<5x1xf32>
    %c6_945 = arith.constant 6 : index
    %c0_946 = arith.constant 0 : index
    %1044 = vector.load %arg3[%c6_945, %c0_946] : memref<9x128xf32, #tpu.memory_space<vmem>>, vector<1x128xf32>
    %1045 = vector.broadcast %1043 : vector<5x1xf32> to vector<5x128xf32>
    %1046 = vector.broadcast %1044 : vector<1x128xf32> to vector<5x128xf32>
    %1047 = arith.mulf %1045, %1046 : vector<5x128xf32>
    %1048 = arith.addf %1041, %1047 : vector<5x128xf32>
    %c0_947 = arith.constant 0 : index
    %c0_948 = arith.constant 0 : index
    %c0_949 = arith.constant 0 : index
    %c0_950 = arith.constant 0 : index
    %c31 = arith.constant 31 : index
    %1049 = vector.load %arg2[%c0_947, %c0_948, %c0_949, %c0_950, %c31] : memref<1x1x2x6x32xf32, #tpu.memory_space<vmem>>, vector<1x1x1x5x1xf32>
    %1050 = vector.shape_cast %1049 : vector<1x1x1x5x1xf32> to vector<5x1xf32>
    %c7_951 = arith.constant 7 : index
    %c0_952 = arith.constant 0 : index
    %1051 = vector.load %arg3[%c7_951, %c0_952] : memref<9x128xf32, #tpu.memory_space<vmem>>, vector<1x128xf32>
    %1052 = vector.broadcast %1050 : vector<5x1xf32> to vector<5x128xf32>
    %1053 = vector.broadcast %1051 : vector<1x128xf32> to vector<5x128xf32>
    %1054 = arith.mulf %1052, %1053 : vector<5x128xf32>
    %1055 = arith.addf %1048, %1054 : vector<5x128xf32>
    %c0_953 = arith.constant 0 : index
    %c0_954 = arith.constant 0 : index
    %c0_955 = arith.constant 0 : index
    %c1_956 = arith.constant 1 : index
    %c28_957 = arith.constant 28 : index
    %1056 = vector.load %arg2[%c0_953, %c0_954, %c0_955, %c1_956, %c28_957] : memref<1x1x2x6x32xf32, #tpu.memory_space<vmem>>, vector<1x1x1x5x1xf32>
    %1057 = vector.shape_cast %1056 : vector<1x1x1x5x1xf32> to vector<5x1xf32>
    %c8_958 = arith.constant 8 : index
    %c0_959 = arith.constant 0 : index
    %1058 = vector.load %arg3[%c8_958, %c0_959] : memref<9x128xf32, #tpu.memory_space<vmem>>, vector<1x128xf32>
    %1059 = vector.broadcast %1057 : vector<5x1xf32> to vector<5x128xf32>
    %1060 = vector.broadcast %1058 : vector<1x128xf32> to vector<5x128xf32>
    %1061 = arith.mulf %1059, %1060 : vector<5x128xf32>
    %1062 = arith.addf %1055, %1061 : vector<5x128xf32>
    %c0_960 = arith.constant 0 : index
    %c0_961 = arith.constant 0 : index
    %1063 = vector.load %arg4[%c0_960, %c0_961] : memref<1x128xf32, #tpu.memory_space<vmem>>, vector<1x128xf32>
    %1064 = vector.broadcast %1063 : vector<1x128xf32> to vector<5x128xf32>
    %1065 = arith.addf %1062, %1064 : vector<5x128xf32>
    %cst_962 = arith.constant 0.000000e+00 : f32
    %1066 = vector.broadcast %cst_962 : f32 to vector<5x128xf32>
    %1067 = arith.maximumf %1065, %1066 : vector<5x128xf32>
    %cst_963 = arith.constant 0.000000e+00 : f32
    %1068 = vector.shape_cast %550 : vector<5x1xi1> to vector<5x1xi1>
    %1069 = vector.broadcast %1068 : vector<5x1xi1> to vector<5x128xi1>
    %1070 = vector.broadcast %cst_963 : f32 to vector<5x128xf32>
    %1071 = arith.select %1069, %1067, %1070 : vector<5x128xi1>, vector<5x128xf32>
    %1072 = arith.truncf %1071 : vector<5x128xf32> to vector<5x128xbf16>
    %c1_964 = arith.constant 1 : index
    %c6_965 = arith.constant 6 : index
    %c0_966 = arith.constant 0 : index
    %c0_967 = arith.constant 0 : index
    %1073 = vector.load %arg11[%c1_964, %c6_965, %c0_966, %c0_967] : memref<2x7x5x128xbf16, #tpu.memory_space<vmem>>, vector<1x1x5x128xbf16>
    %1074 = vector.shape_cast %1073 : vector<1x1x5x128xbf16> to vector<5x128xbf16>
    %1075 = vector.shape_cast %1072 : vector<5x128xbf16> to vector<1x1x5x128xbf16>
    tpu.vector_store %arg11[%c1_964, %c6_965, %c0_966, %c0_967], %1075 {strides = array<i32>} : memref<2x7x5x128xbf16, #tpu.memory_space<vmem>>, vector<1x1x5x128xbf16>,
    %c0_968 = arith.constant 0 : index
    %c0_969 = arith.constant 0 : index
    %1076 = vector.load %arg6[%c0_968, %c0_969] : memref<1x128xf32, #tpu.memory_space<vmem>>, vector<1x128xf32>
    %c0_970 = arith.constant 0 : index
    %c0_971 = arith.constant 0 : index
    %c0_972 = arith.constant 0 : index
    %c0_973 = arith.constant 0 : index
    %1077 = vector.load %arg11[%c0_970, %c0_971, %c0_972, %c0_973] : memref<2x7x5x128xbf16, #tpu.memory_space<vmem>>, vector<1x1x4x128xbf16>
    %1078 = vector.shape_cast %1077 : vector<1x1x4x128xbf16> to vector<4x128xbf16>
    %c0_974 = arith.constant 0 : index
    %c0_975 = arith.constant 0 : index
    %c0_976 = arith.constant 0 : index
    %1079 = vector.load %arg5[%c0_974, %c0_975, %c0_976] : memref<9x128x128xbf16, #tpu.memory_space<vmem>>, vector<1x128x128xbf16>
    %1080 = vector.shape_cast %1079 : vector<1x128x128xbf16> to vector<128x128xbf16>
    %cst_977 = arith.constant dense<0.000000e+00> : vector<4x128xf32>
    %1081 = tpu.matmul %1078, %1080, %cst_977 {dimension_numbers = #tpu.dot_dimension_numbers<[1], [0], [0], [1], [0, 0, 1, 1], [], []>} : vector<4x128xbf16>, vector<128x128xbf16>, vector<4x128xf32> -> vector<4x128xf32>
    %c1_978 = arith.constant 1 : index
    %c0_979 = arith.constant 0 : index
    %c0_980 = arith.constant 0 : index
    %c0_981 = arith.constant 0 : index
    %1082 = vector.load %arg11[%c1_978, %c0_979, %c0_980, %c0_981] : memref<2x7x5x128xbf16, #tpu.memory_space<vmem>>, vector<1x1x4x128xbf16>
    %1083 = vector.shape_cast %1082 : vector<1x1x4x128xbf16> to vector<4x128xbf16>
    %c1_982 = arith.constant 1 : index
    %c0_983 = arith.constant 0 : index
    %c0_984 = arith.constant 0 : index
    %1084 = vector.load %arg5[%c1_982, %c0_983, %c0_984] : memref<9x128x128xbf16, #tpu.memory_space<vmem>>, vector<1x128x128xbf16>
    %1085 = vector.shape_cast %1084 : vector<1x128x128xbf16> to vector<128x128xbf16>
    %cst_985 = arith.constant dense<0.000000e+00> : vector<4x128xf32>
    %1086 = tpu.matmul %1083, %1085, %cst_985 {dimension_numbers = #tpu.dot_dimension_numbers<[1], [0], [0], [1], [0, 0, 1, 1], [], []>} : vector<4x128xbf16>, vector<128x128xbf16>, vector<4x128xf32> -> vector<4x128xf32>
    %1087 = arith.addf %1081, %1086 : vector<4x128xf32>
    %c0_986 = arith.constant 0 : index
    %c0_987 = arith.constant 0 : index
    %c1_988 = arith.constant 1 : index
    %c0_989 = arith.constant 0 : index
    %1088 = vector.load %arg11[%c0_986, %c0_987, %c1_988, %c0_989] : memref<2x7x5x128xbf16, #tpu.memory_space<vmem>>, vector<1x1x4x128xbf16>
    %1089 = vector.shape_cast %1088 : vector<1x1x4x128xbf16> to vector<4x128xbf16>
    %c2_990 = arith.constant 2 : index
    %c0_991 = arith.constant 0 : index
    %c0_992 = arith.constant 0 : index
    %1090 = vector.load %arg5[%c2_990, %c0_991, %c0_992] : memref<9x128x128xbf16, #tpu.memory_space<vmem>>, vector<1x128x128xbf16>
    %1091 = vector.shape_cast %1090 : vector<1x128x128xbf16> to vector<128x128xbf16>
    %cst_993 = arith.constant dense<0.000000e+00> : vector<4x128xf32>
    %1092 = tpu.matmul %1089, %1091, %cst_993 {dimension_numbers = #tpu.dot_dimension_numbers<[1], [0], [0], [1], [0, 0, 1, 1], [], []>} : vector<4x128xbf16>, vector<128x128xbf16>, vector<4x128xf32> -> vector<4x128xf32>
    %1093 = arith.addf %1087, %1092 : vector<4x128xf32>
    %c0_994 = arith.constant 0 : index
    %c1_995 = arith.constant 1 : index
    %c0_996 = arith.constant 0 : index
    %c0_997 = arith.constant 0 : index
    %1094 = vector.load %arg11[%c0_994, %c1_995, %c0_996, %c0_997] : memref<2x7x5x128xbf16, #tpu.memory_space<vmem>>, vector<1x1x4x128xbf16>
    %1095 = vector.shape_cast %1094 : vector<1x1x4x128xbf16> to vector<4x128xbf16>
    %c3_998 = arith.constant 3 : index
    %c0_999 = arith.constant 0 : index
    %c0_1000 = arith.constant 0 : index
    %1096 = vector.load %arg5[%c3_998, %c0_999, %c0_1000] : memref<9x128x128xbf16, #tpu.memory_space<vmem>>, vector<1x128x128xbf16>
    %1097 = vector.shape_cast %1096 : vector<1x128x128xbf16> to vector<128x128xbf16>
    %cst_1001 = arith.constant dense<0.000000e+00> : vector<4x128xf32>
    %1098 = tpu.matmul %1095, %1097, %cst_1001 {dimension_numbers = #tpu.dot_dimension_numbers<[1], [0], [0], [1], [0, 0, 1, 1], [], []>} : vector<4x128xbf16>, vector<128x128xbf16>, vector<4x128xf32> -> vector<4x128xf32>
    %1099 = arith.addf %1093, %1098 : vector<4x128xf32>
    %c1_1002 = arith.constant 1 : index
    %c1_1003 = arith.constant 1 : index
    %c0_1004 = arith.constant 0 : index
    %c0_1005 = arith.constant 0 : index
    %1100 = vector.load %arg11[%c1_1002, %c1_1003, %c0_1004, %c0_1005] : memref<2x7x5x128xbf16, #tpu.memory_space<vmem>>, vector<1x1x4x128xbf16>
    %1101 = vector.shape_cast %1100 : vector<1x1x4x128xbf16> to vector<4x128xbf16>
    %c4_1006 = arith.constant 4 : index
    %c0_1007 = arith.constant 0 : index
    %c0_1008 = arith.constant 0 : index
    %1102 = vector.load %arg5[%c4_1006, %c0_1007, %c0_1008] : memref<9x128x128xbf16, #tpu.memory_space<vmem>>, vector<1x128x128xbf16>
    %1103 = vector.shape_cast %1102 : vector<1x128x128xbf16> to vector<128x128xbf16>
    %cst_1009 = arith.constant dense<0.000000e+00> : vector<4x128xf32>
    %1104 = tpu.matmul %1101, %1103, %cst_1009 {dimension_numbers = #tpu.dot_dimension_numbers<[1], [0], [0], [1], [0, 0, 1, 1], [], []>} : vector<4x128xbf16>, vector<128x128xbf16>, vector<4x128xf32> -> vector<4x128xf32>
    %1105 = arith.addf %1099, %1104 : vector<4x128xf32>
    %c0_1010 = arith.constant 0 : index
    %c1_1011 = arith.constant 1 : index
    %c1_1012 = arith.constant 1 : index
    %c0_1013 = arith.constant 0 : index
    %1106 = vector.load %arg11[%c0_1010, %c1_1011, %c1_1012, %c0_1013] : memref<2x7x5x128xbf16, #tpu.memory_space<vmem>>, vector<1x1x4x128xbf16>
    %1107 = vector.shape_cast %1106 : vector<1x1x4x128xbf16> to vector<4x128xbf16>
    %c5_1014 = arith.constant 5 : index
    %c0_1015 = arith.constant 0 : index
    %c0_1016 = arith.constant 0 : index
    %1108 = vector.load %arg5[%c5_1014, %c0_1015, %c0_1016] : memref<9x128x128xbf16, #tpu.memory_space<vmem>>, vector<1x128x128xbf16>
    %1109 = vector.shape_cast %1108 : vector<1x128x128xbf16> to vector<128x128xbf16>
    %cst_1017 = arith.constant dense<0.000000e+00> : vector<4x128xf32>
    %1110 = tpu.matmul %1107, %1109, %cst_1017 {dimension_numbers = #tpu.dot_dimension_numbers<[1], [0], [0], [1], [0, 0, 1, 1], [], []>} : vector<4x128xbf16>, vector<128x128xbf16>, vector<4x128xf32> -> vector<4x128xf32>
    %1111 = arith.addf %1105, %1110 : vector<4x128xf32>
    %c0_1018 = arith.constant 0 : index
    %c2_1019 = arith.constant 2 : index
    %c0_1020 = arith.constant 0 : index
    %c0_1021 = arith.constant 0 : index
    %1112 = vector.load %arg11[%c0_1018, %c2_1019, %c0_1020, %c0_1021] : memref<2x7x5x128xbf16, #tpu.memory_space<vmem>>, vector<1x1x4x128xbf16>
    %1113 = vector.shape_cast %1112 : vector<1x1x4x128xbf16> to vector<4x128xbf16>
    %c6_1022 = arith.constant 6 : index
    %c0_1023 = arith.constant 0 : index
    %c0_1024 = arith.constant 0 : index
    %1114 = vector.load %arg5[%c6_1022, %c0_1023, %c0_1024] : memref<9x128x128xbf16, #tpu.memory_space<vmem>>, vector<1x128x128xbf16>
    %1115 = vector.shape_cast %1114 : vector<1x128x128xbf16> to vector<128x128xbf16>
    %cst_1025 = arith.constant dense<0.000000e+00> : vector<4x128xf32>
    %1116 = tpu.matmul %1113, %1115, %cst_1025 {dimension_numbers = #tpu.dot_dimension_numbers<[1], [0], [0], [1], [0, 0, 1, 1], [], []>} : vector<4x128xbf16>, vector<128x128xbf16>, vector<4x128xf32> -> vector<4x128xf32>
    %1117 = arith.addf %1111, %1116 : vector<4x128xf32>
    %c1_1026 = arith.constant 1 : index
    %c2_1027 = arith.constant 2 : index
    %c0_1028 = arith.constant 0 : index
    %c0_1029 = arith.constant 0 : index
    %1118 = vector.load %arg11[%c1_1026, %c2_1027, %c0_1028, %c0_1029] : memref<2x7x5x128xbf16, #tpu.memory_space<vmem>>, vector<1x1x4x128xbf16>
    %1119 = vector.shape_cast %1118 : vector<1x1x4x128xbf16> to vector<4x128xbf16>
    %c7_1030 = arith.constant 7 : index
    %c0_1031 = arith.constant 0 : index
    %c0_1032 = arith.constant 0 : index
    %1120 = vector.load %arg5[%c7_1030, %c0_1031, %c0_1032] : memref<9x128x128xbf16, #tpu.memory_space<vmem>>, vector<1x128x128xbf16>
    %1121 = vector.shape_cast %1120 : vector<1x128x128xbf16> to vector<128x128xbf16>
    %cst_1033 = arith.constant dense<0.000000e+00> : vector<4x128xf32>
    %1122 = tpu.matmul %1119, %1121, %cst_1033 {dimension_numbers = #tpu.dot_dimension_numbers<[1], [0], [0], [1], [0, 0, 1, 1], [], []>} : vector<4x128xbf16>, vector<128x128xbf16>, vector<4x128xf32> -> vector<4x128xf32>
    %1123 = arith.addf %1117, %1122 : vector<4x128xf32>
    %c0_1034 = arith.constant 0 : index
    %c2_1035 = arith.constant 2 : index
    %c1_1036 = arith.constant 1 : index
    %c0_1037 = arith.constant 0 : index
    %1124 = vector.load %arg11[%c0_1034, %c2_1035, %c1_1036, %c0_1037] : memref<2x7x5x128xbf16, #tpu.memory_space<vmem>>, vector<1x1x4x128xbf16>
    %1125 = vector.shape_cast %1124 : vector<1x1x4x128xbf16> to vector<4x128xbf16>
    %c8_1038 = arith.constant 8 : index
    %c0_1039 = arith.constant 0 : index
    %c0_1040 = arith.constant 0 : index
    %1126 = vector.load %arg5[%c8_1038, %c0_1039, %c0_1040] : memref<9x128x128xbf16, #tpu.memory_space<vmem>>, vector<1x128x128xbf16>
    %1127 = vector.shape_cast %1126 : vector<1x128x128xbf16> to vector<128x128xbf16>
    %cst_1041 = arith.constant dense<0.000000e+00> : vector<4x128xf32>
    %1128 = tpu.matmul %1125, %1127, %cst_1041 {dimension_numbers = #tpu.dot_dimension_numbers<[1], [0], [0], [1], [0, 0, 1, 1], [], []>} : vector<4x128xbf16>, vector<128x128xbf16>, vector<4x128xf32> -> vector<4x128xf32>
    %1129 = arith.addf %1123, %1128 : vector<4x128xf32>
    %1130 = vector.broadcast %1076 : vector<1x128xf32> to vector<4x128xf32>
    %1131 = arith.addf %1129, %1130 : vector<4x128xf32>
    %cst_1042 = arith.constant 0.000000e+00 : f32
    %1132 = vector.broadcast %cst_1042 : f32 to vector<4x128xf32>
    %1133 = arith.maximumf %1131, %1132 : vector<4x128xf32>
    %1134 = arith.truncf %1133 : vector<4x128xf32> to vector<4x128xbf16>
    %c0_1043 = arith.constant 0 : index
    %c0_1044 = arith.constant 0 : index
    %1135 = vector.load %arg12[%c0_1043, %c0_1044] : memref<4x384xbf16, #tpu.memory_space<vmem>>, vector<4x128xbf16>
    tpu.vector_store %arg12[%c0_1043, %c0_1044], %1134 {strides = array<i32>} : memref<4x384xbf16, #tpu.memory_space<vmem>>, vector<4x128xbf16>,
    %c0_1045 = arith.constant 0 : index
    %c2_1046 = arith.constant 2 : index
    %c0_1047 = arith.constant 0 : index
    %c0_1048 = arith.constant 0 : index
    %1136 = vector.load %arg11[%c0_1045, %c2_1046, %c0_1047, %c0_1048] : memref<2x7x5x128xbf16, #tpu.memory_space<vmem>>, vector<1x1x4x128xbf16>
    %1137 = vector.shape_cast %1136 : vector<1x1x4x128xbf16> to vector<4x128xbf16>
    %c0_1049 = arith.constant 0 : index
    %c0_1050 = arith.constant 0 : index
    %c0_1051 = arith.constant 0 : index
    %1138 = vector.load %arg5[%c0_1049, %c0_1050, %c0_1051] : memref<9x128x128xbf16, #tpu.memory_space<vmem>>, vector<1x128x128xbf16>
    %1139 = vector.shape_cast %1138 : vector<1x128x128xbf16> to vector<128x128xbf16>
    %cst_1052 = arith.constant dense<0.000000e+00> : vector<4x128xf32>
    %1140 = tpu.matmul %1137, %1139, %cst_1052 {dimension_numbers = #tpu.dot_dimension_numbers<[1], [0], [0], [1], [0, 0, 1, 1], [], []>} : vector<4x128xbf16>, vector<128x128xbf16>, vector<4x128xf32> -> vector<4x128xf32>
    %c1_1053 = arith.constant 1 : index
    %c2_1054 = arith.constant 2 : index
    %c0_1055 = arith.constant 0 : index
    %c0_1056 = arith.constant 0 : index
    %1141 = vector.load %arg11[%c1_1053, %c2_1054, %c0_1055, %c0_1056] : memref<2x7x5x128xbf16, #tpu.memory_space<vmem>>, vector<1x1x4x128xbf16>
    %1142 = vector.shape_cast %1141 : vector<1x1x4x128xbf16> to vector<4x128xbf16>
    %c1_1057 = arith.constant 1 : index
    %c0_1058 = arith.constant 0 : index
    %c0_1059 = arith.constant 0 : index
    %1143 = vector.load %arg5[%c1_1057, %c0_1058, %c0_1059] : memref<9x128x128xbf16, #tpu.memory_space<vmem>>, vector<1x128x128xbf16>
    %1144 = vector.shape_cast %1143 : vector<1x128x128xbf16> to vector<128x128xbf16>
    %cst_1060 = arith.constant dense<0.000000e+00> : vector<4x128xf32>
    %1145 = tpu.matmul %1142, %1144, %cst_1060 {dimension_numbers = #tpu.dot_dimension_numbers<[1], [0], [0], [1], [0, 0, 1, 1], [], []>} : vector<4x128xbf16>, vector<128x128xbf16>, vector<4x128xf32> -> vector<4x128xf32>
    %1146 = arith.addf %1140, %1145 : vector<4x128xf32>
    %c0_1061 = arith.constant 0 : index
    %c2_1062 = arith.constant 2 : index
    %c1_1063 = arith.constant 1 : index
    %c0_1064 = arith.constant 0 : index
    %1147 = vector.load %arg11[%c0_1061, %c2_1062, %c1_1063, %c0_1064] : memref<2x7x5x128xbf16, #tpu.memory_space<vmem>>, vector<1x1x4x128xbf16>
    %1148 = vector.shape_cast %1147 : vector<1x1x4x128xbf16> to vector<4x128xbf16>
    %c2_1065 = arith.constant 2 : index
    %c0_1066 = arith.constant 0 : index
    %c0_1067 = arith.constant 0 : index
    %1149 = vector.load %arg5[%c2_1065, %c0_1066, %c0_1067] : memref<9x128x128xbf16, #tpu.memory_space<vmem>>, vector<1x128x128xbf16>
    %1150 = vector.shape_cast %1149 : vector<1x128x128xbf16> to vector<128x128xbf16>
    %cst_1068 = arith.constant dense<0.000000e+00> : vector<4x128xf32>
    %1151 = tpu.matmul %1148, %1150, %cst_1068 {dimension_numbers = #tpu.dot_dimension_numbers<[1], [0], [0], [1], [0, 0, 1, 1], [], []>} : vector<4x128xbf16>, vector<128x128xbf16>, vector<4x128xf32> -> vector<4x128xf32>
    %1152 = arith.addf %1146, %1151 : vector<4x128xf32>
    %c0_1069 = arith.constant 0 : index
    %c3_1070 = arith.constant 3 : index
    %c0_1071 = arith.constant 0 : index
    %c0_1072 = arith.constant 0 : index
    %1153 = vector.load %arg11[%c0_1069, %c3_1070, %c0_1071, %c0_1072] : memref<2x7x5x128xbf16, #tpu.memory_space<vmem>>, vector<1x1x4x128xbf16>
    %1154 = vector.shape_cast %1153 : vector<1x1x4x128xbf16> to vector<4x128xbf16>
    %c3_1073 = arith.constant 3 : index
    %c0_1074 = arith.constant 0 : index
    %c0_1075 = arith.constant 0 : index
    %1155 = vector.load %arg5[%c3_1073, %c0_1074, %c0_1075] : memref<9x128x128xbf16, #tpu.memory_space<vmem>>, vector<1x128x128xbf16>
    %1156 = vector.shape_cast %1155 : vector<1x128x128xbf16> to vector<128x128xbf16>
    %cst_1076 = arith.constant dense<0.000000e+00> : vector<4x128xf32>
    %1157 = tpu.matmul %1154, %1156, %cst_1076 {dimension_numbers = #tpu.dot_dimension_numbers<[1], [0], [0], [1], [0, 0, 1, 1], [], []>} : vector<4x128xbf16>, vector<128x128xbf16>, vector<4x128xf32> -> vector<4x128xf32>
    %1158 = arith.addf %1152, %1157 : vector<4x128xf32>
    %c1_1077 = arith.constant 1 : index
    %c3_1078 = arith.constant 3 : index
    %c0_1079 = arith.constant 0 : index
    %c0_1080 = arith.constant 0 : index
    %1159 = vector.load %arg11[%c1_1077, %c3_1078, %c0_1079, %c0_1080] : memref<2x7x5x128xbf16, #tpu.memory_space<vmem>>, vector<1x1x4x128xbf16>
    %1160 = vector.shape_cast %1159 : vector<1x1x4x128xbf16> to vector<4x128xbf16>
    %c4_1081 = arith.constant 4 : index
    %c0_1082 = arith.constant 0 : index
    %c0_1083 = arith.constant 0 : index
    %1161 = vector.load %arg5[%c4_1081, %c0_1082, %c0_1083] : memref<9x128x128xbf16, #tpu.memory_space<vmem>>, vector<1x128x128xbf16>
    %1162 = vector.shape_cast %1161 : vector<1x128x128xbf16> to vector<128x128xbf16>
    %cst_1084 = arith.constant dense<0.000000e+00> : vector<4x128xf32>
    %1163 = tpu.matmul %1160, %1162, %cst_1084 {dimension_numbers = #tpu.dot_dimension_numbers<[1], [0], [0], [1], [0, 0, 1, 1], [], []>} : vector<4x128xbf16>, vector<128x128xbf16>, vector<4x128xf32> -> vector<4x128xf32>
    %1164 = arith.addf %1158, %1163 : vector<4x128xf32>
    %c0_1085 = arith.constant 0 : index
    %c3_1086 = arith.constant 3 : index
    %c1_1087 = arith.constant 1 : index
    %c0_1088 = arith.constant 0 : index
    %1165 = vector.load %arg11[%c0_1085, %c3_1086, %c1_1087, %c0_1088] : memref<2x7x5x128xbf16, #tpu.memory_space<vmem>>, vector<1x1x4x128xbf16>
    %1166 = vector.shape_cast %1165 : vector<1x1x4x128xbf16> to vector<4x128xbf16>
    %c5_1089 = arith.constant 5 : index
    %c0_1090 = arith.constant 0 : index
    %c0_1091 = arith.constant 0 : index
    %1167 = vector.load %arg5[%c5_1089, %c0_1090, %c0_1091] : memref<9x128x128xbf16, #tpu.memory_space<vmem>>, vector<1x128x128xbf16>
    %1168 = vector.shape_cast %1167 : vector<1x128x128xbf16> to vector<128x128xbf16>
    %cst_1092 = arith.constant dense<0.000000e+00> : vector<4x128xf32>
    %1169 = tpu.matmul %1166, %1168, %cst_1092 {dimension_numbers = #tpu.dot_dimension_numbers<[1], [0], [0], [1], [0, 0, 1, 1], [], []>} : vector<4x128xbf16>, vector<128x128xbf16>, vector<4x128xf32> -> vector<4x128xf32>
    %1170 = arith.addf %1164, %1169 : vector<4x128xf32>
    %c0_1093 = arith.constant 0 : index
    %c4_1094 = arith.constant 4 : index
    %c0_1095 = arith.constant 0 : index
    %c0_1096 = arith.constant 0 : index
    %1171 = vector.load %arg11[%c0_1093, %c4_1094, %c0_1095, %c0_1096] : memref<2x7x5x128xbf16, #tpu.memory_space<vmem>>, vector<1x1x4x128xbf16>
    %1172 = vector.shape_cast %1171 : vector<1x1x4x128xbf16> to vector<4x128xbf16>
    %c6_1097 = arith.constant 6 : index
    %c0_1098 = arith.constant 0 : index
    %c0_1099 = arith.constant 0 : index
    %1173 = vector.load %arg5[%c6_1097, %c0_1098, %c0_1099] : memref<9x128x128xbf16, #tpu.memory_space<vmem>>, vector<1x128x128xbf16>
    %1174 = vector.shape_cast %1173 : vector<1x128x128xbf16> to vector<128x128xbf16>
    %cst_1100 = arith.constant dense<0.000000e+00> : vector<4x128xf32>
    %1175 = tpu.matmul %1172, %1174, %cst_1100 {dimension_numbers = #tpu.dot_dimension_numbers<[1], [0], [0], [1], [0, 0, 1, 1], [], []>} : vector<4x128xbf16>, vector<128x128xbf16>, vector<4x128xf32> -> vector<4x128xf32>
    %1176 = arith.addf %1170, %1175 : vector<4x128xf32>
    %c1_1101 = arith.constant 1 : index
    %c4_1102 = arith.constant 4 : index
    %c0_1103 = arith.constant 0 : index
    %c0_1104 = arith.constant 0 : index
    %1177 = vector.load %arg11[%c1_1101, %c4_1102, %c0_1103, %c0_1104] : memref<2x7x5x128xbf16, #tpu.memory_space<vmem>>, vector<1x1x4x128xbf16>
    %1178 = vector.shape_cast %1177 : vector<1x1x4x128xbf16> to vector<4x128xbf16>
    %c7_1105 = arith.constant 7 : index
    %c0_1106 = arith.constant 0 : index
    %c0_1107 = arith.constant 0 : index
    %1179 = vector.load %arg5[%c7_1105, %c0_1106, %c0_1107] : memref<9x128x128xbf16, #tpu.memory_space<vmem>>, vector<1x128x128xbf16>
    %1180 = vector.shape_cast %1179 : vector<1x128x128xbf16> to vector<128x128xbf16>
    %cst_1108 = arith.constant dense<0.000000e+00> : vector<4x128xf32>
    %1181 = tpu.matmul %1178, %1180, %cst_1108 {dimension_numbers = #tpu.dot_dimension_numbers<[1], [0], [0], [1], [0, 0, 1, 1], [], []>} : vector<4x128xbf16>, vector<128x128xbf16>, vector<4x128xf32> -> vector<4x128xf32>
    %1182 = arith.addf %1176, %1181 : vector<4x128xf32>
    %c0_1109 = arith.constant 0 : index
    %c4_1110 = arith.constant 4 : index
    %c1_1111 = arith.constant 1 : index
    %c0_1112 = arith.constant 0 : index
    %1183 = vector.load %arg11[%c0_1109, %c4_1110, %c1_1111, %c0_1112] : memref<2x7x5x128xbf16, #tpu.memory_space<vmem>>, vector<1x1x4x128xbf16>
    %1184 = vector.shape_cast %1183 : vector<1x1x4x128xbf16> to vector<4x128xbf16>
    %c8_1113 = arith.constant 8 : index
    %c0_1114 = arith.constant 0 : index
    %c0_1115 = arith.constant 0 : index
    %1185 = vector.load %arg5[%c8_1113, %c0_1114, %c0_1115] : memref<9x128x128xbf16, #tpu.memory_space<vmem>>, vector<1x128x128xbf16>
    %1186 = vector.shape_cast %1185 : vector<1x128x128xbf16> to vector<128x128xbf16>
    %cst_1116 = arith.constant dense<0.000000e+00> : vector<4x128xf32>
    %1187 = tpu.matmul %1184, %1186, %cst_1116 {dimension_numbers = #tpu.dot_dimension_numbers<[1], [0], [0], [1], [0, 0, 1, 1], [], []>} : vector<4x128xbf16>, vector<128x128xbf16>, vector<4x128xf32> -> vector<4x128xf32>
    %1188 = arith.addf %1182, %1187 : vector<4x128xf32>
    %1189 = vector.broadcast %1076 : vector<1x128xf32> to vector<4x128xf32>
    %1190 = arith.addf %1188, %1189 : vector<4x128xf32>
    %cst_1117 = arith.constant 0.000000e+00 : f32
    %1191 = vector.broadcast %cst_1117 : f32 to vector<4x128xf32>
    %1192 = arith.maximumf %1190, %1191 : vector<4x128xf32>
    %1193 = arith.truncf %1192 : vector<4x128xf32> to vector<4x128xbf16>
    %c0_1118 = arith.constant 0 : index
    %c128 = arith.constant 128 : index
    %1194 = vector.load %arg12[%c0_1118, %c128] : memref<4x384xbf16, #tpu.memory_space<vmem>>, vector<4x128xbf16>
    tpu.vector_store %arg12[%c0_1118, %c128], %1193 {strides = array<i32>} : memref<4x384xbf16, #tpu.memory_space<vmem>>, vector<4x128xbf16>,
    %c0_1119 = arith.constant 0 : index
    %c4_1120 = arith.constant 4 : index
    %c0_1121 = arith.constant 0 : index
    %c0_1122 = arith.constant 0 : index
    %1195 = vector.load %arg11[%c0_1119, %c4_1120, %c0_1121, %c0_1122] : memref<2x7x5x128xbf16, #tpu.memory_space<vmem>>, vector<1x1x4x128xbf16>
    %1196 = vector.shape_cast %1195 : vector<1x1x4x128xbf16> to vector<4x128xbf16>
    %c0_1123 = arith.constant 0 : index
    %c0_1124 = arith.constant 0 : index
    %c0_1125 = arith.constant 0 : index
    %1197 = vector.load %arg5[%c0_1123, %c0_1124, %c0_1125] : memref<9x128x128xbf16, #tpu.memory_space<vmem>>, vector<1x128x128xbf16>
    %1198 = vector.shape_cast %1197 : vector<1x128x128xbf16> to vector<128x128xbf16>
    %cst_1126 = arith.constant dense<0.000000e+00> : vector<4x128xf32>
    %1199 = tpu.matmul %1196, %1198, %cst_1126 {dimension_numbers = #tpu.dot_dimension_numbers<[1], [0], [0], [1], [0, 0, 1, 1], [], []>} : vector<4x128xbf16>, vector<128x128xbf16>, vector<4x128xf32> -> vector<4x128xf32>
    %c1_1127 = arith.constant 1 : index
    %c4_1128 = arith.constant 4 : index
    %c0_1129 = arith.constant 0 : index
    %c0_1130 = arith.constant 0 : index
    %1200 = vector.load %arg11[%c1_1127, %c4_1128, %c0_1129, %c0_1130] : memref<2x7x5x128xbf16, #tpu.memory_space<vmem>>, vector<1x1x4x128xbf16>
    %1201 = vector.shape_cast %1200 : vector<1x1x4x128xbf16> to vector<4x128xbf16>
    %c1_1131 = arith.constant 1 : index
    %c0_1132 = arith.constant 0 : index
    %c0_1133 = arith.constant 0 : index
    %1202 = vector.load %arg5[%c1_1131, %c0_1132, %c0_1133] : memref<9x128x128xbf16, #tpu.memory_space<vmem>>, vector<1x128x128xbf16>
    %1203 = vector.shape_cast %1202 : vector<1x128x128xbf16> to vector<128x128xbf16>
    %cst_1134 = arith.constant dense<0.000000e+00> : vector<4x128xf32>
    %1204 = tpu.matmul %1201, %1203, %cst_1134 {dimension_numbers = #tpu.dot_dimension_numbers<[1], [0], [0], [1], [0, 0, 1, 1], [], []>} : vector<4x128xbf16>, vector<128x128xbf16>, vector<4x128xf32> -> vector<4x128xf32>
    %1205 = arith.addf %1199, %1204 : vector<4x128xf32>
    %c0_1135 = arith.constant 0 : index
    %c4_1136 = arith.constant 4 : index
    %c1_1137 = arith.constant 1 : index
    %c0_1138 = arith.constant 0 : index
    %1206 = vector.load %arg11[%c0_1135, %c4_1136, %c1_1137, %c0_1138] : memref<2x7x5x128xbf16, #tpu.memory_space<vmem>>, vector<1x1x4x128xbf16>
    %1207 = vector.shape_cast %1206 : vector<1x1x4x128xbf16> to vector<4x128xbf16>
    %c2_1139 = arith.constant 2 : index
    %c0_1140 = arith.constant 0 : index
    %c0_1141 = arith.constant 0 : index
    %1208 = vector.load %arg5[%c2_1139, %c0_1140, %c0_1141] : memref<9x128x128xbf16, #tpu.memory_space<vmem>>, vector<1x128x128xbf16>
    %1209 = vector.shape_cast %1208 : vector<1x128x128xbf16> to vector<128x128xbf16>
    %cst_1142 = arith.constant dense<0.000000e+00> : vector<4x128xf32>
    %1210 = tpu.matmul %1207, %1209, %cst_1142 {dimension_numbers = #tpu.dot_dimension_numbers<[1], [0], [0], [1], [0, 0, 1, 1], [], []>} : vector<4x128xbf16>, vector<128x128xbf16>, vector<4x128xf32> -> vector<4x128xf32>
    %1211 = arith.addf %1205, %1210 : vector<4x128xf32>
    %c0_1143 = arith.constant 0 : index
    %c5_1144 = arith.constant 5 : index
    %c0_1145 = arith.constant 0 : index
    %c0_1146 = arith.constant 0 : index
    %1212 = vector.load %arg11[%c0_1143, %c5_1144, %c0_1145, %c0_1146] : memref<2x7x5x128xbf16, #tpu.memory_space<vmem>>, vector<1x1x4x128xbf16>
    %1213 = vector.shape_cast %1212 : vector<1x1x4x128xbf16> to vector<4x128xbf16>
    %c3_1147 = arith.constant 3 : index
    %c0_1148 = arith.constant 0 : index
    %c0_1149 = arith.constant 0 : index
    %1214 = vector.load %arg5[%c3_1147, %c0_1148, %c0_1149] : memref<9x128x128xbf16, #tpu.memory_space<vmem>>, vector<1x128x128xbf16>
    %1215 = vector.shape_cast %1214 : vector<1x128x128xbf16> to vector<128x128xbf16>
    %cst_1150 = arith.constant dense<0.000000e+00> : vector<4x128xf32>
    %1216 = tpu.matmul %1213, %1215, %cst_1150 {dimension_numbers = #tpu.dot_dimension_numbers<[1], [0], [0], [1], [0, 0, 1, 1], [], []>} : vector<4x128xbf16>, vector<128x128xbf16>, vector<4x128xf32> -> vector<4x128xf32>
    %1217 = arith.addf %1211, %1216 : vector<4x128xf32>
    %c1_1151 = arith.constant 1 : index
    %c5_1152 = arith.constant 5 : index
    %c0_1153 = arith.constant 0 : index
    %c0_1154 = arith.constant 0 : index
    %1218 = vector.load %arg11[%c1_1151, %c5_1152, %c0_1153, %c0_1154] : memref<2x7x5x128xbf16, #tpu.memory_space<vmem>>, vector<1x1x4x128xbf16>
    %1219 = vector.shape_cast %1218 : vector<1x1x4x128xbf16> to vector<4x128xbf16>
    %c4_1155 = arith.constant 4 : index
    %c0_1156 = arith.constant 0 : index
    %c0_1157 = arith.constant 0 : index
    %1220 = vector.load %arg5[%c4_1155, %c0_1156, %c0_1157] : memref<9x128x128xbf16, #tpu.memory_space<vmem>>, vector<1x128x128xbf16>
    %1221 = vector.shape_cast %1220 : vector<1x128x128xbf16> to vector<128x128xbf16>
    %cst_1158 = arith.constant dense<0.000000e+00> : vector<4x128xf32>
    %1222 = tpu.matmul %1219, %1221, %cst_1158 {dimension_numbers = #tpu.dot_dimension_numbers<[1], [0], [0], [1], [0, 0, 1, 1], [], []>} : vector<4x128xbf16>, vector<128x128xbf16>, vector<4x128xf32> -> vector<4x128xf32>
    %1223 = arith.addf %1217, %1222 : vector<4x128xf32>
    %c0_1159 = arith.constant 0 : index
    %c5_1160 = arith.constant 5 : index
    %c1_1161 = arith.constant 1 : index
    %c0_1162 = arith.constant 0 : index
    %1224 = vector.load %arg11[%c0_1159, %c5_1160, %c1_1161, %c0_1162] : memref<2x7x5x128xbf16, #tpu.memory_space<vmem>>, vector<1x1x4x128xbf16>
    %1225 = vector.shape_cast %1224 : vector<1x1x4x128xbf16> to vector<4x128xbf16>
    %c5_1163 = arith.constant 5 : index
    %c0_1164 = arith.constant 0 : index
    %c0_1165 = arith.constant 0 : index
    %1226 = vector.load %arg5[%c5_1163, %c0_1164, %c0_1165] : memref<9x128x128xbf16, #tpu.memory_space<vmem>>, vector<1x128x128xbf16>
    %1227 = vector.shape_cast %1226 : vector<1x128x128xbf16> to vector<128x128xbf16>
    %cst_1166 = arith.constant dense<0.000000e+00> : vector<4x128xf32>
    %1228 = tpu.matmul %1225, %1227, %cst_1166 {dimension_numbers = #tpu.dot_dimension_numbers<[1], [0], [0], [1], [0, 0, 1, 1], [], []>} : vector<4x128xbf16>, vector<128x128xbf16>, vector<4x128xf32> -> vector<4x128xf32>
    %1229 = arith.addf %1223, %1228 : vector<4x128xf32>
    %c0_1167 = arith.constant 0 : index
    %c6_1168 = arith.constant 6 : index
    %c0_1169 = arith.constant 0 : index
    %c0_1170 = arith.constant 0 : index
    %1230 = vector.load %arg11[%c0_1167, %c6_1168, %c0_1169, %c0_1170] : memref<2x7x5x128xbf16, #tpu.memory_space<vmem>>, vector<1x1x4x128xbf16>
    %1231 = vector.shape_cast %1230 : vector<1x1x4x128xbf16> to vector<4x128xbf16>
    %c6_1171 = arith.constant 6 : index
    %c0_1172 = arith.constant 0 : index
    %c0_1173 = arith.constant 0 : index
    %1232 = vector.load %arg5[%c6_1171, %c0_1172, %c0_1173] : memref<9x128x128xbf16, #tpu.memory_space<vmem>>, vector<1x128x128xbf16>
    %1233 = vector.shape_cast %1232 : vector<1x128x128xbf16> to vector<128x128xbf16>
    %cst_1174 = arith.constant dense<0.000000e+00> : vector<4x128xf32>
    %1234 = tpu.matmul %1231, %1233, %cst_1174 {dimension_numbers = #tpu.dot_dimension_numbers<[1], [0], [0], [1], [0, 0, 1, 1], [], []>} : vector<4x128xbf16>, vector<128x128xbf16>, vector<4x128xf32> -> vector<4x128xf32>
    %1235 = arith.addf %1229, %1234 : vector<4x128xf32>
    %c1_1175 = arith.constant 1 : index
    %c6_1176 = arith.constant 6 : index
    %c0_1177 = arith.constant 0 : index
    %c0_1178 = arith.constant 0 : index
    %1236 = vector.load %arg11[%c1_1175, %c6_1176, %c0_1177, %c0_1178] : memref<2x7x5x128xbf16, #tpu.memory_space<vmem>>, vector<1x1x4x128xbf16>
    %1237 = vector.shape_cast %1236 : vector<1x1x4x128xbf16> to vector<4x128xbf16>
    %c7_1179 = arith.constant 7 : index
    %c0_1180 = arith.constant 0 : index
    %c0_1181 = arith.constant 0 : index
    %1238 = vector.load %arg5[%c7_1179, %c0_1180, %c0_1181] : memref<9x128x128xbf16, #tpu.memory_space<vmem>>, vector<1x128x128xbf16>
    %1239 = vector.shape_cast %1238 : vector<1x128x128xbf16> to vector<128x128xbf16>
    %cst_1182 = arith.constant dense<0.000000e+00> : vector<4x128xf32>
    %1240 = tpu.matmul %1237, %1239, %cst_1182 {dimension_numbers = #tpu.dot_dimension_numbers<[1], [0], [0], [1], [0, 0, 1, 1], [], []>} : vector<4x128xbf16>, vector<128x128xbf16>, vector<4x128xf32> -> vector<4x128xf32>
    %1241 = arith.addf %1235, %1240 : vector<4x128xf32>
    %c0_1183 = arith.constant 0 : index
    %c6_1184 = arith.constant 6 : index
    %c1_1185 = arith.constant 1 : index
    %c0_1186 = arith.constant 0 : index
    %1242 = vector.load %arg11[%c0_1183, %c6_1184, %c1_1185, %c0_1186] : memref<2x7x5x128xbf16, #tpu.memory_space<vmem>>, vector<1x1x4x128xbf16>
    %1243 = vector.shape_cast %1242 : vector<1x1x4x128xbf16> to vector<4x128xbf16>
    %c8_1187 = arith.constant 8 : index
    %c0_1188 = arith.constant 0 : index
    %c0_1189 = arith.constant 0 : index
    %1244 = vector.load %arg5[%c8_1187, %c0_1188, %c0_1189] : memref<9x128x128xbf16, #tpu.memory_space<vmem>>, vector<1x128x128xbf16>
    %1245 = vector.shape_cast %1244 : vector<1x128x128xbf16> to vector<128x128xbf16>
    %cst_1190 = arith.constant dense<0.000000e+00> : vector<4x128xf32>
    %1246 = tpu.matmul %1243, %1245, %cst_1190 {dimension_numbers = #tpu.dot_dimension_numbers<[1], [0], [0], [1], [0, 0, 1, 1], [], []>} : vector<4x128xbf16>, vector<128x128xbf16>, vector<4x128xf32> -> vector<4x128xf32>
    %1247 = arith.addf %1241, %1246 : vector<4x128xf32>
    %1248 = vector.broadcast %1076 : vector<1x128xf32> to vector<4x128xf32>
    %1249 = arith.addf %1247, %1248 : vector<4x128xf32>
    %cst_1191 = arith.constant 0.000000e+00 : f32
    %1250 = vector.broadcast %cst_1191 : f32 to vector<4x128xf32>
    %1251 = arith.maximumf %1249, %1250 : vector<4x128xf32>
    %1252 = arith.truncf %1251 : vector<4x128xf32> to vector<4x128xbf16>
    %c0_1192 = arith.constant 0 : index
    %c256 = arith.constant 256 : index
    %1253 = vector.load %arg12[%c0_1192, %c256] : memref<4x384xbf16, #tpu.memory_space<vmem>>, vector<4x128xbf16>
    tpu.vector_store %arg12[%c0_1192, %c256], %1252 {strides = array<i32>} : memref<4x384xbf16, #tpu.memory_space<vmem>>, vector<4x128xbf16>,
    %c0_1193 = arith.constant 0 : index
    %c0_1194 = arith.constant 0 : index
    %1254 = vector.load %arg12[%c0_1193, %c0_1194] : memref<4x384xbf16, #tpu.memory_space<vmem>>, vector<4x384xbf16>
    %c0_1195 = arith.constant 0 : index
    %c0_1196 = arith.constant 0 : index
    %1255 = vector.load %arg7[%c0_1195, %c0_1196] : memref<384x128xbf16, #tpu.memory_space<vmem>>, vector<384x128xbf16>
    %cst_1197 = arith.constant dense<0.000000e+00> : vector<4x128xf32>
    %1256 = tpu.matmul %1254, %1255, %cst_1197 {dimension_numbers = #tpu.dot_dimension_numbers<[1], [0], [0], [1], [0, 0, 1, 1], [], []>} : vector<4x384xbf16>, vector<384x128xbf16>, vector<4x128xf32> -> vector<4x128xf32>
    %c0_1198 = arith.constant 0 : index
    %c0_1199 = arith.constant 0 : index
    %1257 = vector.load %arg8[%c0_1198, %c0_1199] : memref<1x128xf32, #tpu.memory_space<vmem>>, vector<1x128xf32>
    %1258 = vector.broadcast %1257 : vector<1x128xf32> to vector<4x128xf32>
    %1259 = arith.addf %1256, %1258 : vector<4x128xf32>
    %c0_1200 = arith.constant 0 : index
    %c0_1201 = arith.constant 0 : index
    %c0_1202 = arith.constant 0 : index
    %1260 = vector.load %arg9[%c0_1200, %c0_1201, %c0_1202] : memref<1x4x128xf32, #tpu.memory_space<vmem>>, vector<1x4x128xf32>
    %1261 = vector.shape_cast %1260 : vector<1x4x128xf32> to vector<4x128xf32>
    %1262 = arith.addf %1259, %1261 : vector<4x128xf32>
    %c0_1203 = arith.constant 0 : index
    %c0_1204 = arith.constant 0 : index
    %c0_1205 = arith.constant 0 : index
    %1263 = vector.load %arg10[%c0_1203, %c0_1204, %c0_1205] : memref<1x4x128xf32, #tpu.memory_space<vmem>>, vector<1x4x128xf32>
    %1264 = vector.shape_cast %1263 : vector<1x4x128xf32> to vector<4x128xf32>
    %1265 = vector.shape_cast %1262 : vector<4x128xf32> to vector<1x4x128xf32>
    tpu.vector_store %arg10[%c0_1203, %c0_1204, %c0_1205], %1265 {strides = array<i32>} : memref<1x4x128xf32, #tpu.memory_space<vmem>>, vector<1x4x128xf32>,
    return
  }
  func.func @transform_0(%arg0: i32, %arg1: i32) -> (i32, i32, i32, i32, i32) {
    %c0_i32 = arith.constant 0 : i32
    %c0_i32_0 = arith.constant 0 : i32
    %c0_i32_1 = arith.constant 0 : i32
    %c0_i32_2 = arith.constant 0 : i32
    return %arg0, %arg1, %c0_i32, %c0_i32_0, %c0_i32_1 : i32, i32, i32, i32, i32
  }
  func.func @transform_1(%arg0: i32, %arg1: i32) -> (i32, i32) {
    %c0_i32 = arith.constant 0 : i32
    %c0_i32_0 = arith.constant 0 : i32
    %c0_i32_1 = arith.constant 0 : i32
    return %c0_i32, %c0_i32_0 : i32, i32
  }
  func.func @transform_2(%arg0: i32, %arg1: i32) -> (i32, i32) {
    %c0_i32 = arith.constant 0 : i32
    %c0_i32_0 = arith.constant 0 : i32
    %c0_i32_1 = arith.constant 0 : i32
    return %c0_i32, %c0_i32_0 : i32, i32
  }
  func.func @transform_3(%arg0: i32, %arg1: i32) -> (i32, i32, i32) {
    %c0_i32 = arith.constant 0 : i32
    %c0_i32_0 = arith.constant 0 : i32
    %c0_i32_1 = arith.constant 0 : i32
    %c0_i32_2 = arith.constant 0 : i32
    return %c0_i32, %c0_i32_0, %c0_i32_1 : i32, i32, i32
  }
  func.func @transform_4(%arg0: i32, %arg1: i32) -> (i32, i32) {
    %c0_i32 = arith.constant 0 : i32
    %c0_i32_0 = arith.constant 0 : i32
    %c0_i32_1 = arith.constant 0 : i32
    return %c0_i32, %c0_i32_0 : i32, i32
  }
  func.func @transform_5(%arg0: i32, %arg1: i32) -> (i32, i32) {
    %c0_i32 = arith.constant 0 : i32
    %c0_i32_0 = arith.constant 0 : i32
    %c0_i32_1 = arith.constant 0 : i32
    return %c0_i32, %c0_i32_0 : i32, i32
  }
  func.func @transform_6(%arg0: i32, %arg1: i32) -> (i32, i32) {
    %c0_i32 = arith.constant 0 : i32
    %c0_i32_0 = arith.constant 0 : i32
    %c0_i32_1 = arith.constant 0 : i32
    return %c0_i32, %c0_i32_0 : i32, i32
  }
  func.func @transform_7(%arg0: i32, %arg1: i32) -> (i32, i32, i32) {
    %c0_i32 = arith.constant 0 : i32
    %c0_i32_0 = arith.constant 0 : i32
    %c0_i32_1 = arith.constant 0 : i32
    return %arg1, %c0_i32, %c0_i32_0 : i32, i32, i32
  }
  func.func @transform_8(%arg0: i32, %arg1: i32) -> (i32, i32, i32) {
    %c0_i32 = arith.constant 0 : i32
    %c0_i32_0 = arith.constant 0 : i32
    return %arg0, %arg1, %c0_i32 : i32, i32, i32
  }
}

</mosaic_0001>

<bundles_post_ra>
// kernel: tpu_custom_call.1
= control target key start
LH: loop header
LB: loop body
LE: loop exit
PB: predicated region body
PF: predicated region fallthrough
CT: control target
= control target key end

     0   :  { %13 = vsyncpa [#allocation5], 0  ;;  %s8646_s0 = inlined_call_operand.vmem [shape: f32[2,1,2,6,32], index: 0, kind: input, shape index: {}]   ;;  %s8647_s1 = inlined_call_operand.vmem [shape: f32[9,128], index: 1, kind: input, shape index: {}]   ;;  %s8648_s2 = inlined_call_operand.vmem [shape: f32[1,128], index: 2, kind: input, shape index: {}]   ;;  %s8649_s3 = inlined_call_operand.hbm [shape: bf16[9,128,128], index: 3, kind: input, shape index: {}]   ;;  %s8650_s4 = inlined_call_operand.vmem [shape: f32[1,128], index: 4, kind: input, shape index: {}]   ;;  %s8651_s5 = inlined_call_operand.hbm [shape: bf16[384,128], index: 5, kind: input, shape index: {}]   ;;  %s8652_s6 = inlined_call_operand.vmem [shape: f32[1,128], index: 6, kind: input, shape index: {}]   ;;  %s8653_s7 = inlined_call_operand.vmem [shape: f32[1,4,128], index: 7, kind: input, shape index: {}]   ;;  %s8654_s8 = inlined_call_operand.hbm [shape: f32[2,4,128], index: 8, kind: output, shape index: {}]  }
   0x1   :  { %14 = vsyncpa [#allocation8], 0 }
   0x2   :  { %15 = vsyncpa [#allocation6], 0 }
   0x3   :  { %17 = vsyncpa [#allocation6 + $0x1], 0  ;;  %s7462_s27 = smov 0   ;;  %s7464_s28 = smov 0  }
   0x4   :  { %s7466_s29 = smov 0   ;;  %s7468_s30 = smov 0  }
   0x5   :  { %s7470_s9 = smov 0   ;;  %s7472_s10 = smov 0  }
   0x6 LB: > { %8662 = sst [smem:[#allocation13_spill]] %s7363_s29  ;;  %s5481_s11 = sadd.s32 4294967295, %s7375_s10   ;;  %s7375_s10 = sphi %s7472_s10, %s23_s10   ;;  %s7371_s9 = sphi %s7470_s9, %s8684_s9   ;;  %s7367_s30 = sphi %s7468_s30, %s8683_s30   ;;  %s7363_s29 = sphi %s7466_s29, %s8682_s29   ;;  %s7359_s28 = sphi %s7464_s28, %s8686_s28   ;;  %s7355_s27 = sphi %s7462_s27, %s8685_s27  }
   0x7   : > { %8663 = sst [smem:[#allocation14_spill]] %s7371_s9  ;;  %s5482_s12 = sadd.s32 4294967294, %s7375_s10  }
   0x8   : > { %s35_s13 = sadd.s32 1, %s7371_s9  ;;  %s224_s14 = sadd.s32 1, %s7363_s29 }
   0x9   : > { %p37_p0 = scmp.ge.s32.totalorder %s35_s13, 2  ;;  %p234_p1 = scmp.ne.s32.totalorder %s7363_s29, %s7359_s28 }
   0xa   : > { %p235_p2 = scmp.eq.s32.totalorder %s5481_s11, 1  ;;  %p240_p3 = scmp.ne.s32.totalorder %s7359_s28, %s7355_s27 }
   0xb   : > { %s8688_s13 = smov (%p37_p0, %s35_s13), 0  ;;  %p241_p5 = scmp.eq.s32.totalorder %s5482_s12, 1 }
   0xc   : > { %8664 = sst [smem:[#allocation15_spill]] %s8688_s13  ;;  %p7502_p4 = por %p235_p2, %p234_p1 }
   0xd   : > { %s219_s16 = ssub.s32 %s7371_s9, %s8688_s13  ;;  %p5483_p6 = scmp.ge.s32.totalorder %s7375_s10, 1 }
   0xe   : > { %s8665_s15 = scalar_select %p7502_p4, 1, 0 }
   0xf   : > { %p222_p7 = scmp.eq.s32.totalorder %s219_s16, 0  ;;  %p7509_p8 = por %p241_p5, %p240_p3 }
  0x10   : > { %p248_p9 = scmp.lt.s32.totalorder %s7375_s10, 3  ;;  %p7521_p11 = scmp.eq.s32.totalorder %s5481_s11, 0 }
  0x11   : > { %s8666_s17 = scalar_select %p7509_p8, 1, 0 }
  0x12   : > { %s7515_s18 = scalar_select %p222_p7, %s7363_s29, %s224_s14  }
  0x13   : > { %p7517_p10 = pnand %p5483_p6, %p248_p9  ;;  %s7377_s21 = smov [#allocation4]  }
  0x14   : > { %8667 = sst [smem:[#allocation16_spill]] %s7515_s18  ;;  %s266_s22 = sshll.u32 %s7377_s21, 4  ;;  %s267_s22 = int_to_ptr.vmem [resolvable:$true] %s266_s22 }
  0x15   : > { %s8668_s19 = scalar_select %p7517_p10, 1, 0 }
  0x16   : > { %s8669_s20 = scalar_select %p7521_p11, 1, 0 }
  0x17   : > { %p6755_p12 = pneg %p7517_p10  ;;  %s7378_s24 = smov [#allocation7]  }
  0x18   : > { %s282_s25 = sshll.u32 %s7378_s24, 4  ;;  %s7233_s12 = scalar_lea.hbm %s8649_s3, 9216  ;;  %s7533_s25 = int_to_ptr.vmem [resolvable:$true] %s282_s25 }
  0x19   : > { %p7529_p13 = pnand %p7521_p11, %p6755_p12  ;;  %p7234_p0 = scmp.ne.s32.totalorder %s8649_s3, %s7233_s12 }
  0x1a   : > { %p7240_p5 = scmp.lt.u32.totalorder %s7233_s12, %s8649_s3 }
  0x1b   : > { %p7235_p1 = pneg %p7529_p13 }
  0x1d   : > { %p7236_p2 = pnand %p7235_p1, %p7234_p0 }
  0x1f   : > { %p7237_p3 = pneg %p7236_p2 }
  0x21   : > { %p7242_p6 = pnand %p7240_p5, %p7237_p3 }
  0x23   : > { %7245 = shalt.err (!%p7242_p6)
}
  0x24   : > { %s7246_s24 = scalar_lea.vmem %s267_s22, 9216  ;;  %p7254_p8 = scmp.lt.s32.totalorder %s267_s22, %s267_s22 }
  0x25   : > { %p7247_p7 = scmp.ne.s32.totalorder %s267_s22, %s7246_s24  ;;  %p7255_p4 = scmp.lt.s32.totalorder %s7246_s24, %s7246_s24 }
  0x27   : > { %p7249_p9 = pnand %p7247_p7, %p7235_p1  ;;  %p7256_p11 = por %p7255_p4, %p7254_p8 }
  0x29   : > { %p7250_p12 = pneg %p7249_p9 }
  0x2b   : > { %p7257_p10 = pnand %p7256_p11, %p7250_p12 }
  0x2d   : > { %7260 = shalt.err (!%p7257_p10)
}
  0x2e   : > { %s7379_s26 = smov 64   ;;  %s7380_s11 = smov 4  }
  0x2f   : > { %6758 = dma.hbm_to_vmem [thread:$0]  (!%p7529_p13), %s8649_s3, 9216, %s267_s22, [#allocation5], %s7379_s26, %s7379_s26, %s7380_s11  }
  0x30   : > { %s7261_s21 = scalar_lea.hbm %s8651_s5, 3072 }
  0x31   : > { %p7262_p0 = scmp.ne.s32.totalorder %s8651_s5, %s7261_s21  ;;  %p7268_p10 = scmp.lt.u32.totalorder %s7261_s21, %s8651_s5 }
  0x33   : > { %p7264_p4 = pnand %p7262_p0, %p7235_p1 }
  0x35   : > { %p7265_p8 = pneg %p7264_p4 }
  0x37   : > { %p7270_p11 = pnand %p7268_p10, %p7265_p8 }
  0x39   : > { %7273 = shalt.err (!%p7270_p11)
}
  0x3a   : > { %s7274_s22 = scalar_lea.vmem %s7533_s25, 3072  ;;  %p7282_p6 = scmp.lt.s32.totalorder %s7533_s25, %s7533_s25 }
  0x3b   : > { %p7275_p2 = scmp.ne.s32.totalorder %s7533_s25, %s7274_s22  ;;  %p7283_p7 = scmp.lt.s32.totalorder %s7274_s22, %s7274_s22 }
  0x3d   : > { %p7277_p3 = pnand %p7275_p2, %p7235_p1  ;;  %p7284_p9 = por %p7283_p7, %p7282_p6 }
  0x3f   : > { %p7278_p5 = pneg %p7277_p3 }
  0x41   : > { %p7285_p12 = pnand %p7284_p9, %p7278_p5 }
  0x43   : > { %7288 = shalt.err (!%p7285_p12)
}
  0x44   : > { %6761 = dma.hbm_to_vmem [thread:$0]  (!%p7529_p13), %s8651_s5, 3072, %s7533_s25, [#allocation8], %s7379_s26, %s7379_s26, %s7380_s11  }
  0x45   : > { %p8671_p0 = scmp.ne.s32.totalorder %s8668_s19, 0 }
  0x46   : > { %p8672_p4 = scmp.ne.s32.totalorder (!%p8671_p0), %s8669_s20, 0 }
  0x47   : > { %320 = sbr.rel (%p8671_p0) target bundleno = 1167 (0x48f), region = 52 }
  0x4e   : > { %7342 = dma.done.wait (%p8672_p4), [#allocation5], 9216  }
  0x4f   : > { %7344 = vsyncadd (%p8672_p4), [#allocation5], 4294958080 }
  0x50   : > { %7346 = dma.done.wait (%p8672_p4), [#allocation8], 3072  }
  0x51   : > { %7348 = vsyncadd (%p8672_p4), [#allocation8], 4294964224  ;;  %p366_p1 = scmp.lt.s32.totalorder %s7367_s30, 1  ;;  %v7381_v0 = vmov 2   ;;  %v7382_v1 = vmov 0   ;;  %v7383_v5 = vmov 3   ;;  %v380_v58 = vlaneseq }
  0x52   : > { %6858 = vset.pattern.permute.xlu0 %v7381_v0  ;;  %6860 = vset.pattern.permute.xlu1 %v7382_v1  ;;  %v6970_v7 = vld [vmem:[#allocation4 + $0x40] sm:$0xff]   ;;  %v7384_v8 = vmov 0.0   ;;  %v6971_v9 = vld [vmem:[#allocation4 + $0x48] sm:$0xff]   ;;  %v7385_v10 = vmov 6   ;;  %v7386_v11 = vmov 4   ;;  %v6972_v13 = vld [vmem:[#allocation4 + $0x50] sm:$0xff]  }
  0x53   : > { %s367_s18 = scalar_select %p366_p1, %s7367_s30, 1  ;;  %6185 = vmatprep.subr.bf16.mxu0 %v7384_v8  ;;  %6205 = vmatprep.subr.bf16.mxu1 %v7384_v8  ;;  %v7387_v14 = vmov 7   ;;  %v6973_v15 = vld [vmem:[#allocation4 + $0x58] sm:$0xff]   ;;  %v6974_v17 = vld [vmem:[#allocation4 + $0x60] sm:$0xff]   ;;  %v7388_v18 = vmov 5   ;;  %v7389_v19 = vmov 1  }
  0x54   : > { %6186 = vmatpush3.bf16.msra.mxu0 %v6970_v7  ;;  %v6975_v21 = vld [vmem:[#allocation4 + $0x68] sm:$0xff]   ;;  %v6976_v23 = vld [vmem:[#allocation4 + $0x70] sm:$0xff]   ;;  %v6977_v25 = vld [vmem:[#allocation4 + $0x78] sm:$0xff]   ;;  %vm7390_vm0 = vmmov 0   ;;  %v7391_v33 = vmov 10   ;;  %v7392_v36 = vmov 8  }
  0x55   : > { %s5910_s19 = sshll.u32 %s367_s18, 4  ;;  %6187 = vmatprep.subr.bf16.mxu0 %v7384_v8  ;;  %v6978_v26 = vld [vmem:[#allocation4] sm:$0xff]   ;;  %6201 = vmatprep.mubr.msk.bf16.mxu0 %vm7390_vm0, %v7384_v8  ;;  %v6979_v27 = vld [vmem:[#allocation4 + $0x8] sm:$0xff]   ;;  %v6980_v29 = vld [vmem:[#allocation4 + $0x10] sm:$0xff]   ;;  %v7393_v40 = vmov 14   ;;  %v7394_v45 = vmov 15  }
  0x56   : > { %s7598_s26 = scalar_lea.vmem %s8646_s0, %s5910_s19  ;;  %6206 = vmatpush3.bf16.msra.mxu1 %v6978_v26  ;;  %6221 = vmatprep.mubr.msk.bf16.mxu1 %vm7390_vm0, %v7384_v8  ;;  %v6982_v31 = vld [vmem:[#allocation4 + $0x18] sm:$0xff]   ;;  %v6984_v32 = vld [vmem:[#allocation4 + $0x20] sm:$0xff]   ;;  %v6986_v34 = vld [vmem:[#allocation4 + $0x28] sm:$0xff]   ;;  %v7395_v47 = vmov 13   ;;  %v7396_v48 = vmov 9   ;;  %v7397_v50 = vmov 16  }
  0x57   : > { %v1241_v2 = vld [vmem:[%s7598_s26 + $0x1] sm:$0x1f]  ;;  %v5574_v4 = vld [vmem:[%s7598_s26 + $0x8] sm:$0x1f]  ;;  %6207 = vmatprep.subr.bf16.mxu1 %v7384_v8  ;;  %v6988_v38 = vld [vmem:[#allocation4 + $0x30] sm:$0xff]   ;;  %v7398_v51 = vmov 11  }
  0x58   : > { %v1218_v3 = vld [vmem:[%s7598_s26] sm:$0x1f]  ;;  %1245 = vperm.xlu1 %6860, %v1241_v2   ;;  %v5577_v6 = vld [vmem:[%s7598_s26 + $0x9] sm:$0x1f]  ;;  %6188 = vmatpush3.bf16.msra.mxu0 %v6971_v9  ;;  %v6990_v39 = vld [vmem:[#allocation4 + $0x38] sm:$0xff]   ;;  %v7399_v55 = vmov 12  }
  0x59   : > { %1222 = vperm.xlu0 %6858, %v1218_v3   ;;  %v7611_v12 = vld [vmem:[%s7598_s26] sm:$0x1f]  ;;  %6189 = vmatprep.subr.bf16.mxu0 %v7384_v8  ;;  %v5497_v16 = vld [vmem:[%s7598_s26 + $0x8] sm:$0x1f]  ;;  %v7749_v63 = vshrl.u32 %v380_v58, 7  ;;  %vm506_vm3 = vcmask 1042432  }
  0x5a   : > { %v7624_v20 = vld [vmem:[%s7598_s26] sm:$0x1f]  ;;  %v7636_v24 = vld [vmem:[%s7598_s26 + $0x8] sm:$0x1f]  ;;  %6208 = vmatpush3.bf16.msra.mxu1 %v6979_v27  ;;  %vm507_vm4 = vsmask.f32 2304 }
  0x5b   : > { %v7630_v22 = vld [vmem:[%s7598_s26] sm:$0x1f]  ;;  %6209 = vmatprep.subr.bf16.mxu1 %v7384_v8  ;;  %v5589_v30 = vld [vmem:[%s7598_s26 + $0x9] sm:$0x1f]  ;;  %vm7837_vm6 = vmand %vm506_vm3, %vm507_vm4  ;;  %s363_s19 = sand.u32 1, %s7359_s28   ;;  %s5907_s12 = sshll.u32 %s7367_s30, 6 }
  0x5c   : > { %6861 = vset.pattern.permute.xlu1 %v7381_v0  ;;  %6190 = vmatpush3.bf16.msra.mxu0 %v6972_v13  ;;  %v7649_v28 = vld [vmem:[%s7598_s26 + $0x1] sm:$0x1f]  ;;  %v7671_v37 = vld [vmem:[%s7598_s26 + $0x8] sm:$0x1f]  ;;  %v7742_v60 = vld [vmem:[%s8647_s1] ss:$0 sm:$0xff]  ;;  %s8599_s24 = scalar_lea.hbm %s8654_s8, %s5907_s12 }
  0x5d   : > { %6859 = vset.pattern.permute.xlu0 %v7383_v5  ;;  %1258 = vperm.xlu1 %6861, %v5574_v4   ;;  %v7667_v35 = vld [vmem:[%s7598_s26] sm:$0x1f]  ;;  %v5586_v41 = vld [vmem:[%s7598_s26 + $0x8] sm:$0x1f]  ;;  %s5491_s23 = sshll.u32 %s363_s19, 2  ;;  %s5353_s22 = scalar_lea.sflag [#allocation6], %s363_s19 }
  0x5e   : > { %1232 = vperm.xlu0 %6859, %v1218_v3   ;;  %6191 = vmatprep.subr.bf16.mxu0 %v7384_v8  ;;  %v7690_v42 = vld [vmem:[%s7598_s26 + $0x1] sm:$0x1f]  ;;  %v5601_v43 = vld [vmem:[%s7598_s26 + $0x9] sm:$0x1f]  ;;  %s365_s14 = scalar_lea.vmem [#allocation9], %s5491_s23  ;;  %p8679_p8 = scmp.ne.s32.totalorder %s8665_s15, 0 }
  0x5f   : > { %6210 = vmatpush3.bf16.msra.mxu1 %v6980_v29  ;;  %v7697_v44 = vld [vmem:[%s7598_s26] sm:$0x1f]  ;;  %v7708_v49 = vld [vmem:[%s7598_s26 + $0x8] sm:$0x1f]  ;;  %s5367_s16 = sshll.u32 %s365_s14, 4  ;;  %s7416_s30 = smov [#allocation9]   ;;  %s8601_s16 = int_to_ptr.vmem [resolvable:$true] %s5367_s16 }
  0x60   : > { %6192 = vmatpush3.bf16.msra.mxu0 %v6973_v15  ;;  %6211 = vmatprep.subr.bf16.mxu1 %v7384_v8  ;;  %v7703_v46 = vld [vmem:[%s7598_s26] sm:$0x1f]  ;;  %v7723_v53 = vld [vmem:[%s7598_s26 + $0x8] sm:$0x1f]  ;;  %s7289_s29 = scalar_lea.vmem %s8601_s16, 64  ;;  %s7293_s9 = sshll.u32 %s7416_s30, 4  ;;  %s7294_s9 = int_to_ptr.vmem [resolvable:$false] %s7293_s9 }
  0x61   : > { %6862 = vset.pattern.permute.xlu1 %v7383_v5  ;;  %6193 = vmatprep.subr.bf16.mxu0 %v7384_v8  ;;  %v7718_v52 = vld [vmem:[%s7598_s26] sm:$0x1f]  ;;  %v5613_v54 = vld [vmem:[%s7598_s26 + $0x9] sm:$0x1f]  ;;  %v7809_v29 = vld [vmem:[%s8647_s1 + $0x8] ss:$0 sm:$0xff]  ;;  %p7290_p13 = scmp.ne.s32.totalorder %s8601_s16, %s7289_s29  ;;  %p7296_p2 = scmp.lt.s32.totalorder %s8601_s16, %s7294_s9 }
  0x62   : > { %6863 = vset.pattern.permute.xlu0 %v7382_v1  ;;  %1269 = vperm.xlu1 %6862, %v5574_v4   ;;  %v7733_v56 = vld [vmem:[%s7598_s26 + $0x1] sm:$0x1f]  ;;  %v5541_v57 = vld [vmem:[%s7598_s26 + $0x8] sm:$0x1f]  ;;  %s7295_s18 = scalar_lea.vmem %s7294_s9, 128 }
  0x63   : > { %1282 = vperm.xlu0 %6863, %v5577_v6   ;;  %6212 = vmatpush3.bf16.msra.mxu1 %v6982_v31  ;;  %v7747_v62 = vld [vmem:[%s8647_s1 + $0x1] ss:$0 sm:$0xff]  ;;  %v7767_v4 = vld [vmem:[%s8647_s1 + $0x3] ss:$0 sm:$0xff]  ;;  %v5622_v7 = vld [vmem:[%s7598_s26 + $0x8] sm:$0x1f]  ;;  %p7291_p10 = pnand %p7290_p13, %p8679_p8  ;;  %p7297_p3 = scmp.lt.s32.totalorder %s7295_s18, %s7289_s29 }
  0x64   : > { %6194 = vmatpush3.bf16.msra.mxu0 %v6974_v17  ;;  %6213 = vmatprep.subr.bf16.mxu1 %v7384_v8  ;;  %v7799_v27 = vld [vmem:[%s7598_s26] sm:$0x1f]  ;;  %v7166_v58 = vld [vmem:[#allocation4 + $0x188] sm:$0xff]  }
  0x65   : > { %6195 = vmatprep.subr.bf16.mxu0 %v7384_v8  ;;  %p7292_p11 = pneg %p7291_p10  ;;  %p7298_p5 = por %p7297_p3, %p7296_p2 }
  0x66   : > { %6864 = vset.pattern.permute.xlu1 %v7385_v10 }
  0x67   : > { %6866 = vset.pattern.permute.xlu0 %v7386_v11  ;;  %1293 = vperm.xlu1 %6864, %v1218_v3   ;;  %p7299_p6 = pnand %p7298_p5, %p7292_p11 }
  0x68   : > { %1315 = vperm.xlu0 %6866, %v1241_v2   ;;  %6196 = vmatpush3.bf16.msra.mxu0 %v6975_v21  ;;  %v7400_v2 = vmov 18   ;;  %v7790_v21 = vld [vmem:[%s8647_s1 + $0x6] ss:$0 sm:$0xff] }
  0x69   : > { %6197 = vmatprep.subr.bf16.mxu0 %v7384_v8  ;;  %6214 = vmatpush3.bf16.msra.mxu1 %v6984_v32  ;;  %v7402_v32 = vmov 22  }
  0x6a   : > { %6215 = vmatprep.subr.bf16.mxu1 %v7384_v8 }
  0x6b   : > { %6865 = vset.pattern.permute.xlu1 %v7387_v14 }
  0x6c   : > { %6869 = vset.pattern.permute.xlu0 %v7381_v0  ;;  %1304 = vperm.xlu1 %6865, %v1218_v3   ;;  %v7753_v0 = vld [vmem:[%s7598_s26] sm:$0x1f] }
  0x6d   : > { %415 = vperm.xlu0 %6869, %v7611_v12   ;;  %6198 = vmatpush3.bf16.msra.mxu0 %v6976_v23 }
  0x6e   : > { %6199 = vmatprep.subr.bf16.mxu0 %v7384_v8  ;;  %6216 = vmatpush3.bf16.msra.mxu1 %v6986_v34 }
  0x6f   : > { %6217 = vmatprep.subr.bf16.mxu1 %v7384_v8 }
  0x70   : > { %6867 = vset.pattern.permute.xlu1 %v7382_v1 }
  0x71   : > { %451 = vperm.xlu0 %6869, %v5497_v16   ;;  %394 = vperm.xlu1 %6867, %v7611_v12  }
  0x72   : > { %6200 = vmatpush3.bf16.msra.mxu0 %v6977_v25  ;;  %6218 = vmatpush3.bf16.msra.mxu1 %v6988_v38 }
  0x73   : > { %6225 = vmatprep.subr.bf16.mxu0 %v7384_v8  ;;  %6219 = vmatprep.subr.bf16.mxu1 %v7384_v8 }
  0x75   : > { %6873 = vset.pattern.permute.xlu0 %v7388_v18  ;;  %6868 = vset.pattern.permute.xlu1 %v7389_v19 }
  0x76   : > { %473 = vperm.xlu0 %6873, %v7611_v12   ;;  %404 = vperm.xlu1 %6868, %v7611_v12  }
  0x77   : > { %6220 = vmatpush3.bf16.msra.mxu1 %v6990_v39 }
  0x78   : > { %6245 = vmatprep.subr.bf16.mxu1 %v7384_v8 }
  0x7a   : > { %526 = vperm.xlu0 %6873, %v7624_v20   ;;  %6870 = vset.pattern.permute.xlu1 %v7382_v1  ;;  %v7758_v1 = vld [vmem:[%s8647_s1 + $0x2] ss:$0 sm:$0xff] }
  0x7b   : > { %429 = vperm.xlu1 %6870, %v5497_v16  }
  0x7e   : > { %6877 = vset.pattern.permute.xlu0 %v7385_v10 }
  0x7f   : > { %1345 = vperm.xlu0 %6877, %v7630_v22   ;;  %6871 = vset.pattern.permute.xlu1 %v7389_v19 }
  0x80   : > { %440 = vperm.xlu1 %6871, %v5497_v16   ;;  %v7782_v16 = vld [vmem:[%s8647_s1 + $0x5] ss:$0 sm:$0xff] }
  0x83   : > { %572 = vperm.xlu0 %6877, %v7636_v24  }
  0x84   : > { %6872 = vset.pattern.permute.xlu1 %v7386_v11 }
  0x85   : > { %462 = vperm.xlu1 %6872, %v7611_v12  }
  0x87   : > { %6882 = vset.pattern.permute.xlu0 %v7386_v11 }
  0x88   : > { %1368 = vperm.xlu0 %6882, %v7649_v28  }
  0x89   : > { %6874 = vset.pattern.permute.xlu1 %v7385_v10 }
  0x8a   : > { %484 = vperm.xlu1 %6874, %v7611_v12  }
  0x8c   : > { %1405 = vperm.xlu0 %6882, %v5589_v30  }
  0x8e   : > { %6875 = vset.pattern.permute.xlu1 %v7386_v11 }
  0x8f   : > { %516 = vperm.xlu1 %6875, %v7624_v20  }
  0x90   : > { %6887 = vset.pattern.permute.xlu0 %v7391_v33 }
  0x91   : > { %605 = vperm.xlu0 %6887, %v7624_v20  }
  0x93   : > { %6876 = vset.pattern.permute.xlu1 %v7385_v10 }
  0x94   : > { %537 = vperm.xlu1 %6876, %v7624_v20  }
  0x95   : > { %6890 = vset.pattern.permute.xlu0 %v7392_v36 }
  0x96   : > { %633 = vperm.xlu0 %6890, %v7667_v35  }
  0x98   : > { %6878 = vset.pattern.permute.xlu1 %v7387_v14 }
  0x99   : > { %1355 = vperm.xlu1 %6878, %v7630_v22  }
  0x9a   : > { %667 = vperm.xlu0 %6890, %v7671_v37  }
  0x9d   : > { %6879 = vset.pattern.permute.xlu1 %v7386_v11 }
  0x9e   : > { %6894 = vset.pattern.permute.xlu0 %v7391_v33  ;;  %550 = vperm.xlu1 %6879, %v7636_v24  }
  0x9f   : > { %689 = vperm.xlu0 %6894, %v7671_v37  }
  0xa2   : > { %6880 = vset.pattern.permute.xlu1 %v7388_v18  ;;  %v384_v18 = vmul.u32 2, %v7749_v63 }
  0xa3   : > { %6897 = vset.pattern.permute.xlu0 %v7393_v40  ;;  %561 = vperm.xlu1 %6880, %v7636_v24  }
  0xa4   : > { %722 = vperm.xlu0 %6897, %v7667_v35   ;;  %v7796_v25 = vadd.s32 4294967295, %v384_v18 }
  0xa6   : > { %vm387_vm7 = vcmp.ge.s32.totalorder %v7796_v25, 0  ;;  %vm388_vm8 = vcmp.lt.s32.totalorder %v7796_v25, 8 }
  0xa7   : > { %6881 = vset.pattern.permute.xlu1 %v7385_v10  ;;  %v7774_v10 = vld [vmem:[%s8647_s1 + $0x4] ss:$0 sm:$0xff]  ;;  %vm7876_vm9 = vmand %vm387_vm7, %vm388_vm8 }
  0xa8   : > { %6900 = vset.pattern.permute.xlu0 %v7392_v36  ;;  %1381 = vperm.xlu1 %6881, %v5586_v41  }
  0xa9   : > { %1489 = vperm.xlu0 %6900, %v7690_v42  }
  0xac   : > { %6883 = vset.pattern.permute.xlu1 %v7387_v14 }
  0xad   : > { %1526 = vperm.xlu0 %6900, %v5601_v43   ;;  %1392 = vperm.xlu1 %6883, %v5586_v41   ;;  %v7823_v43 = vld [vmem:[%s8648_s2] ss:$0 sm:$0xff] }
  0xb1   : > { %6904 = vset.pattern.permute.xlu0 %v7394_v45  ;;  %6884 = vset.pattern.permute.xlu1 %v7392_v36 }
  0xb2   : > { %1548 = vperm.xlu0 %6904, %v7697_v44   ;;  %583 = vperm.xlu1 %6884, %v7624_v20  }
  0xb6   : > { %6906 = vset.pattern.permute.xlu0 %v7395_v47  ;;  %6885 = vset.pattern.permute.xlu1 %v7396_v48 }
  0xb7   : > { %760 = vperm.xlu0 %6906, %v7703_v46   ;;  %594 = vperm.xlu1 %6885, %v7624_v20  }
  0xbb   : > { %795 = vperm.xlu0 %6906, %v7708_v49   ;;  %6886 = vset.pattern.permute.xlu1 %v7391_v33 }
  0xbc   : > { %1416 = vperm.xlu1 %6886, %v7630_v22  }
  0xbf   : > { %6910 = vset.pattern.permute.xlu0 %v7397_v50 }
  0xc0   : > { %817 = vperm.xlu0 %6910, %v7703_v46   ;;  %6888 = vset.pattern.permute.xlu1 %v7398_v51 }
  0xc1   : > { %1427 = vperm.xlu1 %6888, %v7630_v22   ;;  %v7401_v22 = vmov 20  }
  0xc4   : > { %6913 = vset.pattern.permute.xlu0 %v7393_v40 }
  0xc5   : > { %1587 = vperm.xlu0 %6913, %v7718_v52   ;;  %6889 = vset.pattern.permute.xlu1 %v7392_v36  ;;  %v1214_v36 = vadd.s32 1, %v7796_v25 }
  0xc6   : > { %1438 = vperm.xlu1 %6889, %v7649_v28   ;;  %v7804_v28 = vld [vmem:[%s8647_s1 + $0x7] ss:$0 sm:$0xff] }
  0xc7   : > { %vm1215_vm1 = vcmp.ge.s32.totalorder %v1214_v36, 0  ;;  %vm1216_vm2 = vcmp.lt.s32.totalorder %v1214_v36, 8  ;;  %v6983_v36 = vld [vmem:[#allocation4 + $0x88] sm:$0xff]  }
  0xc8   : > { %vm7831_vm5 = vmand %vm1215_vm1, %vm1216_vm2 }
  0xc9   : > { %1623 = vperm.xlu0 %6913, %v7723_v53  }
  0xca   : > { %6891 = vset.pattern.permute.xlu1 %v7396_v48 }
  0xcb   : > { %643 = vperm.xlu1 %6891, %v7667_v35  }
  0xcd   : > { %6917 = vset.pattern.permute.xlu0 %v7399_v55 }
  0xce   : > { %1647 = vperm.xlu0 %6917, %v5613_v54  }
  0xcf   : > { %6892 = vset.pattern.permute.xlu1 %v7391_v33 }
  0xd0   : > { %654 = vperm.xlu1 %6892, %v7667_v35  }
  0xd2   : > { %6920 = vset.pattern.permute.xlu0 %v7397_v50 }
  0xd3   : > { %1680 = vperm.xlu0 %6920, %v7733_v56  }
  0xd4   : > { %6893 = vset.pattern.permute.xlu1 %v7396_v48 }
  0xd5   : > { %678 = vperm.xlu1 %6893, %v7671_v37  }
  0xd7   : > { %901 = vperm.xlu0 %6920, %v5541_v57   ;;  %v1246_v59 = vpop.permute.xlu1 %1245 }
  0xd8   : > { %v1223_v61 = vpop.permute.xlu0 %1222  ;;  %v1252_v11 = vmul.f32 %v7758_v1, %v1246_v59 }
  0xd9   : > { %6895 = vset.pattern.permute.xlu1 %v7399_v55  ;;  %v1229_v3 = vmul.f32 %v7742_v60, %v1223_v61  ;;  %v1338_v61 = vld [vmem:[#allocation2 + $0x1c] sm:$0x7] }
  0xda   : > { %700 = vperm.xlu1 %6895, %v7667_v35  }
  0xdb   : > { %6925 = vset.pattern.permute.xlu0 %v7400_v2 }
  0xdc   : > { %888 = vperm.xlu0 %6925, %v7753_v0   ;;  %v1259_v5 = vpop.permute.xlu1 %1258 }
  0xdd   : > { %v1233_v6 = vpop.permute.xlu0 %1232  ;;  %v1265_v13 = vmul.f32 %v7767_v4, %v1259_v5 }
  0xde   : > { %v1239_v9 = vmul.f32 %v7747_v62, %v1233_v6  ;;  %6896 = vset.pattern.permute.xlu1 %v7395_v47  ;;  %v7827_v47 = vld [vmem:[%s7598_s26 + $0x1] sm:$0x1f]  ;;  %v7168_v6 = vld [vmem:[#allocation4 + $0x190] sm:$0xff]  }
  0xdf   : > { %711 = vperm.xlu1 %6896, %v7667_v35   ;;  %v5598_v35 = vld [vmem:[%s7598_s26 + $0x8] sm:$0x1f] }
  0xe0   : > { %v1240_v12 = vadd.f32 %v1239_v9, %v1229_v3  ;;  %1744 = vperm.xlu0 %6925, %v5622_v7  }
  0xe1   : > { %v1270_v15 = vpop.permute.xlu1 %1269 }
  0xe2   : > { %v1253_v14 = vadd.f32 %v1252_v11, %v1240_v12  ;;  %v1283_v17 = vpop.permute.xlu0 %1282  ;;  %v1276_v19 = vmul.f32 %v7774_v10, %v1270_v15 }
  0xe3   : > { %6898 = vset.pattern.permute.xlu1 %v7391_v33  ;;  %v1289_v23 = vmul.f32 %v7782_v16, %v1283_v17 }
  0xe4   : > { %v1266_v20 = vadd.f32 %v1265_v13, %v1253_v14  ;;  %6930 = vset.pattern.permute.xlu0 %v7401_v22  ;;  %1466 = vperm.xlu1 %6898, %v7697_v44  }
  0xe5   : > { %934 = vperm.xlu0 %6930, %v7753_v0  }
  0xe6   : > { %v1277_v24 = vadd.f32 %v1276_v19, %v1266_v20  ;;  %v1294_v26 = vpop.permute.xlu1 %1293 }
  0xe7   : > { %v1300_v31 = vmul.f32 %v7790_v21, %v1294_v26  ;;  %v1316_v34 = vpop.permute.xlu0 %1315 }
  0xe8   : > { %v1290_v30 = vadd.f32 %v1289_v23, %v1277_v24  ;;  %6899 = vset.pattern.permute.xlu1 %v7398_v51  ;;  %v1322_v41 = vmul.f32 %v7809_v29, %v1316_v34  ;;  %v6981_v23 = vld [vmem:[#allocation4 + $0x80] sm:$0xff]  }
  0xe9   : > { %6933 = vset.pattern.permute.xlu0 %v7402_v32  ;;  %1476 = vperm.xlu1 %6899, %v7697_v44  }
  0xea   : > { %1779 = vperm.xlu0 %6933, %v7799_v27   ;;  %v1301_v38 = vadd.f32 %v1300_v31, %v1290_v30  ;;  %v5552_v30 = vld [vmem:[%s7598_s26 + $0x8] sm:$0x1f] }
  0xeb   : > { %v1305_v37 = vpop.permute.xlu1 %1304 }
  0xec   : > { %v1311_v39 = vmul.f32 %v7804_v28, %v1305_v37  ;;  %v416_v5 = vpop.permute.xlu0 %415 }
  0xed   : > { %6901 = vset.pattern.permute.xlu1 %v7391_v33  ;;  %v422_v13 = vmul.f32 %v7758_v1, %v416_v5 }
  0xee   : > { %6936 = vset.pattern.permute.xlu0 %v7401_v22  ;;  %v1312_v48 = vadd.f32 %v1311_v39, %v1301_v38  ;;  %1502 = vperm.xlu1 %6901, %v5598_v35  }
  0xef   : > { %1801 = vperm.xlu0 %6936, %v7827_v47  }
  0xf0   : > { %v1323_v54 = vadd.f32 %v1322_v41, %v1312_v48  ;;  %v395_v57 = vpop.permute.xlu1 %394  ;;  %v452_v19 = vpop.permute.xlu0 %451  ;;  %v7864_v41 = vld [vmem:[%s7598_s26] sm:$0x1f]  ;;  %v6985_v48 = vld [vmem:[#allocation4 + $0x90] sm:$0xff]  }
  0xf1   : > { %v401_v9 = vmul.f32 %v7742_v60, %v395_v57 }
  0xf2   : > { %v1331_v33 = vadd.f32 %v7823_v43, %v1323_v54  ;;  %6902 = vset.pattern.permute.xlu1 %v7398_v51 }
  0xf3   : > { %1513 = vperm.xlu1 %6902, %v5598_v35   ;;  %1018 = vperm.xlu0 %6936, %v5552_v30  }
  0xf4   : > { %v1332_v59 = vmax.f32 %v1331_v33, 0.0 }
  0xf5   : > { %v405_v3 = vpop.permute.xlu1 %404  ;;  %v474_v35 = vpop.permute.xlu0 %473 }
  0xf6   : > { %v1335_v7 = vsel %vm7831_vm5, %v1332_v59, 0.0  ;;  %v411_v11 = vmul.f32 %v7747_v62, %v405_v3  ;;  %v480_v39 = vmul.f32 %v7804_v28, %v474_v35  ;;  %v6987_v59 = vld [vmem:[#allocation4 + $0x98] sm:$0xff]  }
  0xf7   : > { %v1336_v12 = vpack.c.bf16 %v1335_v7, %v1335_v7  ;;  %6903 = vset.pattern.permute.xlu1 %v7393_v40  ;;  %6941 = vset.pattern.permute.xlu0 %v7402_v32 }
  0xf8   : > { %v412_v51 = vadd.f32 %v411_v11, %v401_v9  ;;  %1537 = vperm.xlu1 %6903, %v7697_v44   ;;  %v458_v44 = vmul.f32 %v7782_v16, %v452_v19  ;;  %1005 = vperm.xlu0 %6941, %v7864_v41   ;;  %v6989_v9 = vld [vmem:[#allocation4 + $0xa0] sm:$0xff]   ;;  %v7403_v19 = vmov 17  }
  0xf9   : > { %v1339_v14 = vsel %vm7837_vm6, %v1336_v12, %v1338_v61  ;;  %v509_v11 = vld [vmem:[#allocation2] sm:$0x7] }
  0xfa   : > { %1340 = vst [vmem:[#allocation2 + $0x1c] sm:$0x7] %v1339_v14  ;;  %v430_v15 = vpop.permute.xlu1 %429  ;;  %v423_v17 = vadd.f32 %v422_v13, %v412_v51  ;;  %v5634_v51 = vld [vmem:[%s7598_s26 + $0x8] sm:$0x1f]  ;;  %v527_v14 = vpop.permute.xlu0 %526 }
  0xfb   : > { %v436_v18 = vmul.f32 %v7767_v4, %v430_v15  ;;  %v6991_v15 = vld [vmem:[#allocation4 + $0xa8] sm:$0xff]  }
  0xfc   : > { %6905 = vset.pattern.permute.xlu1 %v7399_v55  ;;  %1865 = vperm.xlu0 %6941, %v5634_v51  }
  0xfd   : > { %1559 = vperm.xlu1 %6905, %v7690_v42   ;;  %v437_v24 = vadd.f32 %v436_v18, %v423_v17 }
  0xff   : > { %v441_v20 = vpop.permute.xlu1 %440 }
 0x100   : > { %v447_v26 = vmul.f32 %v7774_v10, %v441_v20  ;;  %v6992_v20 = vld [vmem:[#allocation4 + $0xb0] sm:$0xff]  }
 0x101   : > { %750 = vperm.xlu1 %6905, %v7703_v46   ;;  %v2085_v31 = vld [vmem:[#allocation2 + $0x1c] sm:$0x3] }
 0x102   : > { %v448_v34 = vadd.f32 %v447_v26, %v437_v24  ;;  %6202 = vmatmul.mubr.bf16.vlgmr.msra.gmra.mrb[0].mxu0 %v2085_v31  ;;  %v6993_v26 = vld [vmem:[#allocation4 + $0xb8] sm:$0xff]   ;;  %v6995_v31 = vld [vmem:[#allocation4 + $0xc0] sm:$0xff]  }
 0x103   : > { %6226 = vmatpush3.bf16.msra.mxu0 %v6981_v23  ;;  %6241 = vmatprep.mubr.msk.bf16.mxu0 %vm7390_vm0, %v7384_v8  ;;  %v1346_v23 = vpop.permute.xlu0 %1345 }
 0x104   : > { %v459_v42 = vadd.f32 %v458_v44, %v448_v34  ;;  %v463_v37 = vpop.permute.xlu1 %462  ;;  %6227 = vmatprep.subr.bf16.mxu0 %v7384_v8  ;;  %v533_v44 = vmul.f32 %v7747_v62, %v527_v14 }
 0x105   : > { %v469_v38 = vmul.f32 %v7790_v21, %v463_v37  ;;  %6907 = vset.pattern.permute.xlu1 %v7393_v40 }
 0x106   : > { %771 = vperm.xlu1 %6907, %v7703_v46  }
 0x107   : > { %v470_v54 = vadd.f32 %v469_v38, %v459_v42  ;;  %6228 = vmatpush3.bf16.msra.mxu0 %v6983_v36  ;;  %v573_v42 = vpop.permute.xlu0 %572 }
 0x108   : > { %6229 = vmatprep.subr.bf16.mxu0 %v7384_v8 }
 0x109   : > { %v481_v57 = vadd.f32 %v480_v39, %v470_v54  ;;  %v485_v33 = vpop.permute.xlu1 %484 }
 0x10a   : > { %v491_v61 = vmul.f32 %v7809_v29, %v485_v33  ;;  %6908 = vset.pattern.permute.xlu1 %v7399_v55  ;;  %v1352_v33 = vmul.f32 %v7742_v60, %v1346_v23  ;;  %v7405_v23 = vmov 26  }
 0x10b   : > { %784 = vperm.xlu1 %6908, %v7708_v49   ;;  %6230 = vmatpush3.bf16.msra.mxu0 %v6985_v48  ;;  %v6996_v48 = vld [vmem:[#allocation4 + $0xc8] sm:$0xff]   ;;  %v1369_v51 = vpop.permute.xlu0 %1368 }
 0x10c   : > { %v492_v3 = vadd.f32 %v491_v61, %v481_v57  ;;  %6231 = vmatprep.subr.bf16.mxu0 %v7384_v8  ;;  %v6999_v57 = vld [vmem:[#allocation4 + $0x100] sm:$0xff]  }
 0x10e   : > { %v500_v7 = vadd.f32 %v7823_v43, %v492_v3  ;;  %v517_v25 = vpop.permute.xlu1 %516 }
 0x10f   : > { %6909 = vset.pattern.permute.xlu1 %v7393_v40  ;;  %6232 = vmatpush3.bf16.msra.mxu0 %v6987_v59  ;;  %v523_v30 = vmul.f32 %v7742_v60, %v517_v25  ;;  %v579_v25 = vmul.f32 %v7782_v16, %v573_v42  ;;  %v7001_v60 = vld [vmem:[#allocation4 + $0x108] sm:$0xff]   ;;  %v7406_v42 = vmov 19  }
 0x110   : > { %v501_v12 = vmax.f32 %v500_v7, 0.0  ;;  %806 = vperm.xlu1 %6909, %v7708_v49   ;;  %6233 = vmatprep.subr.bf16.mxu0 %v7384_v8  ;;  %v7404_v49 = vmov 24   ;;  %v6997_v7 = vld [vmem:[#allocation4 + $0xd0] sm:$0xff]  }
 0x111   : > { %6946 = vset.pattern.permute.xlu0 %v7404_v49  ;;  %v534_v38 = vadd.f32 %v533_v44, %v523_v30  ;;  %v7005_v30 = vld [vmem:[#allocation4 + $0x118] sm:$0xff]  }
 0x112   : > { %v504_v13 = vsel %vm7876_vm9, %v501_v12, 0.0  ;;  %1051 = vperm.xlu0 %6946, %v7864_v41  }
 0x113   : > { %v505_v17 = vpack.c.bf16 %v504_v13, %v504_v13  ;;  %v538_v18 = vpop.permute.xlu1 %537  ;;  %6234 = vmatpush3.bf16.msra.mxu0 %v6989_v9 }
 0x114   : > { %6911 = vset.pattern.permute.xlu1 %v7403_v19  ;;  %6235 = vmatprep.subr.bf16.mxu0 %v7384_v8  ;;  %v544_v34 = vmul.f32 %v7758_v1, %v538_v18 }
 0x115   : > { %v510_v40 = vsel %vm7837_vm6, %v505_v17, %v509_v11  ;;  %828 = vperm.xlu1 %6911, %v7703_v46   ;;  %v1375_v17 = vmul.f32 %v7758_v1, %v1369_v51  ;;  %v7924_v1 = vld [vmem:[%s7598_s26] sm:$0x1f]  ;;  %v7013_v51 = vld [vmem:[#allocation4 + $0x138] sm:$0xff]  }
 0x116   : > { %511 = vst [vmem:[#allocation2] sm:$0x7] %v510_v40  ;;  %v545_v54 = vadd.f32 %v544_v34, %v534_v38  ;;  %v7003_v40 = vld [vmem:[#allocation4 + $0x110] sm:$0xff]   ;;  %6949 = vset.pattern.permute.xlu0 %v7405_v23  ;;  %v7935_v34 = vld [vmem:[%s7598_s26 + $0x1] sm:$0x1f] }
 0x117   : > { %6236 = vmatpush3.bf16.msra.mxu0 %v6991_v15  ;;  %1900 = vperm.xlu0 %6949, %v7924_v1   ;;  %v7007_v38 = vld [vmem:[#allocation4 + $0x120] sm:$0xff]  }
 0x118   : > { %v1356_v24 = vpop.permute.xlu1 %1355  ;;  %6237 = vmatprep.subr.bf16.mxu0 %v7384_v8 }
 0x119   : > { %6912 = vset.pattern.permute.xlu1 %v7400_v2  ;;  %v1362_v9 = vmul.f32 %v7747_v62, %v1356_v24 }
 0x11a   : > { %839 = vperm.xlu1 %6912, %v7703_v46  }
 0x11b   : > { %6238 = vmatpush3.bf16.msra.mxu0 %v6992_v20  ;;  %v1363_v15 = vadd.f32 %v1362_v9, %v1352_v33  ;;  %v1406_v20 = vpop.permute.xlu0 %1405  ;;  %6952 = vset.pattern.permute.xlu0 %v7404_v49  ;;  %v7011_v9 = vld [vmem:[#allocation4 + $0x130] sm:$0xff]  }
 0x11c   : > { %6239 = vmatprep.subr.bf16.mxu0 %v7384_v8  ;;  %v1412_v44 = vmul.f32 %v7782_v16, %v1406_v20  ;;  %1922 = vperm.xlu0 %6952, %v7935_v34  }
 0x11d   : > { %v551_v35 = vpop.permute.xlu1 %550  ;;  %v2068_v36 = vld [vmem:[#allocation2] sm:$0x3]  ;;  %v1376_v24 = vadd.f32 %v1375_v17, %v1363_v15 }
 0x11e   : > { %6914 = vset.pattern.permute.xlu1 %v7394_v45  ;;  %6222 = vmatmul.mubr.bf16.vlgmr.msra.gmra.mrb[0].mxu1 %v2068_v36  ;;  %v6994_v37 = vld [vmem:[#allocation2] ss:$0 sps:$4 sm:$0x77]   ;;  %v557_v46 = vmul.f32 %v7767_v4, %v551_v35 }
 0x11f   : > { %1597 = vperm.xlu1 %6914, %v7718_v52   ;;  %6240 = vmatpush3.bf16.msra.mxu0 %v6993_v26  ;;  %v2303_v39 = vshll.u32 %v6994_v37, 16  ;;  %v2301_v61 = vshrl.u32 %v6994_v37, 16  ;;  %v7220_v37 = vld [vmem:[%s7598_s26] sm:$0x1f] }
 0x120   : > { %6246 = vmatpush3.bf16.msra.mxu1 %v6995_v31  ;;  %6265 = vmatprep.subr.bf16.mxu0 %v7384_v8  ;;  %v558_v11 = vadd.f32 %v557_v46, %v545_v54  ;;  %v7002_v31 = vld [vmem:[#allocation4 + $0xe8] sm:$0xff]   ;;  %v606_v46 = vpop.permute.xlu0 %605 }
 0x121   : > { %6247 = vmatprep.subr.bf16.mxu1 %v7384_v8  ;;  %6261 = vmatprep.mubr.msk.bf16.mxu1 %vm7390_vm0, %v7384_v8  ;;  %v2305_v3 = vrot.slane %v2303_v39, 1  ;;  %v7004_v39 = vld [vmem:[#allocation4 + $0xf0] sm:$0xff]   ;;  %v612_v33 = vmul.f32 %v7809_v29, %v606_v46 }
 0x122   : > { %v562_v59 = vpop.permute.xlu1 %561  ;;  %6955 = vset.pattern.permute.xlu0 %v7405_v23 }
 0x123   : > { %v568_v12 = vmul.f32 %v7774_v10, %v562_v59  ;;  %6915 = vset.pattern.permute.xlu1 %v7399_v55  ;;  %v2306_v13 = vor.u32 %v2305_v3, %v2301_v61  ;;  %v6998_v55 = vld [vmem:[#allocation4 + $0xd8] sm:$0xff]   ;;  %v7009_v59 = vld [vmem:[#allocation4 + $0x128] sm:$0xff]  }
 0x124   : > { %1610 = vperm.xlu1 %6915, %v7733_v56   ;;  %6248 = vmatpush3.bf16.msra.mxu1 %v6996_v48  ;;  %v7006_v61 = vld [vmem:[#allocation4 + $0xf8] sm:$0xff]   ;;  %v634_v20 = vpop.permute.xlu0 %633 }
 0x125   : > { %v569_v14 = vadd.f32 %v568_v12, %v558_v11  ;;  %6249 = vmatprep.subr.bf16.mxu1 %v7384_v8  ;;  %6242 = vmatmul.mubr.bf16.vlgmr.msra.gmra.mrb[4].mxu0 %v2306_v13 }
 0x126   : > { %6266 = vmatpush3.bf16.msra.mxu0 %v6999_v57  ;;  %6281 = vmatprep.mubr.msk.bf16.mxu0 %vm7390_vm0, %v7384_v8 }
 0x127   : > { %v1382_v62 = vpop.permute.xlu1 %1381  ;;  %v580_v18 = vadd.f32 %v579_v25, %v569_v14  ;;  %6267 = vmatprep.subr.bf16.mxu0 %v7384_v8 }
 0x128   : > { %6916 = vset.pattern.permute.xlu1 %v7394_v45  ;;  %6250 = vmatpush3.bf16.msra.mxu1 %v6997_v7  ;;  %v1388_v56 = vmul.f32 %v7767_v4, %v1382_v62  ;;  %v7000_v4 = vld [vmem:[#allocation4 + $0xe0] sm:$0xff]  }
 0x129   : > { %1634 = vperm.xlu1 %6916, %v7723_v53   ;;  %6251 = vmatprep.subr.bf16.mxu1 %v7384_v8 }
 0x12a   : > { %6268 = vmatpush3.bf16.msra.mxu0 %v7001_v60  ;;  %v1389_v53 = vadd.f32 %v1388_v56, %v1376_v24  ;;  %v626_v60 = vld [vmem:[#allocation2 + $0x4] sm:$0x7] }
 0x12b   : > { %6269 = vmatprep.subr.bf16.mxu0 %v7384_v8 }
 0x12c   : > { %v1393_v45 = vpop.permute.xlu1 %1392  ;;  %6252 = vmatpush3.bf16.msra.mxu1 %v6998_v55 }
 0x12d   : > { %v1399_v26 = vmul.f32 %v7774_v10, %v1393_v45  ;;  %6918 = vset.pattern.permute.xlu1 %v7400_v2  ;;  %6253 = vmatprep.subr.bf16.mxu1 %v7384_v8  ;;  %v7008_v45 = vld [vmem:[#allocation4 + $0x140] sm:$0xff]  }
 0x12e   : > { %1658 = vperm.xlu1 %6918, %v7718_v52   ;;  %6270 = vmatpush3.bf16.msra.mxu0 %v7003_v40 }
 0x12f   : > { %v1400_v35 = vadd.f32 %v1399_v26, %v1389_v53  ;;  %6271 = vmatprep.subr.bf16.mxu0 %v7384_v8  ;;  %v7221_v53 = vld [vmem:[%s8647_s1] ss:$0 sm:$0xff] }
 0x130   : > { %6254 = vmatpush3.bf16.msra.mxu1 %v7000_v4  ;;  %v640_v26 = vmul.f32 %v7221_v53, %v634_v20  ;;  %v7020_v53 = vld [vmem:[#allocation4 + $0x170] sm:$0xff]  }
 0x131   : > { %v1413_v10 = vadd.f32 %v1412_v44, %v1400_v35  ;;  %v584_v36 = vpop.permute.xlu1 %583  ;;  %6255 = vmatprep.subr.bf16.mxu1 %v7384_v8  ;;  %v7222_v44 = vld [vmem:[%s8647_s1 + $0x1] ss:$0 sm:$0xff]  ;;  %v668_v35 = vpop.permute.xlu0 %667 }
 0x132   : > { %6919 = vset.pattern.permute.xlu1 %v7406_v42  ;;  %v590_v52 = vmul.f32 %v7790_v21, %v584_v36  ;;  %6272 = vmatpush3.bf16.msra.mxu0 %v7005_v30 }
 0x133   : > { %1669 = vperm.xlu1 %6919, %v7220_v37   ;;  %6273 = vmatprep.subr.bf16.mxu0 %v7384_v8  ;;  %v7010_v37 = vld [vmem:[#allocation4 + $0x148] sm:$0xff]  }
 0x134   : > { %6256 = vmatpush3.bf16.msra.mxu1 %v7002_v31  ;;  %v591_v54 = vadd.f32 %v590_v52, %v580_v18 }
 0x135   : > { %6257 = vmatprep.subr.bf16.mxu1 %v7384_v8 }
 0x136   : > { %v595_v48 = vpop.permute.xlu1 %594  ;;  %6274 = vmatpush3.bf16.msra.mxu0 %v7007_v38 }
 0x137   : > { %v601_v57 = vmul.f32 %v7804_v28, %v595_v48  ;;  %6921 = vset.pattern.permute.xlu1 %v7397_v50  ;;  %6275 = vmatprep.subr.bf16.mxu0 %v7384_v8  ;;  %v7224_v48 = vld [vmem:[%s8647_s1 + $0x3] ss:$0 sm:$0xff] }
 0x138   : > { %867 = vperm.xlu1 %6921, %v7753_v0   ;;  %6258 = vmatpush3.bf16.msra.mxu1 %v7004_v39 }
 0x139   : > { %v602_v3 = vadd.f32 %v601_v57, %v591_v54  ;;  %6259 = vmatprep.subr.bf16.mxu1 %v7384_v8  ;;  %v674_v54 = vmul.f32 %v7224_v48, %v668_v35  ;;  %v7228_v35 = vld [vmem:[%s7598_s26] sm:$0x1f]  ;;  %v743_v48 = vld [vmem:[#allocation2 + $0x8] sm:$0x7] }
 0x13a   : > { %6276 = vmatpush3.bf16.msra.mxu0 %v7009_v59 }
 0x13b   : > { %v613_v7 = vadd.f32 %v612_v33, %v602_v3  ;;  %v1417_v25 = vpop.permute.xlu1 %1416  ;;  %6277 = vmatprep.subr.bf16.mxu0 %v7384_v8  ;;  %v7225_v33 = vld [vmem:[%s7598_s26 + $0x8] sm:$0x1f] }
 0x13c   : > { %6922 = vset.pattern.permute.xlu1 %v7403_v19  ;;  %6260 = vmatpush3.bf16.msra.mxu1 %v7006_v61  ;;  %v1423_v13 = vmul.f32 %v7790_v21, %v1417_v25  ;;  %v7012_v61 = vld [vmem:[#allocation4 + $0x150] sm:$0xff]   ;;  %v7226_v25 = vld [vmem:[%s8647_s1 + $0x4] ss:$0 sm:$0xff] }
 0x13d   : > { %v621_v11 = vadd.f32 %v7823_v43, %v613_v7  ;;  %877 = vperm.xlu1 %6922, %v7753_v0   ;;  %6285 = vmatprep.subr.bf16.mxu1 %v7384_v8 }
 0x13e   : > { %6278 = vmatpush3.bf16.msra.mxu0 %v7011_v9  ;;  %v1424_v18 = vadd.f32 %v1423_v13, %v1413_v10  ;;  %v1459_v10 = vld [vmem:[#allocation2 + $0x20] sm:$0x7] }
 0x13f   : > { %v622_v12 = vmax.f32 %v621_v11, 0.0  ;;  %6279 = vmatprep.subr.bf16.mxu0 %v7384_v8  ;;  %v7015_v13 = vld [vmem:[#allocation4 + $0x180] sm:$0xff]  }
 0x140   : > { %v1428_v14 = vpop.permute.xlu1 %1427 }
 0x141   : > { %v623_v15 = vsel %vm7876_vm9, %v622_v12, 0.0  ;;  %6923 = vset.pattern.permute.xlu1 %v7400_v2  ;;  %v1434_v0 = vmul.f32 %v7804_v28, %v1428_v14  ;;  %v7014_v12 = vld [vmem:[#allocation4 + $0x158] sm:$0xff]  }
 0x142   : > { %v624_v17 = vpack.c.bf16 %v623_v15, %v623_v15  ;;  %1708 = vperm.xlu1 %6923, %v7799_v27   ;;  %6280 = vmatpush3.bf16.msra.mxu0 %v7013_v51 }
 0x143   : > { %6305 = vmatprep.subr.bf16.mxu0 %v7384_v8  ;;  %v1435_v56 = vadd.f32 %v1434_v0, %v1424_v18  ;;  %v7227_v0 = vld [vmem:[%s7598_s26 + $0x8] sm:$0x1f] }
 0x144   : > { %v627_v62 = vsel %vm7837_vm6, %v624_v17, %v626_v60 }
 0x145   : > { %628 = vst [vmem:[#allocation2 + $0x4] sm:$0x7] %v627_v62  ;;  %v1439_v55 = vpop.permute.xlu1 %1438  ;;  %v8009_v62 = vld [vmem:[%s8647_s1 + $0x7] ss:$0 sm:$0xff] }
 0x146   : > { %v1445_v40 = vmul.f32 %v7809_v29, %v1439_v55  ;;  %6924 = vset.pattern.permute.xlu1 %v7406_v42  ;;  %v7018_v55 = vld [vmem:[#allocation4 + $0x168] sm:$0xff]  }
 0x147   : > { %1718 = vperm.xlu1 %6924, %v7799_v27  }
 0x148   : > { %v1446_v28 = vadd.f32 %v1445_v40, %v1435_v56 }
 0x14a   : > { %v1454_v24 = vadd.f32 %v7823_v43, %v1446_v28  ;;  %v644_v4 = vpop.permute.xlu1 %643 }
 0x14b   : > { %6926 = vset.pattern.permute.xlu1 %v7397_v50  ;;  %v650_v30 = vmul.f32 %v7222_v44, %v644_v4  ;;  %v7407_v44 = vmov 21  }
 0x14c   : > { %v1455_v31 = vmax.f32 %v1454_v24, 0.0  ;;  %1731 = vperm.xlu1 %6926, %v7827_v47   ;;  %v2397_v27 = vld [vmem:[#allocation2 + $0x4] sm:$0x3]  ;;  %v7223_v47 = vld [vmem:[%s8647_s1 + $0x2] ss:$0 sm:$0xff]  ;;  %v7019_v24 = vld [vmem:[#allocation4 + $0x190] sm:$0xff]  }
 0x14d   : > { %6262 = vmatmul.mubr.bf16.vlgmr.msra.gmra.mrb[4].mxu1 %v2397_v27  ;;  %v651_v52 = vadd.f32 %v650_v30, %v640_v26  ;;  %v7024_v28 = vld [vmem:[#allocation2 + $0x4] ss:$0 sps:$4 sm:$0x77]   ;;  %v7021_v30 = vld [vmem:[#allocation4 + $0x198] sm:$0xff]  }
 0x14e   : > { %v1456_v36 = vsel %vm7831_vm5, %v1455_v31, 0.0  ;;  %6286 = vmatpush3.bf16.msra.mxu1 %v7008_v45  ;;  %6301 = vmatprep.mubr.msk.bf16.mxu1 %vm7390_vm0, %v7384_v8  ;;  %v8020_v45 = vld [vmem:[%s7598_s26] sm:$0x1f] }
 0x14f   : > { %v1457_v38 = vpack.c.bf16 %v1456_v36, %v1456_v36  ;;  %6287 = vmatprep.subr.bf16.mxu1 %v7384_v8  ;;  %v655_v46 = vpop.permute.xlu1 %654  ;;  %1122 = vperm.xlu0 %6955, %v8020_v45   ;;  %v8029_v31 = vld [vmem:[%s8647_s1] ss:$0 sm:$0xff]  ;;  %v8037_v36 = vld [vmem:[%s8647_s1 + $0x1] ss:$0 sm:$0xff] }
 0x150   : > { %6927 = vset.pattern.permute.xlu1 %v7403_v19  ;;  %v661_v39 = vmul.f32 %v7223_v47, %v655_v46  ;;  %v690_v19 = vpop.permute.xlu0 %689  ;;  %v8044_v47 = vld [vmem:[%s8647_s1 + $0x2] ss:$0 sm:$0xff] }
 0x151   : > { %v1460_v57 = vsel %vm7837_vm6, %v1457_v38, %v1459_v10  ;;  %912 = vperm.xlu1 %6927, %v7225_v33   ;;  %v696_v11 = vmul.f32 %v7782_v16, %v690_v19  ;;  %v7017_v16 = vld [vmem:[#allocation4 + $0x188] sm:$0xff]   ;;  %v7022_v10 = vld [vmem:[#allocation4 + $0x178] sm:$0xff]  }
 0x152   : > { %1461 = vst [vmem:[#allocation2 + $0x20] sm:$0x7] %v1460_v57  ;;  %6288 = vmatpush3.bf16.msra.mxu1 %v7010_v37  ;;  %v662_v59 = vadd.f32 %v661_v39, %v651_v52  ;;  %v8052_v19 = vld [vmem:[%s7598_s26 + $0x8] sm:$0x1f] }
 0x153   : > { %6289 = vmatprep.subr.bf16.mxu1 %v7384_v8  ;;  %1157 = vperm.xlu0 %6955, %v8052_v19  }
 0x154   : > { %v675_v3 = vadd.f32 %v674_v54, %v662_v59  ;;  %v679_v7 = vpop.permute.xlu1 %678  ;;  %v723_v18 = vpop.permute.xlu0 %722 }
 0x155   : > { %6928 = vset.pattern.permute.xlu1 %v7400_v2  ;;  %v685_v9 = vmul.f32 %v7226_v25, %v679_v7  ;;  %v7016_v2 = vld [vmem:[#allocation4 + $0x160] sm:$0xff]   ;;  %v729_v20 = vmul.f32 %v7809_v29, %v723_v18  ;;  %v2635_v29 = vshll.u32 %v7024_v28, 16 }
 0x156   : > { %6290 = vmatpush3.bf16.msra.mxu1 %v7012_v61  ;;  %923 = vperm.xlu1 %6928, %v7225_v33   ;;  %v2633_v33 = vshrl.u32 %v7024_v28, 16  ;;  %v7026_v61 = vld [vmem:[#allocation4 + $0x1c0] sm:$0xff]  }
 0x157   : > { %v686_v51 = vadd.f32 %v685_v9, %v675_v3  ;;  %6291 = vmatprep.subr.bf16.mxu1 %v7384_v8  ;;  %v2637_v38 = vrot.slane %v2635_v29, 1  ;;  %v8077_v18 = vld [vmem:[%s8647_s1 + $0x5] ss:$0 sm:$0xff]  ;;  %v7409_v29 = vmov 29  }
 0x158   : > { %v1490_v39 = vpop.permute.xlu0 %1489  ;;  %6959 = vset.pattern.permute.xlu0 %v7409_v29 }
 0x159   : > { %v697_v14 = vadd.f32 %v696_v11, %v686_v51  ;;  %v701_v60 = vpop.permute.xlu1 %700  ;;  %v2504_v15 = vld [vmem:[#allocation2 + $0x20] sm:$0x3]  ;;  %v1496_v7 = vmul.f32 %v8044_v47, %v1490_v39  ;;  %v2638_v25 = vor.u32 %v2637_v38, %v2633_v33  ;;  %v7025_v11 = vld [vmem:[#allocation4 + $0x1a8] sm:$0xff]   ;;  %1179 = vperm.xlu0 %6959, %v8020_v45   ;;  %v7410_v33 = vmov 27  }
 0x15a   : > { %6292 = vmatpush3.bf16.msra.mxu1 %v7014_v12  ;;  %6929 = vset.pattern.permute.xlu1 %v7406_v42  ;;  %v707_v17 = vmul.f32 %v7790_v21, %v701_v60  ;;  %v5625_v42 = vld [vmem:[%s7598_s26 + $0x9] sm:$0x1f]  ;;  %v8062_v12 = vld [vmem:[%s8647_s1 + $0x3] ss:$0 sm:$0xff] }
 0x15b   : > { %6282 = vmatmul.mubr.bf16.vlgmr.msra.gmra.mrb[8].mxu0 %v2504_v15  ;;  %1755 = vperm.xlu1 %6929, %v7227_v0   ;;  %v7027_v0 = vld [vmem:[#allocation4 + $0x1b0] sm:$0xff]   ;;  %v7034_v38 = vld [vmem:[#allocation4 + $0x1e0] sm:$0xff]  }
 0x15c   : > { %6306 = vmatpush3.bf16.msra.mxu0 %v7015_v13  ;;  %6293 = vmatprep.subr.bf16.mxu1 %v7384_v8  ;;  %v708_v56 = vadd.f32 %v707_v17, %v697_v14  ;;  %v7408_v13 = vmov 23   ;;  %v7028_v14 = vld [vmem:[#allocation4 + $0x1c8] sm:$0xff]   ;;  %v1527_v17 = vpop.permute.xlu0 %1526 }
 0x15d   : > { %6307 = vmatprep.subr.bf16.mxu0 %v7384_v8  ;;  %6321 = vmatprep.mubr.msk.bf16.mxu0 %vm7390_vm0, %v7384_v8 }
 0x15e   : > { %6294 = vmatpush3.bf16.msra.mxu1 %v7016_v2  ;;  %v712_v21 = vpop.permute.xlu1 %711  ;;  %v7229_v2 = vld [vmem:[%s7598_s26] sm:$0x1f]  ;;  %6962 = vset.pattern.permute.xlu0 %v7410_v33 }
 0x15f   : > { %v718_v40 = vmul.f32 %v8009_v62, %v712_v21  ;;  %6931 = vset.pattern.permute.xlu1 %v7397_v50  ;;  %6295 = vmatprep.subr.bf16.mxu1 %v7384_v8  ;;  %v7030_v21 = vld [vmem:[#allocation4 + $0x1d0] sm:$0xff]  }
 0x160   : > { %6308 = vmatpush3.bf16.msra.mxu0 %v7017_v16  ;;  %1768 = vperm.xlu1 %6931, %v5625_v42   ;;  %v8072_v16 = vld [vmem:[%s8647_s1 + $0x4] ss:$0 sm:$0xff] }
 0x161   : > { %v719_v4 = vadd.f32 %v718_v40, %v708_v56  ;;  %6309 = vmatprep.subr.bf16.mxu0 %v7384_v8  ;;  %v1533_v40 = vmul.f32 %v8077_v18, %v1527_v17 }
 0x162   : > { %6296 = vmatpush3.bf16.msra.mxu1 %v7018_v55 }
 0x163   : > { %v730_v26 = vadd.f32 %v729_v20, %v719_v4  ;;  %6297 = vmatprep.subr.bf16.mxu1 %v7384_v8  ;;  %v1467_v50 = vpop.permute.xlu1 %1466  ;;  %v7029_v20 = vld [vmem:[#allocation4 + $0x1b8] sm:$0xff]   ;;  %v1549_v4 = vpop.permute.xlu0 %1548 }
 0x164   : > { %6310 = vmatpush3.bf16.msra.mxu0 %v7019_v24  ;;  %6932 = vset.pattern.permute.xlu1 %v7407_v44  ;;  %v1473_v37 = vmul.f32 %v8029_v31, %v1467_v50  ;;  %v8091_v24 = vld [vmem:[%s8647_s1 + $0x6] ss:$0 sm:$0xff] }
 0x165   : > { %v738_v27 = vadd.f32 %v7823_v43, %v730_v26  ;;  %945 = vperm.xlu1 %6932, %v7228_v35   ;;  %6311 = vmatprep.subr.bf16.mxu0 %v7384_v8  ;;  %v7023_v43 = vld [vmem:[#allocation4 + $0x1a0] sm:$0xff]  }
 0x166   : > { %6298 = vmatpush3.bf16.msra.mxu1 %v7020_v53  ;;  %v7032_v53 = vld [vmem:[#allocation4 + $0x1d8] sm:$0xff]  }
 0x167   : > { %v739_v52 = vmax.f32 %v738_v27, 0.0  ;;  %6299 = vmatprep.subr.bf16.mxu1 %v7384_v8  ;;  %v1555_v27 = vmul.f32 %v8009_v62, %v1549_v4  ;;  %v8141_v4 = vld [vmem:[%s7598_s26 + $0x8] sm:$0x1f] }
 0x168   : > { %6312 = vmatpush3.bf16.msra.mxu0 %v7021_v30  ;;  %v1477_v46 = vpop.permute.xlu1 %1476 }
 0x169   : > { %v740_v54 = vsel %vm7876_vm9, %v739_v52, 0.0  ;;  %6934 = vset.pattern.permute.xlu1 %v7402_v32  ;;  %6313 = vmatprep.subr.bf16.mxu0 %v7384_v8  ;;  %v1483_v57 = vmul.f32 %v8037_v36, %v1477_v46 }
 0x16a   : > { %v741_v59 = vpack.c.bf16 %v740_v54, %v740_v54  ;;  %6300 = vmatpush3.bf16.msra.mxu1 %v7022_v10  ;;  %956 = vperm.xlu1 %6934, %v7228_v35   ;;  %v7031_v35 = vld [vmem:[#allocation4 + $0x200] sm:$0xff]   ;;  %v7036_v54 = vld [vmem:[#allocation4 + $0x1e8] sm:$0xff]  }
 0x16b   : > { %v1484_v3 = vadd.f32 %v1483_v57, %v1473_v37  ;;  %6325 = vmatprep.subr.bf16.mxu1 %v7384_v8  ;;  %v8102_v37 = vld [vmem:[%s8647_s1 + $0x8] ss:$0 sm:$0xff] }
 0x16c   : > { %v744_v9 = vsel %vm7837_vm6, %v741_v59, %v743_v48  ;;  %6314 = vmatpush3.bf16.msra.mxu0 %v7023_v43  ;;  %v8114_v48 = vld [vmem:[%s8648_s2] ss:$0 sm:$0xff] }
 0x16d   : > { %745 = vst [vmem:[#allocation2 + $0x8] sm:$0x7] %v744_v9  ;;  %6302 = vmatmul.mubr.bf16.vlgmr.msra.gmra.mrb[8].mxu1 %v2638_v25  ;;  %6315 = vmatprep.subr.bf16.mxu0 %v7384_v8  ;;  %v1503_v51 = vpop.permute.xlu1 %1502  ;;  %v1497_v60 = vadd.f32 %v1496_v7, %v1484_v3  ;;  %v761_v3 = vpop.permute.xlu0 %760  ;;  %v8120_v7 = vld [vmem:[%s7598_s26] sm:$0x1f]  ;;  %v7038_v9 = vld [vmem:[#allocation4 + $0x1f0] sm:$0xff]  }
 0x16e   : > { %6935 = vset.pattern.permute.xlu1 %v7408_v13  ;;  %6326 = vmatpush3.bf16.msra.mxu1 %v7026_v61  ;;  %v1509_v15 = vmul.f32 %v8062_v12, %v1503_v51  ;;  %v7035_v61 = vld [vmem:[#allocation4 + $0x210] sm:$0xff]  }
 0x16f   : > { %1790 = vperm.xlu1 %6935, %v7229_v2   ;;  %6327 = vmatprep.subr.bf16.mxu1 %v7384_v8 }
 0x170   : > { %6316 = vmatpush3.bf16.msra.mxu0 %v7025_v11  ;;  %6341 = vmatprep.mubr.msk.bf16.mxu1 %vm7390_vm0, %v7384_v8  ;;  %v1510_v55 = vadd.f32 %v1509_v15, %v1497_v60  ;;  %v7037_v60 = vld [vmem:[#allocation4 + $0x218] sm:$0xff]   ;;  %v1580_v15 = vld [vmem:[#allocation2 + $0x24] sm:$0x7] }
 0x171   : > { %6317 = vmatprep.subr.bf16.mxu0 %v7384_v8  ;;  %1960 = vperm.xlu0 %6962, %v8120_v7  }
 0x172   : > { %v1514_v42 = vpop.permute.xlu1 %1513  ;;  %6328 = vmatpush3.bf16.msra.mxu1 %v7028_v14  ;;  %v767_v14 = vmul.f32 %v8037_v36, %v761_v3  ;;  %v7045_v3 = vld [vmem:[#allocation4 + $0x238] sm:$0xff]  }
 0x173   : > { %v1520_v56 = vmul.f32 %v8072_v16, %v1514_v42  ;;  %6937 = vset.pattern.permute.xlu1 %v7401_v22  ;;  %6329 = vmatprep.subr.bf16.mxu1 %v7384_v8  ;;  %v7040_v42 = vld [vmem:[#allocation4 + $0x1f8] sm:$0xff]  }
 0x174   : > { %6318 = vmatpush3.bf16.msra.mxu0 %v7027_v0  ;;  %984 = vperm.xlu1 %6937, %v7864_v41   ;;  %v2729_v52 = vld [vmem:[#allocation2 + $0x8] sm:$0x3] }
 0x175   : > { %v1521_v28 = vadd.f32 %v1520_v56, %v1510_v55  ;;  %6319 = vmatprep.subr.bf16.mxu0 %v7384_v8  ;;  %1997 = vperm.xlu0 %6962, %v8141_v4  }
 0x176   : > { %6330 = vmatpush3.bf16.msra.mxu1 %v7030_v21 }
 0x177   : > { %v1534_v26 = vadd.f32 %v1533_v40, %v1521_v28  ;;  %v1538_v50 = vpop.permute.xlu1 %1537  ;;  %6331 = vmatprep.subr.bf16.mxu1 %v7384_v8  ;;  %v7039_v40 = vld [vmem:[#allocation4 + $0x220] sm:$0xff]  }
 0x178   : > { %6320 = vmatpush3.bf16.msra.mxu0 %v7029_v20  ;;  %v1544_v30 = vmul.f32 %v8091_v24, %v1538_v50  ;;  %6938 = vset.pattern.permute.xlu1 %v7407_v44  ;;  %v796_v20 = vpop.permute.xlu0 %795 }
 0x179   : > { %994 = vperm.xlu1 %6938, %v7864_v41   ;;  %6345 = vmatprep.subr.bf16.mxu0 %v7384_v8  ;;  %v7033_v41 = vld [vmem:[#allocation4 + $0x208] sm:$0xff]   ;;  %v802_v50 = vmul.f32 %v8072_v16, %v796_v20 }
 0x17a   : > { %v1545_v10 = vadd.f32 %v1544_v30, %v1534_v26  ;;  %6332 = vmatpush3.bf16.msra.mxu1 %v7032_v53  ;;  %v7230_v30 = vld [vmem:[%s7598_s26 + $0x8] sm:$0x1f] }
 0x17b   : > { %6322 = vmatmul.mubr.bf16.vlgmr.msra.gmra.mrb[12].mxu0 %v2729_v52  ;;  %6333 = vmatprep.subr.bf16.mxu1 %v7384_v8 }
 0x17c   : > { %v1556_v43 = vadd.f32 %v1555_v27, %v1545_v10  ;;  %6346 = vmatpush3.bf16.msra.mxu0 %v7031_v35  ;;  %v1560_v46 = vpop.permute.xlu1 %1559  ;;  %6361 = vmatprep.mubr.msk.bf16.mxu0 %vm7390_vm0, %v7384_v8  ;;  %v7046_v27 = vld [vmem:[#allocation2 + $0x8] ss:$0 sps:$4 sm:$0x77]   ;;  %v7042_v35 = vld [vmem:[#allocation4 + $0x40] sm:$0xff]  }
 0x17d   : > { %v1566_v39 = vmul.f32 %v8102_v37, %v1560_v46  ;;  %6939 = vset.pattern.permute.xlu1 %v7402_v32  ;;  %6347 = vmatprep.subr.bf16.mxu0 %v7384_v8 }
 0x17e   : > { %1829 = vperm.xlu1 %6939, %v7924_v1   ;;  %6334 = vmatpush3.bf16.msra.mxu1 %v7034_v38  ;;  %v818_v38 = vpop.permute.xlu0 %817 }
 0x17f   : > { %v1567_v57 = vadd.f32 %v1566_v39, %v1556_v43  ;;  %6335 = vmatprep.subr.bf16.mxu1 %v7384_v8  ;;  %v7411_v43 = vmov 30   ;;  %v7043_v39 = vld [vmem:[#allocation4 + $0x230] sm:$0xff]  }
 0x180   : > { %6348 = vmatpush3.bf16.msra.mxu0 %v7033_v41  ;;  %v751_v59 = vpop.permute.xlu1 %750  ;;  %6966 = vset.pattern.permute.xlu0 %v7411_v43 }
 0x181   : > { %v1575_v25 = vadd.f32 %v8114_v48, %v1567_v57  ;;  %6349 = vmatprep.subr.bf16.mxu0 %v7384_v8  ;;  %v757_v51 = vmul.f32 %v8029_v31, %v751_v59  ;;  %2021 = vperm.xlu0 %6966, %v8120_v7   ;;  %v824_v57 = vmul.f32 %v8091_v24, %v818_v38  ;;  %v7044_v59 = vld [vmem:[#allocation4 + $0x48] sm:$0xff]  }
 0x182   : > { %6940 = vset.pattern.permute.xlu1 %v7408_v13  ;;  %6336 = vmatpush3.bf16.msra.mxu1 %v7036_v54 }
 0x183   : > { %v1576_v11 = vmax.f32 %v1575_v25, 0.0  ;;  %1839 = vperm.xlu1 %6940, %v7924_v1   ;;  %6337 = vmatprep.subr.bf16.mxu1 %v7384_v8  ;;  %v768_v21 = vadd.f32 %v767_v14, %v757_v51  ;;  %v7412_v25 = vmov 28   ;;  %v7047_v51 = vld [vmem:[#allocation4 + $0x50] sm:$0xff]   ;;  %v2965_v14 = vshrl.u32 %v7046_v27, 16 }
 0x184   : > { %6350 = vmatpush3.bf16.msra.mxu0 %v7035_v61 }
 0x185   : > { %v1577_v2 = vsel %vm7831_vm5, %v1576_v11, 0.0  ;;  %6351 = vmatprep.subr.bf16.mxu0 %v7384_v8  ;;  %v772_v17 = vpop.permute.xlu1 %771  ;;  %6969 = vset.pattern.permute.xlu0 %v7412_v25 }
 0x186   : > { %v1578_v0 = vpack.c.bf16 %v1577_v2, %v1577_v2  ;;  %6338 = vmatpush3.bf16.msra.mxu1 %v7038_v9  ;;  %v778_v55 = vmul.f32 %v8044_v47, %v772_v17 }
 0x187   : > { %6942 = vset.pattern.permute.xlu1 %v7401_v22  ;;  %6339 = vmatprep.subr.bf16.mxu1 %v7384_v8 }
 0x188   : > { %v1581_v56 = vsel %vm7837_vm6, %v1578_v0, %v1580_v15  ;;  %6352 = vmatpush3.bf16.msra.mxu0 %v7037_v60  ;;  %1852 = vperm.xlu1 %6942, %v7935_v34   ;;  %v779_v53 = vadd.f32 %v778_v55, %v768_v21  ;;  %v7041_v34 = vld [vmem:[#allocation4 + $0x228] sm:$0xff]   ;;  %v7048_v15 = vld [vmem:[#allocation4] sm:$0xff]   ;;  %v7049_v55 = vld [vmem:[#allocation4 + $0x58] sm:$0xff]  }
 0x189   : > { %1582 = vst [vmem:[#allocation2 + $0x24] sm:$0x7] %v1581_v56  ;;  %6353 = vmatprep.subr.bf16.mxu0 %v7384_v8  ;;  %v7231_v60 = vld [vmem:[%s7598_s26 + $0x8] sm:$0x1f]  ;;  %v1588_v56 = vpop.permute.xlu0 %1587 }
 0x18a   : > { %v785_v28 = vpop.permute.xlu1 %784  ;;  %6340 = vmatpush3.bf16.msra.mxu1 %v7040_v42  ;;  %v5637_v21 = vld [vmem:[%s7598_s26 + $0x9] sm:$0x1f] }
 0x18b   : > { %v791_v26 = vmul.f32 %v8062_v12, %v785_v28  ;;  %6365 = vmatprep.subr.bf16.mxu1 %v7384_v8  ;;  %v7051_v28 = vld [vmem:[#allocation4 + $0x60] sm:$0xff]  }
 0x18c   : > { %6354 = vmatpush3.bf16.msra.mxu0 %v7039_v40  ;;  %6943 = vset.pattern.permute.xlu1 %v7407_v44  ;;  %v2967_v44 = vshll.u32 %v7046_v27, 16  ;;  %v7050_v40 = vld [vmem:[#allocation4 + $0x8] sm:$0xff]  }
 0x18d   : > { %v792_v29 = vadd.f32 %v791_v26, %v779_v53  ;;  %1029 = vperm.xlu1 %6943, %v7230_v30   ;;  %6355 = vmatprep.subr.bf16.mxu0 %v7384_v8  ;;  %v1594_v26 = vmul.f32 %v8029_v31, %v1588_v56  ;;  %v860_v27 = vld [vmem:[#allocation2 + $0xc] sm:$0x7] }
 0x18e   : > { %v7060_v56 = vld [vmem:[#allocation4 + $0x30] sm:$0xff]  }
 0x18f   : > { %v803_v10 = vadd.f32 %v802_v50, %v792_v29  ;;  %v807_v52 = vpop.permute.xlu1 %806  ;;  %v1624_v29 = vpop.permute.xlu0 %1623 }
 0x190   : > { %6356 = vmatpush3.bf16.msra.mxu0 %v7041_v34  ;;  %v813_v46 = vmul.f32 %v8077_v18, %v807_v52  ;;  %v2836_v41 = vld [vmem:[#allocation2 + $0x24] sm:$0x3]  ;;  %v7052_v34 = vld [vmem:[#allocation4 + $0x10] sm:$0xff]   ;;  %v7053_v52 = vld [vmem:[#allocation4 + $0x68] sm:$0xff]  }
 0x191   : > { %6944 = vset.pattern.permute.xlu1 %v7402_v32  ;;  %6342 = vmatmul.mubr.bf16.vlgmr.msra.gmra.mrb[12].mxu1 %v2836_v41  ;;  %v2969_v32 = vrot.slane %v2967_v44, 1 }
 0x192   : > { %v814_v54 = vadd.f32 %v813_v46, %v803_v10  ;;  %6357 = vmatprep.subr.bf16.mxu0 %v7384_v8  ;;  %6366 = vmatpush3.bf16.msra.mxu1 %v7042_v35  ;;  %v7232_v10 = vld [vmem:[%s7598_s26] sm:$0x1f] }
 0x193   : > { %1040 = vperm.xlu1 %6944, %v7230_v30   ;;  %6367 = vmatprep.subr.bf16.mxu1 %v7384_v8  ;;  %v2970_v2 = vor.u32 %v2969_v32, %v2965_v14  ;;  %v7413_v30 = vmov 25   ;;  %v7056_v32 = vld [vmem:[#allocation4 + $0x20] sm:$0xff]  }
 0x194   : > { %6358 = vmatpush3.bf16.msra.mxu0 %v7043_v39  ;;  %v829_v61 = vpop.permute.xlu1 %828  ;;  %6381 = vmatprep.mubr.msk.bf16.mxu1 %vm7390_vm0, %v7384_v8  ;;  %v825_v9 = vadd.f32 %v824_v57, %v814_v54  ;;  %v7054_v39 = vld [vmem:[#allocation4 + $0x18] sm:$0xff]   ;;  %v1630_v54 = vmul.f32 %v8062_v12, %v1624_v29 }
 0x195   : > { %6359 = vmatprep.subr.bf16.mxu0 %v7384_v8  ;;  %v835_v11 = vmul.f32 %v8009_v62, %v829_v61 }
 0x196   : > { %6368 = vmatpush3.bf16.msra.mxu1 %v7044_v59  ;;  %v7055_v59 = vld [vmem:[#allocation4 + $0x70] sm:$0xff]  }
 0x197   : > { %6945 = vset.pattern.permute.xlu1 %v7408_v13  ;;  %6369 = vmatprep.subr.bf16.mxu1 %v7384_v8  ;;  %v836_v0 = vadd.f32 %v835_v11, %v825_v9 }
 0x198   : > { %6360 = vmatpush3.bf16.msra.mxu0 %v7045_v3  ;;  %1876 = vperm.xlu1 %6945, %v7231_v60   ;;  %v1648_v3 = vpop.permute.xlu0 %1647  ;;  %v7057_v60 = vld [vmem:[#allocation4 + $0x78] sm:$0xff]  }
 0x199   : > { %6385 = vmatprep.subr.bf16.mxu0 %v7384_v8  ;;  %v840_v17 = vpop.permute.xlu1 %839  ;;  %v1654_v14 = vmul.f32 %v8077_v18, %v1648_v3  ;;  %v7075_v3 = vld [vmem:[#allocation2 + $0x8] ss:$0 sps:$4 sm:$0x77]  }
 0x19a   : > { %6370 = vmatpush3.bf16.msra.mxu1 %v7047_v51  ;;  %v846_v42 = vmul.f32 %v8102_v37, %v840_v17 }
 0x19b   : > { %6362 = vmatmul.mubr.bf16.vlgmr.msra.gmra.mrb[16].mxu0 %v2970_v2  ;;  %6371 = vmatprep.subr.bf16.mxu1 %v7384_v8  ;;  %v7058_v2 = vld [vmem:[#allocation4 + $0x28] sm:$0xff]  }
 0x19c   : > { %v847_v13 = vadd.f32 %v846_v42, %v836_v0  ;;  %6386 = vmatpush3.bf16.msra.mxu0 %v7048_v15  ;;  %6947 = vset.pattern.permute.xlu1 %v7401_v22  ;;  %v7059_v42 = vld [vmem:[#allocation4 + $0x80] sm:$0xff]  }
 0x19d   : > { %1889 = vperm.xlu1 %6947, %v5637_v21   ;;  %6387 = vmatprep.subr.bf16.mxu0 %v7384_v8 }
 0x19e   : > { %v855_v20 = vadd.f32 %v8114_v48, %v847_v13  ;;  %6372 = vmatpush3.bf16.msra.mxu1 %v7049_v55  ;;  %v1598_v53 = vpop.permute.xlu1 %1597  ;;  %6401 = vmatprep.mubr.msk.bf16.mxu0 %vm7390_vm0, %v7384_v8  ;;  %v3088_v55 = vld [vmem:[#allocation2 + $0x24] sm:$0x3]  ;;  %v1681_v13 = vpop.permute.xlu0 %1680 }
 0x19f   : > { %6373 = vmatprep.subr.bf16.mxu1 %v7384_v8  ;;  %v1604_v50 = vmul.f32 %v8037_v36, %v1598_v53  ;;  %v7062_v53 = vld [vmem:[#allocation4 + $0x38] sm:$0xff]  }
 0x1a0   : > { %v856_v22 = vmax.f32 %v855_v20, 0.0  ;;  %6388 = vmatpush3.bf16.msra.mxu0 %v7050_v40 }
 0x1a1   : > { %6948 = vset.pattern.permute.xlu1 %v7413_v30  ;;  %6389 = vmatprep.subr.bf16.mxu0 %v7384_v8  ;;  %v1605_v38 = vadd.f32 %v1604_v50, %v1594_v26  ;;  %v7063_v50 = vld [vmem:[#allocation4 + $0x90] sm:$0xff]  }
 0x1a2   : > { %v857_v35 = vsel %vm7876_vm9, %v856_v22, 0.0  ;;  %1062 = vperm.xlu1 %6948, %v7232_v10   ;;  %6374 = vmatpush3.bf16.msra.mxu1 %v7051_v28  ;;  %v1687_v28 = vmul.f32 %v8102_v37, %v1681_v13  ;;  %v7077_v13 = vld [vmem:[#allocation4 + $0xf0] sm:$0xff]  }
 0x1a3   : > { %v858_v46 = vpack.c.bf16 %v857_v35, %v857_v35  ;;  %6375 = vmatprep.subr.bf16.mxu1 %v7384_v8  ;;  %v1611_v41 = vpop.permute.xlu1 %1610  ;;  %v7065_v35 = vld [vmem:[#allocation4 + $0x98] sm:$0xff]  }
 0x1a4   : > { %6390 = vmatpush3.bf16.msra.mxu0 %v7052_v34  ;;  %v1617_v44 = vmul.f32 %v8044_v47, %v1611_v41 }
 0x1a5   : > { %v861_v57 = vsel %vm7837_vm6, %v858_v46, %v860_v27  ;;  %6391 = vmatprep.subr.bf16.mxu0 %v7384_v8  ;;  %v3071_v27 = vld [vmem:[#allocation2 + $0x8] sm:$0x3] }
 0x1a6   : > { %862 = vst [vmem:[#allocation2 + $0xc] sm:$0x7] %v861_v57  ;;  %6950 = vset.pattern.permute.xlu1 %v7405_v23  ;;  %6376 = vmatpush3.bf16.msra.mxu1 %v7053_v52  ;;  %v1618_v61 = vadd.f32 %v1617_v44, %v1605_v38  ;;  %v7066_v52 = vld [vmem:[#allocation4 + $0xc8] sm:$0xff]   ;;  %v7067_v44 = vld [vmem:[#allocation4 + $0xa0] sm:$0xff]   ;;  %v7068_v57 = vld [vmem:[#allocation4 + $0xd0] sm:$0xff]  }
 0x1a7   : > { %1073 = vperm.xlu1 %6950, %v7232_v10   ;;  %6377 = vmatprep.subr.bf16.mxu1 %v7384_v8  ;;  %v1701_v46 = vld [vmem:[#allocation2 + $0x28] sm:$0x7] }
 0x1a8   : > { %6392 = vmatpush3.bf16.msra.mxu0 %v7054_v39  ;;  %v1635_v9 = vpop.permute.xlu1 %1634  ;;  %v1631_v11 = vadd.f32 %v1630_v54, %v1618_v61  ;;  %v7069_v61 = vld [vmem:[#allocation4 + $0xa8] sm:$0xff]  }
 0x1a9   : > { %6393 = vmatprep.subr.bf16.mxu0 %v7384_v8  ;;  %v1641_v51 = vmul.f32 %v8072_v16, %v1635_v9  ;;  %v7071_v9 = vld [vmem:[#allocation4 + $0xb0] sm:$0xff]  }
 0x1aa   : > { %6378 = vmatpush3.bf16.msra.mxu1 %v7055_v59 }
 0x1ab   : > { %6379 = vmatprep.subr.bf16.mxu1 %v7384_v8  ;;  %v1642_v15 = vadd.f32 %v1641_v51, %v1631_v11  ;;  %6951 = vset.pattern.permute.xlu1 %v7410_v33  ;;  %v7061_v33 = vld [vmem:[#allocation4 + $0x88] sm:$0xff]   ;;  %v3304_v51 = vshll.u32 %v7075_v3, 16 }
 0x1ac   : > { %6394 = vmatpush3.bf16.msra.mxu0 %v7056_v32  ;;  %1911 = vperm.xlu1 %6951, %v7924_v1   ;;  %v7070_v32 = vld [vmem:[#allocation4 + $0xd8] sm:$0xff]  }
 0x1ad   : > { %6395 = vmatprep.subr.bf16.mxu0 %v7384_v8  ;;  %v1659_v17 = vpop.permute.xlu1 %1658  ;;  %v1655_v0 = vadd.f32 %v1654_v14, %v1642_v15  ;;  %v7072_v14 = vld [vmem:[#allocation4 + $0xe0] sm:$0xff]   ;;  %v3306_v15 = vrot.slane %v3304_v51, 1 }
 0x1ae   : > { %6380 = vmatpush3.bf16.msra.mxu1 %v7057_v60  ;;  %v1665_v21 = vmul.f32 %v8091_v24, %v1659_v17  ;;  %v3302_v17 = vshrl.u32 %v7075_v3, 16 }
 0x1af   : > { %6405 = vmatprep.subr.bf16.mxu1 %v7384_v8 }
 0x1b0   : > { %6396 = vmatpush3.bf16.msra.mxu0 %v7058_v2  ;;  %6953 = vset.pattern.permute.xlu1 %v7404_v49  ;;  %v1666_v1 = vadd.f32 %v1665_v21, %v1655_v0  ;;  %v7074_v2 = vld [vmem:[#allocation4 + $0xe8] sm:$0xff]   ;;  %v7076_v0 = vld [vmem:[#allocation4 + $0x100] sm:$0xff]  }
 0x1b1   : > { %6382 = vmatmul.mubr.bf16.vlgmr.msra.gmra.mrb[16].mxu1 %v3088_v55  ;;  %6397 = vmatprep.subr.bf16.mxu0 %v7384_v8 }
 0x1b2   : > { %6406 = vmatpush3.bf16.msra.mxu1 %v7059_v42  ;;  %v1670_v40 = vpop.permute.xlu1 %1669  ;;  %6421 = vmatprep.mubr.msk.bf16.mxu1 %vm7390_vm0, %v7384_v8  ;;  %v3307_v42 = vor.u32 %v3306_v15, %v3302_v17  ;;  %v7087_v15 = vld [vmem:[#allocation4 + $0x158] sm:$0xff]  }
 0x1b3   : > { %6407 = vmatprep.subr.bf16.mxu1 %v7384_v8  ;;  %v1676_v20 = vmul.f32 %v8009_v62, %v1670_v40  ;;  %1101 = vperm.xlu1 %6953, %v8020_v45   ;;  %v7064_v62 = vld [vmem:[#allocation4 + $0xc0] sm:$0xff]   ;;  %v7079_v40 = vld [vmem:[#allocation4 + $0xf8] sm:$0xff]  }
 0x1b4   : > { %6398 = vmatpush3.bf16.msra.mxu0 %v7060_v56 }
 0x1b5   : > { %6399 = vmatprep.subr.bf16.mxu0 %v7384_v8  ;;  %v1677_v26 = vadd.f32 %v1676_v20, %v1666_v1 }
 0x1b6   : > { %6408 = vmatpush3.bf16.msra.mxu1 %v7061_v33 }
 0x1b7   : > { %6409 = vmatprep.subr.bf16.mxu1 %v7384_v8  ;;  %v8209_v22 = vpop.permute.xlu1 %867  ;;  %v1688_v34 = vadd.f32 %v1687_v28, %v1677_v26  ;;  %6954 = vset.pattern.permute.xlu1 %v7413_v30  ;;  %v7080_v26 = vld [vmem:[#allocation4 + $0x110] sm:$0xff]  }
 0x1b8   : > { %6400 = vmatpush3.bf16.msra.mxu0 %v7062_v53  ;;  %1111 = vperm.xlu1 %6954, %v8020_v45   ;;  %v874_v21 = vmul.f32 %v8029_v31, %v8209_v22 }
 0x1b9   : > { %6425 = vmatprep.subr.bf16.mxu0 %v7384_v8  ;;  %v1696_v29 = vadd.f32 %v8114_v48, %v1688_v34 }
 0x1ba   : > { %6410 = vmatpush3.bf16.msra.mxu1 %v7063_v50  ;;  %v8254_v50 = vld [vmem:[%s7598_s26 + $0x1] sm:$0x1f] }
 0x1bb   : > { %6402 = vmatmul.mubr.bf16.vlgmr.msra.gmra.mrb[20].mxu0 %v3071_v27  ;;  %6411 = vmatprep.subr.bf16.mxu1 %v7384_v8  ;;  %v1697_v10 = vmax.f32 %v1696_v29, 0.0 }
 0x1bc   : > { %6426 = vmatpush3.bf16.msra.mxu0 %v7064_v62  ;;  %v878_v38 = vpop.permute.xlu1 %877  ;;  %6441 = vmatprep.mubr.msk.bf16.mxu0 %vm7390_vm0, %v7384_v8 }
 0x1bd   : > { %6427 = vmatprep.subr.bf16.mxu0 %v7384_v8  ;;  %v1698_v41 = vsel %vm7831_vm5, %v1697_v10, 0.0  ;;  %6956 = vset.pattern.permute.xlu1 %v7404_v49  ;;  %v884_v55 = vmul.f32 %v8037_v36, %v878_v38  ;;  %v7081_v10 = vld [vmem:[#allocation4 + $0x140] sm:$0xff]   ;;  %v7082_v38 = vld [vmem:[#allocation4 + $0x118] sm:$0xff]  }
 0x1be   : > { %6412 = vmatpush3.bf16.msra.mxu1 %v7065_v35  ;;  %v1699_v39 = vpack.c.bf16 %v1698_v41, %v1698_v41  ;;  %1135 = vperm.xlu1 %6956, %v8052_v19  }
 0x1bf   : > { %6413 = vmatprep.subr.bf16.mxu1 %v7384_v8 }
 0x1c0   : > { %6428 = vmatpush3.bf16.msra.mxu0 %v7066_v52  ;;  %v1702_v54 = vsel %vm7837_vm6, %v1699_v39, %v1701_v46  ;;  %v3398_v52 = vld [vmem:[#allocation2 + $0xc] sm:$0x3] }
 0x1c1   : > { %1703 = vst [vmem:[#allocation2 + $0x28] sm:$0x7] %v1702_v54  ;;  %6429 = vmatprep.subr.bf16.mxu0 %v7384_v8  ;;  %v1709_v59 = vpop.permute.xlu1 %1708  ;;  %v7083_v54 = vld [vmem:[#allocation4 + $0x148] sm:$0xff]  }
 0x1c2   : > { %6414 = vmatpush3.bf16.msra.mxu1 %v7067_v44  ;;  %6957 = vset.pattern.permute.xlu1 %v7413_v30  ;;  %v902_v30 = vpop.permute.xlu0 %901  ;;  %v1715_v22 = vmul.f32 %v8029_v31, %v1709_v59 }
 0x1c3   : > { %6415 = vmatprep.subr.bf16.mxu1 %v7384_v8  ;;  %1146 = vperm.xlu1 %6957, %v8052_v19   ;;  %v7073_v19 = vld [vmem:[#allocation4 + $0xb8] sm:$0xff]   ;;  %v908_v29 = vmul.f32 %v8062_v12, %v902_v30 }
 0x1c4   : > { %6430 = vmatpush3.bf16.msra.mxu0 %v7068_v57  ;;  %v7084_v57 = vld [vmem:[#allocation4 + $0x120] sm:$0xff]  }
 0x1c5   : > { %6431 = vmatprep.subr.bf16.mxu0 %v7384_v8 }
 0x1c6   : > { %6416 = vmatpush3.bf16.msra.mxu1 %v7069_v61  ;;  %v1719_v11 = vpop.permute.xlu1 %1718  ;;  %v889_v1 = vpop.permute.xlu0 %888 }
 0x1c7   : > { %6417 = vmatprep.subr.bf16.mxu1 %v7384_v8  ;;  %6958 = vset.pattern.permute.xlu1 %v7412_v25  ;;  %v895_v33 = vmul.f32 %v8044_v47, %v889_v1  ;;  %v1725_v34 = vmul.f32 %v8037_v36, %v1719_v11  ;;  %v5649_v11 = vld [vmem:[%s7598_s26 + $0x9] sm:$0x1f] }
 0x1c8   : > { %6432 = vmatpush3.bf16.msra.mxu0 %v7070_v32  ;;  %1168 = vperm.xlu1 %6958, %v8020_v45  }
 0x1c9   : > { %6433 = vmatprep.subr.bf16.mxu0 %v7384_v8  ;;  %v1726_v36 = vadd.f32 %v1725_v34, %v1715_v22 }
 0x1ca   : > { %6418 = vmatpush3.bf16.msra.mxu1 %v7071_v9  ;;  %v1745_v41 = vpop.permute.xlu0 %1744  ;;  %v7085_v9 = vld [vmem:[#allocation4 + $0x150] sm:$0xff]  }
 0x1cb   : > { %6419 = vmatprep.subr.bf16.mxu1 %v7384_v8  ;;  %v1732_v60 = vpop.permute.xlu1 %1731  ;;  %v1751_v59 = vmul.f32 %v8062_v12, %v1745_v41  ;;  %v8282_v12 = vld [vmem:[%s8647_s1 + $0x7] ss:$0 sm:$0xff] }
 0x1cc   : > { %6434 = vmatpush3.bf16.msra.mxu0 %v7072_v14  ;;  %6960 = vset.pattern.permute.xlu1 %v7411_v43  ;;  %v885_v43 = vadd.f32 %v884_v55, %v874_v21  ;;  %v1738_v46 = vmul.f32 %v8044_v47, %v1732_v60  ;;  %v7089_v55 = vld [vmem:[#allocation4 + $0x160] sm:$0xff]  }
 0x1cd   : > { %6435 = vmatprep.subr.bf16.mxu0 %v7384_v8  ;;  %1190 = vperm.xlu1 %6960, %v8020_v45   ;;  %v7078_v45 = vld [vmem:[#allocation4 + $0x108] sm:$0xff]  }
 0x1ce   : > { %6420 = vmatpush3.bf16.msra.mxu1 %v7073_v19  ;;  %v896_v27 = vadd.f32 %v895_v33, %v885_v43  ;;  %v1739_v47 = vadd.f32 %v1738_v46, %v1726_v36  ;;  %v935_v51 = vpop.permute.xlu0 %934  ;;  %v7094_v46 = vld [vmem:[#allocation4 + $0x188] sm:$0xff]  }
 0x1cf   : > { %6445 = vmatprep.subr.bf16.mxu1 %v7384_v8  ;;  %v941_v30 = vmul.f32 %v8091_v24, %v935_v51 }
 0x1d0   : > { %6436 = vmatpush3.bf16.msra.mxu0 %v7074_v2  ;;  %v913_v56 = vpop.permute.xlu1 %912  ;;  %v909_v39 = vadd.f32 %v908_v29, %v896_v27  ;;  %v7093_v27 = vld [vmem:[#allocation4 + $0x170] sm:$0xff]  }
 0x1d1   : > { %6422 = vmatmul.mubr.bf16.vlgmr.msra.gmra.mrb[20].mxu1 %v3307_v42  ;;  %6437 = vmatprep.subr.bf16.mxu0 %v7384_v8  ;;  %v919_v44 = vmul.f32 %v8072_v16, %v913_v56 }
 0x1d2   : > { %6446 = vmatpush3.bf16.msra.mxu1 %v7076_v0  ;;  %6461 = vmatprep.mubr.msk.bf16.mxu1 %vm7390_vm0, %v7384_v8  ;;  %v7414_v0 = vmov 31   ;;  %v1780_v21 = vpop.permute.xlu0 %1779 }
 0x1d3   : > { %6447 = vmatprep.subr.bf16.mxu1 %v7384_v8  ;;  %6961 = vset.pattern.permute.xlu1 %v7405_v23  ;;  %v920_v3 = vadd.f32 %v919_v44, %v909_v39 }
 0x1d4   : > { %6438 = vmatpush3.bf16.msra.mxu0 %v7077_v13  ;;  %1950 = vperm.xlu1 %6961, %v8120_v7  }
 0x1d5   : > { %v8250_v20 = vpop.f32.mrb[0].mxu0  ;;  %6439 = vmatprep.subr.bf16.mxu0 %v7384_v8  ;;  %v924_v28 = vpop.permute.xlu1 %923 }
 0x1d6   : > { %6448 = vmatpush3.bf16.msra.mxu1 %v7078_v45  ;;  %v6203_v53 = vpop.f32.mrb[1].mxu0  ;;  %v930_v32 = vmul.f32 %v8077_v18, %v924_v28  ;;  %v7090_v45 = vld [vmem:[#allocation4 + $0x138] sm:$0xff]   ;;  %v1802_v28 = vpop.permute.xlu0 %1801 }
 0x1d7   : > { %v2188_v62 = vpop.f32.mrb[2].mxu0  ;;  %6449 = vmatprep.subr.bf16.mxu1 %v7384_v8 }
 0x1d8   : > { %6440 = vmatpush3.bf16.msra.mxu0 %v7079_v40  ;;  %v6204_v35 = vpop.f32.mrb[3].mxu0  ;;  %6963 = vset.pattern.permute.xlu1 %v7404_v49  ;;  %v931_v19 = vadd.f32 %v930_v32, %v920_v3  ;;  %v7091_v40 = vld [vmem:[#allocation4 + $0x168] sm:$0xff]   ;;  %v7097_v3 = vld [vmem:[#allocation4 + $0x190] sm:$0xff]  }
 0x1d9   : > { %6465 = vmatprep.subr.bf16.mxu0 %v7384_v8  ;;  %1973 = vperm.xlu1 %6963, %v8254_v50   ;;  %v977_v35 = vld [vmem:[#allocation2 + $0x10] sm:$0x7] }
 0x1da   : > { %6450 = vmatpush3.bf16.msra.mxu1 %v7080_v26  ;;  %v1756_v31 = vpop.permute.xlu1 %1755  ;;  %v942_v42 = vadd.f32 %v941_v30, %v931_v19  ;;  %v7092_v26 = vld [vmem:[#allocation4 + $0x180] sm:$0xff]  }
 0x1db   : > { %6442 = vmatmul.mubr.bf16.vlgmr.msra.gmra.mrb[24].mxu0 %v3398_v52  ;;  %6451 = vmatprep.subr.bf16.mxu1 %v7384_v8  ;;  %v1762_v14 = vmul.f32 %v8072_v16, %v1756_v31  ;;  %v7088_v16 = vld [vmem:[#allocation4 + $0x130] sm:$0xff]   ;;  %v8312_v31 = vld [vmem:[%s8648_s2] ss:$0 sm:$0xff] }
 0x1dc   : > { %6466 = vmatpush3.bf16.msra.mxu0 %v7081_v10  ;;  %6481 = vmatprep.mubr.msk.bf16.mxu0 %vm7390_vm0, %v7384_v8 }
 0x1dd   : > { %6467 = vmatprep.subr.bf16.mxu0 %v7384_v8  ;;  %6964 = vset.pattern.permute.xlu1 %v7405_v23  ;;  %v7086_v23 = vld [vmem:[#allocation4 + $0x128] sm:$0xff]  }
 0x1de   : > { %6452 = vmatpush3.bf16.msra.mxu1 %v7082_v38  ;;  %1986 = vperm.xlu1 %6964, %v8141_v4   ;;  %v1752_v4 = vadd.f32 %v1751_v59, %v1739_v47  ;;  %v7095_v47 = vld [vmem:[#allocation4 + $0x178] sm:$0xff]  }
 0x1df   : > { %v1769_v61 = vpop.permute.xlu1 %1768  ;;  %6453 = vmatprep.subr.bf16.mxu1 %v7384_v8 }
 0x1e0   : > { %6468 = vmatpush3.bf16.msra.mxu0 %v7083_v54  ;;  %v1763_v2 = vadd.f32 %v1762_v14, %v1752_v4  ;;  %v1775_v17 = vmul.f32 %v8077_v18, %v1769_v61  ;;  %v1786_v18 = vmul.f32 %v8091_v24, %v1780_v21  ;;  %v7101_v21 = vld [vmem:[#allocation4 + $0x1a0] sm:$0xff]  }
 0x1e1   : > { %6469 = vmatprep.subr.bf16.mxu0 %v7384_v8 }
 0x1e2   : > { %6454 = vmatpush3.bf16.msra.mxu1 %v7084_v57  ;;  %6965 = vset.pattern.permute.xlu1 %v7404_v49  ;;  %v1776_v43 = vadd.f32 %v1775_v17, %v1763_v2 }
 0x1e3   : > { %6455 = vmatprep.subr.bf16.mxu1 %v7384_v8  ;;  %2010 = vperm.xlu1 %6965, %v5649_v11   ;;  %v7098_v11 = vld [vmem:[#allocation4 + $0x1c0] sm:$0xff]  }
 0x1e4   : > { %6470 = vmatpush3.bf16.msra.mxu0 %v7085_v9  ;;  %v946_v60 = vpop.permute.xlu1 %945  ;;  %v1787_v22 = vadd.f32 %v1786_v18, %v1776_v43  ;;  %v7106_v18 = vld [vmem:[#allocation4 + $0x1e0] sm:$0xff]  }
 0x1e5   : > { %6471 = vmatprep.subr.bf16.mxu0 %v7384_v8  ;;  %v952_v49 = vmul.f32 %v8282_v12, %v946_v60 }
 0x1e6   : > { %6456 = vmatpush3.bf16.msra.mxu1 %v7086_v23  ;;  %v1822_v23 = vld [vmem:[#allocation2 + $0x2c] sm:$0x7] }
 0x1e7   : > { %6457 = vmatprep.subr.bf16.mxu1 %v7384_v8  ;;  %6967 = vset.pattern.permute.xlu1 %v7414_v0  ;;  %v953_v13 = vadd.f32 %v952_v49, %v942_v42  ;;  %v7099_v49 = vld [vmem:[#allocation4 + $0x198] sm:$0xff]   ;;  %v7100_v0 = vld [vmem:[#allocation4 + $0x1c8] sm:$0xff]  }
 0x1e8   : > { %6472 = vmatpush3.bf16.msra.mxu0 %v7087_v15  ;;  %2032 = vperm.xlu1 %6967, %v8120_v7   ;;  %v8297_v7 = vld [vmem:[%s8647_s1 + $0x8] ss:$0 sm:$0xff] }
 0x1e9   : > { %6473 = vmatprep.subr.bf16.mxu0 %v7384_v8  ;;  %v957_v56 = vpop.permute.xlu1 %956  ;;  %v1808_v62 = vmul.f32 %v8297_v7, %v1802_v28  ;;  %v7108_v28 = vld [vmem:[#allocation4 + $0x1e8] sm:$0xff]  }
 0x1ea   : > { %6458 = vmatpush3.bf16.msra.mxu1 %v7088_v16  ;;  %v963_v1 = vmul.f32 %v8102_v37, %v957_v56  ;;  %v7096_v37 = vld [vmem:[#allocation2 + $0xc] ss:$0 sps:$4 sm:$0x77]  }
 0x1eb   : > { %6459 = vmatprep.subr.bf16.mxu1 %v7384_v8  ;;  %v3631_v9 = vshrl.u32 %v7096_v37, 16 }
 0x1ec   : > { %v964_v33 = vadd.f32 %v963_v1, %v953_v13  ;;  %6474 = vmatpush3.bf16.msra.mxu0 %v7089_v55  ;;  %6968 = vset.pattern.permute.xlu1 %v7412_v25  ;;  %v3504_v25 = vld [vmem:[#allocation2 + $0x28] sm:$0x3]  ;;  %v7102_v55 = vld [vmem:[#allocation4 + $0x1d0] sm:$0xff]   ;;  %v7104_v1 = vld [vmem:[#allocation4 + $0x1d8] sm:$0xff]  }
 0x1ed   : > { %6475 = vmatprep.subr.bf16.mxu0 %v7384_v8  ;;  %2043 = vperm.xlu1 %6968, %v8254_v50   ;;  %v7103_v13 = vld [vmem:[#allocation4 + $0x1a8] sm:$0xff]  }
 0x1ee   : > { %v972_v24 = vadd.f32 %v8114_v48, %v964_v33  ;;  %6460 = vmatpush3.bf16.msra.mxu1 %v7090_v45  ;;  %v1791_v53 = vpop.permute.xlu1 %1790  ;;  %v3633_v48 = vshll.u32 %v7096_v37, 16  ;;  %v7105_v45 = vld [vmem:[#allocation4 + $0x1b0] sm:$0xff]   ;;  %v7107_v33 = vld [vmem:[#allocation4 + $0x1b8] sm:$0xff]  }
 0x1ef   : > { %v1797_v34 = vmul.f32 %v8282_v12, %v1791_v53  ;;  %6485 = vmatprep.subr.bf16.mxu1 %v7384_v8  ;;  %v8352_v53 = vld [vmem:[%s8647_s1 + $0x1] ss:$0 sm:$0xff] }
 0x1f0   : > { %v973_v29 = vmax.f32 %v972_v24, 0.0  ;;  %6476 = vmatpush3.bf16.msra.mxu0 %v7091_v40  ;;  %v3635_v61 = vrot.slane %v3633_v48, 1  ;;  %v1019_v40 = vpop.permute.xlu0 %1018  ;;  %v8347_v24 = vld [vmem:[%s8647_s1] ss:$0 sm:$0xff] }
 0x1f1   : > { %v1798_v10 = vadd.f32 %v1797_v34, %v1787_v22  ;;  %6462 = vmatmul.mubr.bf16.vlgmr.msra.gmra.mrb[24].mxu1 %v3504_v25  ;;  %v2273_v50 = vpop.f32.mrb[0].mxu1  ;;  %6477 = vmatprep.subr.bf16.mxu0 %v7384_v8  ;;  %v7110_v34 = vld [vmem:[#allocation4 + $0x1f0] sm:$0xff]  }
 0x1f2   : > { %v974_v52 = vsel %vm7876_vm9, %v973_v29, 0.0  ;;  %v2274_v38 = vadd.f32 %v2273_v50, %v8250_v20  ;;  %6486 = vmatpush3.bf16.msra.mxu1 %v7092_v26  ;;  %v6223_v36 = vpop.f32.mrb[1].mxu1  ;;  %6501 = vmatprep.mubr.msk.bf16.mxu1 %vm7390_vm0, %v7384_v8  ;;  %v3636_v19 = vor.u32 %v3635_v61, %v3631_v9  ;;  %v7109_v26 = vld [vmem:[#allocation4 + $0x200] sm:$0xff]   ;;  %v7111_v50 = vld [vmem:[#allocation4 + $0x208] sm:$0xff]  }
 0x1f3   : > { %v975_v41 = vpack.c.bf16 %v974_v52, %v974_v52  ;;  %v1809_v39 = vadd.f32 %v1808_v62, %v1798_v10  ;;  %v2276_v44 = vpop.f32.mrb[2].mxu1  ;;  %6487 = vmatprep.subr.bf16.mxu1 %v7384_v8  ;;  %v8318_v54 = vpop.permute.xlu1 %984  ;;  %v7112_v52 = vld [vmem:[#allocation4 + $0x1f8] sm:$0xff]   ;;  %v8389_v9 = vld [vmem:[%s8647_s1 + $0x5] ss:$0 sm:$0xff] }
 0x1f4   : > { %6478 = vmatpush3.bf16.msra.mxu0 %v7093_v27  ;;  %v6224_v57 = vpop.f32.mrb[3].mxu1  ;;  %v991_v62 = vmul.f32 %v8347_v24, %v8318_v54  ;;  %v8363_v27 = vld [vmem:[%s8647_s1 + $0x2] ss:$0 sm:$0xff]  ;;  %v7113_v44 = vld [vmem:[#allocation4 + $0x210] sm:$0xff]  }
 0x1f5   : > { %v978_v59 = vsel %vm7837_vm6, %v975_v41, %v977_v35  ;;  %v1817_v20 = vadd.f32 %v8312_v31, %v1809_v39  ;;  %6479 = vmatprep.subr.bf16.mxu0 %v7384_v8  ;;  %v1006_v35 = vpop.permute.xlu0 %1005  ;;  %v8381_v57 = vld [vmem:[%s8647_s1 + $0x4] ss:$0 sm:$0xff] }
 0x1f6   : > { %979 = vst [vmem:[#allocation2 + $0x10] sm:$0x7] %v978_v59  ;;  %6488 = vmatpush3.bf16.msra.mxu1 %v7094_v46  ;;  %v1012_v36 = vmul.f32 %v8363_v27, %v1006_v35  ;;  %v8374_v46 = vld [vmem:[%s8647_s1 + $0x3] ss:$0 sm:$0xff] }
 0x1f7   : > { %v1818_v32 = vmax.f32 %v1817_v20, 0.0  ;;  %6489 = vmatprep.subr.bf16.mxu1 %v7384_v8  ;;  %v7114_v59 = vld [vmem:[#allocation4 + $0x40] sm:$0xff]   ;;  %v1025_v20 = vmul.f32 %v8374_v46, %v1019_v40  ;;  %v7119_v40 = vld [vmem:[#allocation4 + $0x228] sm:$0xff]  }
 0x1f8   : > { %6480 = vmatpush3.bf16.msra.mxu0 %v7095_v47  ;;  %v995_v51 = vpop.permute.xlu1 %994  ;;  %v2390_v14 = vpop.f32.mrb[4].mxu0 }
 0x1f9   : > { %v1819_v4 = vsel %vm7831_vm5, %v1818_v32, 0.0  ;;  %6505 = vmatprep.subr.bf16.mxu0 %v7384_v8  ;;  %v8328_v60 = vadd.f32 %v2390_v14, %v2274_v38  ;;  %v6243_v15 = vpop.f32.mrb[5].mxu0  ;;  %v1001_v29 = vmul.f32 %v8352_v53, %v995_v51  ;;  %v1866_v47 = vpop.permute.xlu0 %1865  ;;  %v7115_v51 = vld [vmem:[#allocation4 + $0x218] sm:$0xff]   ;;  %v7116_v14 = vld [vmem:[#allocation4 + $0x48] sm:$0xff]  }
 0x1fa   : > { %v1820_v30 = vpack.c.bf16 %v1819_v4, %v1819_v4  ;;  %6490 = vmatpush3.bf16.msra.mxu1 %v7097_v3  ;;  %v2393_v16 = vpop.f32.mrb[6].mxu0  ;;  %v1872_v32 = vmul.f32 %v8374_v46, %v1866_v47 }
 0x1fb   : > { %6482 = vmatmul.mubr.bf16.vlgmr.msra.gmra.mrb[28].mxu0 %v3636_v19  ;;  %6491 = vmatprep.subr.bf16.mxu1 %v7384_v8  ;;  %v6244_v17 = vpop.f32.mrb[7].mxu0  ;;  %v1002_v38 = vadd.f32 %v1001_v29, %v991_v62 }
 0x1fc   : > { %v1823_v2 = vsel %vm7837_vm6, %v1820_v30, %v1822_v23  ;;  %6506 = vmatpush3.bf16.msra.mxu0 %v7098_v11  ;;  %6521 = vmatprep.mubr.msk.bf16.mxu0 %vm7390_vm0, %v7384_v8  ;;  %v7117_v17 = vld [vmem:[#allocation4 + $0x220] sm:$0xff]  }
 0x1fd   : > { %1824 = vst [vmem:[#allocation2 + $0x2c] sm:$0x7] %v1823_v2  ;;  %6507 = vmatprep.subr.bf16.mxu0 %v7384_v8  ;;  %v1830_v42 = vpop.permute.xlu1 %1829  ;;  %v3727_v22 = vld [vmem:[#allocation2 + $0x10] sm:$0x3]  ;;  %v1013_v61 = vadd.f32 %v1012_v36, %v1002_v38  ;;  %v1052_v16 = vpop.permute.xlu0 %1051 }
 0x1fe   : > { %6492 = vmatpush3.bf16.msra.mxu1 %v7099_v49  ;;  %v1836_v25 = vmul.f32 %v8347_v24, %v1830_v42  ;;  %v8400_v49 = vld [vmem:[%s8647_s1 + $0x6] ss:$0 sm:$0xff] }
 0x1ff   : > { %6493 = vmatprep.subr.bf16.mxu1 %v7384_v8  ;;  %v1026_v19 = vadd.f32 %v1025_v20, %v1013_v61 }
 0x200   : > { %6508 = vmatpush3.bf16.msra.mxu0 %v7100_v0 }
 0x201   : > { %6509 = vmatprep.subr.bf16.mxu0 %v7384_v8 }
 0x202   : > { %6494 = vmatpush3.bf16.msra.mxu1 %v7101_v21  ;;  %v1840_v56 = vpop.permute.xlu1 %1839  ;;  %v7118_v21 = vld [vmem:[#allocation4 + $0x50] sm:$0xff]  }
 0x203   : > { %6495 = vmatprep.subr.bf16.mxu1 %v7384_v8  ;;  %v1846_v10 = vmul.f32 %v8352_v53, %v1840_v56  ;;  %v1058_v56 = vmul.f32 %v8400_v49, %v1052_v16  ;;  %v7127_v16 = vld [vmem:[#allocation4 + $0x70] sm:$0xff]  }
 0x204   : > { %6510 = vmatpush3.bf16.msra.mxu0 %v7102_v55  ;;  %v3833_v11 = vld [vmem:[#allocation2 + $0x2c] sm:$0x3] }
 0x205   : > { %6511 = vmatprep.subr.bf16.mxu0 %v7384_v8  ;;  %v1847_v41 = vadd.f32 %v1846_v10, %v1836_v25  ;;  %v7121_v25 = vld [vmem:[#allocation4 + $0x230] sm:$0xff]  }
 0x206   : > { %6496 = vmatpush3.bf16.msra.mxu1 %v7103_v13 }
 0x207   : > { %6497 = vmatprep.subr.bf16.mxu1 %v7384_v8  ;;  %v1853_v43 = vpop.permute.xlu1 %1852 }
 0x208   : > { %6512 = vmatpush3.bf16.msra.mxu0 %v7104_v1  ;;  %v1859_v39 = vmul.f32 %v8363_v27, %v1853_v43 }
 0x209   : > { %6513 = vmatprep.subr.bf16.mxu0 %v7384_v8 }
 0x20a   : > { %6498 = vmatpush3.bf16.msra.mxu1 %v7105_v45  ;;  %v1860_v3 = vadd.f32 %v1859_v39, %v1847_v41  ;;  %v7123_v41 = vld [vmem:[#allocation4 + $0x238] sm:$0xff]  }
 0x20b   : > { %6499 = vmatprep.subr.bf16.mxu1 %v7384_v8 }
 0x20c   : > { %6514 = vmatpush3.bf16.msra.mxu0 %v7106_v18  ;;  %v1030_v37 = vpop.permute.xlu1 %1029  ;;  %v1873_v15 = vadd.f32 %v1872_v32, %v1860_v3 }
 0x20d   : > { %6515 = vmatprep.subr.bf16.mxu0 %v7384_v8  ;;  %v1036_v23 = vmul.f32 %v8381_v57, %v1030_v37 }
 0x20e   : > { %6500 = vmatpush3.bf16.msra.mxu1 %v7107_v33 }
 0x20f   : > { %6525 = vmatprep.subr.bf16.mxu1 %v7384_v8  ;;  %v1037_v0 = vadd.f32 %v1036_v23, %v1026_v19 }
 0x210   : > { %6516 = vmatpush3.bf16.msra.mxu0 %v7108_v28 }
 0x211   : > { %6502 = vmatmul.mubr.bf16.vlgmr.msra.gmra.mrb[28].mxu1 %v3727_v22  ;;  %6517 = vmatprep.subr.bf16.mxu0 %v7384_v8  ;;  %v1901_v22 = vpop.permute.xlu0 %1900 }
 0x212   : > { %6526 = vmatpush3.bf16.msra.mxu1 %v7109_v26  ;;  %6541 = vmatprep.mubr.msk.bf16.mxu1 %vm7390_vm0, %v7384_v8  ;;  %v1041_v48 = vpop.permute.xlu1 %1040  ;;  %v7125_v26 = vld [vmem:[#allocation2 + $0x10] ss:$0 sps:$4 sm:$0x77]   ;;  %v1907_v35 = vmul.f32 %v8400_v49, %v1901_v22 }
 0x213   : > { %6527 = vmatprep.subr.bf16.mxu1 %v7384_v8  ;;  %v1047_v30 = vmul.f32 %v8389_v9, %v1041_v48  ;;  %v3962_v48 = vshll.u32 %v7125_v26, 16  ;;  %v3960_v32 = vshrl.u32 %v7125_v26, 16 }
 0x214   : > { %6518 = vmatpush3.bf16.msra.mxu0 %v7110_v34  ;;  %v7120_v34 = vld [vmem:[#allocation4 + $0x58] sm:$0xff]  }
 0x215   : > { %6519 = vmatprep.subr.bf16.mxu0 %v7384_v8  ;;  %v1048_v55 = vadd.f32 %v1047_v30, %v1037_v0  ;;  %v1923_v36 = vpop.permute.xlu0 %1922 }
 0x216   : > { %6528 = vmatpush3.bf16.msra.mxu1 %v7111_v50  ;;  %v1929_v61 = vmul.f32 %v8297_v7, %v1923_v36 }
 0x217   : > { %6529 = vmatprep.subr.bf16.mxu1 %v7384_v8  ;;  %v1877_v54 = vpop.permute.xlu1 %1876 }
 0x218   : > { %6520 = vmatpush3.bf16.msra.mxu0 %v7112_v52  ;;  %v1883_v2 = vmul.f32 %v8381_v57, %v1877_v54  ;;  %v7122_v52 = vld [vmem:[#allocation4 + $0x60] sm:$0xff]   ;;  %v3964_v54 = vrot.slane %v3962_v48, 1 }
 0x219   : > { %6545 = vmatprep.subr.bf16.mxu0 %v7384_v8 }
 0x21a   : > { %6530 = vmatpush3.bf16.msra.mxu1 %v7113_v44  ;;  %v1884_v43 = vadd.f32 %v1883_v2, %v1873_v15  ;;  %v3965_v15 = vor.u32 %v3964_v54, %v3960_v32 }
 0x21b   : > { %6522 = vmatmul.mubr.bf16.vlgmr.msra.gmra.mrb[32].mxu0 %v3833_v11  ;;  %6531 = vmatprep.subr.bf16.mxu1 %v7384_v8 }
 0x21c   : > { %6546 = vmatpush3.bf16.msra.mxu0 %v7114_v59  ;;  %v1890_v4 = vpop.permute.xlu1 %1889  ;;  %6561 = vmatprep.mubr.msk.bf16.mxu0 %vm7390_vm0, %v7384_v8  ;;  %v7124_v59 = vld [vmem:[#allocation4 + $0x68] sm:$0xff]  }
 0x21d   : > { %6547 = vmatprep.subr.bf16.mxu0 %v7384_v8  ;;  %v1896_v18 = vmul.f32 %v8389_v9, %v1890_v4  ;;  %v1094_v4 = vld [vmem:[#allocation2 + $0x14] sm:$0x7] }
 0x21e   : > { %6532 = vmatpush3.bf16.msra.mxu1 %v7115_v51  ;;  %v7126_v51 = vld [vmem:[#allocation4] sm:$0xff]  }
 0x21f   : > { %6533 = vmatprep.subr.bf16.mxu1 %v7384_v8  ;;  %v1897_v62 = vadd.f32 %v1896_v18, %v1884_v43  ;;  %v1123_v18 = vpop.permute.xlu0 %1122 }
 0x220   : > { %6548 = vmatpush3.bf16.msra.mxu0 %v7116_v14  ;;  %v2497_v42 = vpop.f32.mrb[4].mxu1  ;;  %v1129_v22 = vmul.f32 %v8363_v27, %v1123_v18  ;;  %v5644_v18 = vld [vmem:[%s8647_s1 + $0x1] ss:$0 sm:$0xff] }
 0x221   : > { %v2503_v13 = vadd.f32 %v2497_v42, %v8328_v60  ;;  %v1063_v1 = vpop.permute.xlu1 %1062  ;;  %v6263_v45 = vpop.f32.mrb[5].mxu1  ;;  %6549 = vmatprep.subr.bf16.mxu0 %v7384_v8  ;;  %v1059_v60 = vadd.f32 %v1058_v56, %v1048_v55  ;;  %v1908_v39 = vadd.f32 %v1907_v35, %v1897_v62  ;;  %v7128_v42 = vld [vmem:[#allocation4 + $0x8] sm:$0xff]   ;;  %v7129_v56 = vld [vmem:[#allocation4 + $0x78] sm:$0xff]  }
 0x222   : > { %6534 = vmatpush3.bf16.msra.mxu1 %v7117_v17  ;;  %v2500_v33 = vpop.f32.mrb[6].mxu1  ;;  %v1069_v28 = vmul.f32 %v8282_v12, %v1063_v1  ;;  %v7130_v1 = vld [vmem:[#allocation4 + $0x10] sm:$0xff]   ;;  %v7133_v62 = vld [vmem:[#allocation4 + $0x88] sm:$0xff]  }
 0x223   : > { %v6264_v37 = vpop.f32.mrb[7].mxu1  ;;  %6535 = vmatprep.subr.bf16.mxu1 %v7384_v8  ;;  %v1943_v45 = vld [vmem:[#allocation2 + $0x30] sm:$0x7]  ;;  %v1158_v35 = vpop.permute.xlu0 %1157 }
 0x224   : > { %6550 = vmatpush3.bf16.msra.mxu0 %v7118_v21  ;;  %v1070_v10 = vadd.f32 %v1069_v28, %v1059_v60  ;;  %v7131_v28 = vld [vmem:[#allocation4 + $0x80] sm:$0xff]   ;;  %v7132_v60 = vld [vmem:[#allocation4 + $0x18] sm:$0xff]   ;;  %v1164_v54 = vmul.f32 %v8389_v9, %v1158_v35 }
 0x225   : > { %6551 = vmatprep.subr.bf16.mxu0 %v7384_v8  ;;  %v7148_v35 = vld [vmem:[#allocation4 + $0x100] sm:$0xff]  }
 0x226   : > { %6536 = vmatpush3.bf16.msra.mxu1 %v7119_v40  ;;  %v1074_v29 = vpop.permute.xlu1 %1073 }
 0x227   : > { %v1080_v50 = vmul.f32 %v8297_v7, %v1074_v29  ;;  %6537 = vmatprep.subr.bf16.mxu1 %v7384_v8 }
 0x228   : > { %6552 = vmatpush3.bf16.msra.mxu0 %v7120_v34  ;;  %v4077_v34 = vld [vmem:[#allocation2 + $0x2c] sm:$0x3] }
 0x229   : > { %v1081_v38 = vadd.f32 %v1080_v50, %v1070_v10  ;;  %6553 = vmatprep.subr.bf16.mxu0 %v7384_v8  ;;  %v7135_v50 = vld [vmem:[#allocation4 + $0x90] sm:$0xff]  }
 0x22a   : > { %6538 = vmatpush3.bf16.msra.mxu1 %v7121_v25  ;;  %v7134_v25 = vld [vmem:[#allocation4 + $0x20] sm:$0xff]  }
 0x22b   : > { %v1089_v44 = vadd.f32 %v8312_v31, %v1081_v38  ;;  %6539 = vmatprep.subr.bf16.mxu1 %v7384_v8  ;;  %v1912_v47 = vpop.permute.xlu1 %1911 }
 0x22c   : > { %6554 = vmatpush3.bf16.msra.mxu0 %v7122_v52  ;;  %v1918_v20 = vmul.f32 %v8282_v12, %v1912_v47  ;;  %v7137_v47 = vld [vmem:[#allocation4 + $0x98] sm:$0xff]  }
 0x22d   : > { %v1090_v3 = vmax.f32 %v1089_v44, 0.0  ;;  %6555 = vmatprep.subr.bf16.mxu0 %v7384_v8 }
 0x22e   : > { %v2604_v11 = vpop.f32.mrb[8].mxu0  ;;  %6540 = vmatpush3.bf16.msra.mxu1 %v7123_v41  ;;  %v1919_v23 = vadd.f32 %v1918_v20, %v1908_v39  ;;  %v7136_v41 = vld [vmem:[#allocation4 + $0x28] sm:$0xff]  }
 0x22f   : > { %v1091_v14 = vsel %vm7876_vm9, %v1090_v3, 0.0  ;;  %v2610_v19 = vadd.f32 %v2604_v11, %v2503_v13  ;;  %v6283_v30 = vpop.f32.mrb[9].mxu0  ;;  %6565 = vmatprep.subr.bf16.mxu1 %v7384_v8  ;;  %v8454_v20 = vld [vmem:[%s8647_s1 + $0x7] ss:$0 sm:$0xff]  ;;  %v7138_v3 = vld [vmem:[#allocation4 + $0x30] sm:$0xff]  }
 0x230   : > { %v1092_v12 = vpack.c.bf16 %v1091_v14, %v1091_v14  ;;  %6556 = vmatpush3.bf16.msra.mxu0 %v7124_v59  ;;  %v2607_v7 = vpop.f32.mrb[10].mxu0  ;;  %v1930_v2 = vadd.f32 %v1929_v61, %v1919_v23  ;;  %v1180_v61 = vpop.permute.xlu0 %1179  ;;  %v7141_v30 = vld [vmem:[#allocation4 + $0xa8] sm:$0xff]  }
 0x231   : > { %v6284_v17 = vpop.f32.mrb[11].mxu0  ;;  %6542 = vmatmul.mubr.bf16.vlgmr.msra.gmra.mrb[32].mxu1 %v3965_v15  ;;  %6557 = vmatprep.subr.bf16.mxu0 %v7384_v8  ;;  %v1186_v23 = vmul.f32 %v8454_v20, %v1180_v61 }
 0x232   : > { %v1095_v0 = vsel %vm7837_vm6, %v1092_v12, %v1094_v4  ;;  %6566 = vmatpush3.bf16.msra.mxu1 %v7126_v51  ;;  %v1938_v21 = vadd.f32 %v8312_v31, %v1930_v2  ;;  %6581 = vmatprep.mubr.msk.bf16.mxu1 %vm7390_vm0, %v7384_v8  ;;  %v1102_v55 = vpop.permute.xlu1 %1101  ;;  %v7140_v4 = vld [vmem:[#allocation4 + $0x38] sm:$0xff]   ;;  %v7142_v2 = vld [vmem:[#allocation4 + $0xc0] sm:$0xff]  }
 0x233   : > { %1096 = vst [vmem:[#allocation2 + $0x14] sm:$0x7] %v1095_v0  ;;  %6567 = vmatprep.subr.bf16.mxu1 %v7384_v8  ;;  %v1108_v31 = vmul.f32 %v8347_v24, %v1102_v55  ;;  %v8471_v17 = vld [vmem:[%s8648_s2] ss:$0 sm:$0xff] }
 0x234   : > { %6558 = vmatpush3.bf16.msra.mxu0 %v7127_v16  ;;  %v1939_v13 = vmax.f32 %v1938_v21, 0.0 }
 0x235   : > { %6559 = vmatprep.subr.bf16.mxu0 %v7384_v8 }
 0x236   : > { %6568 = vmatpush3.bf16.msra.mxu1 %v7128_v42  ;;  %v1940_v43 = vsel %vm7831_vm5, %v1939_v13, 0.0  ;;  %v7143_v13 = vld [vmem:[#allocation4 + $0xb0] sm:$0xff]  }
 0x237   : > { %6569 = vmatprep.subr.bf16.mxu1 %v7384_v8  ;;  %v1941_v33 = vpack.c.bf16 %v1940_v43, %v1940_v43  ;;  %v1112_v40 = vpop.permute.xlu1 %1111 }
 0x238   : > { %6560 = vmatpush3.bf16.msra.mxu0 %v7129_v56  ;;  %v1118_v37 = vmul.f32 %v8352_v53, %v1112_v40  ;;  %v4060_v56 = vld [vmem:[#allocation2 + $0x10] sm:$0x3]  ;;  %v7144_v40 = vld [vmem:[#allocation4 + $0xc8] sm:$0xff]  }
 0x239   : > { %6585 = vmatprep.subr.bf16.mxu0 %v7384_v8  ;;  %v1944_v26 = vsel %vm7837_vm6, %v1941_v33, %v1943_v45  ;;  %v1961_v33 = vpop.permute.xlu0 %1960 }
 0x23a   : > { %6570 = vmatpush3.bf16.msra.mxu1 %v7130_v1  ;;  %1945 = vst [vmem:[#allocation2 + $0x30] sm:$0x7] %v1944_v26  ;;  %v1119_v24 = vadd.f32 %v1118_v37, %v1108_v31  ;;  %v5643_v31 = vld [vmem:[%s8647_s1] ss:$0 sm:$0xff]  ;;  %v7145_v26 = vld [vmem:[#allocation4 + $0xb8] sm:$0xff]  }
 0x23b   : > { %6562 = vmatmul.mubr.bf16.vlgmr.msra.gmra.mrb[36].mxu0 %v4077_v34  ;;  %6571 = vmatprep.subr.bf16.mxu1 %v7384_v8  ;;  %v1967_v34 = vmul.f32 %v5644_v18, %v1961_v33  ;;  %v8525_v18 = vld [vmem:[%s8650_s4] ss:$0 sm:$0xff] }
 0x23c   : > { %6586 = vmatpush3.bf16.msra.mxu0 %v7131_v28  ;;  %6601 = vmatprep.mubr.msk.bf16.mxu0 %vm7390_vm0, %v7384_v8  ;;  %v1130_v53 = vadd.f32 %v1129_v22, %v1119_v24  ;;  %v1211_v24 = vld [vmem:[#allocation2 + $0x18] sm:$0x7]  ;;  %v7159_v33 = vld [vmem:[#allocation4 + $0x140] sm:$0xff]  }
 0x23d   : > { %6587 = vmatprep.subr.bf16.mxu0 %v7384_v8  ;;  %v1136_v29 = vpop.permute.xlu1 %1135 }
 0x23e   : > { %6572 = vmatpush3.bf16.msra.mxu1 %v7132_v60  ;;  %v1142_v27 = vmul.f32 %v8374_v46, %v1136_v29 }
 0x23f   : > { %6573 = vmatprep.subr.bf16.mxu1 %v7384_v8 }
 0x240   : > { %6588 = vmatpush3.bf16.msra.mxu0 %v7133_v62  ;;  %v2722_v10 = vpop.f32.mrb[8].mxu1  ;;  %v1143_v38 = vadd.f32 %v1142_v27, %v1130_v53  ;;  %v7147_v53 = vld [vmem:[#allocation4 + $0xd0] sm:$0xff]  }
 0x241   : > { %v2728_v48 = vadd.f32 %v2722_v10, %v2610_v19  ;;  %v6303_v52 = vpop.f32.mrb[9].mxu1  ;;  %6589 = vmatprep.subr.bf16.mxu0 %v7384_v8  ;;  %v8463_v19 = vld [vmem:[%s8647_s1 + $0x8] ss:$0 sm:$0xff] }
 0x242   : > { %v2725_v36 = vpop.f32.mrb[10].mxu1  ;;  %6574 = vmatpush3.bf16.msra.mxu1 %v7134_v25  ;;  %v1147_v39 = vpop.permute.xlu1 %1146  ;;  %v5645_v25 = vld [vmem:[%s8647_s1 + $0x2] ss:$0 sm:$0xff] }
 0x243   : > { %v6304_v44 = vpop.f32.mrb[11].mxu1  ;;  %6575 = vmatprep.subr.bf16.mxu1 %v7384_v8  ;;  %v1153_v46 = vmul.f32 %v8381_v57, %v1147_v39  ;;  %v7139_v57 = vld [vmem:[#allocation4 + $0xa0] sm:$0xff]   ;;  %v1998_v36 = vpop.permute.xlu0 %1997 }
 0x244   : > { %6590 = vmatpush3.bf16.msra.mxu0 %v7135_v50  ;;  %v5648_v39 = vld [vmem:[%s8647_s1 + $0x4] ss:$0 sm:$0xff]  ;;  %v7150_v44 = vld [vmem:[#allocation4 + $0x108] sm:$0xff]  }
 0x245   : > { %6591 = vmatprep.subr.bf16.mxu0 %v7384_v8  ;;  %v1154_v59 = vadd.f32 %v1153_v46, %v1143_v38  ;;  %v7149_v38 = vld [vmem:[#allocation4 + $0xd8] sm:$0xff]   ;;  %v2004_v61 = vmul.f32 %v5648_v39, %v1998_v36  ;;  %v7167_v36 = vld [vmem:[#allocation4 + $0x160] sm:$0xff]   ;;  %v7175_v39 = vld [vmem:[#allocation2 + $0x14] ss:$0 sps:$4 sm:$0x77]  }
 0x246   : > { %6576 = vmatpush3.bf16.msra.mxu1 %v7136_v41  ;;  %v5647_v41 = vld [vmem:[%s8647_s1 + $0x3] ss:$0 sm:$0xff] }
 0x247   : > { %6577 = vmatprep.subr.bf16.mxu1 %v7384_v8  ;;  %v1165_v32 = vadd.f32 %v1164_v54, %v1154_v59  ;;  %v1169_v11 = vpop.permute.xlu1 %1168 }
 0x248   : > { %6592 = vmatpush3.bf16.msra.mxu0 %v7137_v47  ;;  %v1175_v51 = vmul.f32 %v8400_v49, %v1169_v11  ;;  %v7146_v49 = vld [vmem:[#allocation2 + $0x10] ss:$0 sps:$4 sm:$0x77]   ;;  %v7151_v47 = vld [vmem:[#allocation4 + $0xe0] sm:$0xff]   ;;  %v5651_v11 = vld [vmem:[%s8647_s1 + $0x6] ss:$0 sm:$0xff] }
 0x249   : > { %6593 = vmatprep.subr.bf16.mxu0 %v7384_v8  ;;  %v4293_v45 = vshll.u32 %v7146_v49, 16  ;;  %v4291_v27 = vshrl.u32 %v7146_v49, 16 }
 0x24a   : > { %6578 = vmatpush3.bf16.msra.mxu1 %v7138_v3  ;;  %v1176_v14 = vadd.f32 %v1175_v51, %v1165_v32  ;;  %v7152_v3 = vld [vmem:[#allocation4 + $0x110] sm:$0xff]   ;;  %v7153_v51 = vld [vmem:[#allocation4 + $0xe8] sm:$0xff]  }
 0x24b   : > { %6579 = vmatprep.subr.bf16.mxu1 %v7384_v8  ;;  %v4295_v60 = vrot.slane %v4293_v45, 1  ;;  %v7158_v45 = vld [vmem:[#allocation4 + $0x128] sm:$0xff]  }
 0x24c   : > { %6594 = vmatpush3.bf16.msra.mxu0 %v7139_v57  ;;  %v1187_v15 = vadd.f32 %v1186_v23, %v1176_v14  ;;  %v1191_v12 = vpop.permute.xlu1 %1190  ;;  %v2022_v57 = vpop.permute.xlu0 %2021 }
 0x24d   : > { %6595 = vmatprep.subr.bf16.mxu0 %v7384_v8  ;;  %v1197_v7 = vmul.f32 %v8463_v19, %v1191_v12  ;;  %v4296_v52 = vor.u32 %v4295_v60, %v4291_v27  ;;  %v7154_v12 = vld [vmem:[#allocation4 + $0x118] sm:$0xff]  }
 0x24e   : > { %v2829_v16 = vpop.f32.mrb[12].mxu0  ;;  %6580 = vmatpush3.bf16.msra.mxu1 %v7140_v4 }
 0x24f   : > { %v8473_v0 = vadd.f32 %v2829_v16, %v2728_v48  ;;  %v6323_v42 = vpop.f32.mrb[13].mxu0  ;;  %6605 = vmatprep.subr.bf16.mxu1 %v7384_v8  ;;  %v1198_v21 = vadd.f32 %v1197_v7, %v1187_v15 }
 0x250   : > { %v2832_v55 = vpop.f32.mrb[14].mxu0  ;;  %6596 = vmatpush3.bf16.msra.mxu0 %v7141_v30  ;;  %v2028_v30 = vmul.f32 %v5651_v11, %v2022_v57  ;;  %v7155_v42 = vld [vmem:[#allocation4 + $0xf0] sm:$0xff]   ;;  %v7173_v11 = vld [vmem:[#allocation4 + $0x178] sm:$0xff]  }
 0x251   : > { %v6324_v1 = vpop.f32.mrb[15].mxu0  ;;  %6582 = vmatmul.mubr.bf16.vlgmr.msra.gmra.mrb[36].mxu1 %v4060_v56  ;;  %6597 = vmatprep.subr.bf16.mxu0 %v7384_v8  ;;  %v1206_v43 = vadd.f32 %v8471_v17, %v1198_v21 }
 0x252   : > { %6606 = vmatpush3.bf16.msra.mxu1 %v7142_v2  ;;  %6621 = vmatprep.mubr.msk.bf16.mxu1 %vm7390_vm0, %v7384_v8 }
 0x253   : > { %6607 = vmatprep.subr.bf16.mxu1 %v7384_v8  ;;  %v1207_v28 = vmax.f32 %v1206_v43, 0.0  ;;  %v1951_v37 = vpop.permute.xlu1 %1950 }
 0x254   : > { %6598 = vmatpush3.bf16.msra.mxu0 %v7143_v13  ;;  %v1957_v22 = vmul.f32 %v5643_v31, %v1951_v37 }
 0x255   : > { %6599 = vmatprep.subr.bf16.mxu0 %v7384_v8  ;;  %v1208_v62 = vsel %vm7876_vm9, %v1207_v28, 0.0 }
 0x256   : > { %6608 = vmatpush3.bf16.msra.mxu1 %v7144_v40  ;;  %v1209_v29 = vpack.c.bf16 %v1208_v62, %v1208_v62  ;;  %v1968_v48 = vadd.f32 %v1967_v34, %v1957_v22  ;;  %v4387_v22 = vld [vmem:[#allocation2 + $0x14] sm:$0x3]  ;;  %v7161_v62 = vld [vmem:[#allocation4 + $0x148] sm:$0xff]  }
 0x257   : > { %6609 = vmatprep.subr.bf16.mxu1 %v7384_v8  ;;  %v7160_v34 = vld [vmem:[#allocation4 + $0x130] sm:$0xff]  }
 0x258   : > { %6600 = vmatpush3.bf16.msra.mxu0 %v7145_v26  ;;  %v1212_v10 = vsel %vm7837_vm6, %v1209_v29, %v1211_v24  ;;  %v1974_v50 = vpop.permute.xlu1 %1973 }
 0x259   : > { %6625 = vmatprep.subr.bf16.mxu0 %v7384_v8  ;;  %1213 = vst [vmem:[#allocation2 + $0x18] sm:$0x7] %v1212_v10  ;;  %v1980_v5 = vmul.f32 %v5645_v25, %v1974_v50  ;;  %v7162_v25 = vld [vmem:[#allocation4 + $0x138] sm:$0xff]  }
 0x25a   : > { %6610 = vmatpush3.bf16.msra.mxu1 %v7147_v53 }
 0x25b   : > { %6602 = vmatmul.mubr.bf16.vlgmr.msra.gmra.mrb[40].mxu0 %v4296_v52  ;;  %6611 = vmatprep.subr.bf16.mxu1 %v7384_v8  ;;  %v1981_v46 = vadd.f32 %v1980_v5, %v1968_v48  ;;  %v7164_v48 = vld [vmem:[#allocation4 + $0x180] sm:$0xff]   ;;  %v4493_v5 = vld [vmem:[#allocation2 + $0x30] sm:$0x3] }
 0x25c   : > { %6626 = vmatpush3.bf16.msra.mxu0 %v7148_v35  ;;  %6641 = vmatprep.mubr.msk.bf16.mxu0 %vm7390_vm0, %v7384_v8  ;;  %v2064_v35 = vld [vmem:[#allocation2 + $0x34] sm:$0x7] }
 0x25d   : > { %6627 = vmatprep.subr.bf16.mxu0 %v7384_v8  ;;  %v1987_v54 = vpop.permute.xlu1 %1986 }
 0x25e   : > { %6612 = vmatpush3.bf16.msra.mxu1 %v7149_v38  ;;  %v1993_v59 = vmul.f32 %v5647_v41, %v1987_v54  ;;  %v7165_v38 = vld [vmem:[#allocation4 + $0x158] sm:$0xff]   ;;  %v7169_v41 = vld [vmem:[#allocation4 + $0x168] sm:$0xff]  }
 0x25f   : > { %6613 = vmatprep.subr.bf16.mxu1 %v7384_v8 }
 0x260   : > { %6628 = vmatpush3.bf16.msra.mxu0 %v7150_v44  ;;  %v1994_v32 = vadd.f32 %v1993_v59, %v1981_v46  ;;  %v7170_v46 = vld [vmem:[#allocation4 + $0x198] sm:$0xff]   ;;  %v7171_v59 = vld [vmem:[#allocation4 + $0x170] sm:$0xff]  }
 0x261   : > { %6629 = vmatprep.subr.bf16.mxu0 %v7384_v8 }
 0x262   : > { %6614 = vmatpush3.bf16.msra.mxu1 %v7151_v47  ;;  %v2005_v23 = vadd.f32 %v2004_v61, %v1994_v32  ;;  %v2011_v4 = vpop.permute.xlu1 %2010  ;;  %v7172_v32 = vld [vmem:[#allocation4 + $0x1a0] sm:$0xff]  }
 0x263   : > { %6615 = vmatprep.subr.bf16.mxu1 %v7384_v8  ;;  %v2017_v14 = vmul.f32 %v8389_v9, %v2011_v4  ;;  %v7156_v9 = vld [vmem:[#allocation4 + $0x120] sm:$0xff]  }
 0x264   : > { %6630 = vmatpush3.bf16.msra.mxu0 %v7152_v3  ;;  %v2936_v15 = vpop.f32.mrb[12].mxu1  ;;  %v4622_v3 = vshll.u32 %v7175_v39, 16 }
 0x265   : > { %v2942_v49 = vadd.f32 %v2936_v15, %v8473_v0  ;;  %v6343_v7 = vpop.f32.mrb[13].mxu1  ;;  %6631 = vmatprep.subr.bf16.mxu0 %v7384_v8  ;;  %v2018_v16 = vadd.f32 %v2017_v14, %v2005_v23  ;;  %v7157_v0 = vld [vmem:[#allocation4 + $0xf8] sm:$0xff]   ;;  %v4620_v23 = vshrl.u32 %v7175_v39, 16  ;;  %v7176_v14 = vld [vmem:[#allocation4 + $0x1c0] sm:$0xff]  }
 0x266   : > { %6616 = vmatpush3.bf16.msra.mxu1 %v7153_v51  ;;  %v2939_v2 = vpop.f32.mrb[14].mxu1  ;;  %v4624_v57 = vrot.slane %v4622_v3, 1  ;;  %v7174_v51 = vld [vmem:[#allocation4 + $0x1a8] sm:$0xff]   ;;  %v7177_v7 = vld [vmem:[#allocation4 + $0x1b0] sm:$0xff]  }
 0x267   : > { %v6344_v21 = vpop.f32.mrb[15].mxu1  ;;  %6617 = vmatprep.subr.bf16.mxu1 %v7384_v8  ;;  %v2029_v55 = vadd.f32 %v2028_v30, %v2018_v16  ;;  %v2033_v56 = vpop.permute.xlu1 %2032  ;;  %v7178_v2 = vld [vmem:[#allocation4 + $0x1c8] sm:$0xff]  }
 0x268   : > { %6632 = vmatpush3.bf16.msra.mxu0 %v7154_v12  ;;  %v2039_v13 = vmul.f32 %v8454_v20, %v2033_v56  ;;  %v4625_v12 = vor.u32 %v4624_v57, %v4620_v23  ;;  %v7180_v21 = vld [vmem:[#allocation4 + $0x1d0] sm:$0xff]   ;;  %v4716_v56 = vld [vmem:[#allocation2 + $0x18] sm:$0x3] }
 0x269   : > { %6633 = vmatprep.subr.bf16.mxu0 %v7384_v8 }
 0x26a   : > { %6618 = vmatpush3.bf16.msra.mxu1 %v7155_v42  ;;  %v2040_v1 = vadd.f32 %v2039_v13, %v2029_v55  ;;  %v7179_v42 = vld [vmem:[#allocation4 + $0x1b8] sm:$0xff]   ;;  %v7181_v55 = vld [vmem:[#allocation4 + $0x200] sm:$0xff]   ;;  %v7183_v13 = vld [vmem:[#allocation4 + $0x208] sm:$0xff]  }
 0x26b   : > { %6619 = vmatprep.subr.bf16.mxu1 %v7384_v8 }
 0x26c   : > { %6634 = vmatpush3.bf16.msra.mxu0 %v7156_v9  ;;  %v2044_v43 = vpop.permute.xlu1 %2043  ;;  %v7182_v9 = vld [vmem:[#allocation4 + $0x1d8] sm:$0xff]  }
 0x26d   : > { %6635 = vmatprep.subr.bf16.mxu0 %v7384_v8  ;;  %v2050_v31 = vmul.f32 %v8463_v19, %v2044_v43 }
 0x26e   : > { %v3054_v20 = vpop.f32.mrb[16].mxu0  ;;  %6620 = vmatpush3.bf16.msra.mxu1 %v7157_v0  ;;  %v7184_v0 = vld [vmem:[#allocation4 + $0x1e0] sm:$0xff]  }
 0x26f   : > { %v3060_v40 = vadd.f32 %v3054_v20, %v2942_v49  ;;  %v6363_v28 = vpop.f32.mrb[17].mxu0  ;;  %6645 = vmatprep.subr.bf16.mxu1 %v7384_v8  ;;  %v2051_v37 = vadd.f32 %v2050_v31, %v2040_v1  ;;  %v7185_v1 = vld [vmem:[#allocation4 + $0x210] sm:$0xff]   ;;  %v7187_v31 = vld [vmem:[#allocation4 + $0x218] sm:$0xff]  }
 0x270   : > { %v3057_v26 = vpop.f32.mrb[18].mxu0  ;;  %6636 = vmatpush3.bf16.msra.mxu0 %v7158_v45  ;;  %v7186_v45 = vld [vmem:[#allocation4 + $0x1e8] sm:$0xff]   ;;  %v7188_v28 = vld [vmem:[#allocation4 + $0x1f0] sm:$0xff]  }
 0x271   : > { %v3067_v60 = vadd.f32 %v8525_v18, %v3060_v40  ;;  %v6364_v19 = vpop.f32.mrb[19].mxu0  ;;  %6622 = vmatmul.mubr.bf16.vlgmr.msra.gmra.mrb[40].mxu1 %v4387_v22  ;;  %6637 = vmatprep.subr.bf16.mxu0 %v7384_v8  ;;  %v2059_v24 = vadd.f32 %v8471_v17, %v2051_v37  ;;  %v7163_v17 = vld [vmem:[#allocation4 + $0x150] sm:$0xff]   ;;  %v7189_v26 = vld [vmem:[#allocation4 + $0x220] sm:$0xff]   ;;  %v7190_v22 = vld [vmem:[#allocation4 + $0x1f8] sm:$0xff]  }
 0x272   : > { %6646 = vmatpush3.bf16.msra.mxu1 %v7159_v33  ;;  %6661 = vmatprep.mubr.msk.bf16.mxu1 %vm7390_vm0, %v7384_v8 }
 0x273   : > { %v3068_v53 = vmax.f32 %v3067_v60, 0.0  ;;  %6647 = vmatprep.subr.bf16.mxu1 %v7384_v8  ;;  %v2060_v29 = vmax.f32 %v2059_v24, 0.0  ;;  %v7194_v60 = vld [vmem:[#allocation2 + $0x18] ss:$0 sps:$4 sm:$0x77]  }
 0x274   : > { %6638 = vmatpush3.bf16.msra.mxu0 %v7160_v34  ;;  %v7191_v34 = vld [vmem:[#allocation4 + $0x228] sm:$0xff]  }
 0x275   : > { %v3069_v27 = vpack.c.bf16 %v3068_v53, %v3068_v53  ;;  %6639 = vmatprep.subr.bf16.mxu0 %v7384_v8  ;;  %v2061_v10 = vsel %vm7831_vm5, %v2060_v29, 0.0 }
 0x276   : > { %6648 = vmatpush3.bf16.msra.mxu1 %v7161_v62  ;;  %v2062_v50 = vpack.c.bf16 %v2061_v10, %v2061_v10  ;;  %v7193_v10 = vld [vmem:[#allocation4 + $0x238] sm:$0xff]  }
 0x277   : > { %3070 = vst [vmem:[#allocation3] sm:$0x3] %v3069_v27  ;;  %6649 = vmatprep.subr.bf16.mxu1 %v7384_v8 }
 0x278   : > { %6640 = vmatpush3.bf16.msra.mxu0 %v7162_v25  ;;  %v2065_v52 = vsel %vm7837_vm6, %v2062_v50, %v2064_v35  ;;  %v7192_v25 = vld [vmem:[#allocation4 + $0x230] sm:$0xff]   ;;  %v4951_v35 = vshll.u32 %v7194_v60, 16 }
 0x279   : > { %6665 = vmatprep.subr.bf16.mxu0 %v7384_v8  ;;  %2066 = vst [vmem:[#allocation2 + $0x34] sm:$0x7] %v2065_v52 }
 0x27a   : > { %6650 = vmatpush3.bf16.msra.mxu1 %v7163_v17  ;;  %v4949_v17 = vshrl.u32 %v7194_v60, 16  ;;  %v4953_v50 = vrot.slane %v4951_v35, 1  ;;  %v7211_v60 = vld [vmem:[#allocation7 + $0xa8] sm:$0xff]  }
 0x27b   : > { %6642 = vmatmul.mubr.bf16.vlgmr.msra.gmra.mrb[44].mxu0 %v4493_v5  ;;  %6651 = vmatprep.subr.bf16.mxu1 %v7384_v8 }
 0x27c   : > { %6666 = vmatpush3.bf16.msra.mxu0 %v7164_v48  ;;  %6681 = vmatprep.mubr.msk.bf16.mxu0 %vm7390_vm0, %v7384_v8  ;;  %v4954_v48 = vor.u32 %v4953_v50, %v4949_v17 }
 0x27d   : > { %6667 = vmatprep.subr.bf16.mxu0 %v7384_v8 }
 0x27e   : > { %6652 = vmatpush3.bf16.msra.mxu1 %v7165_v38 }
 0x27f   : > { %6653 = vmatprep.subr.bf16.mxu1 %v7384_v8 }
 0x280   : > { %6668 = vmatpush3.bf16.msra.mxu0 %v7166_v58  ;;  %v4822_v29 = vld [vmem:[#allocation2 + $0x34] sm:$0x3] }
 0x281   : > { %6669 = vmatprep.subr.bf16.mxu0 %v7384_v8 }
 0x282   : > { %6654 = vmatpush3.bf16.msra.mxu1 %v7167_v36 }
 0x283   : > { %6655 = vmatprep.subr.bf16.mxu1 %v7384_v8 }
 0x284   : > { %6670 = vmatpush3.bf16.msra.mxu0 %v7168_v6  ;;  %v3187_v44 = vpop.f32.mrb[16].mxu1 }
 0x285   : > { %v6383_v54 = vpop.f32.mrb[17].mxu1  ;;  %6671 = vmatprep.subr.bf16.mxu0 %v7384_v8 }
 0x286   : > { %v3190_v47 = vpop.f32.mrb[18].mxu1  ;;  %6656 = vmatpush3.bf16.msra.mxu1 %v7169_v41 }
 0x287   : > { %v6384_v61 = vpop.f32.mrb[19].mxu1  ;;  %6657 = vmatprep.subr.bf16.mxu1 %v7384_v8 }
 0x288   : > { %6672 = vmatpush3.bf16.msra.mxu0 %v7170_v46 }
 0x289   : > { %6673 = vmatprep.subr.bf16.mxu0 %v7384_v8 }
 0x28a   : > { %6658 = vmatpush3.bf16.msra.mxu1 %v7171_v59 }
 0x28b   : > { %6659 = vmatprep.subr.bf16.mxu1 %v7384_v8 }
 0x28c   : > { %6674 = vmatpush3.bf16.msra.mxu0 %v7172_v32 }
 0x28d   : > { %6675 = vmatprep.subr.bf16.mxu0 %v7384_v8 }
 0x28e   : > { %v3275_v4 = vpop.f32.mrb[20].mxu0  ;;  %6660 = vmatpush3.bf16.msra.mxu1 %v7173_v11 }
 0x28f   : > { %v3276_v30 = vadd.f32 %v3275_v4, %v3187_v44  ;;  %v6403_v15 = vpop.f32.mrb[21].mxu0  ;;  %6685 = vmatprep.subr.bf16.mxu1 %v7384_v8  ;;  %v7195_v4 = vld [vmem:[#allocation7 + $0x40] sm:$0xff]  }
 0x290   : > { %v3278_v49 = vpop.f32.mrb[22].mxu0  ;;  %6676 = vmatpush3.bf16.msra.mxu0 %v7174_v51 }
 0x291   : > { %v6404_v16 = vpop.f32.mrb[23].mxu0  ;;  %6662 = vmatmul.mubr.bf16.vlgmr.msra.gmra.mrb[44].mxu1 %v4625_v12  ;;  %6677 = vmatprep.subr.bf16.mxu0 %v7384_v8 }
 0x292   : > { %6686 = vmatpush3.bf16.msra.mxu1 %v7176_v14  ;;  %6701 = vmatprep.mubr.msk.bf16.mxu1 %vm7390_vm0, %v7384_v8  ;;  %v7196_v14 = vld [vmem:[#allocation7 + $0x80] sm:$0xff]   ;;  %v7198_v16 = vld [vmem:[#allocation7 + $0x48] sm:$0xff]  }
 0x293   : > { %6687 = vmatprep.subr.bf16.mxu1 %v7384_v8 }
 0x294   : > { %6678 = vmatpush3.bf16.msra.mxu0 %v7177_v7 }
 0x295   : > { %6679 = vmatprep.subr.bf16.mxu0 %v7384_v8 }
 0x296   : > { %6688 = vmatpush3.bf16.msra.mxu1 %v7178_v2  ;;  %v7199_v2 = vld [vmem:[#allocation7 + $0x88] sm:$0xff]  }
 0x297   : > { %6689 = vmatprep.subr.bf16.mxu1 %v7384_v8 }
 0x298   : > { %6680 = vmatpush3.bf16.msra.mxu0 %v7179_v42 }
 0x299   : > { %6705 = vmatprep.subr.bf16.mxu0 %v7384_v8 }
 0x29a   : > { %6690 = vmatpush3.bf16.msra.mxu1 %v7180_v21 }
 0x29b   : > { %6682 = vmatmul.mubr.bf16.vlgmr.msra.gmra.mrb[48].mxu0 %v4716_v56  ;;  %6691 = vmatprep.subr.bf16.mxu1 %v7384_v8  ;;  %v7201_v56 = vld [vmem:[#allocation7 + $0x50] sm:$0xff]  }
 0x29c   : > { %6706 = vmatpush3.bf16.msra.mxu0 %v7181_v55  ;;  %6721 = vmatprep.mubr.msk.bf16.mxu0 %vm7390_vm0, %v7384_v8  ;;  %v7200_v55 = vld [vmem:[#allocation7 + $0x8] sm:$0xff]  }
 0x29d   : > { %6707 = vmatprep.subr.bf16.mxu0 %v7384_v8 }
 0x29e   : > { %6692 = vmatpush3.bf16.msra.mxu1 %v7182_v9  ;;  %v7202_v9 = vld [vmem:[#allocation7 + $0x90] sm:$0xff]  }
 0x29f   : > { %6693 = vmatprep.subr.bf16.mxu1 %v7384_v8 }
 0x2a0   : > { %6708 = vmatpush3.bf16.msra.mxu0 %v7183_v13 }
 0x2a1   : > { %6709 = vmatprep.subr.bf16.mxu0 %v7384_v8 }
 0x2a2   : > { %6694 = vmatpush3.bf16.msra.mxu1 %v7184_v0  ;;  %v7203_v0 = vld [vmem:[#allocation7 + $0x10] sm:$0xff]  }
 0x2a3   : > { %6695 = vmatprep.subr.bf16.mxu1 %v7384_v8 }
 0x2a4   : > { %6710 = vmatpush3.bf16.msra.mxu0 %v7185_v1  ;;  %v3391_v43 = vpop.f32.mrb[20].mxu1 }
 0x2a5   : > { %v3397_v20 = vadd.f32 %v3391_v43, %v3276_v30  ;;  %v6423_v33 = vpop.f32.mrb[21].mxu1  ;;  %6711 = vmatprep.subr.bf16.mxu0 %v7384_v8  ;;  %v7197_v30 = vld [vmem:[#allocation7] sm:$0xff]   ;;  %v7204_v43 = vld [vmem:[#allocation7 + $0x58] sm:$0xff]  }
 0x2a6   : > { %v3394_v40 = vpop.f32.mrb[22].mxu1  ;;  %6696 = vmatpush3.bf16.msra.mxu1 %v7186_v45  ;;  %v7206_v33 = vld [vmem:[#allocation7 + $0x18] sm:$0xff]  }
 0x2a7   : > { %v6424_v37 = vpop.f32.mrb[23].mxu1  ;;  %6697 = vmatprep.subr.bf16.mxu1 %v7384_v8 }
 0x2a8   : > { %6712 = vmatpush3.bf16.msra.mxu0 %v7187_v31  ;;  %v7205_v31 = vld [vmem:[#allocation7 + $0x98] sm:$0xff]   ;;  %v7207_v37 = vld [vmem:[#allocation7 + $0x60] sm:$0xff]  }
 0x2a9   : > { %6713 = vmatprep.subr.bf16.mxu0 %v7384_v8 }
 0x2aa   : > { %6698 = vmatpush3.bf16.msra.mxu1 %v7188_v28 }
 0x2ab   : > { %6699 = vmatprep.subr.bf16.mxu1 %v7384_v8 }
 0x2ac   : > { %6714 = vmatpush3.bf16.msra.mxu0 %v7189_v26  ;;  %v7208_v26 = vld [vmem:[#allocation7 + $0xa0] sm:$0xff]  }
 0x2ad   : > { %6715 = vmatprep.subr.bf16.mxu0 %v7384_v8 }
 0x2ae   : > { %v3497_v19 = vpop.f32.mrb[24].mxu0  ;;  %6700 = vmatpush3.bf16.msra.mxu1 %v7190_v22  ;;  %v7209_v22 = vld [vmem:[#allocation7 + $0x20] sm:$0xff]  }
 0x2af   : > { %v3503_v24 = vadd.f32 %v3497_v19, %v3397_v20  ;;  %v6443_v62 = vpop.f32.mrb[25].mxu0  ;;  %6154 = vmatprep.subr.bf16.mxu1 %v7195_v4  ;;  %v7212_v19 = vld [vmem:[#allocation7 + $0x28] sm:$0xff]  }
 0x2b0   : > { %v3500_v53 = vpop.f32.mrb[26].mxu0  ;;  %6716 = vmatpush3.bf16.msra.mxu0 %v7191_v34  ;;  %v7210_v34 = vld [vmem:[#allocation7 + $0x68] sm:$0xff]   ;;  %v7214_v62 = vld [vmem:[#allocation7 + $0xb0] sm:$0xff]  }
 0x2b1   : > { %v6444_v27 = vpop.f32.mrb[27].mxu0  ;;  %6702 = vmatmul.mubr.bf16.vlgmr.msra.gmra.mrb[48].mxu1 %v4822_v29  ;;  %6717 = vmatprep.subr.bf16.mxu0 %v7384_v8  ;;  %v7215_v53 = vld [vmem:[#allocation7 + $0x30] sm:$0xff]   ;;  %v7216_v29 = vld [vmem:[#allocation7 + $0x78] sm:$0xff]  }
 0x2b2   : > { %6155 = vmatpush3.bf16.msra.mxu1 %v7197_v30  ;;  %v7218_v27 = vld [vmem:[#allocation7 + $0x38] sm:$0xff]  }
 0x2b3   : > { %6156 = vmatprep.subr.bf16.mxu1 %v7198_v16 }
 0x2b4   : > { %6718 = vmatpush3.bf16.msra.mxu0 %v7192_v25  ;;  %v7217_v25 = vld [vmem:[#allocation7 + $0xb8] sm:$0xff]  }
 0x2b5   : > { %6719 = vmatprep.subr.bf16.mxu0 %v7384_v8 }
 0x2b6   : > { %6157 = vmatpush3.bf16.msra.mxu1 %v7200_v55 }
 0x2b7   : > { %6158 = vmatprep.subr.bf16.mxu1 %v7201_v56 }
 0x2b8   : > { %6720 = vmatpush3.bf16.msra.mxu0 %v7193_v10 }
 0x2b9   : > { %6725 = vmatprep.subr.bf16.mxu0 %v7384_v8 }
 0x2ba   : > { %6159 = vmatpush3.bf16.msra.mxu1 %v7203_v0 }
 0x2bb   : > { %6722 = vmatmul.mubr.bf16.vlgmr.msra.gmra.mrb[52].mxu0 %v4954_v48  ;;  %6160 = vmatprep.subr.bf16.mxu1 %v7204_v43 }
 0x2bc   : > { %6741 = vmatprep.mubr.msk.bf16.mxu0 %vm7390_vm0, %v7384_v8  ;;  %6726 = vmatpush3.bf16.msra.mxu0 %v7196_v14 }
 0x2bd   : > { %6727 = vmatprep.subr.bf16.mxu0 %v7384_v8 }
 0x2be   : > { %6161 = vmatpush3.bf16.msra.mxu1 %v7206_v33 }
 0x2bf   : > { %6162 = vmatprep.subr.bf16.mxu1 %v7207_v37 }
 0x2c0   : > { %6728 = vmatpush3.bf16.msra.mxu0 %v7199_v2 }
 0x2c1   : > { %6729 = vmatprep.subr.bf16.mxu0 %v7384_v8 }
 0x2c2   : > { %6163 = vmatpush3.bf16.msra.mxu1 %v7209_v22 }
 0x2c3   : > { %6164 = vmatprep.subr.bf16.mxu1 %v7210_v34 }
 0x2c4   : > { %v3603_v52 = vpop.f32.mrb[24].mxu1  ;;  %6730 = vmatpush3.bf16.msra.mxu0 %v7202_v9 }
 0x2c5   : > { %v3609_v5 = vadd.f32 %v3603_v52, %v3503_v24  ;;  %v6463_v38 = vpop.f32.mrb[25].mxu1  ;;  %6731 = vmatprep.subr.bf16.mxu0 %v7384_v8  ;;  %v7213_v24 = vld [vmem:[#allocation7 + $0x70] sm:$0xff]  }
 0x2c6   : > { %v3606_v58 = vpop.f32.mrb[26].mxu1  ;;  %6165 = vmatpush3.bf16.msra.mxu1 %v7212_v19 }
 0x2c7   : > { %v6464_v36 = vpop.f32.mrb[27].mxu1  ;;  %6166 = vmatprep.subr.bf16.mxu1 %v7213_v24 }
 0x2c8   : > { %6732 = vmatpush3.bf16.msra.mxu0 %v7205_v31 }
 0x2c9   : > { %6733 = vmatprep.subr.bf16.mxu0 %v7384_v8 }
 0x2ca   : > { %6167 = vmatpush3.bf16.msra.mxu1 %v7215_v53 }
 0x2cb   : > { %6168 = vmatprep.subr.bf16.mxu1 %v7216_v29 }
 0x2cc   : > { %6734 = vmatpush3.bf16.msra.mxu0 %v7208_v26 }
 0x2cd   : > { %6735 = vmatprep.subr.bf16.mxu0 %v7384_v8 }
 0x2ce   : > { %v3720_v6 = vpop.f32.mrb[28].mxu0  ;;  %6169 = vmatpush3.bf16.msra.mxu1 %v7218_v27  ;;  %v5349_v27 = vld [vmem:[%s8653_s7] sm:$0xf] }
 0x2cf   : > { %v3726_v41 = vadd.f32 %v3720_v6, %v3609_v5  ;;  %v6483_v39 = vpop.f32.mrb[29].mxu0 }
 0x2d0   : > { %v3723_v44 = vpop.f32.mrb[30].mxu0  ;;  %6736 = vmatpush3.bf16.msra.mxu0 %v7211_v60  ;;  %v5881_v60 = vld [vmem:[%s8652_s6] ss:$0 sm:$0xff] }
 0x2d1   : > { %v6484_v46 = vpop.f32.mrb[31].mxu0  ;;  %6737 = vmatprep.subr.bf16.mxu0 %v7384_v8 }
 0x2d4   : > { %6738 = vmatpush3.bf16.msra.mxu0 %v7214_v62 }
 0x2d5   : > { %6739 = vmatprep.subr.bf16.mxu0 %v7384_v8 }
 0x2d8   : > { %6740 = vmatpush3.bf16.msra.mxu0 %v7217_v25 }
 0x2e4   : > { %v3826_v54 = vpop.f32.mrb[28].mxu1 }
 0x2e5   : > { %v3832_v47 = vadd.f32 %v3826_v54, %v3726_v41  ;;  %v6503_v59 = vpop.f32.mrb[29].mxu1 }
 0x2e6   : > { %v3829_v61 = vpop.f32.mrb[30].mxu1 }
 0x2e7   : > { %v6504_v3 = vpop.f32.mrb[31].mxu1 }
 0x2ee   : > { %v3932_v32 = vpop.f32.mrb[32].mxu0 }
 0x2ef   : > { %v3938_v11 = vadd.f32 %v3932_v32, %v3832_v47  ;;  %v6523_v57 = vpop.f32.mrb[33].mxu0 }
 0x2f0   : > { %v3935_v51 = vpop.f32.mrb[34].mxu0 }
 0x2f1   : > { %v6524_v23 = vpop.f32.mrb[35].mxu0 }
 0x304   : > { %v4049_v15 = vpop.f32.mrb[32].mxu1 }
 0x305   : > { %v4055_v12 = vadd.f32 %v4049_v15, %v3938_v11  ;;  %v6543_v49 = vpop.f32.mrb[33].mxu1 }
 0x306   : > { %v4052_v7 = vpop.f32.mrb[34].mxu1 }
 0x307   : > { %v4056_v42 = vadd.f32 %v8525_v18, %v4055_v12  ;;  %v6544_v21 = vpop.f32.mrb[35].mxu1 }
 0x309   : > { %v4057_v13 = vmax.f32 %v4056_v42, 0.0 }
 0x30b   : > { %v4058_v1 = vpack.c.bf16 %v4057_v13, %v4057_v13 }
 0x30d   : > { %4059 = vst [vmem:[#allocation3 + $0x2] sm:$0x3] %v4058_v1  ;;  %v7415_v1 = vmov 1983009808  }
 0x30e   : > { %v4176_v45 = vpop.f32.mrb[36].mxu0 }
 0x30f   : > { %v6563_v20 = vpop.f32.mrb[37].mxu0 }
 0x310   : > { %v4179_v40 = vpop.f32.mrb[38].mxu0 }
 0x311   : > { %v6564_v28 = vpop.f32.mrb[39].mxu0 }
 0x324   : > { %v4264_v35 = vpop.f32.mrb[36].mxu1 }
 0x325   : > { %v4265_v10 = vadd.f32 %v4264_v35, %v4176_v45  ;;  %v6583_v17 = vpop.f32.mrb[37].mxu1  ;;  %v5108_v45 = vunpack.c.l.s4 %v7415_v1 }
 0x326   : > { %v4267_v50 = vpop.f32.mrb[38].mxu1 }
 0x327   : > { %v6584_v48 = vpop.f32.mrb[39].mxu1  ;;  %v5109_v31 = vunpack.c.0.s8 %v5108_v45 }
 0x329   : > { %v5112_v20 = vsub.s32 %v5109_v31, %v7749_v63 }
 0x32e   : > { %v4380_v52 = vpop.f32.mrb[40].mxu0 }
 0x32f   : > { %v4386_v5 = vadd.f32 %v4380_v52, %v4265_v10  ;;  %v6603_v38 = vpop.f32.mrb[41].mxu0 }
 0x330   : > { %v4383_v58 = vpop.f32.mrb[42].mxu0 }
 0x331   : > { %v6604_v36 = vpop.f32.mrb[43].mxu0 }
 0x344   : > { %v4486_v6 = vpop.f32.mrb[40].mxu1 }
 0x345   : > { %v4492_v41 = vadd.f32 %v4486_v6, %v4386_v5  ;;  %v6623_v39 = vpop.f32.mrb[41].mxu1 }
 0x346   : > { %v4489_v44 = vpop.f32.mrb[42].mxu1 }
 0x347   : > { %v6624_v46 = vpop.f32.mrb[43].mxu1 }
 0x34e   : > { %v4592_v8 = vpop.f32.mrb[44].mxu0 }
 0x34f   : > { %v4598_v54 = vadd.f32 %v4592_v8, %v4492_v41  ;;  %v6643_v47 = vpop.f32.mrb[45].mxu0 }
 0x350   : > { %v4595_v59 = vpop.f32.mrb[46].mxu0 }
 0x351   : > { %v6644_v61 = vpop.f32.mrb[47].mxu0 }
 0x364   : > { %v4709_v3 = vpop.f32.mrb[44].mxu1 }
 0x365   : > { %v4715_v32 = vadd.f32 %v4709_v3, %v4598_v54  ;;  %v6663_v11 = vpop.f32.mrb[45].mxu1 }
 0x366   : > { %v4712_v57 = vpop.f32.mrb[46].mxu1 }
 0x367   : > { %v6664_v51 = vpop.f32.mrb[47].mxu1 }
 0x36e   : > { %v4815_v23 = vpop.f32.mrb[48].mxu0 }
 0x36f   : > { %v4821_v4 = vadd.f32 %v4815_v23, %v4715_v32  ;;  %v6683_v14 = vpop.f32.mrb[49].mxu0 }
 0x370   : > { %v4818_v30 = vpop.f32.mrb[50].mxu0 }
 0x371   : > { %v6684_v15 = vpop.f32.mrb[51].mxu0 }
 0x384   : > { %v4921_v12 = vpop.f32.mrb[48].mxu1 }
 0x385   : > { %v4927_v49 = vadd.f32 %v4921_v12, %v4821_v4  ;;  %v6703_v7 = vpop.f32.mrb[49].mxu1 }
 0x386   : > { %v4924_v16 = vpop.f32.mrb[50].mxu1 }
 0x387   : > { %v6704_v2 = vpop.f32.mrb[51].mxu1 }
 0x38e   : > { %v5038_v42 = vpop.f32.mrb[52].mxu0 }
 0x38f   : > { %v5044_v21 = vadd.f32 %v5038_v42, %v4927_v49  ;;  %v6723_v55 = vpop.f32.mrb[53].mxu0 }
 0x390   : > { %v5041_v56 = vpop.f32.mrb[54].mxu0 }
 0x391   : > { %v5045_v9 = vadd.f32 %v8525_v18, %v5044_v21  ;;  %v6724_v13 = vpop.f32.mrb[55].mxu0 }
 0x393   : > { %v5046_v0 = vmax.f32 %v5045_v9, 0.0 }
 0x395   : > { %v5047_v43 = vpack.c.bf16 %v5046_v0, %v5046_v0 }
 0x397   : > { %5048 = vst [vmem:[#allocation3 + $0x4] sm:$0x3] %v5047_v43 }
 0x39e   : > { %v5049_v33 = vld [vmem:[#allocation3] sm:$0x3f] }
 0x39f   : > { %v5106_v40 = vcombine.high %v5049_v33, %v5049_v33  ;;  %v5113_v28 = vrot.slane %v5049_v33, %v5112_v20 }
 0x3a1   : > { %v5121_v37 = vcombine.high %v5113_v28, %v5113_v28  ;;  %v5120_v26 = vrot.slane %v5106_v40, %v5112_v20 }
 0x3a3   : > { %5301 = vmatprep.mubr.bf16.mxu1 %v5121_v37  ;;  %6742 = vmatmul.mubr.bf16.vlgmr.msra.gmra.mrb[56].mxu0 %v5120_v26 }
 0x3a4   : > { %5302 = vmatmul.mubr.bf16.vlgmr.msra.gmra.mrb[52].mxu1 %v5113_v28 }
 0x476   : > { %v5343_v18 = vpop.f32.mrb[56].mxu0 }
 0x477   : > { %v6170_v22 = vpop.f32.mrb[52].mxu1  ;;  %v6743_v34 = vpop.f32.mrb[57].mxu0 }
 0x478   : > { %v6171_v19 = vpop.f32.mrb[53].mxu1  ;;  %v5346_v63 = vpop.f32.mrb[58].mxu0 }
 0x479   : > { %v6172_v24 = vadd.f32 %v6171_v19, %v6170_v22  ;;  %v6173_v62 = vpop.f32.mrb[54].mxu1  ;;  %v6744_v53 = vpop.f32.mrb[59].mxu0 }
 0x47a   : > { %v6174_v29 = vpop.f32.mrb[55].mxu1 }
 0x47b   : > { %v5304_v25 = vadd.f32 %v6172_v24, %v5881_v60 }
 0x47d   : > { %v5344_v35 = vadd.f32 %v5343_v18, %v5304_v25 }
 0x47f   : > { %v5350_v10 = vadd.f32 %v5349_v27, %v5344_v35 }
 0x481   : > { %5351 = vst [vmem:[%s365_s14] sm:$0xf] %v5350_v10 }
 0x482   : > { %7302 = shalt.err (!%p7299_p6)
}
 0x483   : > { %s7303_s19 = scalar_lea.hbm %s8599_s24, 64  ;;  %s7307_s20 = scalar_lea.hbm %s8654_s8, 128 }
 0x484   : > { %p7304_p7 = scmp.ne.s32.totalorder %s8599_s24, %s7303_s19  ;;  %p7308_p0 = scmp.lt.u32.totalorder %s8599_s24, %s8654_s8 }
 0x485   : > { %p7309_p4 = scmp.lt.u32.totalorder %s7307_s20, %s7303_s19  ;;  %p7311_p13 = scmp.lt.u32.totalorder %s7303_s19, %s8599_s24 }
 0x486   : > { %p7305_p9 = pnand %p7304_p7, %p8679_p8 }
 0x487   : > { %p7310_p1 = por %p7309_p4, %p7308_p0 }
 0x488   : > { %p7306_p12 = pneg %p7305_p9 }
 0x489   : > { %p7312_p10 = por %p7311_p13, %p7310_p1 }
 0x48b   : > { %p7313_p11 = pnand %p7312_p10, %p7306_p12 }
 0x48d   : > { %7316 = shalt.err (!%p7313_p11)
}
 0x48e   : > { %6753 = dma.vmem_to_hbm [thread:$0]  (%p8679_p8), %s8601_s16, 64, %s8599_s24, %s5353_s22  }
 0x48f PF: > { %p6770_p2 = scmp.ge.s32.totalorder %s7375_s10, 2  ;;  %s5379_s12 = sand.u32 1, %s7355_s27  }
 0x490   : > { %p8680_p3 = scmp.ne.s32.totalorder %s8666_s17, 0  ;;  %s5380_s14 = scalar_lea.sflag [#allocation6], %s5379_s12 }
 0x492   : > { %p6763_p5 = pnand %p6770_p2, %p8680_p3 }
 0x494   : > { %7350 = dma.done.wait (!%p6763_p5), %s5380_s14, 64  }
 0x495   : > { %7352 = vsyncadd (!%p6763_p5), %s5380_s14, 4294967232  ;;  %s23_s10 = sadd.s32 1, %s7375_s10   ;;  %s8681_s21 = sld [smem:[#allocation13_spill]] }
 0x496   : > { %p20_p6 = scmp.ge.s32.totalorder %s23_s10, 4   ;;  %s8682_s29 = sld [smem:[#allocation16_spill]] }
 0x497   : > { %s8683_s30 = sld [smem:[#allocation14_spill]]  ;;  %s8684_s9 = sld [smem:[#allocation15_spill]] }
 0x498   : > { %s8685_s27 = smov %s7359_s28  ;;  %22 = sbr.rel (!%p20_p6) target bundleno = 6 (0x6), region = 121 }
 0x49b   : > { %s8686_s28 = smov %s8681_s21 }
 0x49f   :  { %5385 = vsyncpa [#allocation5], 1 }
 0x4a0   :  { %5387 = vsyncpa [#allocation5 + $0x1], 1 }
 0x4a1   :  { %5388 = vsyncpa [#allocation8], 1 }
 0x4a2   :  { %5389 = vsyncpa [#allocation6], 1 }
 0x4a3   :  { %5391 = vsyncpa [#allocation6 + $0x1], 1 }

</bundles_post_ra>
